<compile_context>
chip_gen: v7x
topology: tpu7x:2x2x1
jax: 0.10.0
libtpu: 0.0.40
codegen_flags: <defaults>
</compile_context>

<pallas_src>
import functools
import math

import jax
import jax.numpy as jnp
from jax import lax
from jax.experimental import pallas as pl
from jax.experimental.pallas import tpu as pltpu


def _mha_kernel(q_ref, k_ref, v_ref, o_ref, ctx_ref, *, head_num, head_dim):
    # q_ref : (TQ, C)  query tile for one batch element (input dtype)
    # k_ref : (N,  C)  full keys for this batch element
    # v_ref : (N,  C)  full values for this batch element
    # o_ref : (TQ, C)  output tile
    # ctx_ref: (TQ, C) f32 VMEM scratch the heads write into (no lane-axis concat)
    scale = 1.0 / math.sqrt(head_dim)

    # Scale hoisted out of the head loop; native dtype feeds the MXU directly.
    q = q_ref[...] * scale                      # (TQ, C)
    k = k_ref[...]                              # (N,  C)
    v = v_ref[...]                              # (N,  C)

    for h in range(head_num):                   # static unrolled loop over heads
        lo = h * head_dim
        hi = lo + head_dim
        qh = q[:, lo:hi]                        # (TQ, d)
        kh = k[:, lo:hi]                        # (N,  d)
        vh = v[:, lo:hi]                        # (N,  d)

        # QK^T without materializing kh.T: contract last dims of both operands.
        s = lax.dot_general(qh, kh, (((1,), (1,)), ((), ())),
                            preferred_element_type=jnp.float32)      # (TQ, N) f32

        # Numerically stable softmax statistics in f32.
        m = jnp.max(s, axis=-1, keepdims=True)
        p = jnp.exp(s - m)                                           # unnormalized
        denom = jnp.sum(p, axis=-1, keepdims=True)                   # (TQ, 1)

        # PV in the input dtype on the MXU, f32 accumulation.
        ctx = jnp.dot(p.astype(v_ref.dtype), vh,
                      preferred_element_type=jnp.float32)            # (TQ, d)

        # EUP approx reciprocal + one Newton step (~full f32 precision);
        # normalize after PV (d columns instead of N).
        inv = pl.reciprocal(denom, approx=True)
        inv = inv * (2.0 - denom * inv)
        ctx_ref[:, lo:hi] = ctx * inv                                # per-head slab write

    # Single cast + lane-contiguous store of the whole (TQ, C) tile.
    o_ref[...] = ctx_ref[...].astype(o_ref.dtype)


def _choose_q_tile(B, N):
    """Largest q-tile dividing N (multiple of 8), capped so the per-head f32
    (tq, N) score tile stays ~<= 8 MiB, keeping >= 2 grid steps when B == 1."""
    tiles = [t for t in range(8, N + 1, 8) if N % t == 0]
    if not tiles:
        return N                                   # tiny / odd N: one full tile
    cap = max(8, (8 * 1024 * 1024) // (4 * N))
    capped = [t for t in tiles if t <= cap] or tiles[:1]
    tq = capped[-1]
    if B == 1 and tq == N:
        smaller = [t for t in capped if N // t >= 2]
        if smaller:
            tq = smaller[-1]                       # keep both TensorCores busy
    return tq


def attention_forward(query, key, value, head_num, *, q_tile=None):
    """query/key/value: (B, N, C) arrays; returns (B, N, C)."""
    B, N, C = query.shape
    assert key.shape == (B, N, C) and value.shape == (B, N, C)
    assert C % head_num == 0, "hidden size must be divisible by head_num"
    head_dim = C // head_num

    tq = q_tile if q_tile is not None else _choose_q_tile(B, N)
    assert N % tq == 0 and (tq % 8 == 0 or tq == N)

    kernel = functools.partial(_mha_kernel, head_num=head_num, head_dim=head_dim)

    # Rough per-step VMEM footprint; raise scoped limit only when needed.
    itemsize = jnp.dtype(query.dtype).itemsize
    vmem_est = (2 * (2 * tq * C + 2 * N * C) * itemsize   # q/out + k/v double-buffered
                + 4 * tq * C                              # f32 context scratch
                + 2 * 4 * tq * N)                         # live f32 score tiles
    params = dict(dimension_semantics=("parallel", "parallel"))
    if vmem_est > 32 * 1024 * 1024:
        params["vmem_limit_bytes"] = int(min(2 * vmem_est, 128 * 1024 * 1024))

    return pl.pallas_call(
        kernel,
        out_shape=jax.ShapeDtypeStruct((B, N, C), query.dtype),
        grid_spec=pltpu.PrefetchScalarGridSpec(
            num_scalar_prefetch=0,
            grid=(B, N // tq),
            in_specs=[
                pl.BlockSpec((None, tq, C), lambda b, qi: (b, qi, 0)),  # Q tile
                pl.BlockSpec((None, N, C), lambda b, qi: (b, 0, 0)),    # full K
                pl.BlockSpec((None, N, C), lambda b, qi: (b, 0, 0)),    # full V
            ],
            out_specs=pl.BlockSpec((None, tq, C), lambda b, qi: (b, qi, 0)),
            scratch_shapes=[pltpu.VMEM((tq, C), jnp.float32)],
        ),
        compiler_params=pltpu.CompilerParams(**params),
    )(query, key, value)


def attention_reference(q, k, v, head_num):
    """Pure-JAX reference matching the PyTorch Attention.forward."""
    B, N, C = q.shape
    d = C // head_num
    qh = q.reshape(B, N, head_num, d).transpose(0, 2, 1, 3).astype(jnp.float32)
    kh = k.reshape(B, N, head_num, d).transpose(0, 2, 1, 3).astype(jnp.float32)
    vh = v.reshape(B, N, head_num, d).transpose(0, 2, 1, 3).astype(jnp.float32)
    s = jnp.einsum("bhqd,bhkd->bhqk", qh, kh) / math.sqrt(d)
    p = jax.nn.softmax(s, axis=-1)
    ctx = jnp.einsum("bhqk,bhkd->bhqd", p, vh)
    return ctx.transpose(0, 2, 1, 3).reshape(B, N, C).astype(q.dtype)


if __name__ == "__main__":
    key = jax.random.PRNGKey(0)
    B, N, C, head_num = 2, 256, 32, 4   # seq=256, hidden=32, 4 heads -> head_dim=8

    kq, kk, kv = jax.random.split(key, 3)
    q = jax.random.normal(kq, (B, N, C), dtype=jnp.float32)
    k = jax.random.normal(kk, (B, N, C), dtype=jnp.float32)
    v = jax.random.normal(kv, (B, N, C), dtype=jnp.float32)

    out = attention_forward(q, k, v, head_num)
    out = jax.block_until_ready(out)

    ref = attention_reference(q, k, v, head_num)
    assert out.shape == (B, N, C)
    assert jnp.max(jnp.abs(out - ref)) < 5e-4, "mismatch vs reference attention"

    print("KERNEL_OK")
</pallas_src>

<mosaic_0001>
module attributes {stable_mosaic.version = 11 : i64} {
  func.func @_mha_kernel(%arg0: i32, %arg1: i32, %arg2: memref<1x256x32xf32, #tpu.memory_space<vmem>>, %arg3: memref<1x256x32xf32, #tpu.memory_space<vmem>>, %arg4: memref<1x256x32xf32, #tpu.memory_space<vmem>>, %arg5: memref<1x256x32xf32, #tpu.memory_space<vmem>>, %arg6: memref<256x32xf32, #tpu.memory_space<vmem>>) attributes {dimension_semantics = [#tpu.dimension_semantics<parallel>, #tpu.dimension_semantics<parallel>], iteration_bounds = array<i64: 2, 1>, scalar_prefetch = 0 : i64, scratch_operands = 1 : i64, tpu.core_type = #tpu.core_type<tc>, window_params = [{transform_indices = @transform_0, window_bounds = array<i64: 1, 256, 32>}, {transform_indices = @transform_1, window_bounds = array<i64: 1, 256, 32>}, {transform_indices = @transform_2, window_bounds = array<i64: 1, 256, 32>}, {transform_indices = @transform_3, window_bounds = array<i64: 1, 256, 32>}]} {
    %c0 = arith.constant 0 : index
    %c0_0 = arith.constant 0 : index
    %c0_1 = arith.constant 0 : index
    %0 = vector.load %arg2[%c0, %c0_0, %c0_1] : memref<1x256x32xf32, #tpu.memory_space<vmem>>, vector<1x256x32xf32>
    %1 = vector.shape_cast %0 : vector<1x256x32xf32> to vector<256x32xf32>
    %cst = arith.constant 0.353553385 : f32
    %2 = vector.broadcast %cst : f32 to vector<256x32xf32>
    %3 = arith.mulf %1, %2 : vector<256x32xf32>
    %c0_2 = arith.constant 0 : index
    %c0_3 = arith.constant 0 : index
    %c0_4 = arith.constant 0 : index
    %4 = vector.load %arg3[%c0_2, %c0_3, %c0_4] : memref<1x256x32xf32, #tpu.memory_space<vmem>>, vector<1x256x32xf32>
    %5 = vector.shape_cast %4 : vector<1x256x32xf32> to vector<256x32xf32>
    %c0_5 = arith.constant 0 : index
    %c0_6 = arith.constant 0 : index
    %c0_7 = arith.constant 0 : index
    %6 = vector.load %arg4[%c0_5, %c0_6, %c0_7] : memref<1x256x32xf32, #tpu.memory_space<vmem>>, vector<1x256x32xf32>
    %7 = vector.shape_cast %6 : vector<1x256x32xf32> to vector<256x32xf32>
    %8 = vector.extract_strided_slice %3 {offsets = [0, 0], sizes = [256, 8], strides = [1, 1]} : vector<256x32xf32> to vector<256x8xf32>
    %9 = vector.extract_strided_slice %5 {offsets = [0, 0], sizes = [256, 8], strides = [1, 1]} : vector<256x32xf32> to vector<256x8xf32>
    %10 = vector.extract_strided_slice %7 {offsets = [0, 0], sizes = [256, 8], strides = [1, 1]} : vector<256x32xf32> to vector<256x8xf32>
    %cst_8 = arith.constant dense<0.000000e+00> : vector<256x256xf32>
    %11 = tpu.matmul %8, %9, %cst_8 {dimension_numbers = #tpu.dot_dimension_numbers<[1], [1], [0], [0], [0, 0, 1, 0], [], []>} : vector<256x8xf32>, vector<256x8xf32>, vector<256x256xf32> -> vector<256x256xf32>
    %cst_9 = arith.constant dense<0xFF800000> : vector<256xf32>
    %12 = vector.multi_reduction <maximumf>, %11, %cst_9 [1] : vector<256x256xf32> to vector<256xf32>
    %13 = vector.shape_cast %12 : vector<256xf32> to vector<256x1xf32>
    %14 = vector.broadcast %13 : vector<256x1xf32> to vector<256x256xf32>
    %15 = arith.subf %11, %14 : vector<256x256xf32>
    %16 = math.exp %15 : vector<256x256xf32>
    %cst_10 = arith.constant dense<0.000000e+00> : vector<256xf32>
    %17 = vector.multi_reduction <add>, %16, %cst_10 [1] : vector<256x256xf32> to vector<256xf32>
    %18 = vector.shape_cast %17 : vector<256xf32> to vector<256x1xf32>
    %cst_11 = arith.constant dense<0.000000e+00> : vector<256x8xf32>
    %19 = tpu.matmul %16, %10, %cst_11 {dimension_numbers = #tpu.dot_dimension_numbers<[1], [0], [0], [1], [0, 0, 1, 1], [], []>} : vector<256x256xf32>, vector<256x8xf32>, vector<256x8xf32> -> vector<256x8xf32>
    %20 = tpu.reciprocal %18 {approx = true} : vector<256x1xf32> -> vector<256x1xf32>
    %21 = arith.mulf %18, %20 : vector<256x1xf32>
    %cst_12 = arith.constant 2.000000e+00 : f32
    %22 = vector.broadcast %cst_12 : f32 to vector<256x1xf32>
    %23 = arith.subf %22, %21 : vector<256x1xf32>
    %24 = arith.mulf %20, %23 : vector<256x1xf32>
    %25 = vector.broadcast %24 : vector<256x1xf32> to vector<256x8xf32>
    %26 = arith.mulf %19, %25 : vector<256x8xf32>
    %c0_13 = arith.constant 0 : index
    %c0_14 = arith.constant 0 : index
    %27 = vector.load %arg6[%c0_13, %c0_14] : memref<256x32xf32, #tpu.memory_space<vmem>>, vector<256x8xf32>
    tpu.vector_store %arg6[%c0_13, %c0_14], %26 {strides = array<i32>} : memref<256x32xf32, #tpu.memory_space<vmem>>, vector<256x8xf32>,
    %28 = vector.extract_strided_slice %3 {offsets = [0, 8], sizes = [256, 8], strides = [1, 1]} : vector<256x32xf32> to vector<256x8xf32>
    %29 = vector.extract_strided_slice %5 {offsets = [0, 8], sizes = [256, 8], strides = [1, 1]} : vector<256x32xf32> to vector<256x8xf32>
    %30 = vector.extract_strided_slice %7 {offsets = [0, 8], sizes = [256, 8], strides = [1, 1]} : vector<256x32xf32> to vector<256x8xf32>
    %cst_15 = arith.constant dense<0.000000e+00> : vector<256x256xf32>
    %31 = tpu.matmul %28, %29, %cst_15 {dimension_numbers = #tpu.dot_dimension_numbers<[1], [1], [0], [0], [0, 0, 1, 0], [], []>} : vector<256x8xf32>, vector<256x8xf32>, vector<256x256xf32> -> vector<256x256xf32>
    %cst_16 = arith.constant dense<0xFF800000> : vector<256xf32>
    %32 = vector.multi_reduction <maximumf>, %31, %cst_16 [1] : vector<256x256xf32> to vector<256xf32>
    %33 = vector.shape_cast %32 : vector<256xf32> to vector<256x1xf32>
    %34 = vector.broadcast %33 : vector<256x1xf32> to vector<256x256xf32>
    %35 = arith.subf %31, %34 : vector<256x256xf32>
    %36 = math.exp %35 : vector<256x256xf32>
    %cst_17 = arith.constant dense<0.000000e+00> : vector<256xf32>
    %37 = vector.multi_reduction <add>, %36, %cst_17 [1] : vector<256x256xf32> to vector<256xf32>
    %38 = vector.shape_cast %37 : vector<256xf32> to vector<256x1xf32>
    %cst_18 = arith.constant dense<0.000000e+00> : vector<256x8xf32>
    %39 = tpu.matmul %36, %30, %cst_18 {dimension_numbers = #tpu.dot_dimension_numbers<[1], [0], [0], [1], [0, 0, 1, 1], [], []>} : vector<256x256xf32>, vector<256x8xf32>, vector<256x8xf32> -> vector<256x8xf32>
    %40 = tpu.reciprocal %38 {approx = true} : vector<256x1xf32> -> vector<256x1xf32>
    %41 = arith.mulf %38, %40 : vector<256x1xf32>
    %cst_19 = arith.constant 2.000000e+00 : f32
    %42 = vector.broadcast %cst_19 : f32 to vector<256x1xf32>
    %43 = arith.subf %42, %41 : vector<256x1xf32>
    %44 = arith.mulf %40, %43 : vector<256x1xf32>
    %45 = vector.broadcast %44 : vector<256x1xf32> to vector<256x8xf32>
    %46 = arith.mulf %39, %45 : vector<256x8xf32>
    %c0_20 = arith.constant 0 : index
    %c8 = arith.constant 8 : index
    %47 = vector.load %arg6[%c0_20, %c8] : memref<256x32xf32, #tpu.memory_space<vmem>>, vector<256x8xf32>
    tpu.vector_store %arg6[%c0_20, %c8], %46 {strides = array<i32>} : memref<256x32xf32, #tpu.memory_space<vmem>>, vector<256x8xf32>,
    %48 = vector.extract_strided_slice %3 {offsets = [0, 16], sizes = [256, 8], strides = [1, 1]} : vector<256x32xf32> to vector<256x8xf32>
    %49 = vector.extract_strided_slice %5 {offsets = [0, 16], sizes = [256, 8], strides = [1, 1]} : vector<256x32xf32> to vector<256x8xf32>
    %50 = vector.extract_strided_slice %7 {offsets = [0, 16], sizes = [256, 8], strides = [1, 1]} : vector<256x32xf32> to vector<256x8xf32>
    %cst_21 = arith.constant dense<0.000000e+00> : vector<256x256xf32>
    %51 = tpu.matmul %48, %49, %cst_21 {dimension_numbers = #tpu.dot_dimension_numbers<[1], [1], [0], [0], [0, 0, 1, 0], [], []>} : vector<256x8xf32>, vector<256x8xf32>, vector<256x256xf32> -> vector<256x256xf32>
    %cst_22 = arith.constant dense<0xFF800000> : vector<256xf32>
    %52 = vector.multi_reduction <maximumf>, %51, %cst_22 [1] : vector<256x256xf32> to vector<256xf32>
    %53 = vector.shape_cast %52 : vector<256xf32> to vector<256x1xf32>
    %54 = vector.broadcast %53 : vector<256x1xf32> to vector<256x256xf32>
    %55 = arith.subf %51, %54 : vector<256x256xf32>
    %56 = math.exp %55 : vector<256x256xf32>
    %cst_23 = arith.constant dense<0.000000e+00> : vector<256xf32>
    %57 = vector.multi_reduction <add>, %56, %cst_23 [1] : vector<256x256xf32> to vector<256xf32>
    %58 = vector.shape_cast %57 : vector<256xf32> to vector<256x1xf32>
    %cst_24 = arith.constant dense<0.000000e+00> : vector<256x8xf32>
    %59 = tpu.matmul %56, %50, %cst_24 {dimension_numbers = #tpu.dot_dimension_numbers<[1], [0], [0], [1], [0, 0, 1, 1], [], []>} : vector<256x256xf32>, vector<256x8xf32>, vector<256x8xf32> -> vector<256x8xf32>
    %60 = tpu.reciprocal %58 {approx = true} : vector<256x1xf32> -> vector<256x1xf32>
    %61 = arith.mulf %58, %60 : vector<256x1xf32>
    %cst_25 = arith.constant 2.000000e+00 : f32
    %62 = vector.broadcast %cst_25 : f32 to vector<256x1xf32>
    %63 = arith.subf %62, %61 : vector<256x1xf32>
    %64 = arith.mulf %60, %63 : vector<256x1xf32>
    %65 = vector.broadcast %64 : vector<256x1xf32> to vector<256x8xf32>
    %66 = arith.mulf %59, %65 : vector<256x8xf32>
    %c0_26 = arith.constant 0 : index
    %c16 = arith.constant 16 : index
    %67 = vector.load %arg6[%c0_26, %c16] : memref<256x32xf32, #tpu.memory_space<vmem>>, vector<256x8xf32>
    tpu.vector_store %arg6[%c0_26, %c16], %66 {strides = array<i32>} : memref<256x32xf32, #tpu.memory_space<vmem>>, vector<256x8xf32>,
    %68 = vector.extract_strided_slice %3 {offsets = [0, 24], sizes = [256, 8], strides = [1, 1]} : vector<256x32xf32> to vector<256x8xf32>
    %69 = vector.extract_strided_slice %5 {offsets = [0, 24], sizes = [256, 8], strides = [1, 1]} : vector<256x32xf32> to vector<256x8xf32>
    %70 = vector.extract_strided_slice %7 {offsets = [0, 24], sizes = [256, 8], strides = [1, 1]} : vector<256x32xf32> to vector<256x8xf32>
    %cst_27 = arith.constant dense<0.000000e+00> : vector<256x256xf32>
    %71 = tpu.matmul %68, %69, %cst_27 {dimension_numbers = #tpu.dot_dimension_numbers<[1], [1], [0], [0], [0, 0, 1, 0], [], []>} : vector<256x8xf32>, vector<256x8xf32>, vector<256x256xf32> -> vector<256x256xf32>
    %cst_28 = arith.constant dense<0xFF800000> : vector<256xf32>
    %72 = vector.multi_reduction <maximumf>, %71, %cst_28 [1] : vector<256x256xf32> to vector<256xf32>
    %73 = vector.shape_cast %72 : vector<256xf32> to vector<256x1xf32>
    %74 = vector.broadcast %73 : vector<256x1xf32> to vector<256x256xf32>
    %75 = arith.subf %71, %74 : vector<256x256xf32>
    %76 = math.exp %75 : vector<256x256xf32>
    %cst_29 = arith.constant dense<0.000000e+00> : vector<256xf32>
    %77 = vector.multi_reduction <add>, %76, %cst_29 [1] : vector<256x256xf32> to vector<256xf32>
    %78 = vector.shape_cast %77 : vector<256xf32> to vector<256x1xf32>
    %cst_30 = arith.constant dense<0.000000e+00> : vector<256x8xf32>
    %79 = tpu.matmul %76, %70, %cst_30 {dimension_numbers = #tpu.dot_dimension_numbers<[1], [0], [0], [1], [0, 0, 1, 1], [], []>} : vector<256x256xf32>, vector<256x8xf32>, vector<256x8xf32> -> vector<256x8xf32>
    %80 = tpu.reciprocal %78 {approx = true} : vector<256x1xf32> -> vector<256x1xf32>
    %81 = arith.mulf %78, %80 : vector<256x1xf32>
    %cst_31 = arith.constant 2.000000e+00 : f32
    %82 = vector.broadcast %cst_31 : f32 to vector<256x1xf32>
    %83 = arith.subf %82, %81 : vector<256x1xf32>
    %84 = arith.mulf %80, %83 : vector<256x1xf32>
    %85 = vector.broadcast %84 : vector<256x1xf32> to vector<256x8xf32>
    %86 = arith.mulf %79, %85 : vector<256x8xf32>
    %c0_32 = arith.constant 0 : index
    %c24 = arith.constant 24 : index
    %87 = vector.load %arg6[%c0_32, %c24] : memref<256x32xf32, #tpu.memory_space<vmem>>, vector<256x8xf32>
    tpu.vector_store %arg6[%c0_32, %c24], %86 {strides = array<i32>} : memref<256x32xf32, #tpu.memory_space<vmem>>, vector<256x8xf32>,
    %c0_33 = arith.constant 0 : index
    %c0_34 = arith.constant 0 : index
    %88 = vector.load %arg6[%c0_33, %c0_34] : memref<256x32xf32, #tpu.memory_space<vmem>>, vector<256x32xf32>
    %c0_35 = arith.constant 0 : index
    %c0_36 = arith.constant 0 : index
    %c0_37 = arith.constant 0 : index
    %89 = vector.load %arg5[%c0_35, %c0_36, %c0_37] : memref<1x256x32xf32, #tpu.memory_space<vmem>>, vector<1x256x32xf32>
    %90 = vector.shape_cast %89 : vector<1x256x32xf32> to vector<256x32xf32>
    %91 = vector.shape_cast %88 : vector<256x32xf32> to vector<1x256x32xf32>
    tpu.vector_store %arg5[%c0_35, %c0_36, %c0_37], %91 {strides = array<i32>} : memref<1x256x32xf32, #tpu.memory_space<vmem>>, vector<1x256x32xf32>,
    return
  }
  func.func @transform_0(%arg0: i32, %arg1: i32) -> (i32, i32, i32) {
    %c0_i32 = arith.constant 0 : i32
    %c0_i32_0 = arith.constant 0 : i32
    return %arg0, %arg1, %c0_i32 : i32, i32, i32
  }
  func.func @transform_1(%arg0: i32, %arg1: i32) -> (i32, i32, i32) {
    %c0_i32 = arith.constant 0 : i32
    %c0_i32_0 = arith.constant 0 : i32
    %c0_i32_1 = arith.constant 0 : i32
    return %arg0, %c0_i32, %c0_i32_0 : i32, i32, i32
  }
  func.func @transform_2(%arg0: i32, %arg1: i32) -> (i32, i32, i32) {
    %c0_i32 = arith.constant 0 : i32
    %c0_i32_0 = arith.constant 0 : i32
    %c0_i32_1 = arith.constant 0 : i32
    return %arg0, %c0_i32, %c0_i32_0 : i32, i32, i32
  }
  func.func @transform_3(%arg0: i32, %arg1: i32) -> (i32, i32, i32) {
    %c0_i32 = arith.constant 0 : i32
    %c0_i32_0 = arith.constant 0 : i32
    return %arg0, %arg1, %c0_i32 : i32, i32, i32
  }
}

</mosaic_0001>

<bundles_post_ra>
// kernel: tpu_custom_call.1
= control target key start
LH: loop header
LB: loop body
LE: loop exit
PB: predicated region body
PF: predicated region fallthrough
CT: control target
= control target key end

     0   :  { %s8879_s12 = smov 0   ;;  %s8881_s13 = smov 0   ;;  %s13784_s0 = inlined_call_operand.vmem [shape: f32[2,256,32], index: 0, kind: input, shape index: {}]   ;;  %s13785_s1 = inlined_call_operand.vmem [shape: f32[2,256,32], index: 1, kind: input, shape index: {}]   ;;  %s13786_s2 = inlined_call_operand.vmem [shape: f32[2,256,32], index: 2, kind: input, shape index: {}]   ;;  %s13787_s3 = inlined_call_operand.vmem [shape: f32[2,256,32], index: 3, kind: output, shape index: {}]  }
   0x1   :  { %s8883_s14 = smov 0  }
   0x2 LB: > { %s25_s15 = sadd.s32 1, %s8846_s13  ;;  %p6458_p0 = scmp.ge.s32.totalorder %s8850_s14, 1  ;;  %s8850_s14 = sphi %s8883_s14, %s13_s14   ;;  %s8846_s13 = sphi %s8881_s13, %s15368_s13   ;;  %s8842_s12 = sphi %s8879_s12, %s15367_s12  }
   0x3   : > { %p27_p1 = scmp.ge.s32.totalorder %s25_s15, 2  ;;  %p178_p2 = scmp.lt.s32.totalorder %s8850_s14, 3 }
   0x5   : > { %s15370_s15 = smov (%p27_p1, %s25_s15), 0  ;;  %p179_p3 = pnand %p6458_p0, %p178_p2 }
   0x7   : > { %182 = sbr.rel (%p179_p3) target bundleno = 2902 (0xb56), region = 32 }
   0xe   : > { %p221_p4 = scmp.lt.s32.totalorder %s8842_s12, 1  ;;  %vm378_vm0 = vcmask 64512   ;;  %s8852_s23 = smov 120   ;;  %vm3167_vm2 = vcmask 130112   ;;  %vm4706_vm3 = vcmask 195712   ;;  %vm6245_vm4 = vcmask 261312  }
   0xf   : > { %vm8907_vm1 = vmpackc.low %vm378_vm0, %vm378_vm0  ;;  %s8853_s24 = smov 112   ;;  %s8854_s25 = smov 104   ;;  %vm6310_vm5 = vcmask 261120  }
  0x10   : > { %s15372_s12 = smov (!%p221_p4, %s8842_s12), 1  ;;  %s8856_s29 = smov 8  }
  0x11   : > { %s8897_s16 = sshll.u32 %s15372_s12, 8  ;;  %s8857_s30 = smov 16  }
  0x12   : > { %s8903_s19 = scalar_lea.vmem %s13785_s1, %s8897_s16  ;;  %s8917_s22 = scalar_lea.vmem %s13784_s0, %s8897_s16 }
  0x13   : > { %v330_v1 = vld [vmem:[%s8903_s19 + $0x80] sm:$0xff]  ;;  %v331_v2 = vld [vmem:[%s8903_s19 + $0x88] sm:$0xff]  ;;  %v252_v12 = vld [vmem:[%s8917_s22 + $0x10] sm:$0xff]  ;;  %s9517_s28 = scalar_lea.vmem %s13786_s2, %s8897_s16  ;;  %s8858_s4 = smov 24  }
  0x14   : > { %v314_v3 = vld [vmem:[%s8903_s19] sm:$0xff]  ;;  %v7113_v4 = vpack.c.bf16 %v331_v2, %v330_v1  ;;  %v251_v5 = vld [vmem:[%s8917_s22 + $0x8] sm:$0xff]  ;;  %v8923_v8 = vpack.i.bf16 %v331_v2, %v330_v1  ;;  %v332_v14 = vld [vmem:[%s8903_s19 + $0x90] sm:$0xff]  ;;  %v8939_v16 = vmul.f32 0.35355338, %v252_v12  ;;  %s13669_s7 = scalar_lea.vmem %s13787_s3, %s8897_s16 }
  0x15   : > { %v250_v6 = vld [vmem:[%s8917_s22] sm:$0xff]  ;;  %v315_v7 = vld [vmem:[%s8903_s19 + $0x8] sm:$0xff]  ;;  %v8925_v9 = vmul.f32 0.35355338, %v251_v5  ;;  %v333_v15 = vld [vmem:[%s8903_s19 + $0x98] sm:$0xff] }
  0x16   : > { %v8927_v10 = vmul.f32 0.35355338, %v250_v6  ;;  %v7116_v11 = vpack.c.bf16 %v315_v7, %v314_v3  ;;  %v254_v13 = vld [vmem:[%s8917_s22 + $0x20] sm:$0xff]  ;;  %7115 = vmatprep.subr.msk.bf16.mxu0 %vm8907_vm1, %v7113_v4  ;;  %14314 = vst [vmem:[#allocation3_spill] sm:$0xff] %v8939_v16  ;;  %v7119_v18 = vpack.c.bf16 %v333_v15, %v332_v14  ;;  %v8943_v19 = vpack.i.bf16 %v333_v15, %v332_v14  ;;  %v253_v20 = vld [vmem:[%s8917_s22 + $0x18] sm:$0xff]  ;;  %v256_v21 = vld [vmem:[%s8917_s22 + $0x30] sm:$0xff] }
  0x17   : > { %1631 = vrot.lane.b32.xlu1 %v8925_v9, %s8852_s23  ;;  %v8941_v17 = vmul.f32 0.35355338, %v254_v13  ;;  %v316_v22 = vld [vmem:[%s8903_s19 + $0x10] sm:$0xff]  ;;  %v317_v23 = vld [vmem:[%s8903_s19 + $0x18] sm:$0xff]  ;;  %v8955_v24 = vpack.i.bf16 %v315_v7, %v314_v3  ;;  %v334_v25 = vld [vmem:[%s8903_s19 + $0xa0] sm:$0xff] }
  0x18   : > { %1629 = vrot.lane.b32.xlu0 %v8927_v10, %s8852_s23  ;;  %7118 = vmatpush3.bf16.xpose.msk.msra.mxu0 %vm8907_vm1, %v7116_v11  ;;  %v335_v26 = vld [vmem:[%s8903_s19 + $0xa8] sm:$0xff]  ;;  %v8963_v27 = vmul.f32 0.35355338, %v253_v20  ;;  %v8965_v28 = vmul.f32 0.35355338, %v256_v21  ;;  %v7122_v30 = vpack.c.bf16 %v317_v23, %v316_v22  ;;  %v258_v32 = vld [vmem:[%s8917_s22 + $0x40] sm:$0xff]  ;;  %v8995_v46 = vpack.i.bf16 %v317_v23, %v316_v22 }
  0x19   : > { %14315 = vst [vmem:[#allocation4_spill] sm:$0xff] %v8941_v17  ;;  %6761 = vmatprep.mubr.msk.f32.mxu0 %vm378_vm0, %v8927_v10  ;;  %7121 = vmatprep.subr.msk.bf16.mxu0 %vm8907_vm1, %v7119_v18  ;;  %v8967_v29 = vpack.i.bf16 %v335_v26, %v334_v25  ;;  %v255_v31 = vld [vmem:[%s8917_s22 + $0x28] sm:$0xff]  ;;  %v7125_v33 = vpack.c.bf16 %v335_v26, %v334_v25  ;;  %v336_v34 = vld [vmem:[%s8903_s19 + $0xb0] sm:$0xff]  ;;  %v337_v35 = vld [vmem:[%s8903_s19 + $0xb8] sm:$0xff]  ;;  %v8981_v38 = vmul.f32 0.35355338, %v258_v32 }
  0x1a   : > { %14316 = vst [vmem:[#allocation5_spill] sm:$0xff] %v8963_v27  ;;  %14317 = vst [vmem:[#allocation6_spill] sm:$0xff] %v8965_v28  ;;  %v8973_v36 = vpack.i.bf16 %v337_v35, %v336_v34  ;;  %v8979_v37 = vmul.f32 0.35355338, %v255_v31  ;;  %v257_v39 = vld [vmem:[%s8917_s22 + $0x38] sm:$0xff]  ;;  %v260_v40 = vld [vmem:[%s8917_s22 + $0x50] sm:$0xff]  ;;  %v7131_v52 = vpack.c.bf16 %v337_v35, %v336_v34 }
  0x1b   : > { %1633 = vrot.lane.b32.xlu1 %v8939_v16, %s8852_s23  ;;  %14319 = vst [vmem:[#allocation8_spill] sm:$0xff] %v8981_v38  ;;  %v338_v41 = vld [vmem:[%s8903_s19 + $0xc0] sm:$0xff]  ;;  %v339_v42 = vld [vmem:[%s8903_s19 + $0xc8] sm:$0xff]  ;;  %v9001_v47 = vmul.f32 0.35355338, %v257_v39  ;;  %v261_v56 = vld [vmem:[%s8917_s22 + $0x58] sm:$0xff] }
  0x1c   : > { %1637 = vrot.lane.b32.xlu0 %v8941_v17, %s8852_s23  ;;  %14318 = vst [vmem:[#allocation7_spill] sm:$0xff] %v8979_v37  ;;  %v318_v43 = vld [vmem:[%s8903_s19 + $0x20] sm:$0xff]  ;;  %v319_v44 = vld [vmem:[%s8903_s19 + $0x28] sm:$0xff]  ;;  %v8993_v45 = vpack.i.bf16 %v339_v42, %v338_v41  ;;  %v9003_v48 = vmul.f32 0.35355338, %v260_v40  ;;  %v264_v57 = vld [vmem:[%s8917_s22 + $0x70] sm:$0xff]  ;;  %v7137_v3 = vpack.c.bf16 %v339_v42, %v338_v41 }
  0x1d   : > { %14320 = vst [vmem:[#allocation9_spill] sm:$0xff] %v9001_v47  ;;  %v7128_v49 = vpack.c.bf16 %v319_v44, %v318_v43  ;;  %v259_v50 = vld [vmem:[%s8917_s22 + $0x48] sm:$0xff]  ;;  %v262_v51 = vld [vmem:[%s8917_s22 + $0x60] sm:$0xff]  ;;  %v9007_v53 = vpack.i.bf16 %v319_v44, %v318_v43  ;;  %v320_v58 = vld [vmem:[%s8903_s19 + $0x30] sm:$0xff]  ;;  %v9031_v61 = vmul.f32 0.35355338, %v261_v56 }
  0x1e   : > { %14321 = vst [vmem:[#allocation10_spill] sm:$0xff] %v9003_v48  ;;  %v9013_v54 = vmul.f32 0.35355338, %v259_v50  ;;  %v9015_v55 = vmul.f32 0.35355338, %v262_v51  ;;  %v321_v59 = vld [vmem:[%s8903_s19 + $0x38] sm:$0xff] }
  0x1f   : > { %1635 = vrot.lane.b32.xlu1 %v8963_v27, %s8852_s23  ;;  %v9025_v60 = vpack.i.bf16 %v321_v59, %v320_v58  ;;  %14324 = vst [vmem:[#allocation13_spill] sm:$0xff] %v9031_v61  ;;  %v9033_v62 = vmul.f32 0.35355338, %v264_v57  ;;  %v7134_v63 = vpack.c.bf16 %v321_v59, %v320_v58  ;;  %v263_v1 = vld [vmem:[%s8917_s22 + $0x68] sm:$0xff]  ;;  %v266_v2 = vld [vmem:[%s8917_s22 + $0x80] sm:$0xff]  ;;  %v265_v6 = vld [vmem:[%s8917_s22 + $0x78] sm:$0xff] }
  0x20   : > { %1641 = vrot.lane.b32.xlu0 %v8965_v28, %s8852_s23  ;;  %7124 = vmatpush3.bf16.xpose.msk.msra.mxu0 %vm8907_vm1, %v7122_v30  ;;  %14322 = vst [vmem:[#allocation11_spill] sm:$0xff] %v9013_v54  ;;  %14323 = vst [vmem:[#allocation12_spill] sm:$0xff] %v9015_v55  ;;  %v9041_v4 = vmul.f32 0.35355338, %v263_v1  ;;  %v9043_v5 = vmul.f32 0.35355338, %v266_v2 }
  0x21   : > { %7127 = vmatprep.subr.msk.bf16.mxu0 %vm8907_vm1, %v7125_v33  ;;  %14325 = vst [vmem:[#allocation14_spill] sm:$0xff] %v9033_v62  ;;  %v268_v7 = vld [vmem:[%s8917_s22 + $0x90] sm:$0xff]  ;;  %v9052_v11 = vld [vmem:[%s8903_s19 + $0x40] sm:$0xff]  ;;  %v9055_v12 = vld [vmem:[%s8903_s19 + $0x48] sm:$0xff]  ;;  %v9067_v15 = vmul.f32 0.35355338, %v265_v6 }
  0x22   : > { %14326 = vst [vmem:[#allocation15_spill] sm:$0xff] %v9041_v4  ;;  %14327 = vst [vmem:[#allocation16_spill] sm:$0xff] %v9043_v5  ;;  %v9058_v13 = vld [vmem:[%s8903_s19 + $0xd0] sm:$0xff]  ;;  %v9061_v14 = vld [vmem:[%s8903_s19 + $0xd8] sm:$0xff]  ;;  %v9069_v18 = vmul.f32 0.35355338, %v268_v7  ;;  %v7140_v20 = vpack.c.bf16 %v9055_v12, %v9052_v11 }
  0x23   : > { %1639 = vrot.lane.b32.xlu1 %v8979_v37, %s8852_s23  ;;  %14328 = vst [vmem:[#allocation17_spill] sm:$0xff] %v9067_v15  ;;  %v267_v21 = vld [vmem:[%s8917_s22 + $0x88] sm:$0xff]  ;;  %v270_v22 = vld [vmem:[%s8917_s22 + $0xa0] sm:$0xff]  ;;  %v7143_v23 = vpack.c.bf16 %v9061_v14, %v9058_v13  ;;  %v269_v30 = vld [vmem:[%s8917_s22 + $0x98] sm:$0xff] }
  0x24   : > { %1645 = vrot.lane.b32.xlu0 %v8981_v38, %s8852_s23  ;;  %14329 = vst [vmem:[#allocation18_spill] sm:$0xff] %v9069_v18  ;;  %v9081_v25 = vmul.f32 0.35355338, %v267_v21  ;;  %v9083_v26 = vmul.f32 0.35355338, %v270_v22  ;;  %v272_v31 = vld [vmem:[%s8917_s22 + $0xb0] sm:$0xff] }
  0x25   : > { %v9092_v32 = vld [vmem:[%s8903_s19 + $0x50] sm:$0xff]  ;;  %v9095_v33 = vld [vmem:[%s8903_s19 + $0x58] sm:$0xff]  ;;  %v9098_v34 = vld [vmem:[%s8903_s19 + $0xe0] sm:$0xff]  ;;  %v9107_v39 = vmul.f32 0.35355338, %v269_v30 }
  0x26   : > { %14330 = vst [vmem:[#allocation19_spill] sm:$0xff] %v9081_v25  ;;  %14331 = vst [vmem:[#allocation20_spill] sm:$0xff] %v9083_v26  ;;  %v9101_v35 = vld [vmem:[%s8903_s19 + $0xe8] sm:$0xff]  ;;  %v9109_v40 = vmul.f32 0.35355338, %v272_v31  ;;  %v7146_v41 = vpack.c.bf16 %v9095_v33, %v9092_v32  ;;  %v274_v43 = vld [vmem:[%s8917_s22 + $0xc0] sm:$0xff] }
  0x27   : > { %1643 = vrot.lane.b32.xlu1 %v9001_v47, %s8852_s23  ;;  %14332 = vst [vmem:[#allocation21_spill] sm:$0xff] %v9107_v39  ;;  %v271_v42 = vld [vmem:[%s8917_s22 + $0xa8] sm:$0xff]  ;;  %v7149_v44 = vpack.c.bf16 %v9101_v35, %v9098_v34  ;;  %v9123_v50 = vmul.f32 0.35355338, %v274_v43  ;;  %v273_v51 = vld [vmem:[%s8917_s22 + $0xb8] sm:$0xff]  ;;  %v326_v56 = vld [vmem:[%s8903_s19 + $0x60] sm:$0xff] }
  0x28   : > { %1649 = vrot.lane.b32.xlu0 %v9003_v48, %s8852_s23  ;;  %7130 = vmatpush3.bf16.xpose.msk.msra.mxu0 %vm8907_vm1, %v7128_v49  ;;  %14333 = vst [vmem:[#allocation22_spill] sm:$0xff] %v9109_v40  ;;  %v9121_v49 = vmul.f32 0.35355338, %v271_v42  ;;  %v327_v57 = vld [vmem:[%s8903_s19 + $0x68] sm:$0xff]  ;;  %v9134_v58 = vld [vmem:[%s8903_s19 + $0xf0] sm:$0xff]  ;;  %v9137_v59 = vld [vmem:[%s8903_s19 + $0xf8] sm:$0xff] }
  0x29   : > { %7133 = vmatprep.subr.msk.bf16.mxu0 %vm8907_vm1, %v7131_v52  ;;  %14335 = vst [vmem:[#allocation24_spill] sm:$0xff] %v9123_v50  ;;  %v276_v52 = vld [vmem:[%s8917_s22 + $0xd0] sm:$0xff]  ;;  %v7152_v2 = vpack.c.bf16 %v327_v57, %v326_v56  ;;  %v278_v6 = vld [vmem:[%s8917_s22 + $0xe0] sm:$0xff]  ;;  %v7155_v7 = vpack.c.bf16 %v9137_v59, %v9134_v58  ;;  %v277_v22 = vld [vmem:[%s8917_s22 + $0xd8] sm:$0xff] }
  0x2a   : > { %14334 = vst [vmem:[#allocation23_spill] sm:$0xff] %v9121_v49  ;;  %v9145_v1 = vmul.f32 0.35355338, %v276_v52  ;;  %v9157_v21 = vmul.f32 0.35355338, %v278_v6  ;;  %v328_v30 = vld [vmem:[%s8903_s19 + $0x70] sm:$0xff]  ;;  %v9207_v6 = vpack.i.bf16 %v327_v57, %v326_v56 }
  0x2b   : > { %1647 = vrot.lane.b32.xlu1 %v9013_v54, %s8852_s23  ;;  %v329_v31 = vld [vmem:[%s8903_s19 + $0x78] sm:$0xff] }
  0x2c   : > { %1653 = vrot.lane.b32.xlu0 %v9015_v55, %s8852_s23  ;;  %14337 = vst [vmem:[#allocation26_spill] sm:$0xff] %v9145_v1  ;;  %14339 = vst [vmem:[#allocation28_spill] sm:$0xff] %v9157_v21  ;;  %v7158_v43 = vpack.c.bf16 %v329_v31, %v328_v30  ;;  %v281_v52 = vld [vmem:[%s8917_s22 + $0xf8] sm:$0xff] }
  0x2f   : > { %1651 = vrot.lane.b32.xlu1 %v9031_v61, %s8852_s23 }
  0x30   : > { %1657 = vrot.lane.b32.xlu0 %v9033_v62, %s8852_s23  ;;  %7136 = vmatpush3.bf16.xpose.msk.msra.mxu0 %vm8907_vm1, %v7134_v63  ;;  %v9143_v63 = vmul.f32 0.35355338, %v273_v51 }
  0x31   : > { %7139 = vmatprep.subr.msk.bf16.mxu0 %vm8907_vm1, %v7137_v3  ;;  %v275_v3 = vld [vmem:[%s8917_s22 + $0xc8] sm:$0xff] }
  0x32   : > { %14336 = vst [vmem:[#allocation25_spill] sm:$0xff] %v9143_v63 }
  0x33   : > { %1655 = vrot.lane.b32.xlu1 %v9041_v4, %s8852_s23 }
  0x34   : > { %1661 = vrot.lane.b32.xlu0 %v9043_v5, %s8852_s23 }
  0x37   : > { %1659 = vrot.lane.b32.xlu1 %v9067_v15, %s8852_s23 }
  0x38   : > { %1665 = vrot.lane.b32.xlu0 %v9069_v18, %s8852_s23  ;;  %7142 = vmatpush3.bf16.xpose.msk.msra.mxu0 %vm8907_vm1, %v7140_v20  ;;  %v9155_v20 = vmul.f32 0.35355338, %v275_v3  ;;  %v9197_v3 = vpack.i.bf16 %v9055_v12, %v9052_v11  ;;  %v9219_v11 = vpack.i.bf16 %v9095_v33, %v9092_v32  ;;  %v9229_v12 = vpack.i.bf16 %v329_v31, %v328_v30 }
  0x39   : > { %7145 = vmatprep.subr.msk.bf16.mxu0 %vm8907_vm1, %v7143_v23  ;;  %v280_v23 = vld [vmem:[%s8917_s22 + $0xf0] sm:$0xff]  ;;  %v9249_v32 = vpack.i.bf16 %v9101_v35, %v9098_v34  ;;  %v9261_v33 = vpack.i.bf16 %v9061_v14, %v9058_v13  ;;  %v9273_v34 = vpack.i.bf16 %v9137_v59, %v9134_v58 }
  0x3a   : > { %14338 = vst [vmem:[#allocation27_spill] sm:$0xff] %v9155_v20  ;;  %v9173_v42 = vmul.f32 0.35355338, %v280_v23 }
  0x3b   : > { %1663 = vrot.lane.b32.xlu1 %v9081_v25, %s8852_s23 }
  0x3c   : > { %1669 = vrot.lane.b32.xlu0 %v9083_v26, %s8852_s23  ;;  %14341 = vst [vmem:[#allocation30_spill] sm:$0xff] %v9173_v42 }
  0x3f   : > { %1667 = vrot.lane.b32.xlu1 %v9107_v39, %s8852_s23 }
  0x40   : > { %1673 = vrot.lane.b32.xlu0 %v9109_v40, %s8852_s23  ;;  %7148 = vmatpush3.bf16.xpose.msk.msra.mxu0 %vm8907_vm1, %v7146_v41  ;;  %v9171_v41 = vmul.f32 0.35355338, %v277_v22 }
  0x41   : > { %7151 = vmatprep.subr.msk.bf16.mxu0 %vm8907_vm1, %v7149_v44  ;;  %v279_v44 = vld [vmem:[%s8917_s22 + $0xe8] sm:$0xff] }
  0x42   : > { %14340 = vst [vmem:[#allocation29_spill] sm:$0xff] %v9171_v41  ;;  %v9180_v51 = vmul.f32 0.35355338, %v279_v44 }
  0x43   : > { %1671 = vrot.lane.b32.xlu1 %v9121_v49, %s8852_s23 }
  0x44   : > { %1677 = vrot.lane.b32.xlu0 %v9123_v50, %s8852_s23  ;;  %14342 = vst [vmem:[#allocation31_spill] sm:$0xff] %v9180_v51 }
  0x47   : > { %1675 = vrot.lane.b32.xlu1 %v9143_v63, %s8852_s23 }
  0x48   : > { %1681 = vrot.lane.b32.xlu0 %v9145_v1, %s8852_s23  ;;  %7154 = vmatpush3.bf16.xpose.msk.msra.mxu0 %vm8907_vm1, %v7152_v2  ;;  %v9189_v2 = vmul.f32 0.35355338, %v281_v52 }
  0x49   : > { %7157 = vmatprep.subr.msk.bf16.mxu0 %vm8907_vm1, %v7155_v7 }
  0x4a   : > { %14343 = vst [vmem:[#allocation32_spill] sm:$0xff] %v9189_v2 }
  0x4b   : > { %1679 = vrot.lane.b32.xlu1 %v9155_v20, %s8852_s23 }
  0x4c   : > { %1685 = vrot.lane.b32.xlu0 %v9157_v21, %s8852_s23 }
  0x4f   : > { %1683 = vrot.lane.b32.xlu1 %v9171_v41, %s8852_s23 }
  0x50   : > { %1689 = vrot.lane.b32.xlu0 %v9173_v42, %s8852_s23  ;;  %7160 = vmatpush3.bf16.xpose.msk.msra.mxu0 %vm8907_vm1, %v7158_v43 }
  0x53   : > { %1687 = vrot.lane.b32.xlu1 %v9180_v51, %s8852_s23 }
  0x54   : > { %7529 = vrot.lane.b32.xlu0 %v8955_v24, %s8852_s23 }
  0x57   : > { %1691 = vrot.lane.b32.xlu1 %v9189_v2, %s8852_s23  ;;  %6762 = vmatmul.mubr.msk.f32.vlgmr.msra.gmra.mrb[0].mxu0 %vm378_vm0, %v8927_v10 }
  0x58   : > { %7539 = vrot.lane.b32.xlu0 %v9007_v53, %s8852_s23  ;;  %6763 = vmatprep.mubr.msk.f32.mxu0 %vm378_vm0, %v8925_v9 }
  0x5b   : > { %7534 = vrot.lane.b32.xlu1 %v8995_v46, %s8852_s23  ;;  %6764 = vmatmul.mubr.msk.f32.gmra.mrb[2].mxu0 %vm378_vm0, %v8925_v9 }
  0x5c   : > { %7549 = vrot.lane.b32.xlu0 %v9197_v3, %s8852_s23  ;;  %6765 = vmatprep.mubr.msk.f32.mxu0 %vm378_vm0, %v8939_v16 }
  0x5f   : > { %7544 = vrot.lane.b32.xlu1 %v9025_v60, %s8852_s23  ;;  %6766 = vmatmul.mubr.msk.f32.gmra.mrb[4].mxu0 %vm378_vm0, %v8939_v16 }
  0x60   : > { %7559 = vrot.lane.b32.xlu0 %v9207_v6, %s8852_s23  ;;  %6767 = vmatprep.mubr.msk.f32.mxu0 %vm378_vm0, %v8963_v27 }
  0x63   : > { %7554 = vrot.lane.b32.xlu1 %v9219_v11, %s8852_s23  ;;  %6768 = vmatmul.mubr.msk.f32.gmra.mrb[6].mxu0 %vm378_vm0, %v8963_v27 }
  0x64   : > { %7569 = vrot.lane.b32.xlu0 %v8923_v8, %s8852_s23  ;;  %6769 = vmatprep.mubr.msk.f32.mxu0 %vm378_vm0, %v8941_v17 }
  0x67   : > { %7564 = vrot.lane.b32.xlu1 %v9229_v12, %s8852_s23  ;;  %6770 = vmatmul.mubr.msk.f32.gmra.mrb[8].mxu0 %vm378_vm0, %v8941_v17 }
  0x68   : > { %7579 = vrot.lane.b32.xlu0 %v8967_v29, %s8852_s23  ;;  %6771 = vmatprep.mubr.msk.f32.mxu0 %vm378_vm0, %v8979_v37 }
  0x6b   : > { %7574 = vrot.lane.b32.xlu1 %v8943_v19, %s8852_s23  ;;  %6772 = vmatmul.mubr.msk.f32.gmra.mrb[10].mxu0 %vm378_vm0, %v8979_v37 }
  0x6c   : > { %7589 = vrot.lane.b32.xlu0 %v8993_v45, %s8852_s23  ;;  %6773 = vmatprep.mubr.msk.f32.mxu0 %vm378_vm0, %v8965_v28 }
  0x6f   : > { %7584 = vrot.lane.b32.xlu1 %v8973_v36, %s8852_s23  ;;  %6774 = vmatmul.mubr.msk.f32.gmra.mrb[12].mxu0 %vm378_vm0, %v8965_v28 }
  0x70   : > { %7599 = vrot.lane.b32.xlu0 %v9249_v32, %s8852_s23  ;;  %6775 = vmatprep.mubr.msk.f32.mxu0 %vm378_vm0, %v9001_v47 }
  0x73   : > { %7594 = vrot.lane.b32.xlu1 %v9261_v33, %s8852_s23  ;;  %6776 = vmatmul.mubr.msk.f32.gmra.mrb[14].mxu0 %vm378_vm0, %v9001_v47 }
  0x74   : > { %7609 = vrot.lane.b32.xlu0 %v8923_v8, %s8853_s24  ;;  %6777 = vmatprep.mubr.msk.f32.mxu0 %vm378_vm0, %v8981_v38 }
  0x77   : > { %7604 = vrot.lane.b32.xlu1 %v9273_v34, %s8852_s23  ;;  %6778 = vmatmul.mubr.msk.f32.gmra.mrb[16].mxu0 %vm378_vm0, %v8981_v38 }
  0x78   : > { %7629 = vrot.lane.b32.xlu0 %v8967_v29, %s8853_s24  ;;  %6779 = vmatprep.mubr.msk.f32.mxu0 %vm378_vm0, %v9013_v54 }
  0x7b   : > { %7614 = vrot.lane.b32.xlu1 %v8955_v24, %s8853_s24  ;;  %6780 = vmatmul.mubr.msk.f32.gmra.mrb[18].mxu0 %vm378_vm0, %v9013_v54 }
  0x7c   : > { %7639 = vrot.lane.b32.xlu0 %v8973_v36, %s8853_s24  ;;  %6781 = vmatprep.mubr.msk.f32.mxu0 %vm378_vm0, %v9003_v48 }
  0x7f   : > { %7619 = vrot.lane.b32.xlu1 %v8943_v19, %s8853_s24  ;;  %6782 = vmatmul.mubr.msk.f32.gmra.mrb[20].mxu0 %vm378_vm0, %v9003_v48 }
  0x80   : > { %7649 = vrot.lane.b32.xlu0 %v8993_v45, %s8853_s24  ;;  %6783 = vmatprep.mubr.msk.f32.mxu0 %vm378_vm0, %v9031_v61 }
  0x83   : > { %7624 = vrot.lane.b32.xlu1 %v8995_v46, %s8853_s24  ;;  %6784 = vmatmul.mubr.msk.f32.gmra.mrb[22].mxu0 %vm378_vm0, %v9031_v61 }
  0x84   : > { %7659 = vrot.lane.b32.xlu0 %v9261_v33, %s8853_s24  ;;  %6785 = vmatprep.mubr.msk.f32.mxu0 %vm378_vm0, %v9015_v55 }
  0x87   : > { %7634 = vrot.lane.b32.xlu1 %v9007_v53, %s8853_s24  ;;  %6786 = vmatmul.mubr.msk.f32.gmra.mrb[24].mxu0 %vm378_vm0, %v9015_v55 }
  0x88   : > { %7669 = vrot.lane.b32.xlu0 %v9249_v32, %s8853_s24  ;;  %6787 = vmatprep.mubr.msk.f32.mxu0 %vm378_vm0, %v9041_v4 }
  0x89   : > { %v9317_v13 = vpop.permute.xlu1 %1631 }
  0x8a   : > { %v9319_v14 = vpop.permute.xlu0 %1629 }
  0x8b   : > { %7644 = vrot.lane.b32.xlu1 %v9025_v60, %s8853_s24  ;;  %6788 = vmatmul.mubr.msk.f32.gmra.mrb[26].mxu0 %vm378_vm0, %v9041_v4 }
  0x8c   : > { %7679 = vrot.lane.b32.xlu0 %v9273_v34, %s8853_s24  ;;  %6789 = vmatprep.mubr.msk.f32.mxu0 %vm378_vm0, %v9033_v62 }
  0x8d   : > { %v9329_v35 = vpop.permute.xlu1 %1633 }
  0x8e   : > { %v9331_v56 = vpop.permute.xlu0 %1637 }
  0x8f   : > { %7654 = vrot.lane.b32.xlu1 %v9197_v3, %s8853_s24  ;;  %6790 = vmatmul.mubr.msk.f32.gmra.mrb[28].mxu0 %vm378_vm0, %v9033_v62 }
  0x90   : > { %3200 = vrot.lane.b32.xlu0 %v8927_v10, %s8853_s24  ;;  %6791 = vmatprep.mubr.msk.f32.mxu0 %vm378_vm0, %v9067_v15 }
  0x91   : > { %v9341_v57 = vpop.permute.xlu1 %1635 }
  0x92   : > { %v9343_v58 = vpop.permute.xlu0 %1641 }
  0x93   : > { %7664 = vrot.lane.b32.xlu1 %v9219_v11, %s8853_s24  ;;  %6792 = vmatmul.mubr.msk.f32.gmra.mrb[30].mxu0 %vm378_vm0, %v9067_v15 }
  0x94   : > { %3204 = vrot.lane.b32.xlu0 %v8939_v16, %s8853_s24  ;;  %6793 = vmatprep.mubr.msk.f32.mxu0 %vm378_vm0, %v9043_v5 }
  0x95   : > { %v9353_v59 = vpop.permute.xlu1 %1639 }
  0x96   : > { %v9355_v7 = vpop.permute.xlu0 %1645 }
  0x97   : > { %7674 = vrot.lane.b32.xlu1 %v9207_v6, %s8853_s24  ;;  %6794 = vmatmul.mubr.msk.f32.gmra.mrb[32].mxu0 %vm378_vm0, %v9043_v5 }
  0x98   : > { %3208 = vrot.lane.b32.xlu0 %v8941_v17, %s8853_s24  ;;  %6795 = vmatprep.mubr.msk.f32.mxu0 %vm378_vm0, %v9081_v25 }
  0x99   : > { %v9365_v22 = vpop.permute.xlu1 %1643 }
  0x9a   : > { %v9367_v23 = vpop.permute.xlu0 %1649 }
  0x9b   : > { %7684 = vrot.lane.b32.xlu1 %v9229_v12, %s8853_s24  ;;  %6796 = vmatmul.mubr.msk.f32.gmra.mrb[34].mxu0 %vm378_vm0, %v9081_v25 }
  0x9c   : > { %3210 = vrot.lane.b32.xlu0 %v8979_v37, %s8853_s24  ;;  %6797 = vmatprep.mubr.msk.f32.mxu0 %vm378_vm0, %v9069_v18 }
  0x9d   : > { %v9377_v30 = vpop.permute.xlu1 %1647 }
  0x9e   : > { %v9379_v31 = vpop.permute.xlu0 %1653 }
  0x9f   : > { %3202 = vrot.lane.b32.xlu1 %v8925_v9, %s8853_s24  ;;  %6798 = vmatmul.mubr.msk.f32.gmra.mrb[36].mxu0 %vm378_vm0, %v9069_v18 }
  0xa0   : > { %3212 = vrot.lane.b32.xlu0 %v8965_v28, %s8853_s24  ;;  %6799 = vmatprep.mubr.msk.f32.mxu0 %vm378_vm0, %v9107_v39 }
  0xa1   : > { %v9389_v43 = vpop.permute.xlu1 %1651 }
  0xa2   : > { %v9391_v44 = vpop.permute.xlu0 %1657 }
  0xa3   : > { %3206 = vrot.lane.b32.xlu1 %v8963_v27, %s8853_s24  ;;  %6800 = vmatmul.mubr.msk.f32.gmra.mrb[38].mxu0 %vm378_vm0, %v9107_v39 }
  0xa4   : > { %3214 = vrot.lane.b32.xlu0 %v9001_v47, %s8853_s24  ;;  %6801 = vmatprep.mubr.msk.f32.mxu0 %vm378_vm0, %v9083_v26 }
  0xa5   : > { %v9401_v52 = vpop.permute.xlu1 %1655 }
  0xa6   : > { %v9403_v28 = vpop.permute.xlu0 %1661 }
  0xa7   : > { %3228 = vrot.lane.b32.xlu1 %v9033_v62, %s8853_s24  ;;  %6802 = vmatmul.mubr.msk.f32.gmra.mrb[40].mxu0 %vm378_vm0, %v9083_v26 }
  0xa8   : > { %3216 = vrot.lane.b32.xlu0 %v8981_v38, %s8853_s24  ;;  %6803 = vmatprep.mubr.msk.f32.mxu0 %vm378_vm0, %v9121_v49 }
  0xa9   : > { %v9413_v47 = vpop.permute.xlu1 %1659 }
  0xaa   : > { %v9415_v37 = vpop.permute.xlu0 %1665 }
  0xab   : > { %14344 = vst [vmem:[#allocation33_spill] sm:$0xff] %v9415_v37  ;;  %7699 = vrot.lane.b32.xlu1 %v8943_v19, %s8854_s25  ;;  %6804 = vmatmul.mubr.msk.f32.gmra.mrb[42].mxu0 %vm378_vm0, %v9121_v49 }
  0xac   : > { %3218 = vrot.lane.b32.xlu0 %v9013_v54, %s8853_s24  ;;  %6805 = vmatprep.mubr.msk.f32.mxu0 %vm378_vm0, %v9109_v40 }
  0xad   : > { %v9425_v62 = vpop.permute.xlu1 %1663 }
  0xae   : > { %v9427_v38 = vpop.permute.xlu0 %1669 }
  0xaf   : > { %14345 = vst [vmem:[#allocation34_spill] sm:$0xff] %v9427_v38  ;;  %7704 = vrot.lane.b32.xlu1 %v8995_v46, %s8854_s25  ;;  %6806 = vmatmul.mubr.msk.f32.gmra.mrb[44].mxu0 %vm378_vm0, %v9109_v40  ;;  %v9593_v38 = vld [vmem:[%s9517_s28 + $0x30] sm:$0xff] }
  0xb0   : > { %3220 = vrot.lane.b32.xlu0 %v9003_v48, %s8853_s24  ;;  %6807 = vmatprep.mubr.msk.f32.mxu0 %vm378_vm0, %v9143_v63 }
  0xb1   : > { %v9437_v19 = vpop.permute.xlu1 %1667 }
  0xb2   : > { %14346 = vst [vmem:[#allocation35_spill] sm:$0xff] %v9437_v19  ;;  %v9439_v54 = vpop.permute.xlu0 %1673  ;;  %v9596_v19 = vld [vmem:[%s9517_s28 + $0x38] sm:$0xff] }
  0xb3   : > { %14347 = vst [vmem:[#allocation36_spill] sm:$0xff] %v9439_v54  ;;  %7709 = vrot.lane.b32.xlu1 %v8967_v29, %s8854_s25  ;;  %6808 = vmatmul.mubr.msk.f32.gmra.mrb[46].mxu0 %vm378_vm0, %v9143_v63  ;;  %v9576_v54 = vld [vmem:[%s9517_s28 + $0x28] sm:$0xff] }
  0xb4   : > { %3222 = vrot.lane.b32.xlu0 %v9031_v61, %s8853_s24  ;;  %6809 = vmatprep.mubr.msk.f32.mxu0 %vm378_vm0, %v9123_v50 }
  0xb5   : > { %v9449_v46 = vpop.permute.xlu1 %1671 }
  0xb6   : > { %14348 = vst [vmem:[#allocation37_spill] sm:$0xff] %v9449_v46  ;;  %v9451_v48 = vpop.permute.xlu0 %1677 }
  0xb7   : > { %14349 = vst [vmem:[#allocation38_spill] sm:$0xff] %v9451_v48  ;;  %7714 = vrot.lane.b32.xlu1 %v9007_v53, %s8854_s25  ;;  %6810 = vmatmul.mubr.msk.f32.gmra.mrb[48].mxu0 %vm378_vm0, %v9123_v50 }
  0xb8   : > { %3224 = vrot.lane.b32.xlu0 %v9015_v55, %s8853_s24  ;;  %6811 = vmatprep.mubr.msk.f32.mxu0 %vm378_vm0, %v9155_v20 }
  0xb9   : > { %v9461_v29 = vpop.permute.xlu1 %1675 }
  0xba   : > { %14350 = vst [vmem:[#allocation39_spill] sm:$0xff] %v9461_v29  ;;  %v9463_v61 = vpop.permute.xlu0 %1681  ;;  %v9573_v29 = vld [vmem:[%s9517_s28 + $0x20] sm:$0xff] }
  0xbb   : > { %14351 = vst [vmem:[#allocation40_spill] sm:$0xff] %v9463_v61  ;;  %7719 = vrot.lane.b32.xlu1 %v8973_v36, %s8854_s25  ;;  %6812 = vmatmul.mubr.msk.f32.gmra.mrb[50].mxu0 %vm378_vm0, %v9155_v20 }
  0xbc   : > { %3226 = vrot.lane.b32.xlu0 %v9041_v4, %s8853_s24  ;;  %6813 = vmatprep.mubr.msk.f32.mxu0 %vm378_vm0, %v9145_v1 }
  0xbd   : > { %v9473_v53 = vpop.permute.xlu1 %1679 }
  0xbe   : > { %14352 = vst [vmem:[#allocation41_spill] sm:$0xff] %v9473_v53  ;;  %v9475_v55 = vpop.permute.xlu0 %1685 }
  0xbf   : > { %14353 = vst [vmem:[#allocation42_spill] sm:$0xff] %v9475_v55  ;;  %7724 = vrot.lane.b32.xlu1 %v9025_v60, %s8854_s25  ;;  %6814 = vmatmul.mubr.msk.f32.gmra.mrb[52].mxu0 %vm378_vm0, %v9145_v1  ;;  %v9559_v55 = vld [vmem:[%s9517_s28 + $0x10] sm:$0xff] }
  0xc0   : > { %3230 = vrot.lane.b32.xlu0 %v9067_v15, %s8853_s24  ;;  %6815 = vmatprep.mubr.msk.f32.mxu0 %vm378_vm0, %v9171_v41 }
  0xc1   : > { %v9485_v36 = vpop.permute.xlu1 %1683 }
  0xc2   : > { %14354 = vst [vmem:[#allocation43_spill] sm:$0xff] %v9485_v36  ;;  %v9487_v4 = vpop.permute.xlu0 %1689  ;;  %v9562_v36 = vld [vmem:[%s9517_s28 + $0x18] sm:$0xff] }
  0xc3   : > { %14355 = vst [vmem:[#allocation44_spill] sm:$0xff] %v9487_v4  ;;  %7729 = vrot.lane.b32.xlu1 %v8993_v45, %s8854_s25  ;;  %6816 = vmatmul.mubr.msk.f32.gmra.mrb[54].mxu0 %vm378_vm0, %v9171_v41 }
  0xc4   : > { %7689 = vrot.lane.b32.xlu0 %v8923_v8, %s8854_s25  ;;  %6817 = vmatprep.mubr.msk.f32.mxu0 %vm378_vm0, %v9157_v21 }
  0xc5   : > { %v9497_v60 = vpop.permute.xlu1 %1687 }
  0xc6   : > { %14356 = vst [vmem:[#allocation45_spill] sm:$0xff] %v9497_v60  ;;  %v7530_v15 = vpop.permute.xlu0 %7529 }
  0xc7   : > { %7734 = vrot.lane.b32.xlu1 %v9197_v3, %s8854_s25  ;;  %6818 = vmatmul.mubr.msk.f32.gmra.mrb[56].mxu0 %vm378_vm0, %v9157_v21  ;;  %v9526_v3 = vld [vmem:[%s9517_s28] sm:$0xff] }
  0xc8   : > { %3232 = vrot.lane.b32.xlu0 %v9043_v5, %s8853_s24  ;;  %6819 = vmatprep.mubr.msk.f32.mxu0 %vm378_vm0, %v9180_v51  ;;  %v9529_v5 = vld [vmem:[%s9517_s28 + $0x8] sm:$0xff] }
  0xc9   : > { %v9507_v8 = vpop.permute.xlu1 %1691 }
  0xca   : > { %14357 = vst [vmem:[#allocation46_spill] sm:$0xff] %v9507_v8  ;;  %v9509_v45 = vpop.permute.xlu0 %7539 }
  0xcb   : > { %7739 = vrot.lane.b32.xlu1 %v9261_v33, %s8854_s25  ;;  %6820 = vmatmul.mubr.msk.f32.gmra.mrb[58].mxu0 %vm378_vm0, %v9180_v51 }
  0xcc   : > { %7694 = vrot.lane.b32.xlu0 %v8955_v24, %s8854_s25  ;;  %6821 = vmatprep.mubr.msk.f32.mxu0 %vm378_vm0, %v9173_v42  ;;  %v7748_v24 = vpack.i.bf16 %v9529_v5, %v9526_v3 }
  0xcd   : > { %v7535_v17 = vpop.permute.xlu1 %7534 }
  0xce   : > { %v9531_v27 = vpop.permute.xlu0 %7549 }
  0xcf   : > { %7744 = vrot.lane.b32.xlu1 %v9219_v11, %s8854_s25  ;;  %6822 = vmatmul.mubr.msk.f32.gmra.mrb[60].mxu0 %vm378_vm0, %v9173_v42  ;;  %v7532_v11 = vunpack.i.h.bf16 %v7530_v15 }
  0xd0   : > { %3234 = vrot.lane.b32.xlu0 %v9081_v25, %s8853_s24  ;;  %6823 = vmatprep.mubr.msk.f32.mxu0 %vm378_vm0, %v9189_v2  ;;  %v7531_v25 = vunpack.i.l.bf16 %v7530_v15 }
  0xd1   : > { %v9543_v33 = vpop.permute.xlu1 %7544 }
  0xd2   : > { %v9545_v8 = vpop.permute.xlu0 %7559  ;;  %v7212_v61 = vpack.c.bf16 %v7532_v11, %v7531_v25 }
  0xd3   : > { %7749 = vrot.lane.b32.xlu1 %v7748_v24, %s8852_s23  ;;  %6824 = vmatmul.mubr.msk.f32.gmra.mrb[62].mxu0 %vm378_vm0, %v9189_v2  ;;  %v7763_v24 = vpack.i.bf16 %v9562_v36, %v9559_v55 }
  0xd4   : > { %3236 = vrot.lane.b32.xlu0 %v9069_v18, %s8853_s24  ;;  %6857 = vmatprep.mubr.msk.f32.mxu0 %vm378_vm0, %v9319_v14 }
  0xd5   : > { %v9556_v4 = vpop.permute.xlu1 %7554 }
  0xd6   : > { %v7570_v60 = vpop.permute.xlu0 %7569 }
  0xd7   : > { %v7572_v18 = vunpack.i.h.bf16 %v7570_v60  ;;  %v7571_v16 = vunpack.i.l.bf16 %v7570_v60  ;;  %3256 = vrot.lane.b32.xlu1 %v9157_v21, %s8853_s24  ;;  %v7537_v60 = vunpack.i.h.bf16 %v7535_v17 }
  0xd8   : > { %3238 = vrot.lane.b32.xlu0 %v9107_v39, %s8853_s24  ;;  %v7536_v39 = vunpack.i.l.bf16 %v7535_v17 }
  0xd9   : > { %v7209_v15 = vpack.c.bf16 %v7572_v18, %v7571_v16  ;;  %v9570_v53 = vpop.permute.xlu1 %7564  ;;  %v7768_v16 = vpack.i.bf16 %v9576_v54, %v9573_v29 }
  0xda   : > { %v7580_v48 = vpop.permute.xlu0 %7579  ;;  %v7218_v17 = vpack.c.bf16 %v7537_v60, %v7536_v39 }
  0xdb   : > { %7211 = vmatprep.subr.msk.bf16.mxu0 %vm8907_vm1, %v7209_v15  ;;  %7764 = vrot.lane.b32.xlu1 %v7763_v24, %s8852_s23  ;;  %v7582_v11 = vunpack.i.h.bf16 %v7580_v48  ;;  %v7581_v21 = vunpack.i.l.bf16 %v7580_v48 }
  0xdc   : > { %3240 = vrot.lane.b32.xlu0 %v9083_v26, %s8853_s24  ;;  %7214 = vmatpush3.bf16.xpose.msk.msra.mxu0 %vm8907_vm1, %v7212_v61 }
  0xdd   : > { %v7575_v18 = vpop.permute.xlu1 %7574  ;;  %v7221_v37 = vpack.c.bf16 %v7582_v11, %v7581_v21  ;;  %v7783_v21 = vpack.i.bf16 %v9596_v19, %v9593_v38 }
  0xde   : > { %v7590_v25 = vpop.permute.xlu0 %7589  ;;  %v7577_v15 = vunpack.i.h.bf16 %v7575_v18  ;;  %v7576_v46 = vunpack.i.l.bf16 %v7575_v18  ;;  %v9618_v18 = vld [vmem:[%s9517_s28 + $0x48] sm:$0xff] }
  0xdf   : > { %7769 = vrot.lane.b32.xlu1 %v7768_v16, %s8852_s23  ;;  %v9615_v16 = vld [vmem:[%s9517_s28 + $0x40] sm:$0xff] }
  0xe0   : > { %3242 = vrot.lane.b32.xlu0 %v9121_v49, %s8853_s24  ;;  %v7215_v26 = vpack.c.bf16 %v7577_v15, %v7576_v46  ;;  %v7541_v46 = vunpack.i.l.bf16 %v9509_v45  ;;  %v7788_v11 = vpack.i.bf16 %v9618_v18, %v9615_v16  ;;  %v7546_v49 = vunpack.i.l.bf16 %v9543_v33 }
  0xe1   : > { %v7585_v24 = vpop.permute.xlu1 %7584 }
  0xe2   : > { %v9590_v61 = vpop.permute.xlu0 %7599  ;;  %7217 = vmatprep.subr.msk.bf16.mxu0 %vm8907_vm1, %v7215_v26  ;;  %v7587_v48 = vunpack.i.h.bf16 %v7585_v24  ;;  %v7586_v39 = vunpack.i.l.bf16 %v7585_v24  ;;  %v7542_v26 = vunpack.i.h.bf16 %v9509_v45  ;;  %v9628_v45 = vld [vmem:[%s9517_s28 + $0x50] sm:$0xff]  ;;  %v9631_v24 = vld [vmem:[%s9517_s28 + $0x58] sm:$0xff] }
  0xe3   : > { %3260 = vrot.lane.b32.xlu1 %v9173_v42, %s8853_s24  ;;  %v7547_v42 = vunpack.i.h.bf16 %v9543_v33  ;;  %v7592_v33 = vunpack.i.h.bf16 %v7590_v25 }
  0xe4   : > { %3244 = vrot.lane.b32.xlu0 %v9109_v40, %s8853_s24  ;;  %7220 = vmatpush3.bf16.xpose.msk.msra.mxu0 %vm8907_vm1, %v7218_v17  ;;  %v7224_v15 = vpack.c.bf16 %v7542_v26, %v7541_v46  ;;  %v9650_v26 = vld [vmem:[%s9517_s28 + $0x68] sm:$0xff]  ;;  %v7591_v46 = vunpack.i.l.bf16 %v7590_v25  ;;  %v7552_v25 = vunpack.i.h.bf16 %v9531_v27 }
  0xe5   : > { %7223 = vmatprep.subr.msk.bf16.mxu0 %vm8907_vm1, %v7221_v37  ;;  %v7227_v37 = vpack.c.bf16 %v7587_v48, %v7586_v39  ;;  %v7793_v48 = vpack.i.bf16 %v9631_v24, %v9628_v45 }
  0xe6   : > { %v9612_v60 = vpop.permute.xlu0 %7609 }
  0xe7   : > { %7784 = vrot.lane.b32.xlu1 %v7783_v21, %s8852_s23  ;;  %v9647_v21 = vld [vmem:[%s9517_s28 + $0x60] sm:$0xff] }
  0xe8   : > { %3246 = vrot.lane.b32.xlu0 %v9143_v63, %s8853_s24  ;;  %v7230_v63 = vpack.c.bf16 %v7547_v42, %v7546_v49 }
  0xea   : > { %v9625_v17 = vpop.permute.xlu0 %7629 }
  0xeb   : > { %7789 = vrot.lane.b32.xlu1 %v7788_v11, %s8852_s23 }
  0xec   : > { %3248 = vrot.lane.b32.xlu0 %v9123_v50, %s8853_s24  ;;  %7226 = vmatpush3.bf16.xpose.msk.msra.mxu0 %vm8907_vm1, %v7224_v15  ;;  %v7595_v15 = vpop.permute.xlu1 %7594  ;;  %v7233_v50 = vpack.c.bf16 %v7592_v33, %v7591_v46 }
  0xed   : > { %7229 = vmatprep.subr.msk.bf16.mxu0 %vm8907_vm1, %v7227_v37  ;;  %v7798_v37 = vpack.i.bf16 %v9650_v26, %v9647_v21  ;;  %v7597_v49 = vunpack.i.h.bf16 %v7595_v15  ;;  %v7596_v42 = vunpack.i.l.bf16 %v7595_v15  ;;  %v7601_v15 = vunpack.i.l.bf16 %v9590_v61 }
  0xee   : > { %v9644_v39 = vpop.permute.xlu0 %7639 }
  0xef   : > { %7794 = vrot.lane.b32.xlu1 %v7793_v48, %s8852_s23  ;;  %v7551_v48 = vunpack.i.l.bf16 %v9531_v27  ;;  %v7239_v33 = vpack.c.bf16 %v7597_v49, %v7596_v42 }
  0xf0   : > { %3250 = vrot.lane.b32.xlu0 %v9155_v20, %s8853_s24  ;;  %v7605_v42 = vpop.permute.xlu1 %7604 }
  0xf1   : > { %v7236_v46 = vpack.c.bf16 %v7552_v25, %v7551_v48  ;;  %v7607_v25 = vunpack.i.h.bf16 %v7605_v42  ;;  %v7606_v48 = vunpack.i.l.bf16 %v7605_v42 }
  0xf2   : > { %v9657_v11 = vpop.permute.xlu0 %7649 }
  0xf3   : > { %7799 = vrot.lane.b32.xlu1 %v7798_v37, %s8852_s23  ;;  %v7602_v37 = vunpack.i.h.bf16 %v9590_v61  ;;  %v7562_v61 = vunpack.i.h.bf16 %v9545_v8 }
  0xf4   : > { %3252 = vrot.lane.b32.xlu0 %v9145_v1, %s8853_s24  ;;  %7232 = vmatpush3.bf16.xpose.msk.msra.mxu0 %vm8907_vm1, %v7230_v63  ;;  %v7557_v63 = vunpack.i.h.bf16 %v9556_v4 }
  0xf5   : > { %7235 = vmatprep.subr.msk.bf16.mxu0 %vm8907_vm1, %v7233_v50  ;;  %v7556_v50 = vunpack.i.l.bf16 %v9556_v4 }
  0xf6   : > { %v9668_v20 = vpop.permute.xlu0 %7659 }
  0xf7   : > { %v7242_v49 = vpack.c.bf16 %v7557_v63, %v7556_v50 }
  0xf8   : > { %3254 = vrot.lane.b32.xlu0 %v9171_v41, %s8853_s24  ;;  %v14377_v41 = vld [vmem:[#allocation34_spill] sm:$0xff] }
  0xfa   : > { %v9672_v1 = vpop.permute.xlu0 %7669 }
  0xfc   : > { %7754 = vrot.lane.b32.xlu0 %v9249_v32, %s8854_s25  ;;  %7238 = vmatpush3.bf16.xpose.msk.msra.mxu0 %vm8907_vm1, %v7236_v46  ;;  %v7245_v32 = vpack.c.bf16 %v7602_v37, %v7601_v15  ;;  %v7251_v46 = vpack.c.bf16 %v7607_v25, %v7606_v48  ;;  %v7567_v37 = vunpack.i.h.bf16 %v9570_v53  ;;  %v7566_v15 = vunpack.i.l.bf16 %v9570_v53 }
  0xfd   : > { %7241 = vmatprep.subr.msk.bf16.mxu0 %vm8907_vm1, %v7239_v33  ;;  %v7561_v33 = vunpack.i.l.bf16 %v9545_v8  ;;  %v7162_v8 = vpack.c.bf16 %v9529_v5, %v9526_v3  ;;  %v7612_v53 = vunpack.i.h.bf16 %v9612_v60  ;;  %v7165_v5 = vpack.c.bf16 %v9562_v36, %v9559_v55 }
  0xfe   : > { %v9682_v27 = vpop.permute.xlu0 %7679 }
  0xff   : > { %v7248_v63 = vpack.c.bf16 %v7562_v61, %v7561_v33  ;;  %v7168_v33 = vpack.c.bf16 %v9576_v54, %v9573_v29 }
 0x100   : > { %7759 = vrot.lane.b32.xlu0 %v9207_v6, %s8854_s25 }
 0x102   : > { %v9688_v4 = vpop.permute.xlu0 %3200 }
 0x104   : > { %3258 = vrot.lane.b32.xlu0 %v9180_v51, %s8853_s24  ;;  %7244 = vmatpush3.bf16.xpose.msk.msra.mxu0 %vm8907_vm1, %v7242_v49  ;;  %v13829_v49 = vmov 0.0|0.0  }
 0x105   : > { %7247 = vmatprep.subr.msk.bf16.mxu0 %vm8907_vm1, %v7245_v32  ;;  %7161 = vmatprep.subr.bf16.mxu1 %v13829_v49  ;;  %v7254_v32 = vpack.c.bf16 %v7567_v37, %v7566_v15  ;;  %v7171_v37 = vpack.c.bf16 %v9596_v19, %v9593_v38  ;;  %v7631_v19 = vunpack.i.l.bf16 %v9625_v17 }
 0x106   : > { %v9698_v6 = vpop.permute.xlu0 %3204  ;;  %7163 = vmatpush1.bf16.msra.mxu1 %v7162_v8 }
 0x107   : > { %7164 = vmatprep.subr.bf16.mxu1 %v13829_v49 }
 0x108   : > { %7774 = vrot.lane.b32.xlu0 %v9273_v34, %s8854_s25  ;;  %v7615_v34 = vpop.permute.xlu1 %7614 }
 0x109   : > { %v7616_v61 = vunpack.i.l.bf16 %v7615_v34 }
 0x10a   : > { %v9702_v50 = vpop.permute.xlu0 %3208  ;;  %7166 = vmatpush1.bf16.msra.mxu1 %v7165_v5  ;;  %v9778_v5 = vld [vmem:[%s9517_s28 + $0x70] sm:$0xff] }
 0x10b   : > { %7167 = vmatprep.subr.bf16.mxu1 %v13829_v49 }
 0x10c   : > { %7779 = vrot.lane.b32.xlu0 %v9229_v12, %s8854_s25  ;;  %7250 = vmatpush3.bf16.xpose.msk.msra.mxu0 %vm8907_vm1, %v7248_v63  ;;  %v7611_v12 = vunpack.i.l.bf16 %v9612_v60  ;;  %v7620_v48 = vpop.permute.xlu1 %7619  ;;  %v7617_v60 = vunpack.i.h.bf16 %v7615_v34  ;;  %v7174_v34 = vpack.c.bf16 %v9618_v18, %v9615_v16  ;;  %v7177_v16 = vpack.c.bf16 %v9631_v24, %v9628_v45 }
 0x10d   : > { %7253 = vmatprep.subr.msk.bf16.mxu0 %vm8907_vm1, %v7251_v46  ;;  %v7622_v46 = vunpack.i.h.bf16 %v7620_v48  ;;  %v7621_v55 = vunpack.i.l.bf16 %v7620_v48  ;;  %v7180_v45 = vpack.c.bf16 %v9650_v26, %v9647_v21  ;;  %v7641_v24 = vunpack.i.l.bf16 %v9644_v39 }
 0x10e   : > { %v9715_v42 = vpop.permute.xlu0 %3210  ;;  %v7305_v25 = vpack.c.bf16 %v7612_v53, %v7611_v12  ;;  %7169 = vmatpush1.bf16.msra.mxu1 %v7168_v33  ;;  %v7308_v63 = vpack.c.bf16 %v7617_v60, %v7616_v61  ;;  %v9796_v61 = vld [vmem:[%s9517_s28 + $0x88] sm:$0xff] }
 0x10f   : > { %7170 = vmatprep.subr.bf16.mxu1 %v13829_v49  ;;  %v7311_v15 = vpack.c.bf16 %v7622_v46, %v7621_v55 }
 0x110   : > { %3262 = vrot.lane.b32.xlu0 %v9189_v2, %s8853_s24  ;;  %v7625_v8 = vpop.permute.xlu1 %7624 }
 0x111   : > { %v7627_v54 = vunpack.i.h.bf16 %v7625_v8  ;;  %v7626_v29 = vunpack.i.l.bf16 %v7625_v8  ;;  %v9819_v8 = vld [vmem:[%s9517_s28 + $0x90] sm:$0xff] }
 0x112   : > { %v9724_v3 = vpop.permute.xlu0 %3212  ;;  %7172 = vmatpush1.bf16.msra.mxu1 %v7171_v37 }
 0x113   : > { %7173 = vmatprep.subr.bf16.mxu1 %v13829_v49  ;;  %v7314_v53 = vpack.c.bf16 %v7627_v54, %v7626_v29  ;;  %v9822_v54 = vld [vmem:[%s9517_s28 + $0x98] sm:$0xff]  ;;  %v7652_v29 = vunpack.i.h.bf16 %v9657_v11 }
 0x114   : > { %7256 = vmatpush3.bf16.xpose.msk.msra.mxu0 %vm8907_vm1, %v7254_v32  ;;  %v7635_v18 = vpop.permute.xlu1 %7634 }
 0x115   : > { %7307 = vmatprep.subr.msk.bf16.mxu0 %vm8907_vm1, %v7305_v25  ;;  %v9781_v25 = vld [vmem:[%s9517_s28 + $0x78] sm:$0xff] }
 0x116   : > { %v9733_v36 = vpop.permute.xlu0 %3214  ;;  %7175 = vmatpush1.bf16.msra.mxu1 %v7174_v34  ;;  %v7183_v26 = vpack.c.bf16 %v9781_v25, %v9778_v5  ;;  %v7651_v34 = vunpack.i.l.bf16 %v9657_v11  ;;  %v9840_v11 = vld [vmem:[%s9517_s28 + $0xa0] sm:$0xff] }
 0x117   : > { %7176 = vmatprep.subr.bf16.mxu1 %v13829_v49  ;;  %14358 = vst [vmem:[#allocation47_spill] sm:$0xff] %v9840_v11 }
 0x118   : > { %v7645_v60 = vpop.permute.xlu1 %7644 }
 0x119   : > { %v7647_v55 = vunpack.i.h.bf16 %v7645_v60 }
 0x11a   : > { %v9747_v38 = vpop.permute.xlu0 %3216  ;;  %7178 = vmatpush1.bf16.msra.mxu1 %v7177_v16 }
 0x11b   : > { %6858 = vmatmul.mubr.msk.f32.vlgmr.msra.gmra.mrb[64].mxu0 %vm378_vm0, %v9319_v14  ;;  %v7632_v14 = vunpack.i.h.bf16 %v9625_v17  ;;  %7179 = vmatprep.subr.bf16.mxu1 %v13829_v49  ;;  %v7636_v17 = vunpack.i.l.bf16 %v7635_v18 }
 0x11c   : > { %6859 = vmatprep.mubr.msk.f32.mxu0 %vm378_vm0, %v9317_v13  ;;  %7310 = vmatpush3.bf16.xpose.msk.msra.mxu0 %vm8907_vm1, %v7308_v63  ;;  %v7646_v63 = vunpack.i.l.bf16 %v7645_v60 }
 0x11d   : > { %7313 = vmatprep.subr.msk.bf16.mxu0 %vm8907_vm1, %v7311_v15  ;;  %v7317_v12 = vpack.c.bf16 %v7632_v14, %v7631_v19  ;;  %v7655_v19 = vpop.permute.xlu1 %7654 }
 0x11e   : > { %v9760_v32 = vpop.permute.xlu0 %3218  ;;  %7181 = vmatpush1.bf16.msra.mxu1 %v7180_v45 }
 0x11f   : > { %6860 = vmatmul.mubr.msk.f32.gmra.mrb[66].mxu0 %vm378_vm0, %v9317_v13  ;;  %v7637_v13 = vunpack.i.h.bf16 %v7635_v18  ;;  %7182 = vmatprep.subr.bf16.mxu1 %v13829_v49 }
 0x120   : > { %6861 = vmatprep.mubr.msk.f32.mxu0 %vm378_vm0, %v9329_v35 }
 0x121   : > { %v7320_v21 = vpack.c.bf16 %v7637_v13, %v7636_v17  ;;  %v7329_v13 = vpack.c.bf16 %v7652_v29, %v7651_v34  ;;  %v7665_v45 = vpop.permute.xlu1 %7664 }
 0x122   : > { %v9788_v48 = vpop.permute.xlu0 %3220  ;;  %7184 = vmatpush1.bf16.msra.mxu1 %v7183_v26  ;;  %v7656_v26 = vunpack.i.l.bf16 %v7655_v19 }
 0x123   : > { %6862 = vmatmul.mubr.msk.f32.gmra.mrb[68].mxu0 %vm378_vm0, %v9329_v35  ;;  %v7642_v35 = vunpack.i.h.bf16 %v9644_v39  ;;  %7185 = vmatprep.subr.bf16.mxu1 %v13829_v49 }
 0x124   : > { %6863 = vmatprep.mubr.msk.f32.mxu0 %vm378_vm0, %v9341_v57  ;;  %7316 = vmatpush3.bf16.xpose.msk.msra.mxu0 %vm8907_vm1, %v7314_v53  ;;  %v7326_v53 = vpack.c.bf16 %v7647_v55, %v7646_v63  ;;  %v7662_v55 = vunpack.i.h.bf16 %v9668_v20  ;;  %v7661_v63 = vunpack.i.l.bf16 %v9668_v20 }
 0x125   : > { %7319 = vmatprep.subr.msk.bf16.mxu0 %vm8907_vm1, %v7317_v12  ;;  %v7323_v39 = vpack.c.bf16 %v7642_v35, %v7641_v24  ;;  %v9843_v12 = vld [vmem:[%s9517_s28 + $0xa8] sm:$0xff] }
 0x126   : > { %v9813_v15 = vpop.permute.xlu0 %3222  ;;  %14359 = vst [vmem:[#allocation48_spill] sm:$0xff] %v9843_v12  ;;  %v7192_v35 = vpack.c.bf16 %v9843_v12, %v9840_v11  ;;  %v7335_v20 = vpack.c.bf16 %v7662_v55, %v7661_v63  ;;  %v7672_v55 = vunpack.i.h.bf16 %v9672_v1  ;;  %v7671_v63 = vunpack.i.l.bf16 %v9672_v1 }
 0x127   : > { %6864 = vmatmul.mubr.msk.f32.gmra.mrb[70].mxu0 %vm378_vm0, %v9341_v57  ;;  %v9793_v57 = vld [vmem:[%s9517_s28 + $0x80] sm:$0xff]  ;;  %v7682_v1 = vunpack.i.h.bf16 %v9682_v27 }
 0x128   : > { %6865 = vmatprep.mubr.msk.f32.mxu0 %vm378_vm0, %v9331_v56  ;;  %v7186_v46 = vpack.c.bf16 %v9796_v61, %v9793_v57 }
 0x12a   : > { %v9799_v33 = vpop.f32.mrb[0].mxu0  ;;  %7187 = vmatpush1.bf16.msra.mxu1 %v7186_v46  ;;  %v369_v46 = vld [vmem:[%s9517_s28 + $0xb8] sm:$0xff] }
 0x12b   : > { %6866 = vmatmul.mubr.msk.f32.gmra.mrb[72].mxu0 %vm378_vm0, %v9331_v56  ;;  %v9807_v56 = vpop.f32.mrb[1].mxu0  ;;  %7188 = vmatprep.subr.bf16.mxu1 %v13829_v49 }
 0x12c   : > { %6867 = vmatprep.mubr.msk.f32.mxu0 %vm378_vm0, %v9353_v59  ;;  %7322 = vmatpush3.bf16.xpose.msk.msra.mxu0 %vm8907_vm1, %v7320_v21  ;;  %v828_v37 = vmax.f32 %v9799_v33, %v9807_v56  ;;  %v7657_v21 = vunpack.i.h.bf16 %v7655_v19 }
 0x12d   : > { %7325 = vmatprep.subr.msk.bf16.mxu0 %vm8907_vm1, %v7323_v39  ;;  %v368_v39 = vld [vmem:[%s9517_s28 + $0xb0] sm:$0xff] }
 0x12e   : > { %v9826_v14 = vpop.f32.mrb[2].mxu0  ;;  %v7195_v29 = vpack.c.bf16 %v369_v46, %v368_v39  ;;  %v7332_v34 = vpack.c.bf16 %v7657_v21, %v7656_v26  ;;  %v7667_v21 = vunpack.i.h.bf16 %v7665_v45  ;;  %v7666_v26 = vunpack.i.l.bf16 %v7665_v45 }
 0x12f   : > { %6868 = vmatmul.mubr.msk.f32.gmra.mrb[74].mxu0 %vm378_vm0, %v9353_v59  ;;  %829 = vmax.xlane.f32.xlu0 %v828_v37  ;;  %v7189_v59 = vpack.c.bf16 %v9822_v54, %v9819_v8  ;;  %v9832_v16 = vpop.f32.mrb[3].mxu0 }
 0x130   : > { %6869 = vmatprep.mubr.msk.f32.mxu0 %vm378_vm0, %v9343_v58  ;;  %v831_v18 = vmax.f32 %v9826_v14, %v9832_v16 }
 0x131   : > { %7190 = vmatpush1.bf16.msra.mxu1 %v7189_v59 }
 0x132   : > { %7191 = vmatprep.subr.bf16.mxu1 %v13829_v49  ;;  %v9845_v17 = vpop.f32.mrb[4].mxu0 }
 0x133   : > { %6870 = vmatmul.mubr.msk.f32.gmra.mrb[76].mxu0 %vm378_vm0, %v9343_v58  ;;  %832 = vmax.xlane.f32.xlu0 %v831_v18  ;;  %v9851_v58 = vpop.permute.xlu0 %3224  ;;  %v9853_v24 = vpop.f32.mrb[5].mxu0 }
 0x134   : > { %6871 = vmatprep.mubr.msk.f32.mxu0 %vm378_vm0, %v9365_v22  ;;  %7328 = vmatpush3.bf16.xpose.msk.msra.mxu0 %vm8907_vm1, %v7326_v53  ;;  %v834_v60 = vmax.f32 %v9845_v17, %v9853_v24 }
 0x135   : > { %7331 = vmatprep.subr.msk.bf16.mxu0 %vm8907_vm1, %v7329_v13  ;;  %7193 = vmatpush1.bf16.msra.mxu1 %v7192_v35  ;;  %v370_v13 = vld [vmem:[%s9517_s28 + $0xc0] sm:$0xff]  ;;  %v371_v35 = vld [vmem:[%s9517_s28 + $0xc8] sm:$0xff] }
 0x136   : > { %7194 = vmatprep.subr.bf16.mxu1 %v13829_v49  ;;  %835 = vmax.xlane.f32.xlu1 %v834_v60  ;;  %v9868_v37 = vpop.f32.mrb[6].mxu0  ;;  %v7198_v39 = vpack.c.bf16 %v371_v35, %v370_v13 }
 0x137   : > { %6872 = vmatmul.mubr.msk.f32.gmra.mrb[78].mxu0 %vm378_vm0, %v9365_v22  ;;  %v9872_v19 = vpop.f32.mrb[7].mxu0  ;;  %v7675_v22 = vpop.permute.xlu1 %7674 }
 0x138   : > { %6873 = vmatprep.mubr.msk.f32.mxu0 %vm378_vm0, %v9355_v7  ;;  %v837_v59 = vmax.f32 %v9868_v37, %v9872_v19  ;;  %v9876_v53 = vpop.permute.xlu0 %3226 }
 0x139   : > { %7196 = vmatpush1.bf16.msra.mxu1 %v7195_v29  ;;  %v372_v29 = vld [vmem:[%s9517_s28 + $0xd0] sm:$0xff] }
 0x13a   : > { %7197 = vmatprep.subr.bf16.mxu1 %v13829_v49  ;;  %838 = vmax.xlane.f32.xlu1 %v837_v59  ;;  %v9883_v18 = vpop.f32.mrb[8].mxu0 }
 0x13b   : > { %6874 = vmatmul.mubr.msk.f32.gmra.mrb[80].mxu0 %vm378_vm0, %v9355_v7  ;;  %14360 = vst [vmem:[#allocation49_spill] sm:$0xff] %v9883_v18  ;;  %v9889_v60 = vpop.permute.xlu1 %7684  ;;  %v9891_v7 = vpop.f32.mrb[9].mxu0 }
 0x13c   : > { %6875 = vmatprep.mubr.msk.f32.mxu0 %vm378_vm0, %v9377_v30  ;;  %7334 = vmatpush3.bf16.xpose.msk.msra.mxu0 %vm8907_vm1, %v7332_v34  ;;  %14361 = vst [vmem:[#allocation50_spill] sm:$0xff] %v9891_v7  ;;  %v373_v34 = vld [vmem:[%s9517_s28 + $0xd8] sm:$0xff]  ;;  %v9908_v59 = vpop.permute.xlu0 %3230 }
 0x13d   : > { %7337 = vmatprep.subr.msk.bf16.mxu0 %vm8907_vm1, %v7335_v20  ;;  %7199 = vmatpush1.bf16.msra.mxu1 %v7198_v39  ;;  %v7338_v20 = vpack.c.bf16 %v7667_v21, %v7666_v26  ;;  %v7201_v13 = vpack.c.bf16 %v373_v34, %v372_v29  ;;  %v7341_v39 = vpack.c.bf16 %v7672_v55, %v7671_v63  ;;  %v374_v21 = vld [vmem:[%s9517_s28 + $0xe0] sm:$0xff]  ;;  %v375_v26 = vld [vmem:[%s9517_s28 + $0xe8] sm:$0xff]  ;;  %v7677_v29 = vunpack.i.h.bf16 %v7675_v22 }
 0x13e   : > { %v9903_v45 = vpop.f32.mrb[10].mxu0  ;;  %7200 = vmatprep.subr.bf16.mxu1 %v13829_v49  ;;  %v7803_v55 = vpack.i.bf16 %v9781_v25, %v9778_v5  ;;  %v14364_v25 = vmov 0.0|0.0  }
 0x13f   : > { %6876 = vmatmul.mubr.msk.f32.gmra.mrb[82].mxu0 %vm378_vm0, %v9377_v30  ;;  %14362 = vst [vmem:[#allocation51_spill] sm:$0xff] %v9903_v45  ;;  %v9910_v30 = vpop.f32.mrb[11].mxu0  ;;  %v9916_v35 = vpop.permute.xlu1 %3202 }
 0x140   : > { %6877 = vmatprep.mubr.msk.f32.mxu0 %vm378_vm0, %v9367_v23  ;;  %14363 = vst [vmem:[#allocation52_spill] sm:$0xff] %v9910_v30  ;;  %v7690_v63 = vpop.permute.xlu0 %7689 }
 0x141   : > { %7202 = vmatpush1.bf16.msra.mxu1 %v7201_v13  ;;  %v7204_v13 = vpack.c.bf16 %v375_v26, %v374_v21  ;;  %v377_v21 = vld [vmem:[%s9517_s28 + $0xf8] sm:$0xff] }
 0x142   : > { %v9920_v46 = vpop.f32.mrb[12].mxu0  ;;  %7203 = vmatprep.subr.bf16.mxu1 %v13829_v49 }
 0x143   : > { %6878 = vmatmul.mubr.msk.f32.gmra.mrb[84].mxu0 %vm378_vm0, %v9367_v23  ;;  %v7676_v23 = vunpack.i.l.bf16 %v7675_v22  ;;  %v9927_v34 = vpop.f32.mrb[13].mxu0  ;;  %v9946_v2 = vpop.permute.xlu1 %3206 }
 0x144   : > { %6879 = vmatprep.mubr.msk.f32.mxu0 %vm378_vm0, %v9389_v43  ;;  %7340 = vmatpush3.bf16.xpose.msk.msra.mxu0 %vm8907_vm1, %v7338_v20  ;;  %v7681_v20 = vunpack.i.l.bf16 %v9682_v27 }
 0x145   : > { %7343 = vmatprep.subr.msk.bf16.mxu0 %vm8907_vm1, %v7341_v39  ;;  %7205 = vmatpush1.bf16.msra.mxu1 %v7204_v13  ;;  %v376_v39 = vld [vmem:[%s9517_s28 + $0xf0] sm:$0xff]  ;;  %v7344_v26 = vpack.c.bf16 %v7677_v29, %v7676_v23  ;;  %v9961_v29 = vpop.permute.xlu0 %3232 }
 0x146   : > { %v9939_v22 = vpop.f32.mrb[14].mxu0  ;;  %7206 = vmatprep.subr.bf16.mxu1 %v13829_v49  ;;  %v7207_v13 = vpack.c.bf16 %v377_v21, %v376_v39  ;;  %v7347_v49 = vpack.c.bf16 %v7682_v1, %v7681_v20  ;;  %v7691_v39 = vunpack.i.l.bf16 %v7690_v63 }
 0x147   : > { %6880 = vmatmul.mubr.msk.f32.gmra.mrb[86].mxu0 %vm378_vm0, %v9389_v43  ;;  %v9948_v43 = vpop.f32.mrb[15].mxu0  ;;  %v9978_v20 = vpop.permute.xlu1 %3228 }
 0x148   : > { %6881 = vmatprep.mubr.msk.f32.mxu0 %vm378_vm0, %v9379_v31 }
 0x149   : > { %4739 = vrot.lane.b32.xlu0 %v8927_v10, %s8854_s25  ;;  %7208 = vmatpush1.bf16.msra.mxu1 %v7207_v13  ;;  %v7687_v10 = vunpack.i.h.bf16 %v9889_v60 }
 0x14a   : > { %v9958_v5 = vpop.f32.mrb[16].mxu0  ;;  %7257 = vmatprep.subr.bf16.mxu1 %v14364_v25 }
 0x14b   : > { %6882 = vmatmul.mubr.msk.f32.gmra.mrb[88].mxu0 %vm378_vm0, %v9379_v31  ;;  %7804 = vrot.lane.b32.xlu1 %v7803_v55, %s8852_s23  ;;  %v7686_v31 = vunpack.i.l.bf16 %v9889_v60  ;;  %v9968_v23 = vpop.f32.mrb[17].mxu0  ;;  %v7692_v55 = vunpack.i.h.bf16 %v7690_v63  ;;  %v9998_v13 = vpop.permute.xlu1 %7699 }
 0x14c   : > { %6883 = vmatprep.mubr.msk.f32.mxu0 %vm378_vm0, %v9401_v52  ;;  %7346 = vmatpush3.bf16.xpose.msk.msra.mxu0 %vm8907_vm1, %v7344_v26  ;;  %v9988_v26 = vpop.permute.xlu0 %7694 }
 0x14d   : > { %7349 = vmatprep.subr.msk.bf16.mxu0 %vm8907_vm1, %v7347_v49  ;;  %4741 = vrot.lane.b32.xlu0 %v8925_v9, %s8854_s25  ;;  %v7350_v21 = vpack.c.bf16 %v7687_v10, %v7686_v31  ;;  %v14374_v9 = vld [vmem:[#allocation35_spill] sm:$0xff]  ;;  %v7696_v12 = vunpack.i.l.bf16 %v9988_v26 }
 0x14e   : > { %v9982_v60 = vpop.f32.mrb[18].mxu0 }
 0x14f   : > { %6884 = vmatmul.mubr.msk.f32.gmra.mrb[90].mxu0 %vm378_vm0, %v9401_v52  ;;  %v9984_v49 = vpop.f32.mrb[19].mxu0  ;;  %v7401_v52 = vpack.c.bf16 %v7692_v55, %v7691_v39 }
 0x150   : > { %6885 = vmatprep.mubr.msk.f32.mxu0 %vm378_vm0, %v9391_v44  ;;  %v10012_v55 = vpop.permute.xlu0 %3234 }
 0x152   : > { %v9994_v63 = vpop.f32.mrb[20].mxu0 }
 0x153   : > { %6886 = vmatmul.mubr.msk.f32.gmra.mrb[92].mxu0 %vm378_vm0, %v9391_v44  ;;  %14365 = vst [vmem:[#allocation53_spill] sm:$0xff] %v9994_v63  ;;  %v10000_v10 = vpop.f32.mrb[21].mxu0 }
 0x154   : > { %6887 = vmatprep.mubr.msk.f32.mxu0 %vm378_vm0, %v9413_v47  ;;  %7352 = vmatpush3.bf16.xpose.msk.msra.mxu0 %vm8907_vm1, %v7350_v21  ;;  %14366 = vst [vmem:[#allocation54_spill] sm:$0xff] %v10000_v10  ;;  %v10030_v1 = vpop.permute.xlu0 %3236  ;;  %v14371_v21 = vld [vmem:[#allocation33_spill] sm:$0xff] }
 0x155   : > { %7403 = vmatprep.subr.msk.bf16.mxu0 %vm8907_vm1, %v7401_v52  ;;  %v10020_v52 = vpop.permute.xlu1 %7704 }
 0x156   : > { %v10010_v44 = vpop.f32.mrb[22].mxu0 }
 0x157   : > { %6888 = vmatmul.mubr.msk.f32.gmra.mrb[94].mxu0 %vm378_vm0, %v9413_v47  ;;  %14367 = vst [vmem:[#allocation55_spill] sm:$0xff] %v10010_v44  ;;  %v10014_v39 = vpop.f32.mrb[23].mxu0 }
 0x158   : > { %6889 = vmatprep.mubr.msk.f32.mxu0 %vm378_vm0, %v9403_v28  ;;  %14368 = vst [vmem:[#allocation56_spill] sm:$0xff] %v10014_v39 }
 0x159   : > { %v10038_v27 = vpop.permute.xlu1 %7709 }
 0x15a   : > { %v10024_v47 = vpop.f32.mrb[24].mxu0 }
 0x15b   : > { %6890 = vmatmul.mubr.msk.f32.gmra.mrb[96].mxu0 %vm378_vm0, %v9403_v28  ;;  %14369 = vst [vmem:[#allocation57_spill] sm:$0xff] %v10024_v47  ;;  %v10026_v31 = vpop.f32.mrb[25].mxu0  ;;  %v14380_v47 = vld [vmem:[#allocation37_spill] sm:$0xff] }
 0x15c   : > { %6891 = vmatprep.mubr.msk.f32.mxu0 %vm378_vm0, %v9425_v62  ;;  %14370 = vst [vmem:[#allocation58_spill] sm:$0xff] %v10026_v31 }
 0x15d   : > { %v10058_v39 = vpop.permute.xlu1 %7714 }
 0x15e   : > { %v10036_v28 = vpop.f32.mrb[26].mxu0 }
 0x15f   : > { %6892 = vmatmul.mubr.msk.f32.gmra.mrb[98].mxu0 %vm378_vm0, %v9425_v62  ;;  %14372 = vst [vmem:[#allocation33_spill] sm:$0xff] %v10036_v28  ;;  %v10040_v51 = vpop.f32.mrb[27].mxu0  ;;  %v10050_v62 = vpop.permute.xlu0 %3238 }
 0x160   : > { %6893 = vmatprep.mubr.msk.f32.mxu0 %vm378_vm0, %v14371_v21  ;;  %14373 = vst [vmem:[#allocation59_spill] sm:$0xff] %v10040_v51 }
 0x162   : > { %v10048_v40 = vpop.f32.mrb[28].mxu0 }
 0x163   : > { %6894 = vmatmul.mubr.msk.f32.gmra.mrb[100].mxu0 %vm378_vm0, %v14371_v21  ;;  %14375 = vst [vmem:[#allocation35_spill] sm:$0xff] %v10048_v40  ;;  %v10052_v31 = vpop.f32.mrb[29].mxu0  ;;  %v10068_v44 = vpop.permute.xlu0 %3240 }
 0x164   : > { %6895 = vmatprep.mubr.msk.f32.mxu0 %vm378_vm0, %v14374_v9  ;;  %14376 = vst [vmem:[#allocation60_spill] sm:$0xff] %v10052_v31  ;;  %v14382_v31 = vmax.f32 %v9883_v18, %v9891_v7  ;;  %v10079_v40 = vpop.permute.xlu1 %7719  ;;  %v14393_v7 = vld [vmem:[#allocation38_spill] sm:$0xff]  ;;  %v7808_v18 = vpack.i.bf16 %v9796_v61, %v9793_v57 }
 0x165   : > { %v14408_v57 = vld [vmem:[#allocation42_spill] sm:$0xff] }
 0x166   : > { %v10062_v21 = vpop.f32.mrb[30].mxu0 }
 0x167   : > { %6896 = vmatmul.mubr.msk.f32.gmra.mrb[102].mxu0 %vm378_vm0, %v14374_v9  ;;  %14378 = vst [vmem:[#allocation34_spill] sm:$0xff] %v10062_v21  ;;  %v10064_v51 = vpop.f32.mrb[31].mxu0  ;;  %v10091_v21 = vpop.permute.xlu0 %3242 }
 0x168   : > { %6897 = vmatprep.mubr.msk.f32.mxu0 %vm378_vm0, %v14377_v41  ;;  %14379 = vst [vmem:[#allocation61_spill] sm:$0xff] %v10064_v51  ;;  %14386 = vst [vmem:[#allocation63_spill] sm:$0xff] %v10091_v21  ;;  %v10100_v28 = vpop.permute.xlu1 %7724 }
 0x16a   : > { %v10074_v9 = vpop.f32.mrb[32].mxu0 }
 0x16b   : > { %6898 = vmatmul.mubr.msk.f32.gmra.mrb[104].mxu0 %vm378_vm0, %v14377_v41  ;;  %14381 = vst [vmem:[#allocation37_spill] sm:$0xff] %v10074_v9  ;;  %v10081_v10 = vpop.f32.mrb[33].mxu0  ;;  %v14384_v41 = vld [vmem:[#allocation36_spill] sm:$0xff] }
 0x16c   : > { %6899 = vmatprep.mubr.msk.f32.mxu0 %vm378_vm0, %v14380_v47  ;;  %841 = vmax.xlane.f32.xlu0 %v14382_v31  ;;  %14383 = vst [vmem:[#allocation62_spill] sm:$0xff] %v10081_v10  ;;  %v14387_v31 = vmax.f32 %v9903_v45, %v9910_v30  ;;  %v10112_v30 = vpop.permute.xlu0 %3244 }
 0x16d   : > { %14392 = vst [vmem:[#allocation66_spill] sm:$0xff] %v10112_v30  ;;  %v14404_v30 = vld [vmem:[#allocation3_spill] sm:$0xff] }
 0x16e   : > { %v10089_v51 = vpop.f32.mrb[34].mxu0 }
 0x16f   : > { %6900 = vmatmul.mubr.msk.f32.gmra.mrb[106].mxu0 %vm378_vm0, %v14380_v47  ;;  %14385 = vst [vmem:[#allocation36_spill] sm:$0xff] %v10089_v51  ;;  %844 = vmax.xlane.f32.xlu1 %v14387_v31  ;;  %v10096_v63 = vpop.f32.mrb[35].mxu0  ;;  %v14389_v47 = vld [vmem:[#allocation39_spill] sm:$0xff]  ;;  %v14396_v31 = vld [vmem:[#allocation41_spill] sm:$0xff] }
 0x170   : > { %6901 = vmatprep.mubr.msk.f32.mxu0 %vm378_vm0, %v14384_v41  ;;  %14388 = vst [vmem:[#allocation64_spill] sm:$0xff] %v10096_v63 }
 0x172   : > { %v10106_v10 = vpop.f32.mrb[36].mxu0 }
 0x173   : > { %6902 = vmatmul.mubr.msk.f32.gmra.mrb[108].mxu0 %vm378_vm0, %v14384_v41  ;;  %14390 = vst [vmem:[#allocation39_spill] sm:$0xff] %v10106_v10  ;;  %v10108_v9 = vpop.f32.mrb[37].mxu0  ;;  %v10120_v41 = vpop.permute.xlu1 %7729 }
 0x174   : > { %6903 = vmatprep.mubr.msk.f32.mxu0 %vm378_vm0, %v14389_v47  ;;  %14391 = vst [vmem:[#allocation65_spill] sm:$0xff] %v10108_v9 }
 0x176   : > { %v10118_v63 = vpop.f32.mrb[38].mxu0 }
 0x177   : > { %6904 = vmatmul.mubr.msk.f32.gmra.mrb[110].mxu0 %vm378_vm0, %v14389_v47  ;;  %14394 = vst [vmem:[#allocation38_spill] sm:$0xff] %v10118_v63  ;;  %v10122_v51 = vpop.f32.mrb[39].mxu0  ;;  %v10132_v47 = vpop.permute.xlu0 %3246 }
 0x178   : > { %6905 = vmatprep.mubr.msk.f32.mxu0 %vm378_vm0, %v14393_v7  ;;  %14395 = vst [vmem:[#allocation67_spill] sm:$0xff] %v10122_v51  ;;  %14398 = vst [vmem:[#allocation68_spill] sm:$0xff] %v10132_v47  ;;  %v10140_v21 = vpop.permute.xlu1 %7734  ;;  %v7702_v47 = vunpack.i.h.bf16 %v9998_v13 }
 0x17a   : > { %v10130_v9 = vpop.f32.mrb[40].mxu0 }
 0x17b   : > { %6906 = vmatmul.mubr.msk.f32.gmra.mrb[112].mxu0 %vm378_vm0, %v14393_v7  ;;  %14397 = vst [vmem:[#allocation41_spill] sm:$0xff] %v10130_v9  ;;  %v10134_v10 = vpop.f32.mrb[41].mxu0  ;;  %v14400_v7 = vld [vmem:[#allocation40_spill] sm:$0xff]  ;;  %v10153_v61 = vpop.permute.xlu0 %3248 }
 0x17c   : > { %6907 = vmatprep.mubr.msk.f32.mxu0 %vm378_vm0, %v14396_v31  ;;  %14399 = vst [vmem:[#allocation69_spill] sm:$0xff] %v10134_v10  ;;  %14403 = vst [vmem:[#allocation71_spill] sm:$0xff] %v10153_v61  ;;  %v10163_v9 = vpop.permute.xlu1 %7739 }
 0x17e   : > { %v10146_v45 = vpop.f32.mrb[42].mxu0 }
 0x17f   : > { %6908 = vmatmul.mubr.msk.f32.gmra.mrb[114].mxu0 %vm378_vm0, %v14396_v31  ;;  %14401 = vst [vmem:[#allocation40_spill] sm:$0xff] %v10146_v45  ;;  %v10148_v51 = vpop.f32.mrb[43].mxu0  ;;  %v14405_v31 = vld [vmem:[#allocation43_spill] sm:$0xff]  ;;  %v14416_v45 = vld [vmem:[#allocation44_spill] sm:$0xff] }
 0x180   : > { %6909 = vmatprep.mubr.msk.f32.mxu0 %vm378_vm0, %v14400_v7  ;;  %14402 = vst [vmem:[#allocation70_spill] sm:$0xff] %v10148_v51  ;;  %7809 = vrot.lane.b32.xlu1 %v7808_v18, %s8852_s23  ;;  %v10181_v61 = vpop.permute.xlu1 %7744  ;;  %v14412_v18 = vld [vmem:[#allocation45_spill] sm:$0xff] }
 0x182   : > { %4743 = vrot.lane.b32.xlu0 %v14404_v30, %s8854_s25  ;;  %v10161_v10 = vpop.f32.mrb[44].mxu0 }
 0x183   : > { %6910 = vmatmul.mubr.msk.f32.gmra.mrb[116].mxu0 %vm378_vm0, %v14400_v7  ;;  %14406 = vst [vmem:[#allocation3_spill] sm:$0xff] %v10161_v10  ;;  %v10165_v63 = vpop.f32.mrb[45].mxu0  ;;  %v10175_v7 = vpop.permute.xlu0 %3250  ;;  %v14419_v10 = vld [vmem:[#allocation46_spill] sm:$0xff] }
 0x184   : > { %6911 = vmatprep.mubr.msk.f32.mxu0 %vm378_vm0, %v14405_v31  ;;  %14407 = vst [vmem:[#allocation43_spill] sm:$0xff] %v10165_v63  ;;  %14410 = vst [vmem:[#allocation72_spill] sm:$0xff] %v10175_v7 }
 0x186   : > { %v10173_v30 = vpop.f32.mrb[46].mxu0 }
 0x187   : > { %6912 = vmatmul.mubr.msk.f32.gmra.mrb[118].mxu0 %vm378_vm0, %v14405_v31  ;;  %14409 = vst [vmem:[#allocation42_spill] sm:$0xff] %v10173_v30  ;;  %v10177_v51 = vpop.f32.mrb[47].mxu0  ;;  %v10193_v7 = vpop.permute.xlu0 %3252 }
 0x188   : > { %6913 = vmatprep.mubr.msk.f32.mxu0 %vm378_vm0, %v14408_v57  ;;  %14411 = vst [vmem:[#allocation73_spill] sm:$0xff] %v10177_v51  ;;  %14415 = vst [vmem:[#allocation75_spill] sm:$0xff] %v10193_v7  ;;  %v7697_v7 = vunpack.i.h.bf16 %v9988_v26 }
 0x18a   : > { %v10187_v31 = vpop.f32.mrb[48].mxu0  ;;  %v7404_v26 = vpack.c.bf16 %v7697_v7, %v7696_v12  ;;  %v7706_v7 = vunpack.i.l.bf16 %v10020_v52 }
 0x18b   : > { %6914 = vmatmul.mubr.msk.f32.gmra.mrb[120].mxu0 %vm378_vm0, %v14408_v57  ;;  %14413 = vst [vmem:[#allocation45_spill] sm:$0xff] %v10187_v31  ;;  %v10189_v63 = vpop.f32.mrb[49].mxu0  ;;  %v10201_v57 = vpop.permute.xlu1 %7749 }
 0x18c   : > { %6915 = vmatprep.mubr.msk.f32.mxu0 %vm378_vm0, %v14412_v18  ;;  %14414 = vst [vmem:[#allocation74_spill] sm:$0xff] %v10189_v63 }
 0x18e   : > { %v10199_v51 = vpop.f32.mrb[50].mxu0 }
 0x18f   : > { %6916 = vmatmul.mubr.msk.f32.gmra.mrb[122].mxu0 %vm378_vm0, %v14412_v18  ;;  %14417 = vst [vmem:[#allocation44_spill] sm:$0xff] %v10199_v51  ;;  %v10203_v30 = vpop.f32.mrb[51].mxu0  ;;  %v10213_v18 = vpop.permute.xlu0 %3254 }
 0x190   : > { %6917 = vmatprep.mubr.msk.f32.mxu0 %vm378_vm0, %v14416_v45  ;;  %14418 = vst [vmem:[#allocation76_spill] sm:$0xff] %v10203_v30  ;;  %14421 = vst [vmem:[#allocation77_spill] sm:$0xff] %v10213_v18  ;;  %v10223_v30 = vpop.permute.xlu1 %3256 }
 0x192   : > { %v10211_v63 = vpop.f32.mrb[52].mxu0 }
 0x193   : > { %6918 = vmatmul.mubr.msk.f32.gmra.mrb[124].mxu0 %vm378_vm0, %v14416_v45  ;;  %14420 = vst [vmem:[#allocation46_spill] sm:$0xff] %v10211_v63  ;;  %v10215_v31 = vpop.f32.mrb[53].mxu0  ;;  %v7701_v45 = vunpack.i.l.bf16 %v9998_v13  ;;  %v10235_v63 = vpop.permute.xlu0 %7754 }
 0x194   : > { %6919 = vmatprep.mubr.msk.f32.mxu0 %vm378_vm0, %v14419_v10  ;;  %14422 = vst [vmem:[#allocation78_spill] sm:$0xff] %v10215_v31 }
 0x195   : > { %v7407_v31 = vpack.c.bf16 %v7702_v47, %v7701_v45  ;;  %v7707_v47 = vunpack.i.h.bf16 %v10020_v52  ;;  %v7712_v45 = vunpack.i.h.bf16 %v10038_v27 }
 0x196   : > { %v10229_v51 = vpop.f32.mrb[54].mxu0 }
 0x197   : > { %6920 = vmatmul.mubr.msk.f32.gmra.mrb[126].mxu0 %vm378_vm0, %v14419_v10  ;;  %14423 = vst [vmem:[#allocation79_spill] sm:$0xff] %v10229_v51  ;;  %v10231_v18 = vpop.f32.mrb[55].mxu0  ;;  %v10245_v10 = vpop.permute.xlu1 %7764  ;;  %v7410_v52 = vpack.c.bf16 %v7707_v47, %v7706_v7  ;;  %v7717_v7 = vunpack.i.h.bf16 %v10058_v39 }
 0x198   : > { %6953 = vmatprep.mubr.msk.f32.mxu0 %vm378_vm0, %v9688_v4  ;;  %14424 = vst [vmem:[#allocation80_spill] sm:$0xff] %v10231_v18  ;;  %v10263_v11 = vpop.permute.xlu0 %7759 }
 0x19a   : > { %v10243_v13 = vpop.f32.mrb[56].mxu0 }
 0x19b   : > { %6954 = vmatmul.mubr.msk.f32.vlgmr.msra.gmra.mrb[128].mxu0 %vm378_vm0, %v9688_v4  ;;  %14425 = vst [vmem:[#allocation81_spill] sm:$0xff] %v10243_v13  ;;  %v10249_v12 = vpop.f32.mrb[57].mxu0  ;;  %v14429_v4 = vmax.f32 %v9920_v46, %v9927_v34  ;;  %v10272_v13 = vpop.permute.xlu1 %7769 }
 0x19c   : > { %7406 = vmatpush3.bf16.xpose.msk.msra.mxu0 %vm8907_vm1, %v7404_v26  ;;  %6955 = vmatprep.mubr.msk.f32.mxu0 %vm378_vm0, %v9916_v35  ;;  %14426 = vst [vmem:[#allocation82_spill] sm:$0xff] %v10249_v12  ;;  %v7711_v26 = vunpack.i.l.bf16 %v10038_v27  ;;  %v10295_v27 = vpop.permute.xlu0 %3258 }
 0x19d   : > { %7409 = vmatprep.subr.msk.bf16.mxu0 %vm8907_vm1, %v7407_v31 }
 0x19e   : > { %v10261_v31 = vpop.f32.mrb[58].mxu0  ;;  %v7413_v12 = vpack.c.bf16 %v7712_v45, %v7711_v26  ;;  %v7722_v26 = vunpack.i.h.bf16 %v10079_v40 }
 0x19f   : > { %6956 = vmatmul.mubr.msk.f32.gmra.mrb[130].mxu0 %vm378_vm0, %v9916_v35  ;;  %14427 = vst [vmem:[#allocation83_spill] sm:$0xff] %v10261_v31  ;;  %v10265_v18 = vpop.f32.mrb[59].mxu0 }
 0x1a0   : > { %6957 = vmatprep.mubr.msk.f32.mxu0 %vm378_vm0, %v9698_v6  ;;  %14428 = vst [vmem:[#allocation84_spill] sm:$0xff] %v10265_v18 }
 0x1a1   : > { %847 = vmax.xlane.f32.xlu0 %v14429_v4  ;;  %v7716_v4 = vunpack.i.l.bf16 %v10058_v39 }
 0x1a2   : > { %v10280_v35 = vpop.f32.mrb[60].mxu0 }
 0x1a3   : > { %6958 = vmatmul.mubr.msk.f32.gmra.mrb[132].mxu0 %vm378_vm0, %v9698_v6  ;;  %v10284_v47 = vpop.f32.mrb[61].mxu0  ;;  %v14431_v6 = vmax.f32 %v9939_v22, %v9948_v43  ;;  %v7416_v18 = vpack.c.bf16 %v7717_v7, %v7716_v4  ;;  %v7726_v7 = vunpack.i.l.bf16 %v10100_v28  ;;  %v7732_v4 = vunpack.i.h.bf16 %v10120_v41 }
 0x1a4   : > { %7412 = vmatpush3.bf16.xpose.msk.msra.mxu0 %vm8907_vm1, %v7410_v52  ;;  %6959 = vmatprep.mubr.msk.f32.mxu0 %vm378_vm0, %v9946_v2  ;;  %14430 = vst [vmem:[#allocation85_spill] sm:$0xff] %v10284_v47  ;;  %v7721_v52 = vunpack.i.l.bf16 %v10079_v40  ;;  %v10315_v40 = vpop.permute.xlu0 %7774 }
 0x1a5   : > { %7415 = vmatprep.subr.msk.bf16.mxu0 %vm8907_vm1, %v7413_v12  ;;  %850 = vmax.xlane.f32.xlu1 %v14431_v6  ;;  %v10303_v12 = vpop.permute.xlu1 %3260 }
 0x1a6   : > { %v10301_v39 = vpop.f32.mrb[62].mxu0  ;;  %v7419_v47 = vpack.c.bf16 %v7722_v26, %v7721_v52  ;;  %v7731_v26 = vunpack.i.l.bf16 %v10120_v41  ;;  %v7737_v41 = vunpack.i.h.bf16 %v10140_v21 }
 0x1a7   : > { %6960 = vmatmul.mubr.msk.f32.gmra.mrb[134].mxu0 %vm378_vm0, %v9946_v2  ;;  %14432 = vst [vmem:[#allocation86_spill] sm:$0xff] %v10301_v39  ;;  %v10305_v6 = vpop.f32.mrb[63].mxu0  ;;  %v7727_v2 = vunpack.i.h.bf16 %v10100_v28  ;;  %v7813_v28 = vpack.i.bf16 %v9822_v54, %v9819_v8  ;;  %v14434_v8 = vld [vmem:[#allocation5_spill] sm:$0xff] }
 0x1a8   : > { %6961 = vmatprep.mubr.msk.f32.mxu0 %vm378_vm0, %v9702_v50  ;;  %14433 = vst [vmem:[#allocation87_spill] sm:$0xff] %v10305_v6  ;;  %v7425_v52 = vpack.c.bf16 %v7732_v4, %v7731_v26  ;;  %v10329_v45 = vpop.permute.xlu0 %7779  ;;  %v7746_v26 = vunpack.i.l.bf16 %v10181_v61 }
 0x1ab   : > { %6962 = vmatmul.mubr.msk.f32.gmra.mrb[136].mxu0 %vm378_vm0, %v9702_v50  ;;  %v10323_v50 = vpop.permute.xlu1 %7784 }
 0x1ac   : > { %7418 = vmatpush3.bf16.xpose.msk.msra.mxu0 %vm8907_vm1, %v7416_v18  ;;  %6963 = vmatprep.mubr.msk.f32.mxu0 %vm378_vm0, %v9715_v42  ;;  %v7422_v18 = vpack.c.bf16 %v7727_v2, %v7726_v7  ;;  %v7741_v2 = vunpack.i.l.bf16 %v10163_v9  ;;  %v10354_v54 = vpop.permute.xlu0 %3262 }
 0x1ad   : > { %7421 = vmatprep.subr.msk.bf16.mxu0 %vm8907_vm1, %v7419_v47  ;;  %v7736_v47 = vunpack.i.l.bf16 %v10140_v21 }
 0x1af   : > { %6964 = vmatmul.mubr.msk.f32.gmra.mrb[138].mxu0 %vm378_vm0, %v9715_v42  ;;  %v10339_v42 = vpop.permute.xlu1 %7789  ;;  %v7428_v7 = vpack.c.bf16 %v7737_v41, %v7736_v47 }
 0x1b0   : > { %6965 = vmatprep.mubr.msk.f32.mxu0 %vm378_vm0, %v9724_v3 }
 0x1b3   : > { %6966 = vmatmul.mubr.msk.f32.gmra.mrb[140].mxu0 %vm378_vm0, %v9724_v3  ;;  %v7742_v3 = vunpack.i.h.bf16 %v10163_v9  ;;  %v10356_v21 = vpop.permute.xlu1 %7794  ;;  %v7747_v9 = vunpack.i.h.bf16 %v10181_v61 }
 0x1b4   : > { %7424 = vmatpush3.bf16.xpose.msk.msra.mxu0 %vm8907_vm1, %v7422_v18  ;;  %6967 = vmatprep.mubr.msk.f32.mxu0 %vm378_vm0, %v9733_v36 }
 0x1b5   : > { %7427 = vmatprep.subr.msk.bf16.mxu0 %vm8907_vm1, %v7425_v52  ;;  %v7431_v4 = vpack.c.bf16 %v7742_v3, %v7741_v2  ;;  %v7434_v61 = vpack.c.bf16 %v7747_v9, %v7746_v26  ;;  %v7776_v9 = vunpack.i.l.bf16 %v10315_v40 }
 0x1b6   : > { %7814 = vrot.lane.b32.xlu1 %v7813_v28, %s8852_s23  ;;  %v7756_v28 = vunpack.i.l.bf16 %v10235_v63 }
 0x1b7   : > { %6968 = vmatmul.mubr.msk.f32.gmra.mrb[142].mxu0 %vm378_vm0, %v9733_v36  ;;  %4745 = vrot.lane.b32.xlu0 %v14434_v8, %s8854_s25  ;;  %v10376_v3 = vpop.permute.xlu1 %7799 }
 0x1b8   : > { %6969 = vmatprep.mubr.msk.f32.mxu0 %vm378_vm0, %v9747_v38 }
 0x1bb   : > { %6970 = vmatmul.mubr.msk.f32.gmra.mrb[144].mxu0 %vm378_vm0, %v9747_v38  ;;  %v7757_v38 = vunpack.i.h.bf16 %v10235_v63 }
 0x1bc   : > { %7430 = vmatpush3.bf16.xpose.msk.msra.mxu0 %vm8907_vm1, %v7428_v7  ;;  %6971 = vmatprep.mubr.msk.f32.mxu0 %vm378_vm0, %v9760_v32  ;;  %v830_v36 = vpop.xlane.xlu0 %829  ;;  %v7762_v7 = vunpack.i.h.bf16 %v10263_v11 }
 0x1bd   : > { %7433 = vmatprep.subr.msk.bf16.mxu0 %vm8907_vm1, %v7431_v4  ;;  %v924_v18 = vsub.f32 %v9799_v33, %v830_v36  ;;  %v925_v52 = vsub.f32 %v9807_v56, %v830_v36  ;;  %v7437_v8 = vpack.c.bf16 %v7757_v38, %v7756_v28  ;;  %v7777_v36 = vunpack.i.h.bf16 %v10315_v40 }
 0x1bf   : > { %6972 = vmatmul.mubr.msk.f32.gmra.mrb[146].mxu0 %vm378_vm0, %v9760_v32  ;;  %v988_v41 = vmul.f32 1.442695, %v924_v18  ;;  %v990_v47 = vmul.f32 1.442695, %v925_v52  ;;  %v7751_v52 = vunpack.i.l.bf16 %v10201_v57  ;;  %v7443_v28 = vpack.c.bf16 %v7777_v36, %v7776_v9 }
 0x1c0   : > { %6973 = vmatprep.mubr.msk.f32.mxu0 %vm378_vm0, %v9788_v48  ;;  %v833_v2 = vpop.xlane.xlu0 %832  ;;  %v7792_v9 = vunpack.i.h.bf16 %v10339_v42 }
 0x1c1   : > { %8008 = vpow2.f32 %v988_v41  ;;  %v926_v33 = vsub.f32 %v9826_v14, %v833_v2  ;;  %v927_v56 = vsub.f32 %v9832_v16, %v833_v2  ;;  %v7761_v16 = vunpack.i.l.bf16 %v10263_v11 }
 0x1c2   : > { %8010 = vpow2.f32 %v990_v47  ;;  %v7752_v11 = vunpack.i.h.bf16 %v10201_v57 }
 0x1c3   : > { %6974 = vmatmul.mubr.msk.f32.gmra.mrb[148].mxu0 %vm378_vm0, %v9788_v48  ;;  %v992_v32 = vmul.f32 1.442695, %v926_v33  ;;  %v994_v63 = vmul.f32 1.442695, %v927_v56  ;;  %v836_v14 = vpop.xlane.xlu1 %835  ;;  %v7440_v38 = vpack.c.bf16 %v7762_v7, %v7761_v16 }
 0x1c4   : > { %7436 = vmatpush3.bf16.xpose.msk.msra.mxu0 %vm8907_vm1, %v7434_v61  ;;  %6975 = vmatprep.mubr.msk.f32.mxu0 %vm378_vm0, %v9813_v15  ;;  %v928_v4 = vsub.f32 %v9845_v17, %v836_v14  ;;  %v929_v48 = vsub.f32 %v9853_v24, %v836_v14  ;;  %v7258_v2 = vpack.c.bf16 %v7752_v11, %v7751_v52  ;;  %v7781_v61 = vunpack.i.l.bf16 %v10329_v45 }
 0x1c5   : > { %7439 = vmatprep.subr.msk.bf16.mxu0 %vm8907_vm1, %v7437_v8  ;;  %8012 = vpow2.f32 %v992_v32  ;;  %v14438_v11 = vmax.f32 %v9982_v60, %v9984_v49  ;;  %v7796_v52 = vunpack.i.l.bf16 %v10356_v21 }
 0x1c6   : > { %8014 = vpow2.f32 %v994_v63  ;;  %v996_v26 = vmul.f32 1.442695, %v928_v4  ;;  %v998_v18 = vmul.f32 1.442695, %v929_v48  ;;  %v7771_v63 = vunpack.i.l.bf16 %v10272_v13 }
 0x1c7   : > { %6976 = vmatmul.mubr.msk.f32.gmra.mrb[150].mxu0 %vm378_vm0, %v9813_v15  ;;  %v839_v17 = vpop.xlane.xlu1 %838  ;;  %v7786_v4 = vunpack.i.l.bf16 %v10323_v50 }
 0x1c8   : > { %6977 = vmatprep.mubr.msk.f32.mxu0 %vm378_vm0, %v9851_v58  ;;  %8016 = vpow2.f32 %v996_v26  ;;  %v930_v24 = vsub.f32 %v9868_v37, %v839_v17  ;;  %v931_v40 = vsub.f32 %v9872_v19, %v839_v17  ;;  %v7767_v37 = vunpack.i.h.bf16 %v10245_v10 }
 0x1c9   : > { %8018 = vpow2.f32 %v998_v18  ;;  %v7766_v19 = vunpack.i.l.bf16 %v10245_v10  ;;  %v7791_v26 = vunpack.i.l.bf16 %v10339_v42  ;;  %v7797_v42 = vunpack.i.h.bf16 %v10356_v21 }
 0x1ca   : > { %v1000_v41 = vmul.f32 1.442695, %v930_v24  ;;  %v1002_v47 = vmul.f32 1.442695, %v931_v40  ;;  %v7802_v17 = vunpack.i.h.bf16 %v10376_v3 }
 0x1cb   : > { %6978 = vmatmul.mubr.msk.f32.gmra.mrb[152].mxu0 %vm378_vm0, %v9851_v58  ;;  %v8009_v15 = vpop.eup %8008  ;;  %v7782_v58 = vunpack.i.h.bf16 %v10329_v45  ;;  %v7261_v8 = vpack.c.bf16 %v7767_v37, %v7766_v19  ;;  %v7772_v45 = vunpack.i.h.bf16 %v10272_v13  ;;  %v7787_v13 = vunpack.i.h.bf16 %v10323_v50  ;;  %v7805_v24 = vpop.permute.xlu1 %7804 }
 0x1cc   : > { %7442 = vmatpush3.bf16.xpose.msk.msra.mxu0 %vm8907_vm1, %v7440_v38  ;;  %6979 = vmatprep.mubr.msk.f32.mxu0 %vm378_vm0, %v9876_v53  ;;  %v8011_v57 = vpop.eup %8010  ;;  %8020 = vpow2.f32 %v1000_v41  ;;  %v7801_v38 = vunpack.i.l.bf16 %v10376_v3  ;;  %v7807_v21 = vunpack.i.h.bf16 %v7805_v24  ;;  %v7806_v40 = vunpack.i.l.bf16 %v7805_v24  ;;  %v14439_v3 = vld [vmem:[#allocation47_spill] sm:$0xff] }
 0x1cd   : > { %7445 = vmatprep.subr.msk.bf16.mxu0 %vm8907_vm1, %v7443_v28  ;;  %1276 = vmatprep.mubr.f32.mxu1 %v8011_v57  ;;  %v10414_v33 = vadd.f32 %v8011_v57, %v8009_v15  ;;  %8022 = vpow2.f32 %v1002_v47  ;;  %v7446_v32 = vpack.c.bf16 %v7782_v58, %v7781_v61  ;;  %v7264_v16 = vpack.c.bf16 %v7772_v45, %v7771_v63  ;;  %v14440_v28 = vld [vmem:[#allocation48_spill] sm:$0xff]  ;;  %v14441_v41 = vld [vmem:[#allocation63_spill] sm:$0xff] }
 0x1ce   : > { %1277 = vmatmul.mubr.f32.vlgmr.msra.gmra.mrb[0].mxu1 %v8009_v15  ;;  %v7267_v50 = vpack.c.bf16 %v7787_v13, %v7786_v4  ;;  %v7279_v15 = vpack.c.bf16 %v7807_v21, %v7806_v40  ;;  %v14445_v63 = vld [vmem:[#allocation71_spill] sm:$0xff]  ;;  %v14447_v4 = vld [vmem:[#allocation50_spill] sm:$0xff] }
 0x1cf   : > { %14435 = vst [vmem:[#allocation5_spill] sm:$0xff] %v10414_v33  ;;  %6980 = vmatmul.mubr.msk.f32.gmra.mrb[154].mxu0 %vm378_vm0, %v9876_v53  ;;  %v8013_v56 = vpop.eup %8012  ;;  %7259 = vmatpush1.bf16.msra.mxu1 %v7258_v2  ;;  %v10489_v2 = vpop.permute.xlu0 %4739  ;;  %v14451_v40 = vld [vmem:[#allocation75_spill] sm:$0xff] }
 0x1d0   : > { %6981 = vmatprep.mubr.msk.f32.mxu0 %vm378_vm0, %v9978_v20  ;;  %v8015_v10 = vpop.eup %8014  ;;  %7260 = vmatprep.subr.bf16.mxu1 %v14364_v25  ;;  %v8778_v33 = vld [vmem:[%s9517_s28 + $0xc0] sm:$0xff] }
 0x1d1   : > { %1281 = vmatprep.mubr.f32.mxu1 %v8015_v10  ;;  %v10423_v7 = vadd.f32 %v8015_v10, %v8013_v56 }
 0x1d2   : > { %1282 = vmatmul.mubr.f32.gmra.mrb[2].mxu1 %v8013_v56  ;;  %v8017_v53 = vpop.eup %8016  ;;  %v14444_v56 = vld [vmem:[#allocation68_spill] sm:$0xff] }
 0x1d3   : > { %6982 = vmatmul.mubr.msk.f32.gmra.mrb[156].mxu0 %vm378_vm0, %v9978_v20  ;;  %7262 = vmatpush1.bf16.msra.mxu1 %v7261_v8  ;;  %v8019_v14 = vpop.eup %8018  ;;  %v14437_v20 = vmax.f32 %v9958_v5, %v9968_v23  ;;  %v10507_v10 = vpop.permute.xlu0 %4741 }
 0x1d4   : > { %7448 = vmatpush3.bf16.xpose.msk.msra.mxu0 %vm8907_vm1, %v7446_v32  ;;  %7263 = vmatprep.subr.bf16.mxu1 %v14364_v25  ;;  %v10434_v48 = vadd.f32 %v8019_v14, %v8017_v53 }
 0x1d5   : > { %6983 = vmatprep.mubr.msk.f32.mxu0 %vm378_vm0, %v9908_v59  ;;  %1286 = vmatprep.mubr.f32.mxu1 %v8019_v14 }
 0x1d6   : > { %14436 = vst [vmem:[#allocation88_spill] sm:$0xff] %v10434_v48  ;;  %1287 = vmatmul.mubr.f32.gmra.mrb[4].mxu1 %v8017_v53  ;;  %853 = vmax.xlane.f32.xlu0 %v14437_v20  ;;  %v8021_v0 = vpop.eup %8020 }
 0x1d7   : > { %7265 = vmatpush1.bf16.msra.mxu1 %v7264_v16  ;;  %6984 = vmatmul.mubr.msk.f32.gmra.mrb[158].mxu0 %vm378_vm0, %v9908_v59  ;;  %v8023_v36 = vpop.eup %8022  ;;  %v7270_v59 = vpack.c.bf16 %v7792_v9, %v7791_v26  ;;  %v14446_v16 = vld [vmem:[#allocation49_spill] sm:$0xff]  ;;  %v14448_v26 = vld [vmem:[#allocation72_spill] sm:$0xff] }
 0x1d8   : > { %7266 = vmatprep.subr.bf16.mxu1 %v14364_v25  ;;  %6985 = vmatprep.mubr.msk.f32.mxu0 %vm378_vm0, %v9961_v29  ;;  %v10446_v18 = vadd.f32 %v8023_v36, %v8021_v0 }
 0x1d9   : > { %1291 = vmatprep.mubr.f32.mxu1 %v8023_v36 }
 0x1da   : > { %1292 = vmatmul.mubr.f32.gmra.mrb[6].mxu1 %v8021_v0  ;;  %856 = vmax.xlane.f32.xlu1 %v14438_v11 }
 0x1db   : > { %7268 = vmatpush1.bf16.msra.mxu1 %v7267_v50  ;;  %6986 = vmatmul.mubr.msk.f32.gmra.mrb[160].mxu0 %vm378_vm0, %v9961_v29  ;;  %v7273_v29 = vpack.c.bf16 %v7797_v42, %v7796_v52  ;;  %v14450_v52 = vld [vmem:[#allocation52_spill] sm:$0xff] }
 0x1dc   : > { %7269 = vmatprep.subr.bf16.mxu1 %v14364_v25  ;;  %6987 = vmatprep.mubr.msk.f32.mxu0 %vm378_vm0, %v10012_v55 }
 0x1df   : > { %7271 = vmatpush1.bf16.msra.mxu1 %v7270_v59  ;;  %6988 = vmatmul.mubr.msk.f32.gmra.mrb[162].mxu0 %vm378_vm0, %v10012_v55  ;;  %v7276_v55 = vpack.c.bf16 %v7802_v17, %v7801_v38  ;;  %v14449_v59 = vld [vmem:[#allocation51_spill] sm:$0xff] }
 0x1e0   : > { %7272 = vmatprep.subr.bf16.mxu1 %v14364_v25  ;;  %6989 = vmatprep.mubr.msk.f32.mxu0 %vm378_vm0, %v10030_v1 }
 0x1e3   : > { %7274 = vmatpush1.bf16.msra.mxu1 %v7273_v29  ;;  %6990 = vmatmul.mubr.msk.f32.gmra.mrb[164].mxu0 %vm378_vm0, %v10030_v1  ;;  %v7818_v1 = vpack.i.bf16 %v14440_v28, %v14439_v3 }
 0x1e4   : > { %7275 = vmatprep.subr.bf16.mxu1 %v14364_v25  ;;  %6991 = vmatprep.mubr.msk.f32.mxu0 %vm378_vm0, %v10050_v62 }
 0x1e7   : > { %7277 = vmatpush1.bf16.msra.mxu1 %v7276_v55  ;;  %6992 = vmatmul.mubr.msk.f32.gmra.mrb[166].mxu0 %vm378_vm0, %v10050_v62  ;;  %v14442_v62 = vld [vmem:[#allocation4_spill] sm:$0xff] }
 0x1e8   : > { %7278 = vmatprep.subr.bf16.mxu1 %v14364_v25  ;;  %6993 = vmatprep.mubr.msk.f32.mxu0 %vm378_vm0, %v10068_v44 }
 0x1eb   : > { %7280 = vmatpush1.bf16.msra.mxu1 %v7279_v15  ;;  %6994 = vmatmul.mubr.msk.f32.gmra.mrb[168].mxu0 %vm378_vm0, %v10068_v44  ;;  %v14443_v44 = vld [vmem:[#allocation66_spill] sm:$0xff] }
 0x1ec   : > { %7819 = vrot.lane.b32.xlu1 %v7818_v1, %s8852_s23  ;;  %6995 = vmatprep.mubr.msk.f32.mxu0 %vm378_vm0, %v14441_v41 }
 0x1ed   : > { %4747 = vrot.lane.b32.xlu0 %v14442_v62, %s8854_s25  ;;  %7281 = vmatprep.subr.bf16.mxu1 %v14364_v25 }
 0x1ee   : > { %v10484_v47 = vpop.f32.mrb[64].mxu0 }
 0x1ef   : > { %v10487_v57 = vpop.f32.mrb[65].mxu0  ;;  %6996 = vmatmul.mubr.msk.f32.gmra.mrb[170].mxu0 %vm378_vm0, %v14441_v41 }
 0x1f0   : > { %6997 = vmatprep.mubr.msk.f32.mxu0 %vm378_vm0, %v14443_v44 }
 0x1f2   : > { %v10497_v19 = vpop.f32.mrb[66].mxu0 }
 0x1f3   : > { %v10499_v58 = vpop.f32.mrb[67].mxu0  ;;  %6998 = vmatmul.mubr.msk.f32.gmra.mrb[172].mxu0 %vm378_vm0, %v14443_v44  ;;  %v14452_v44 = vld [vmem:[#allocation77_spill] sm:$0xff] }
 0x1f4   : > { %6999 = vmatprep.mubr.msk.f32.mxu0 %vm378_vm0, %v14444_v56 }
 0x1f6   : > { %v10509_v8 = vpop.f32.mrb[68].mxu0 }
 0x1f7   : > { %v10511_v32 = vpop.f32.mrb[69].mxu0  ;;  %7000 = vmatmul.mubr.msk.f32.gmra.mrb[174].mxu0 %vm378_vm0, %v14444_v56 }
 0x1f8   : > { %7001 = vmatprep.mubr.msk.f32.mxu0 %vm378_vm0, %v14445_v63 }
 0x1f9   : > { %v842_v53 = vpop.xlane.xlu0 %841 }
 0x1fa   : > { %v10519_v14 = vpop.f32.mrb[70].mxu0  ;;  %v932_v13 = vsub.f32 %v14446_v16, %v842_v53  ;;  %v933_v20 = vsub.f32 %v14447_v4, %v842_v53 }
 0x1fb   : > { %v10523_v0 = vpop.f32.mrb[71].mxu0  ;;  %7002 = vmatmul.mubr.msk.f32.gmra.mrb[176].mxu0 %vm378_vm0, %v14445_v63 }
 0x1fc   : > { %v1004_v50 = vmul.f32 1.442695, %v932_v13  ;;  %v1006_v9 = vmul.f32 1.442695, %v933_v20  ;;  %7003 = vmatprep.mubr.msk.f32.mxu0 %vm378_vm0, %v14448_v26  ;;  %v845_v11 = vpop.xlane.xlu1 %844 }
 0x1fd   : > { %v934_v42 = vsub.f32 %v14449_v59, %v845_v11  ;;  %v935_v29 = vsub.f32 %v14450_v52, %v845_v11  ;;  %v14456_v59 = vld [vmem:[#allocation53_spill] sm:$0xff] }
 0x1fe   : > { %8024 = vpow2.f32 %v1004_v50  ;;  %v10533_v17 = vpop.f32.mrb[72].mxu0 }
 0x1ff   : > { %8026 = vpow2.f32 %v1006_v9  ;;  %v10535_v38 = vpop.f32.mrb[73].mxu0  ;;  %7004 = vmatmul.mubr.msk.f32.gmra.mrb[178].mxu0 %vm378_vm0, %v14448_v26  ;;  %v1008_v24 = vmul.f32 1.442695, %v934_v42  ;;  %v1010_v55 = vmul.f32 1.442695, %v935_v29  ;;  %v14457_v42 = vld [vmem:[#allocation54_spill] sm:$0xff] }
 0x200   : > { %7005 = vmatprep.mubr.msk.f32.mxu0 %vm378_vm0, %v14451_v40  ;;  %v7810_v28 = vpop.permute.xlu1 %7809  ;;  %v14458_v52 = vmax.f32 %v14456_v59, %v14457_v42 }
 0x201   : > { %8028 = vpow2.f32 %v1008_v24  ;;  %v7812_v15 = vunpack.i.h.bf16 %v7810_v28  ;;  %v7811_v41 = vunpack.i.l.bf16 %v7810_v28  ;;  %v14461_v28 = vld [vmem:[#allocation55_spill] sm:$0xff] }
 0x202   : > { %v10543_v3 = vpop.f32.mrb[74].mxu0  ;;  %8030 = vpow2.f32 %v1010_v55 }
 0x203   : > { %v10545_v1 = vpop.f32.mrb[75].mxu0  ;;  %7006 = vmatmul.mubr.msk.f32.gmra.mrb[180].mxu0 %vm378_vm0, %v14451_v40  ;;  %v7282_v56 = vpack.c.bf16 %v7812_v15, %v7811_v41  ;;  %v14462_v15 = vld [vmem:[#allocation56_spill] sm:$0xff] }
 0x204   : > { %7007 = vmatprep.mubr.msk.f32.mxu0 %vm378_vm0, %v14452_v44  ;;  %v14463_v41 = vmax.f32 %v14461_v28, %v14462_v15 }
 0x205   : > { %7283 = vmatpush1.bf16.msra.mxu1 %v7282_v56 }
 0x206   : > { %v10553_v63 = vpop.f32.mrb[76].mxu0  ;;  %7284 = vmatprep.subr.bf16.mxu1 %v14364_v25 }
 0x207   : > { %14453 = vst [vmem:[#allocation47_spill] sm:$0xff] %v10553_v63  ;;  %v10555_v53 = vpop.f32.mrb[77].mxu0  ;;  %7008 = vmatmul.mubr.msk.f32.gmra.mrb[182].mxu0 %vm378_vm0, %v14452_v44 }
 0x208   : > { %14454 = vst [vmem:[#allocation48_spill] sm:$0xff] %v10555_v53  ;;  %v8025_v13 = vpop.eup %8024  ;;  %7009 = vmatprep.mubr.msk.f32.mxu0 %vm378_vm0, %v10223_v30 }
 0x209   : > { %v8027_v4 = vpop.eup %8026 }
 0x20a   : > { %v10564_v20 = vpop.f32.mrb[78].mxu0  ;;  %1296 = vmatprep.mubr.f32.mxu1 %v8027_v4  ;;  %v10568_v9 = vadd.f32 %v8027_v4, %v8025_v13 }
 0x20b   : > { %v10566_v50 = vpop.f32.mrb[79].mxu0  ;;  %1297 = vmatmul.mubr.f32.gmra.mrb[8].mxu1 %v8025_v13  ;;  %7010 = vmatmul.mubr.msk.f32.gmra.mrb[184].mxu0 %vm378_vm0, %v10223_v30  ;;  %v8029_v11 = vpop.eup %8028 }
 0x20c   : > { %14455 = vst [vmem:[#allocation63_spill] sm:$0xff] %v10568_v9  ;;  %859 = vmax.xlane.f32.xlu0 %v14458_v52  ;;  %7011 = vmatprep.mubr.msk.f32.mxu0 %vm378_vm0, %v10295_v27  ;;  %v8031_v29 = vpop.eup %8030  ;;  %v4744_v13 = vpop.permute.xlu0 %4743 }
 0x20d   : > { %1301 = vmatprep.mubr.f32.mxu1 %v8031_v29  ;;  %v10583_v40 = vadd.f32 %v8031_v29, %v8029_v11 }
 0x20e   : > { %v10579_v24 = vpop.f32.mrb[80].mxu0 }
 0x20f   : > { %14459 = vst [vmem:[#allocation4_spill] sm:$0xff] %v10579_v24  ;;  %v10581_v55 = vpop.f32.mrb[81].mxu0  ;;  %1302 = vmatmul.mubr.f32.gmra.mrb[10].mxu1 %v8029_v11  ;;  %7012 = vmatmul.mubr.msk.f32.gmra.mrb[186].mxu0 %vm378_vm0, %v10295_v27  ;;  %v8776_v11 = vld [vmem:[%s9517_s28 + $0xb0] sm:$0xff] }
 0x210   : > { %14460 = vst [vmem:[#allocation66_spill] sm:$0xff] %v10581_v55  ;;  %862 = vmax.xlane.f32.xlu1 %v14463_v41  ;;  %7013 = vmatprep.mubr.msk.f32.mxu0 %vm378_vm0, %v10303_v12 }
 0x212   : > { %v10594_v44 = vpop.f32.mrb[82].mxu0 }
 0x213   : > { %v10596_v56 = vpop.f32.mrb[83].mxu0  ;;  %7014 = vmatmul.mubr.msk.f32.gmra.mrb[188].mxu0 %vm378_vm0, %v10303_v12  ;;  %v14468_v12 = vld [vmem:[#allocation7_spill] sm:$0xff] }
 0x214   : > { %7015 = vmatprep.mubr.msk.f32.mxu0 %vm378_vm0, %v10354_v54 }
 0x216   : > { %v10604_v27 = vpop.f32.mrb[84].mxu0 }
 0x217   : > { %14464 = vst [vmem:[#allocation68_spill] sm:$0xff] %v10604_v27  ;;  %v10606_v4 = vpop.f32.mrb[85].mxu0  ;;  %7016 = vmatmul.mubr.msk.f32.gmra.mrb[190].mxu0 %vm378_vm0, %v10354_v54  ;;  %v8777_v54 = vld [vmem:[%s9517_s28 + $0xb8] sm:$0xff] }
 0x218   : > { %14465 = vst [vmem:[#allocation71_spill] sm:$0xff] %v10606_v4  ;;  %7049 = vmatprep.mubr.msk.f32.mxu0 %vm378_vm0, %v10489_v2  ;;  %v7823_v30 = vpack.i.bf16 %v8777_v54, %v8776_v11 }
 0x21a   : > { %v10614_v52 = vpop.f32.mrb[86].mxu0 }
 0x21b   : > { %v10616_v29 = vpop.f32.mrb[87].mxu0  ;;  %7050 = vmatmul.mubr.msk.f32.vlgmr.msra.gmra.mrb[192].mxu0 %vm378_vm0, %v10489_v2 }
 0x21c   : > { %7051 = vmatprep.mubr.msk.f32.mxu0 %vm378_vm0, %v10507_v10 }
 0x21e   : > { %v10624_v41 = vpop.f32.mrb[88].mxu0 }
 0x21f   : > { %14466 = vst [vmem:[#allocation49_spill] sm:$0xff] %v10624_v41  ;;  %v10628_v16 = vpop.f32.mrb[89].mxu0  ;;  %7052 = vmatmul.mubr.msk.f32.gmra.mrb[194].mxu0 %vm378_vm0, %v10507_v10 }
 0x220   : > { %14467 = vst [vmem:[#allocation50_spill] sm:$0xff] %v10628_v16  ;;  %7053 = vmatprep.mubr.msk.f32.mxu0 %vm378_vm0, %v4744_v13 }
 0x221   : > { %7824 = vrot.lane.b32.xlu1 %v7823_v30, %s8852_s23 }
 0x222   : > { %v10636_v2 = vpop.f32.mrb[90].mxu0  ;;  %4749 = vrot.lane.b32.xlu0 %v14468_v12, %s8854_s25 }
 0x223   : > { %v10640_v21 = vpop.f32.mrb[91].mxu0  ;;  %7054 = vmatmul.mubr.msk.f32.gmra.mrb[196].mxu0 %vm378_vm0, %v4744_v13 }
 0x226   : > { %v10645_v54 = vpop.f32.mrb[92].mxu0 }
 0x227   : > { %14469 = vst [vmem:[#allocation72_spill] sm:$0xff] %v10645_v54  ;;  %v10647_v26 = vpop.f32.mrb[93].mxu0 }
 0x228   : > { %14470 = vst [vmem:[#allocation51_spill] sm:$0xff] %v10647_v26 }
 0x22a   : > { %v10651_v30 = vpop.f32.mrb[94].mxu0 }
 0x22b   : > { %v10653_v62 = vpop.f32.mrb[95].mxu0 }
 0x22c   : > { %14471 = vst [vmem:[#allocation52_spill] sm:$0xff] %v10653_v62 }
 0x22e   : > { %v10657_v36 = vpop.f32.mrb[96].mxu0  ;;  %v848_v45 = vpop.xlane.xlu0 %847 }
 0x22f   : > { %14472 = vst [vmem:[#allocation75_spill] sm:$0xff] %v10657_v36  ;;  %v10659_v11 = vpop.f32.mrb[97].mxu0  ;;  %v936_v13 = vsub.f32 %v9920_v46, %v848_v45  ;;  %v937_v61 = vsub.f32 %v9927_v34, %v848_v45 }
 0x230   : > { %14473 = vst [vmem:[#allocation77_spill] sm:$0xff] %v10659_v11 }
 0x231   : > { %v1012_v10 = vmul.f32 1.442695, %v936_v13  ;;  %v1014_v26 = vmul.f32 1.442695, %v937_v61 }
 0x232   : > { %v10665_v54 = vpop.f32.mrb[98].mxu0  ;;  %v4746_v16 = vpop.permute.xlu0 %4745 }
 0x233   : > { %14474 = vst [vmem:[#allocation53_spill] sm:$0xff] %v10665_v54  ;;  %v851_v41 = vpop.xlane.xlu1 %850  ;;  %8032 = vpow2.f32 %v1012_v10  ;;  %v10669_v4 = vpop.f32.mrb[99].mxu0  ;;  %7055 = vmatprep.mubr.msk.f32.mxu0 %vm378_vm0, %v4746_v16 }
 0x234   : > { %v938_v12 = vsub.f32 %v9939_v22, %v851_v41  ;;  %v939_v9 = vsub.f32 %v9948_v43, %v851_v41  ;;  %14475 = vst [vmem:[#allocation54_spill] sm:$0xff] %v10669_v4  ;;  %8034 = vpow2.f32 %v1014_v26  ;;  %7056 = vmatmul.mubr.msk.f32.gmra.mrb[198].mxu0 %vm378_vm0, %v4746_v16  ;;  %v14484_v22 = vld [vmem:[#allocation58_spill] sm:$0xff] }
 0x236   : > { %v1016_v34 = vmul.f32 1.442695, %v938_v12  ;;  %v1018_v61 = vmul.f32 1.442695, %v939_v9  ;;  %v10675_v45 = vpop.f32.mrb[100].mxu0 }
 0x237   : > { %14476 = vst [vmem:[#allocation55_spill] sm:$0xff] %v10675_v45  ;;  %v10677_v13 = vpop.f32.mrb[101].mxu0  ;;  %v7815_v10 = vpop.permute.xlu1 %7814 }
 0x238   : > { %14477 = vst [vmem:[#allocation56_spill] sm:$0xff] %v10677_v13  ;;  %8036 = vpow2.f32 %v1016_v34  ;;  %v7817_v43 = vunpack.i.h.bf16 %v7815_v10  ;;  %v7816_v41 = vunpack.i.l.bf16 %v7815_v10 }
 0x239   : > { %8038 = vpow2.f32 %v1018_v61 }
 0x23a   : > { %v10681_v26 = vpop.f32.mrb[102].mxu0  ;;  %v7285_v37 = vpack.c.bf16 %v7817_v43, %v7816_v41  ;;  %v14483_v41 = vld [vmem:[#allocation57_spill] sm:$0xff] }
 0x23b   : > { %14478 = vst [vmem:[#allocation7_spill] sm:$0xff] %v10681_v26  ;;  %v10683_v46 = vpop.f32.mrb[103].mxu0  ;;  %v14485_v16 = vmax.f32 %v14483_v41, %v14484_v22 }
 0x23c   : > { %14479 = vst [vmem:[#allocation89_spill] sm:$0xff] %v10683_v46  ;;  %7286 = vmatpush1.bf16.msra.mxu1 %v7285_v37 }
 0x23d   : > { %7287 = vmatprep.subr.bf16.mxu1 %v14364_v25  ;;  %v8033_v9 = vpop.eup %8032 }
 0x23e   : > { %v10688_v12 = vpop.f32.mrb[104].mxu0  ;;  %v8035_v34 = vpop.eup %8034 }
 0x23f   : > { %14480 = vst [vmem:[#allocation90_spill] sm:$0xff] %v10688_v12  ;;  %v10690_v11 = vpop.f32.mrb[105].mxu0  ;;  %1306 = vmatprep.mubr.f32.mxu1 %v8035_v34  ;;  %v10694_v10 = vadd.f32 %v8035_v34, %v8033_v9  ;;  %v14489_v34 = vld [vmem:[#allocation59_spill] sm:$0xff] }
 0x240   : > { %14481 = vst [vmem:[#allocation91_spill] sm:$0xff] %v10690_v11  ;;  %1307 = vmatmul.mubr.f32.gmra.mrb[12].mxu1 %v8033_v9  ;;  %v14488_v9 = vld [vmem:[#allocation33_spill] sm:$0xff] }
 0x241   : > { %14482 = vst [vmem:[#allocation92_spill] sm:$0xff] %v10694_v10  ;;  %865 = vmax.xlane.f32.xlu0 %v14485_v16  ;;  %v14490_v11 = vmax.f32 %v14488_v9, %v14489_v34  ;;  %v8779_v10 = vld [vmem:[%s9517_s28 + $0xc8] sm:$0xff] }
 0x242   : > { %v8037_v43 = vpop.eup %8036  ;;  %v10699_v37 = vpop.f32.mrb[106].mxu0 }
 0x243   : > { %14486 = vst [vmem:[#allocation57_spill] sm:$0xff] %v10699_v37  ;;  %v8039_v13 = vpop.eup %8038  ;;  %v10701_v45 = vpop.f32.mrb[107].mxu0 }
 0x244   : > { %14487 = vst [vmem:[#allocation58_spill] sm:$0xff] %v10701_v45  ;;  %1311 = vmatprep.mubr.f32.mxu1 %v8039_v13  ;;  %v10705_v61 = vadd.f32 %v8039_v13, %v8037_v43 }
 0x245   : > { %1312 = vmatmul.mubr.f32.gmra.mrb[14].mxu1 %v8037_v43  ;;  %868 = vmax.xlane.f32.xlu1 %v14490_v11 }
 0x246   : > { %v10710_v12 = vpop.f32.mrb[108].mxu0 }
 0x247   : > { %14491 = vst [vmem:[#allocation33_spill] sm:$0xff] %v10710_v12  ;;  %v10712_v16 = vpop.f32.mrb[109].mxu0 }
 0x248   : > { %14492 = vst [vmem:[#allocation59_spill] sm:$0xff] %v10712_v16  ;;  %v7828_v16 = vpack.i.bf16 %v8779_v10, %v8778_v33 }
 0x24a   : > { %v10716_v27 = vpop.f32.mrb[110].mxu0 }
 0x24b   : > { %14493 = vst [vmem:[#allocation93_spill] sm:$0xff] %v10716_v27  ;;  %v10718_v48 = vpop.f32.mrb[111].mxu0 }
 0x24c   : > { %14494 = vst [vmem:[#allocation94_spill] sm:$0xff] %v10718_v48  ;;  %v14501_v48 = vld [vmem:[#allocation6_spill] sm:$0xff] }
 0x24e   : > { %v10722_v36 = vpop.f32.mrb[112].mxu0 }
 0x24f   : > { %14495 = vst [vmem:[#allocation95_spill] sm:$0xff] %v10722_v36  ;;  %v10724_v43 = vpop.f32.mrb[113].mxu0 }
 0x250   : > { %14496 = vst [vmem:[#allocation96_spill] sm:$0xff] %v10724_v43 }
 0x252   : > { %v10728_v55 = vpop.f32.mrb[114].mxu0 }
 0x253   : > { %14497 = vst [vmem:[#allocation97_spill] sm:$0xff] %v10728_v55  ;;  %v10730_v24 = vpop.f32.mrb[115].mxu0 }
 0x254   : > { %14498 = vst [vmem:[#allocation98_spill] sm:$0xff] %v10730_v24 }
 0x256   : > { %v10736_v45 = vpop.f32.mrb[116].mxu0  ;;  %7829 = vrot.lane.b32.xlu1 %v7828_v16, %s8852_s23 }
 0x257   : > { %14499 = vst [vmem:[#allocation99_spill] sm:$0xff] %v10736_v45  ;;  %v10739_v13 = vpop.f32.mrb[117].mxu0  ;;  %4751 = vrot.lane.b32.xlu0 %v14501_v48, %s8854_s25 }
 0x258   : > { %14500 = vst [vmem:[#allocation100_spill] sm:$0xff] %v10739_v13 }
 0x25a   : > { %v10745_v43 = vpop.f32.mrb[118].mxu0 }
 0x25b   : > { %14502 = vst [vmem:[#allocation6_spill] sm:$0xff] %v10745_v43  ;;  %v10747_v36 = vpop.f32.mrb[119].mxu0 }
 0x25c   : > { %14503 = vst [vmem:[#allocation101_spill] sm:$0xff] %v10747_v36 }
 0x25e   : > { %v10751_v10 = vpop.f32.mrb[120].mxu0 }
 0x25f   : > { %14504 = vst [vmem:[#allocation102_spill] sm:$0xff] %v10751_v10  ;;  %v10753_v12 = vpop.f32.mrb[121].mxu0 }
 0x260   : > { %14505 = vst [vmem:[#allocation103_spill] sm:$0xff] %v10753_v12 }
 0x262   : > { %v10757_v24 = vpop.f32.mrb[122].mxu0 }
 0x263   : > { %14506 = vst [vmem:[#allocation104_spill] sm:$0xff] %v10757_v24  ;;  %v10759_v48 = vpop.f32.mrb[123].mxu0  ;;  %v854_v55 = vpop.xlane.xlu0 %853 }
 0x264   : > { %14507 = vst [vmem:[#allocation105_spill] sm:$0xff] %v10759_v48  ;;  %v940_v13 = vsub.f32 %v9958_v5, %v854_v55  ;;  %v941_v45 = vsub.f32 %v9968_v23, %v854_v55 }
 0x266   : > { %v10765_v33 = vpop.f32.mrb[124].mxu0  ;;  %v1020_v36 = vmul.f32 1.442695, %v940_v13  ;;  %v1022_v43 = vmul.f32 1.442695, %v941_v45 }
 0x267   : > { %14508 = vst [vmem:[#allocation106_spill] sm:$0xff] %v10765_v33  ;;  %v10767_v27 = vpop.f32.mrb[125].mxu0  ;;  %v4748_v37 = vpop.permute.xlu0 %4747 }
 0x268   : > { %14509 = vst [vmem:[#allocation107_spill] sm:$0xff] %v10767_v27  ;;  %v857_v16 = vpop.xlane.xlu1 %856  ;;  %8040 = vpow2.f32 %v1020_v36  ;;  %7057 = vmatprep.mubr.msk.f32.mxu0 %vm378_vm0, %v4748_v37 }
 0x269   : > { %v942_v10 = vsub.f32 %v9982_v60, %v857_v16  ;;  %v943_v11 = vsub.f32 %v9984_v49, %v857_v16  ;;  %8042 = vpow2.f32 %v1022_v43  ;;  %7058 = vmatmul.mubr.msk.f32.gmra.mrb[200].mxu0 %vm378_vm0, %v4748_v37  ;;  %v14518_v37 = vld [vmem:[#allocation35_spill] sm:$0xff] }
 0x26a   : > { %v10775_v5 = vpop.f32.mrb[126].mxu0 }
 0x26b   : > { %14510 = vst [vmem:[#allocation108_spill] sm:$0xff] %v10775_v5  ;;  %v1024_v23 = vmul.f32 1.442695, %v942_v10  ;;  %v1026_v55 = vmul.f32 1.442695, %v943_v11  ;;  %v10777_v45 = vpop.f32.mrb[127].mxu0 }
 0x26c   : > { %14511 = vst [vmem:[#allocation109_spill] sm:$0xff] %v10777_v45  ;;  %v7820_v12 = vpop.permute.xlu1 %7819 }
 0x26d   : > { %8044 = vpow2.f32 %v1024_v23  ;;  %v7822_v36 = vunpack.i.h.bf16 %v7820_v12  ;;  %v7821_v60 = vunpack.i.l.bf16 %v7820_v12 }
 0x26e   : > { %8046 = vpow2.f32 %v1026_v55  ;;  %v10781_v49 = vpop.f32.mrb[128].mxu0 }
 0x26f   : > { %14512 = vst [vmem:[#allocation110_spill] sm:$0xff] %v10781_v49  ;;  %v10783_v16 = vpop.f32.mrb[129].mxu0  ;;  %v7288_v43 = vpack.c.bf16 %v7822_v36, %v7821_v60 }
 0x270   : > { %14513 = vst [vmem:[#allocation111_spill] sm:$0xff] %v10783_v16 }
 0x271   : > { %7289 = vmatpush1.bf16.msra.mxu1 %v7288_v43  ;;  %v14519_v43 = vld [vmem:[#allocation60_spill] sm:$0xff] }
 0x272   : > { %v10787_v11 = vpop.f32.mrb[130].mxu0  ;;  %7290 = vmatprep.subr.bf16.mxu1 %v14364_v25  ;;  %v8041_v10 = vpop.eup %8040  ;;  %v14520_v16 = vmax.f32 %v14518_v37, %v14519_v43 }
 0x273   : > { %14514 = vst [vmem:[#allocation112_spill] sm:$0xff] %v10787_v11  ;;  %v10790_v13 = vpop.f32.mrb[131].mxu0  ;;  %v8043_v23 = vpop.eup %8042 }
 0x274   : > { %14515 = vst [vmem:[#allocation113_spill] sm:$0xff] %v10790_v13  ;;  %1316 = vmatprep.mubr.f32.mxu1 %v8043_v23  ;;  %v10794_v55 = vadd.f32 %v8043_v23, %v8041_v10  ;;  %v14524_v23 = vld [vmem:[#allocation34_spill] sm:$0xff]  ;;  %v14525_v13 = vld [vmem:[#allocation61_spill] sm:$0xff] }
 0x275   : > { %1317 = vmatmul.mubr.f32.gmra.mrb[16].mxu1 %v8041_v10  ;;  %v14526_v11 = vmax.f32 %v14524_v23, %v14525_v13 }
 0x276   : > { %14516 = vst [vmem:[#allocation114_spill] sm:$0xff] %v10794_v55  ;;  %v10796_v36 = vpop.f32.mrb[132].mxu0  ;;  %871 = vmax.xlane.f32.xlu0 %v14520_v16 }
 0x277   : > { %14517 = vst [vmem:[#allocation115_spill] sm:$0xff] %v10796_v36  ;;  %v8045_v60 = vpop.eup %8044  ;;  %v10801_v49 = vpop.f32.mrb[133].mxu0  ;;  %v14536_v36 = vld [vmem:[#allocation9_spill] sm:$0xff] }
 0x278   : > { %14521 = vst [vmem:[#allocation35_spill] sm:$0xff] %v10801_v49  ;;  %v8047_v27 = vpop.eup %8046 }
 0x279   : > { %1321 = vmatprep.mubr.f32.mxu1 %v8047_v27  ;;  %v10805_v12 = vadd.f32 %v8047_v27, %v8045_v60 }
 0x27a   : > { %1322 = vmatmul.mubr.f32.gmra.mrb[18].mxu1 %v8045_v60  ;;  %v10807_v10 = vpop.f32.mrb[134].mxu0  ;;  %874 = vmax.xlane.f32.xlu1 %v14526_v11 }
 0x27b   : > { %14522 = vst [vmem:[#allocation60_spill] sm:$0xff] %v10805_v12  ;;  %14523 = vst [vmem:[#allocation116_spill] sm:$0xff] %v10807_v10  ;;  %v10812_v45 = vpop.f32.mrb[135].mxu0  ;;  %v8781_v10 = vld [vmem:[%s9517_s28 + $0xd8] sm:$0xff] }
 0x27c   : > { %14527 = vst [vmem:[#allocation34_spill] sm:$0xff] %v10812_v45  ;;  %v8780_v45 = vld [vmem:[%s9517_s28 + $0xd0] sm:$0xff] }
 0x27d   : > { %v7833_v48 = vpack.i.bf16 %v8781_v10, %v8780_v45 }
 0x27e   : > { %v10816_v5 = vpop.f32.mrb[136].mxu0 }
 0x27f   : > { %14528 = vst [vmem:[#allocation61_spill] sm:$0xff] %v10816_v5  ;;  %v10818_v33 = vpop.f32.mrb[137].mxu0 }
 0x280   : > { %14529 = vst [vmem:[#allocation117_spill] sm:$0xff] %v10818_v33 }
 0x282   : > { %v10822_v49 = vpop.f32.mrb[138].mxu0 }
 0x283   : > { %14530 = vst [vmem:[#allocation118_spill] sm:$0xff] %v10822_v49  ;;  %v10824_v60 = vpop.f32.mrb[139].mxu0 }
 0x284   : > { %14531 = vst [vmem:[#allocation119_spill] sm:$0xff] %v10824_v60 }
 0x286   : > { %v10828_v11 = vpop.f32.mrb[140].mxu0 }
 0x287   : > { %14532 = vst [vmem:[#allocation120_spill] sm:$0xff] %v10828_v11  ;;  %v10830_v55 = vpop.f32.mrb[141].mxu0 }
 0x288   : > { %14533 = vst [vmem:[#allocation121_spill] sm:$0xff] %v10830_v55 }
 0x28a   : > { %v10836_v24 = vpop.f32.mrb[142].mxu0 }
 0x28b   : > { %14534 = vst [vmem:[#allocation122_spill] sm:$0xff] %v10836_v24  ;;  %v10838_v27 = vpop.f32.mrb[143].mxu0  ;;  %7834 = vrot.lane.b32.xlu1 %v7833_v48, %s8852_s23 }
 0x28c   : > { %14535 = vst [vmem:[#allocation123_spill] sm:$0xff] %v10838_v27  ;;  %4753 = vrot.lane.b32.xlu0 %v14536_v36, %s8854_s25 }
 0x28e   : > { %v10845_v60 = vpop.f32.mrb[144].mxu0 }
 0x28f   : > { %14537 = vst [vmem:[#allocation9_spill] sm:$0xff] %v10845_v60  ;;  %v10847_v49 = vpop.f32.mrb[145].mxu0 }
 0x290   : > { %14538 = vst [vmem:[#allocation124_spill] sm:$0xff] %v10847_v49 }
 0x292   : > { %v10851_v45 = vpop.f32.mrb[146].mxu0 }
 0x293   : > { %14539 = vst [vmem:[#allocation125_spill] sm:$0xff] %v10851_v45  ;;  %v10853_v10 = vpop.f32.mrb[147].mxu0 }
 0x294   : > { %14540 = vst [vmem:[#allocation126_spill] sm:$0xff] %v10853_v10 }
 0x296   : > { %v10857_v55 = vpop.f32.mrb[148].mxu0 }
 0x297   : > { %14541 = vst [vmem:[#allocation127_spill] sm:$0xff] %v10857_v55  ;;  %v10859_v33 = vpop.f32.mrb[149].mxu0  ;;  %v14564_v55 = vld [vmem:[#allocation64_spill] sm:$0xff] }
 0x298   : > { %14542 = vst [vmem:[#allocation128_spill] sm:$0xff] %v10859_v33 }
 0x299   : > { %v860_v27 = vpop.xlane.xlu0 %859 }
 0x29a   : > { %v10863_v24 = vpop.f32.mrb[150].mxu0  ;;  %v944_v11 = vsub.f32 %v14456_v59, %v860_v27  ;;  %v945_v16 = vsub.f32 %v14457_v42, %v860_v27 }
 0x29b   : > { %14543 = vst [vmem:[#allocation129_spill] sm:$0xff] %v10863_v24  ;;  %v10867_v49 = vpop.f32.mrb[151].mxu0 }
 0x29c   : > { %14544 = vst [vmem:[#allocation130_spill] sm:$0xff] %v10867_v49  ;;  %v1028_v48 = vmul.f32 1.442695, %v944_v11  ;;  %v1030_v10 = vmul.f32 1.442695, %v945_v16 }
 0x29d   : > { %v4750_v45 = vpop.permute.xlu0 %4749  ;;  %v863_v5 = vpop.xlane.xlu1 %862 }
 0x29e   : > { %8048 = vpow2.f32 %v1028_v48  ;;  %v946_v53 = vsub.f32 %v14461_v28, %v863_v5  ;;  %v947_v36 = vsub.f32 %v14462_v15, %v863_v5  ;;  %7059 = vmatprep.mubr.msk.f32.mxu0 %vm378_vm0, %v4750_v45  ;;  %v10874_v33 = vpop.f32.mrb[152].mxu0 }
 0x29f   : > { %14545 = vst [vmem:[#allocation131_spill] sm:$0xff] %v10874_v33  ;;  %8050 = vpow2.f32 %v1030_v10  ;;  %7060 = vmatmul.mubr.msk.f32.gmra.mrb[202].mxu0 %vm378_vm0, %v4750_v45  ;;  %v10877_v59 = vpop.f32.mrb[153].mxu0 }
 0x2a0   : > { %14546 = vst [vmem:[#allocation132_spill] sm:$0xff] %v10877_v59  ;;  %v1032_v42 = vmul.f32 1.442695, %v946_v53  ;;  %v1034_v27 = vmul.f32 1.442695, %v947_v36 }
 0x2a1   : > { %v10881_v11 = vpop.f32.mrb[0].mxu1  ;;  %v7825_v45 = vpop.permute.xlu1 %7824 }
 0x2a2   : > { %14547 = vst [vmem:[#allocation133_spill] sm:$0xff] %v10881_v11  ;;  %v10883_v48 = vpop.f32.mrb[154].mxu0  ;;  %8052 = vpow2.f32 %v1032_v42  ;;  %v1280_v28 = vpop.f32.mrb[1].mxu1  ;;  %v7827_v10 = vunpack.i.h.bf16 %v7825_v45  ;;  %v7826_v60 = vunpack.i.l.bf16 %v7825_v45 }
 0x2a3   : > { %14548 = vst [vmem:[#allocation134_spill] sm:$0xff] %v10883_v48  ;;  %v10885_v15 = vpop.f32.mrb[155].mxu0  ;;  %8054 = vpow2.f32 %v1034_v27  ;;  %v14557_v48 = vld [vmem:[#allocation62_spill] sm:$0xff] }
 0x2a4   : > { %14549 = vst [vmem:[#allocation135_spill] sm:$0xff] %v10885_v15  ;;  %v7291_v33 = vpack.c.bf16 %v7827_v10, %v7826_v60 }
 0x2a5   : > { %v10889_v53 = vpop.f32.mrb[2].mxu1 }
 0x2a6   : > { %14550 = vst [vmem:[#allocation136_spill] sm:$0xff] %v10889_v53  ;;  %v10891_v36 = vpop.f32.mrb[156].mxu0  ;;  %v1285_v16 = vpop.f32.mrb[3].mxu1  ;;  %7292 = vmatpush1.bf16.msra.mxu1 %v7291_v33  ;;  %v14573_v53 = vld [vmem:[#allocation40_spill] sm:$0xff] }
 0x2a7   : > { %14551 = vst [vmem:[#allocation137_spill] sm:$0xff] %v10891_v36  ;;  %v10893_v59 = vpop.f32.mrb[157].mxu0  ;;  %7293 = vmatprep.subr.bf16.mxu1 %v14364_v25  ;;  %v14556_v16 = vld [vmem:[#allocation37_spill] sm:$0xff] }
 0x2a8   : > { %14552 = vst [vmem:[#allocation138_spill] sm:$0xff] %v10893_v59  ;;  %v8049_v28 = vpop.eup %8048  ;;  %v14558_v60 = vmax.f32 %v14556_v16, %v14557_v48 }
 0x2a9   : > { %v8051_v27 = vpop.eup %8050  ;;  %v10897_v49 = vpop.f32.mrb[4].mxu1 }
 0x2aa   : > { %14553 = vst [vmem:[#allocation139_spill] sm:$0xff] %v10897_v49  ;;  %1326 = vmatprep.mubr.f32.mxu1 %v8051_v27  ;;  %v1290_v45 = vpop.f32.mrb[5].mxu1  ;;  %v10900_v5 = vpop.f32.mrb[158].mxu0  ;;  %v10902_v15 = vadd.f32 %v8051_v27, %v8049_v28 }
 0x2ab   : > { %14554 = vst [vmem:[#allocation140_spill] sm:$0xff] %v10900_v5  ;;  %1327 = vmatmul.mubr.f32.gmra.mrb[20].mxu1 %v8049_v28  ;;  %877 = vmax.xlane.f32.xlu0 %v14558_v60  ;;  %v10907_v10 = vpop.f32.mrb[159].mxu0  ;;  %v14563_v28 = vld [vmem:[#allocation36_spill] sm:$0xff]  ;;  %v14569_v5 = vld [vmem:[#allocation67_spill] sm:$0xff] }
 0x2ac   : > { %14555 = vst [vmem:[#allocation141_spill] sm:$0xff] %v10902_v15  ;;  %14559 = vst [vmem:[#allocation37_spill] sm:$0xff] %v10907_v10  ;;  %v8053_v42 = vpop.eup %8052  ;;  %v14565_v49 = vmax.f32 %v14563_v28, %v14564_v55  ;;  %v14568_v10 = vld [vmem:[#allocation38_spill] sm:$0xff] }
 0x2ad   : > { %v8055_v59 = vpop.eup %8054  ;;  %v10911_v36 = vpop.f32.mrb[6].mxu1 }
 0x2ae   : > { %14560 = vst [vmem:[#allocation62_spill] sm:$0xff] %v10911_v36  ;;  %1331 = vmatprep.mubr.f32.mxu1 %v8055_v59  ;;  %v1295_v45 = vpop.f32.mrb[7].mxu1  ;;  %v10913_v24 = vpop.f32.mrb[160].mxu0  ;;  %v10915_v27 = vadd.f32 %v8055_v59, %v8053_v42  ;;  %v14570_v36 = vmax.f32 %v14568_v10, %v14569_v5 }
 0x2af   : > { %14561 = vst [vmem:[#allocation142_spill] sm:$0xff] %v10913_v24  ;;  %1332 = vmatmul.mubr.f32.gmra.mrb[22].mxu1 %v8053_v42  ;;  %880 = vmax.xlane.f32.xlu1 %v14565_v49  ;;  %v10920_v60 = vpop.f32.mrb[161].mxu0  ;;  %v14574_v49 = vld [vmem:[#allocation70_spill] sm:$0xff] }
 0x2b0   : > { %14562 = vst [vmem:[#allocation143_spill] sm:$0xff] %v10915_v27  ;;  %14566 = vst [vmem:[#allocation36_spill] sm:$0xff] %v10920_v60  ;;  %v14575_v15 = vmax.f32 %v14573_v53, %v14574_v49  ;;  %v14578_v24 = vld [vmem:[#allocation42_spill] sm:$0xff] }
 0x2b2   : > { %v10924_v33 = vpop.f32.mrb[162].mxu0 }
 0x2b3   : > { %14567 = vst [vmem:[#allocation64_spill] sm:$0xff] %v10924_v33  ;;  %886 = vmax.xlane.f32.xlu1 %v14570_v36  ;;  %v10929_v45 = vpop.f32.mrb[163].mxu0  ;;  %v14579_v36 = vld [vmem:[#allocation73_spill] sm:$0xff]  ;;  %v14583_v33 = vld [vmem:[#allocation44_spill] sm:$0xff] }
 0x2b4   : > { %14571 = vst [vmem:[#allocation38_spill] sm:$0xff] %v10929_v45  ;;  %v14580_v46 = vmax.f32 %v14578_v24, %v14579_v36 }
 0x2b6   : > { %v10933_v42 = vpop.f32.mrb[164].mxu0 }
 0x2b7   : > { %14572 = vst [vmem:[#allocation67_spill] sm:$0xff] %v10933_v42  ;;  %892 = vmax.xlane.f32.xlu1 %v14575_v15  ;;  %v10938_v63 = vpop.f32.mrb[165].mxu0  ;;  %v14584_v15 = vld [vmem:[#allocation76_spill] sm:$0xff] }
 0x2b8   : > { %14576 = vst [vmem:[#allocation40_spill] sm:$0xff] %v10938_v63  ;;  %v14585_v27 = vmax.f32 %v14583_v33, %v14584_v15  ;;  %v14587_v63 = vld [vmem:[#allocation8_spill] sm:$0xff] }
 0x2b9   : > { %v14589_v42 = vld [vmem:[#allocation80_spill] sm:$0xff] }
 0x2ba   : > { %v10942_v60 = vpop.f32.mrb[166].mxu0  ;;  %v14590_v54 = vmax.f32 %v10229_v51, %v14589_v42  ;;  %v14632_v42 = vld [vmem:[#allocation46_spill] sm:$0xff] }
 0x2bb   : > { %14577 = vst [vmem:[#allocation70_spill] sm:$0xff] %v10942_v60  ;;  %898 = vmax.xlane.f32.xlu1 %v14580_v46  ;;  %v10947_v26 = vpop.f32.mrb[167].mxu0  ;;  %v14593_v60 = vld [vmem:[#allocation84_spill] sm:$0xff] }
 0x2bc   : > { %14581 = vst [vmem:[#allocation42_spill] sm:$0xff] %v10947_v26  ;;  %v14594_v12 = vmax.f32 %v10261_v31, %v14593_v60 }
 0x2be   : > { %v10951_v45 = vpop.f32.mrb[168].mxu0 }
 0x2bf   : > { %14582 = vst [vmem:[#allocation73_spill] sm:$0xff] %v10951_v45  ;;  %904 = vmax.xlane.f32.xlu1 %v14585_v27  ;;  %v10956_v4 = vpop.f32.mrb[169].mxu0 }
 0x2c0   : > { %14586 = vst [vmem:[#allocation44_spill] sm:$0xff] %v10956_v4 }
 0x2c1   : > { %4755 = vrot.lane.b32.xlu0 %v14587_v63, %s8854_s25  ;;  %v8782_v63 = vld [vmem:[%s9517_s28 + $0xe0] sm:$0xff] }
 0x2c2   : > { %v10962_v46 = vpop.f32.mrb[170].mxu0 }
 0x2c3   : > { %14588 = vst [vmem:[#allocation76_spill] sm:$0xff] %v10962_v46  ;;  %910 = vmax.xlane.f32.xlu1 %v14590_v54  ;;  %v10967_v59 = vpop.f32.mrb[171].mxu0  ;;  %v14597_v54 = vmax.f32 %v10301_v39, %v10305_v6 }
 0x2c4   : > { %14591 = vst [vmem:[#allocation8_spill] sm:$0xff] %v10967_v59 }
 0x2c6   : > { %v10971_v27 = vpop.f32.mrb[172].mxu0 }
 0x2c7   : > { %14592 = vst [vmem:[#allocation144_spill] sm:$0xff] %v10971_v27  ;;  %916 = vmax.xlane.f32.xlu1 %v14594_v12  ;;  %v10976_v11 = vpop.f32.mrb[173].mxu0 }
 0x2c8   : > { %14595 = vst [vmem:[#allocation145_spill] sm:$0xff] %v10976_v11 }
 0x2ca   : > { %v10980_v4 = vpop.f32.mrb[174].mxu0 }
 0x2cb   : > { %14596 = vst [vmem:[#allocation146_spill] sm:$0xff] %v10980_v4  ;;  %922 = vmax.xlane.f32.xlu1 %v14597_v54  ;;  %v10985_v45 = vpop.f32.mrb[175].mxu0 }
 0x2cc   : > { %14598 = vst [vmem:[#allocation147_spill] sm:$0xff] %v10985_v45 }
 0x2ce   : > { %v866_v59 = vpop.xlane.xlu0 %865  ;;  %v10989_v46 = vpop.f32.mrb[176].mxu0 }
 0x2cf   : > { %14599 = vst [vmem:[#allocation148_spill] sm:$0xff] %v10989_v46  ;;  %v948_v12 = vsub.f32 %v14483_v41, %v866_v59  ;;  %v949_v31 = vsub.f32 %v14484_v22, %v866_v59  ;;  %v10993_v60 = vpop.f32.mrb[177].mxu0 }
 0x2d0   : > { %14600 = vst [vmem:[#allocation149_spill] sm:$0xff] %v10993_v60  ;;  %v8783_v60 = vld [vmem:[%s9517_s28 + $0xe8] sm:$0xff] }
 0x2d1   : > { %v1036_v11 = vmul.f32 1.442695, %v948_v12  ;;  %v1038_v27 = vmul.f32 1.442695, %v949_v31 }
 0x2d2   : > { %v4752_v54 = vpop.permute.xlu0 %4751  ;;  %v869_v39 = vpop.xlane.xlu1 %868 }
 0x2d3   : > { %8056 = vpow2.f32 %v1036_v11  ;;  %v950_v6 = vsub.f32 %v14488_v9, %v869_v39  ;;  %v951_v26 = vsub.f32 %v14489_v34, %v869_v39  ;;  %v10999_v45 = vpop.f32.mrb[178].mxu0  ;;  %7061 = vmatprep.mubr.msk.f32.mxu0 %vm378_vm0, %v4752_v54 }
 0x2d4   : > { %14601 = vst [vmem:[#allocation150_spill] sm:$0xff] %v10999_v45  ;;  %8058 = vpow2.f32 %v1038_v27  ;;  %v11002_v22 = vpop.f32.mrb[179].mxu0  ;;  %7062 = vmatmul.mubr.msk.f32.gmra.mrb[204].mxu0 %vm378_vm0, %v4752_v54  ;;  %v7838_v54 = vpack.i.bf16 %v8783_v60, %v8782_v63  ;;  %v14618_v45 = vld [vmem:[#allocation69_spill] sm:$0xff] }
 0x2d5   : > { %14602 = vst [vmem:[#allocation151_spill] sm:$0xff] %v11002_v22  ;;  %v1040_v41 = vmul.f32 1.442695, %v950_v6  ;;  %v1042_v31 = vmul.f32 1.442695, %v951_v26 }
 0x2d6   : > { %v11007_v59 = vpop.f32.mrb[180].mxu0  ;;  %v7830_v9 = vpop.permute.xlu1 %7829 }
 0x2d7   : > { %14603 = vst [vmem:[#allocation152_spill] sm:$0xff] %v11007_v59  ;;  %8060 = vpow2.f32 %v1040_v41  ;;  %v11009_v39 = vpop.f32.mrb[181].mxu0  ;;  %v7832_v34 = vunpack.i.h.bf16 %v7830_v9  ;;  %v7831_v12 = vunpack.i.l.bf16 %v7830_v9 }
 0x2d8   : > { %14604 = vst [vmem:[#allocation153_spill] sm:$0xff] %v11009_v39  ;;  %8062 = vpow2.f32 %v1042_v31 }
 0x2d9   : > { %v7294_v6 = vpack.c.bf16 %v7832_v34, %v7831_v12  ;;  %v14611_v12 = vld [vmem:[#allocation39_spill] sm:$0xff] }
 0x2da   : > { %v11015_v26 = vpop.f32.mrb[182].mxu0 }
 0x2db   : > { %14605 = vst [vmem:[#allocation154_spill] sm:$0xff] %v11015_v26  ;;  %v11017_v46 = vpop.f32.mrb[183].mxu0  ;;  %7295 = vmatpush1.bf16.msra.mxu1 %v7294_v6  ;;  %v14612_v6 = vld [vmem:[#allocation65_spill] sm:$0xff] }
 0x2dc   : > { %14606 = vst [vmem:[#allocation155_spill] sm:$0xff] %v11017_v46  ;;  %7839 = vrot.lane.b32.xlu1 %v7838_v54, %s8852_s23  ;;  %7296 = vmatprep.subr.bf16.mxu1 %v14364_v25  ;;  %v14613_v41 = vmax.f32 %v14611_v12, %v14612_v6 }
 0x2dd   : > { %v8057_v31 = vpop.eup %8056 }
 0x2de   : > { %v8059_v9 = vpop.eup %8058  ;;  %v11023_v11 = vpop.f32.mrb[8].mxu1 }
 0x2df   : > { %14607 = vst [vmem:[#allocation156_spill] sm:$0xff] %v11023_v11  ;;  %v11025_v27 = vpop.f32.mrb[184].mxu0  ;;  %1336 = vmatprep.mubr.f32.mxu1 %v8059_v9  ;;  %v1300_v60 = vpop.f32.mrb[9].mxu1  ;;  %v11029_v34 = vadd.f32 %v8059_v9, %v8057_v31  ;;  %v14623_v11 = vld [vmem:[#allocation43_spill] sm:$0xff] }
 0x2e0   : > { %14608 = vst [vmem:[#allocation157_spill] sm:$0xff] %v11025_v27  ;;  %v11027_v63 = vpop.f32.mrb[185].mxu0  ;;  %1337 = vmatmul.mubr.f32.gmra.mrb[24].mxu1 %v8057_v31  ;;  %883 = vmax.xlane.f32.xlu0 %v14613_v41  ;;  %v14617_v31 = vld [vmem:[#allocation41_spill] sm:$0xff]  ;;  %v14622_v27 = vld [vmem:[#allocation3_spill] sm:$0xff] }
 0x2e1   : > { %14609 = vst [vmem:[#allocation158_spill] sm:$0xff] %v11027_v63  ;;  %14610 = vst [vmem:[#allocation159_spill] sm:$0xff] %v11029_v34  ;;  %v8061_v46 = vpop.eup %8060  ;;  %v14619_v4 = vmax.f32 %v14617_v31, %v14618_v45  ;;  %v14627_v34 = vld [vmem:[#allocation45_spill] sm:$0xff] }
 0x2e2   : > { %v8063_v26 = vpop.eup %8062  ;;  %v11036_v39 = vpop.f32.mrb[10].mxu1 }
 0x2e3   : > { %14614 = vst [vmem:[#allocation39_spill] sm:$0xff] %v11036_v39  ;;  %v11038_v59 = vpop.f32.mrb[186].mxu0  ;;  %1341 = vmatprep.mubr.f32.mxu1 %v8063_v26  ;;  %v1305_v60 = vpop.f32.mrb[11].mxu1  ;;  %v11042_v9 = vadd.f32 %v8063_v26, %v8061_v46  ;;  %v14624_v39 = vmax.f32 %v14622_v27, %v14623_v11 }
 0x2e4   : > { %14615 = vst [vmem:[#allocation65_spill] sm:$0xff] %v11038_v59  ;;  %v11040_v22 = vpop.f32.mrb[187].mxu0  ;;  %1342 = vmatmul.mubr.f32.gmra.mrb[26].mxu1 %v8061_v46  ;;  %889 = vmax.xlane.f32.xlu0 %v14619_v4  ;;  %v14628_v4 = vld [vmem:[#allocation74_spill] sm:$0xff] }
 0x2e5   : > { %14616 = vst [vmem:[#allocation160_spill] sm:$0xff] %v11040_v22  ;;  %v14629_v51 = vmax.f32 %v14627_v34, %v14628_v4  ;;  %v14637_v4 = vld [vmem:[#allocation81_spill] sm:$0xff] }
 0x2e6   : > { %v11049_v54 = vpop.f32.mrb[188].mxu0 }
 0x2e7   : > { %14620 = vst [vmem:[#allocation41_spill] sm:$0xff] %v11049_v54  ;;  %v11051_v63 = vpop.f32.mrb[189].mxu0 }
 0x2e8   : > { %14621 = vst [vmem:[#allocation69_spill] sm:$0xff] %v11051_v63  ;;  %895 = vmax.xlane.f32.xlu0 %v14624_v39  ;;  %v14633_v39 = vld [vmem:[#allocation78_spill] sm:$0xff] }
 0x2e9   : > { %v14634_v11 = vmax.f32 %v14632_v42, %v14633_v39 }
 0x2ea   : > { %v11058_v60 = vpop.f32.mrb[190].mxu0 }
 0x2eb   : > { %14625 = vst [vmem:[#allocation3_spill] sm:$0xff] %v11058_v60  ;;  %v11060_v46 = vpop.f32.mrb[191].mxu0 }
 0x2ec   : > { %14626 = vst [vmem:[#allocation161_spill] sm:$0xff] %v11060_v46  ;;  %901 = vmax.xlane.f32.xlu0 %v14629_v51  ;;  %v14638_v51 = vld [vmem:[#allocation82_spill] sm:$0xff] }
 0x2ed   : > { %v14639_v34 = vmax.f32 %v14637_v4, %v14638_v51 }
 0x2ee   : > { %v11067_v22 = vpop.f32.mrb[192].mxu0 }
 0x2ef   : > { %14630 = vst [vmem:[#allocation162_spill] sm:$0xff] %v11067_v22  ;;  %v11069_v59 = vpop.f32.mrb[193].mxu0 }
 0x2f0   : > { %14631 = vst [vmem:[#allocation163_spill] sm:$0xff] %v11069_v59  ;;  %907 = vmax.xlane.f32.xlu0 %v14634_v11  ;;  %v14642_v11 = vld [vmem:[#allocation85_spill] sm:$0xff]  ;;  %v14644_v59 = vmax.f32 %v10484_v47, %v10487_v57 }
 0x2f1   : > { %v14643_v39 = vmax.f32 %v10280_v35, %v14642_v11 }
 0x2f2   : > { %v11076_v63 = vpop.f32.mrb[194].mxu0 }
 0x2f3   : > { %14635 = vst [vmem:[#allocation46_spill] sm:$0xff] %v11076_v63  ;;  %v11078_v54 = vpop.f32.mrb[195].mxu0 }
 0x2f4   : > { %14636 = vst [vmem:[#allocation164_spill] sm:$0xff] %v11078_v54  ;;  %913 = vmax.xlane.f32.xlu0 %v14639_v34  ;;  %v14645_v34 = vmax.f32 %v10497_v19, %v10499_v58 }
 0x2f6   : > { %v11085_v46 = vpop.f32.mrb[196].mxu0 }
 0x2f7   : > { %14640 = vst [vmem:[#allocation81_spill] sm:$0xff] %v11085_v46  ;;  %v11087_v60 = vpop.f32.mrb[197].mxu0 }
 0x2f8   : > { %14641 = vst [vmem:[#allocation165_spill] sm:$0xff] %v11087_v60  ;;  %919 = vmax.xlane.f32.xlu0 %v14643_v39 }
 0x2fc   : > { %2143 = vmax.xlane.f32.xlu0 %v14644_v59 }
 0x300   : > { %2146 = vmax.xlane.f32.xlu1 %v14645_v34 }
 0x303   : > { %v872_v41 = vpop.xlane.xlu0 %871 }
 0x304   : > { %v952_v54 = vsub.f32 %v14518_v37, %v872_v41  ;;  %v953_v63 = vsub.f32 %v14519_v43, %v872_v41  ;;  %v8785_v41 = vld [vmem:[%s9517_s28 + $0xf8] sm:$0xff] }
 0x306   : > { %v1044_v22 = vmul.f32 1.442695, %v952_v54  ;;  %v1046_v51 = vmul.f32 1.442695, %v953_v63 }
 0x307   : > { %v4754_v11 = vpop.permute.xlu0 %4753  ;;  %v875_v39 = vpop.xlane.xlu1 %874 }
 0x308   : > { %8064 = vpow2.f32 %v1044_v22  ;;  %v954_v26 = vsub.f32 %v14524_v23, %v875_v39  ;;  %v955_v59 = vsub.f32 %v14525_v13, %v875_v39  ;;  %v11104_v60 = vpop.f32.mrb[198].mxu0  ;;  %7063 = vmatprep.mubr.msk.f32.mxu0 %vm378_vm0, %v4754_v11  ;;  %v8784_v13 = vld [vmem:[%s9517_s28 + $0xf0] sm:$0xff] }
 0x309   : > { %14646 = vst [vmem:[#allocation166_spill] sm:$0xff] %v11104_v60  ;;  %8066 = vpow2.f32 %v1046_v51  ;;  %v11107_v34 = vpop.f32.mrb[199].mxu0  ;;  %7064 = vmatmul.mubr.msk.f32.gmra.mrb[206].mxu0 %vm378_vm0, %v4754_v11  ;;  %v7843_v39 = vpack.i.bf16 %v8785_v41, %v8784_v13  ;;  %v14651_v41 = vmax.f32 %v10509_v8, %v10511_v32  ;;  %v14670_v60 = vld [vmem:[#allocation143_spill] sm:$0xff] }
 0x30a   : > { %14647 = vst [vmem:[#allocation167_spill] sm:$0xff] %v11107_v34  ;;  %v1048_v37 = vmul.f32 1.442695, %v954_v26  ;;  %v1050_v43 = vmul.f32 1.442695, %v955_v59  ;;  %v14648_v26 = vld [vmem:[#allocation11_spill] sm:$0xff] }
 0x30b   : > { %v7835_v63 = vpop.permute.xlu1 %7834 }
 0x30c   : > { %8068 = vpow2.f32 %v1048_v37  ;;  %v7837_v23 = vunpack.i.h.bf16 %v7835_v63  ;;  %v7836_v54 = vunpack.i.l.bf16 %v7835_v63 }
 0x30d   : > { %8070 = vpow2.f32 %v1050_v43 }
 0x30e   : > { %v7297_v46 = vpack.c.bf16 %v7837_v23, %v7836_v54 }
 0x310   : > { %7298 = vmatpush1.bf16.msra.mxu1 %v7297_v46 }
 0x311   : > { %7844 = vrot.lane.b32.xlu1 %v7843_v39, %s8852_s23  ;;  %7299 = vmatprep.subr.bf16.mxu1 %v14364_v25  ;;  %v14652_v39 = vmax.f32 %v10519_v14, %v10523_v0 }
 0x312   : > { %v8065_v51 = vpop.eup %8064  ;;  %4757 = vrot.lane.b32.xlu0 %v14648_v26, %s8854_s25 }
 0x313   : > { %v8067_v11 = vpop.eup %8066  ;;  %v11118_v59 = vpop.f32.mrb[12].mxu1 }
 0x314   : > { %14649 = vst [vmem:[#allocation11_spill] sm:$0xff] %v11118_v59  ;;  %1346 = vmatprep.mubr.f32.mxu1 %v8067_v11  ;;  %v1310_v37 = vpop.f32.mrb[13].mxu1  ;;  %v11120_v63 = vadd.f32 %v8067_v11, %v8065_v51  ;;  %v14672_v59 = vld [vmem:[#allocation89_spill] sm:$0xff] }
 0x315   : > { %1347 = vmatmul.mubr.f32.gmra.mrb[28].mxu1 %v8065_v51  ;;  %v14653_v51 = vmax.f32 %v10543_v3, %v10545_v1 }
 0x316   : > { %v8069_v43 = vpop.eup %8068 }
 0x317   : > { %v8071_v13 = vpop.eup %8070 }
 0x318   : > { %v11122_v23 = vpop.f32.mrb[14].mxu1  ;;  %1351 = vmatprep.mubr.f32.mxu1 %v8071_v13  ;;  %v11124_v54 = vadd.f32 %v8071_v13, %v8069_v43  ;;  %v14655_v13 = vmax.f32 %v10564_v20, %v10566_v50 }
 0x319   : > { %14650 = vst [vmem:[#allocation168_spill] sm:$0xff] %v11122_v23  ;;  %v1315_v46 = vpop.f32.mrb[15].mxu1  ;;  %1352 = vmatmul.mubr.f32.gmra.mrb[30].mxu1 %v8069_v43  ;;  %v14654_v43 = vmax.f32 %v10533_v17, %v10535_v38 }
 0x331   : > { %2149 = vmax.xlane.f32.xlu0 %v14651_v41 }
 0x335   : > { %2152 = vmax.xlane.f32.xlu0 %v14652_v39  ;;  %2158 = vmax.xlane.f32.xlu1 %v14653_v51 }
 0x338   : > { %v878_v26 = vpop.xlane.xlu0 %877 }
 0x339   : > { %v956_v11 = vsub.f32 %v14556_v16, %v878_v26  ;;  %v957_v37 = vsub.f32 %v14557_v48, %v878_v26  ;;  %2155 = vmax.xlane.f32.xlu0 %v14654_v43  ;;  %2164 = vmax.xlane.f32.xlu1 %v14655_v13 }
 0x33b   : > { %v1052_v46 = vmul.f32 1.442695, %v956_v11  ;;  %v1054_v41 = vmul.f32 1.442695, %v957_v37 }
 0x33c   : > { %v4756_v39 = vpop.permute.xlu0 %4755  ;;  %v881_v22 = vpop.xlane.xlu1 %880 }
 0x33d   : > { %8072 = vpow2.f32 %v1052_v46  ;;  %v958_v51 = vsub.f32 %v14563_v28, %v881_v22  ;;  %v959_v34 = vsub.f32 %v14564_v55, %v881_v22  ;;  %v11145_v16 = vpop.f32.mrb[200].mxu0  ;;  %7065 = vmatprep.mubr.msk.f32.mxu0 %vm378_vm0, %v4756_v39  ;;  %1120 = vadd.xlane.f32.xlu1 %v10423_v7  ;;  %v14658_v22 = vmax.f32 %v10594_v44, %v10596_v56 }
 0x33e   : > { %14656 = vst [vmem:[#allocation169_spill] sm:$0xff] %v11145_v16  ;;  %8074 = vpow2.f32 %v1054_v41  ;;  %v11149_v48 = vpop.f32.mrb[201].mxu0  ;;  %7066 = vmatmul.mubr.msk.f32.gmra.mrb[208].mxu0 %vm378_vm0, %v4756_v39 }
 0x33f   : > { %14657 = vst [vmem:[#allocation170_spill] sm:$0xff] %v11149_v48  ;;  %v1056_v26 = vmul.f32 1.442695, %v958_v51  ;;  %v1058_v11 = vmul.f32 1.442695, %v959_v34  ;;  %v14667_v48 = vld [vmem:[#allocation53_spill] sm:$0xff] }
 0x340   : > { %v887_v43 = vpop.xlane.xlu1 %886 }
 0x341   : > { %8076 = vpow2.f32 %v1056_v26  ;;  %v962_v55 = vsub.f32 %v14568_v10, %v887_v43  ;;  %v963_v28 = vsub.f32 %v14569_v5, %v887_v43  ;;  %2170 = vmax.xlane.f32.xlu1 %v14658_v22 }
 0x342   : > { %8078 = vpow2.f32 %v1058_v11 }
 0x343   : > { %v1064_v7 = vmul.f32 1.442695, %v962_v55  ;;  %v1066_v13 = vmul.f32 1.442695, %v963_v28 }
 0x344   : > { %v893_v46 = vpop.xlane.xlu1 %892 }
 0x345   : > { %8080 = vpow2.f32 %v1064_v7  ;;  %v966_v34 = vsub.f32 %v14573_v53, %v893_v46  ;;  %v967_v41 = vsub.f32 %v14574_v49, %v893_v46  ;;  %1126 = vadd.xlane.f32.xlu1 %v10446_v18  ;;  %v14660_v53 = vmax.f32 %v10614_v52, %v10616_v29 }
 0x346   : > { %8082 = vpow2.f32 %v1066_v13 }
 0x347   : > { %v8073_v39 = vpop.eup %8072  ;;  %v1072_v10 = vmul.f32 1.442695, %v966_v34  ;;  %v1074_v51 = vmul.f32 1.442695, %v967_v41 }
 0x348   : > { %v8075_v5 = vpop.eup %8074  ;;  %v11162_v26 = vpop.f32.mrb[16].mxu1 }
 0x349   : > { %14659 = vst [vmem:[#allocation171_spill] sm:$0xff] %v11162_v26  ;;  %v899_v43 = vpop.xlane.xlu1 %898  ;;  %8084 = vpow2.f32 %v1072_v10  ;;  %1356 = vmatprep.mubr.f32.mxu1 %v8075_v5  ;;  %v1320_v28 = vpop.f32.mrb[17].mxu1  ;;  %2176 = vmax.xlane.f32.xlu1 %v14660_v53  ;;  %v11169_v18 = vadd.f32 %v8075_v5, %v8073_v39  ;;  %v14671_v26 = vld [vmem:[#allocation7_spill] sm:$0xff] }
 0x34a   : > { %v970_v11 = vsub.f32 %v14578_v24, %v899_v43  ;;  %v971_v55 = vsub.f32 %v14579_v36, %v899_v43  ;;  %8086 = vpow2.f32 %v1074_v51  ;;  %1357 = vmatmul.mubr.f32.gmra.mrb[32].mxu1 %v8073_v39  ;;  %v14662_v43 = vld [vmem:[#allocation10_spill] sm:$0xff] }
 0x34b   : > { %v8077_v49 = vpop.eup %8076 }
 0x34c   : > { %v1080_v22 = vmul.f32 1.442695, %v970_v11  ;;  %v1082_v7 = vmul.f32 1.442695, %v971_v55  ;;  %v8079_v13 = vpop.eup %8078 }
 0x34d   : > { %v11171_v46 = vpop.f32.mrb[18].mxu1  ;;  %v905_v34 = vpop.xlane.xlu1 %904  ;;  %1361 = vmatprep.mubr.f32.mxu1 %v8079_v13  ;;  %1132 = vadd.xlane.f32.xlu1 %v10583_v40  ;;  %v11176_v10 = vadd.f32 %v8079_v13, %v8077_v49 }
 0x34e   : > { %14661 = vst [vmem:[#allocation172_spill] sm:$0xff] %v11171_v46  ;;  %8088 = vpow2.f32 %v1080_v22  ;;  %v974_v24 = vsub.f32 %v14583_v33, %v905_v34  ;;  %v975_v36 = vsub.f32 %v14584_v15, %v905_v34  ;;  %v1325_v41 = vpop.f32.mrb[19].mxu1  ;;  %1362 = vmatmul.mubr.f32.gmra.mrb[34].mxu1 %v8077_v49  ;;  %v14663_v33 = vmax.f32 %v10636_v2, %v10640_v21 }
 0x34f   : > { %8090 = vpow2.f32 %v1082_v7  ;;  %v11178_v39 = vpop.eup %8080  ;;  %4759 = vrot.lane.b32.xlu0 %v14662_v43, %s8854_s25  ;;  %v14664_v34 = vmax.f32 %v10651_v30, %v10653_v62  ;;  %v14673_v46 = vmax.f32 %v14671_v26, %v14672_v59  ;;  %v14680_v59 = vld [vmem:[#allocation5_spill] sm:$0xff] }
 0x350   : > { %v1088_v51 = vmul.f32 1.442695, %v974_v24  ;;  %v1090_v5 = vmul.f32 1.442695, %v975_v36  ;;  %v11182_v11 = vpop.eup %8082 }
 0x351   : > { %v11184_v55 = vpop.xlane.xlu1 %910  ;;  %2182 = vmax.xlane.f32.xlu1 %v14663_v33  ;;  %v11191_v40 = vadd.f32 %v11182_v11, %v11178_v39 }
 0x352   : > { %8092 = vpow2.f32 %v1088_v51  ;;  %v14665_v51 = vld [vmem:[#allocation60_spill] sm:$0xff] }
 0x353   : > { %8094 = vpow2.f32 %v1090_v5  ;;  %v11193_v15 = vpop.eup %8084 }
 0x354   : > { %v11195_v28 = vpop.eup %8086 }
 0x355   : > { %v11197_v53 = vpop.xlane.xlu1 %916  ;;  %1138 = vadd.xlane.f32.xlu1 %v10705_v61  ;;  %v11202_v49 = vadd.f32 %v11195_v28, %v11193_v15 }
 0x358   : > { %v11204_v22 = vpop.eup %8088 }
 0x359   : > { %v11206_v7 = vpop.eup %8090  ;;  %v11208_v13 = vpop.xlane.xlu1 %922  ;;  %2188 = vmax.xlane.f32.xlu1 %v14664_v34  ;;  %v14668_v34 = vld [vmem:[#allocation54_spill] sm:$0xff] }
 0x35a   : > { %v11215_v24 = vadd.f32 %v11206_v7, %v11204_v22  ;;  %v14669_v16 = vmax.f32 %v14667_v48, %v14668_v34  ;;  %v14677_v48 = vld [vmem:[#allocation57_spill] sm:$0xff] }
 0x35c   : > { %v11217_v36 = vpop.eup %8092 }
 0x35d   : > { %v11219_v61 = vpop.eup %8094  ;;  %v7840_v41 = vpop.permute.xlu1 %7839  ;;  %1144 = vadd.xlane.f32.xlu1 %v14665_v51 }
 0x35e   : > { %v7842_v5 = vunpack.i.h.bf16 %v7840_v41  ;;  %v7841_v43 = vunpack.i.l.bf16 %v7840_v41  ;;  %v11224_v33 = vadd.f32 %v11219_v61, %v11217_v36 }
 0x360   : > { %14666 = vst [vmem:[#allocation10_spill] sm:$0xff] %v11224_v33  ;;  %v7300_v37 = vpack.c.bf16 %v7842_v5, %v7841_v43  ;;  %v14674_v43 = vld [vmem:[#allocation47_spill] sm:$0xff]  ;;  %v14675_v33 = vld [vmem:[#allocation48_spill] sm:$0xff] }
 0x361   : > { %2194 = vmax.xlane.f32.xlu1 %v14669_v16  ;;  %v14676_v23 = vmax.f32 %v14674_v43, %v14675_v33 }
 0x362   : > { %7301 = vmatpush1.bf16.msra.mxu1 %v7300_v37 }
 0x363   : > { %7302 = vmatprep.subr.bf16.mxu1 %v14364_v25 }
 0x365   : > { %1150 = vadd.xlane.f32.xlu1 %v14670_v60  ;;  %v14678_v60 = vld [vmem:[#allocation58_spill] sm:$0xff] }
 0x366   : > { %v14679_v62 = vmax.f32 %v14677_v48, %v14678_v60  ;;  %v14688_v48 = vld [vmem:[#allocation94_spill] sm:$0xff] }
 0x369   : > { %2200 = vmax.xlane.f32.xlu1 %v14673_v46 }
 0x36d   : > { %v884_v51 = vpop.xlane.xlu0 %883  ;;  %1156 = vadd.xlane.f32.xlu1 %v11042_v9 }
 0x36e   : > { %v960_v41 = vsub.f32 %v14611_v12, %v884_v51  ;;  %v961_v5 = vsub.f32 %v14612_v6, %v884_v51  ;;  %2161 = vmax.xlane.f32.xlu0 %v14676_v23 }
 0x370   : > { %v1060_v16 = vmul.f32 1.442695, %v960_v41  ;;  %v1062_v37 = vmul.f32 1.442695, %v961_v5  ;;  %v14690_v41 = vld [vmem:[#allocation45_spill] sm:$0xff] }
 0x371   : > { %v890_v34 = vpop.xlane.xlu0 %889  ;;  %2206 = vmax.xlane.f32.xlu1 %v14679_v62 }
 0x372   : > { %8096 = vpow2.f32 %v1060_v16  ;;  %v964_v46 = vsub.f32 %v14617_v31, %v890_v34  ;;  %v965_v9 = vsub.f32 %v14618_v45, %v890_v34  ;;  %1117 = vadd.xlane.f32.xlu0 %v14680_v59  ;;  %v11246_v12 = vpop.f32.mrb[202].mxu0  ;;  %v14683_v31 = vld [vmem:[#allocation43_spill] sm:$0xff]  ;;  %v14684_v34 = vld [vmem:[#allocation4_spill] sm:$0xff]  ;;  %v14685_v59 = vld [vmem:[#allocation66_spill] sm:$0xff] }
 0x373   : > { %14681 = vst [vmem:[#allocation60_spill] sm:$0xff] %v11246_v12  ;;  %8098 = vpow2.f32 %v1062_v37  ;;  %v11248_v6 = vpop.f32.mrb[203].mxu0  ;;  %v14686_v16 = vmax.f32 %v14684_v34, %v14685_v59 }
 0x374   : > { %14682 = vst [vmem:[#allocation143_spill] sm:$0xff] %v11248_v6  ;;  %v1068_v23 = vmul.f32 1.442695, %v964_v46  ;;  %v1070_v51 = vmul.f32 1.442695, %v965_v9  ;;  %v14687_v9 = vld [vmem:[#allocation93_spill] sm:$0xff] }
 0x375   : > { %v896_v5 = vpop.xlane.xlu0 %895  ;;  %1162 = vadd.xlane.f32.xlu1 %v11124_v54  ;;  %v14689_v33 = vmax.f32 %v14687_v9, %v14688_v48  ;;  %v14698_v48 = vld [vmem:[#allocation97_spill] sm:$0xff] }
 0x376   : > { %8100 = vpow2.f32 %v1068_v23  ;;  %v968_v62 = vsub.f32 %v14622_v27, %v896_v5  ;;  %v969_v45 = vsub.f32 %v14683_v31, %v896_v5  ;;  %2167 = vmax.xlane.f32.xlu0 %v14686_v16  ;;  %v14691_v23 = vld [vmem:[#allocation74_spill] sm:$0xff]  ;;  %v14692_v27 = vld [vmem:[#allocation88_spill] sm:$0xff] }
 0x377   : > { %8102 = vpow2.f32 %v1070_v51 }
 0x378   : > { %v1076_v37 = vmul.f32 1.442695, %v968_v62  ;;  %v1078_v60 = vmul.f32 1.442695, %v969_v45  ;;  %v14694_v45 = vld [vmem:[#allocation78_spill] sm:$0xff] }
 0x379   : > { %v902_v46 = vpop.xlane.xlu0 %901  ;;  %2212 = vmax.xlane.f32.xlu1 %v14689_v33 }
 0x37a   : > { %8104 = vpow2.f32 %v1076_v37  ;;  %v972_v54 = vsub.f32 %v14690_v41, %v902_v46  ;;  %v973_v6 = vsub.f32 %v14691_v23, %v902_v46  ;;  %1123 = vadd.xlane.f32.xlu0 %v14692_v27  ;;  %v14695_v37 = vld [vmem:[#allocation68_spill] sm:$0xff]  ;;  %v14696_v46 = vld [vmem:[#allocation71_spill] sm:$0xff] }
 0x37b   : > { %8106 = vpow2.f32 %v1078_v60  ;;  %v14697_v23 = vmax.f32 %v14695_v37, %v14696_v46 }
 0x37c   : > { %v8097_v5 = vpop.eup %8096  ;;  %v1084_v31 = vmul.f32 1.442695, %v972_v54  ;;  %v1086_v12 = vmul.f32 1.442695, %v973_v6 }
 0x37d   : > { %v8099_v16 = vpop.eup %8098  ;;  %v908_v51 = vpop.xlane.xlu0 %907  ;;  %1168 = vadd.xlane.f32.xlu1 %v11176_v10 }
 0x37e   : > { %8108 = vpow2.f32 %v1084_v31  ;;  %v11265_v62 = vpop.f32.mrb[20].mxu1  ;;  %1366 = vmatprep.mubr.f32.mxu1 %v8099_v16  ;;  %v976_v33 = vsub.f32 %v14632_v42, %v908_v51  ;;  %v977_v41 = vsub.f32 %v14694_v45, %v908_v51  ;;  %2173 = vmax.xlane.f32.xlu0 %v14697_v23  ;;  %v11272_v60 = vadd.f32 %v8099_v16, %v8097_v5  ;;  %v14699_v42 = vld [vmem:[#allocation98_spill] sm:$0xff]  ;;  %v14702_v23 = vld [vmem:[#allocation63_spill] sm:$0xff] }
 0x37f   : > { %14693 = vst [vmem:[#allocation7_spill] sm:$0xff] %v11265_v62  ;;  %8110 = vpow2.f32 %v1086_v12  ;;  %v1330_v6 = vpop.f32.mrb[21].mxu1  ;;  %1367 = vmatmul.mubr.f32.gmra.mrb[36].mxu1 %v8097_v5  ;;  %v14700_v9 = vmax.f32 %v14698_v48, %v14699_v42  ;;  %v14701_v45 = vld [vmem:[#allocation82_spill] sm:$0xff] }
 0x380   : > { %v8101_v54 = vpop.eup %8100  ;;  %v1092_v27 = vmul.f32 1.442695, %v976_v33  ;;  %v1094_v10 = vmul.f32 1.442695, %v977_v41  ;;  %1371 = vmatprep.mubr.f32.mxu1 %v11182_v11  ;;  %v14705_v42 = vld [vmem:[#allocation50_spill] sm:$0xff] }
 0x381   : > { %v8103_v31 = vpop.eup %8102  ;;  %v914_v62 = vpop.xlane.xlu0 %913  ;;  %2218 = vmax.xlane.f32.xlu1 %v14700_v9 }
 0x382   : > { %8112 = vpow2.f32 %v1092_v27  ;;  %v11278_v51 = vpop.f32.mrb[22].mxu1  ;;  %v980_v16 = vsub.f32 %v14637_v4, %v914_v62  ;;  %v981_v12 = vsub.f32 %v14701_v45, %v914_v62  ;;  %1129 = vadd.xlane.f32.xlu0 %v14702_v23  ;;  %v11283_v5 = vadd.f32 %v8103_v31, %v8101_v54  ;;  %v14703_v62 = vld [vmem:[#allocation85_spill] sm:$0xff] }
 0x383   : > { %8114 = vpow2.f32 %v1094_v10  ;;  %v1335_v33 = vpop.f32.mrb[23].mxu1  ;;  %1372 = vmatmul.mubr.f32.gmra.mrb[38].mxu1 %v11178_v39  ;;  %v14704_v23 = vld [vmem:[#allocation49_spill] sm:$0xff] }
 0x384   : > { %v8105_v11 = vpop.eup %8104  ;;  %v1100_v41 = vmul.f32 1.442695, %v980_v16  ;;  %v1102_v6 = vmul.f32 1.442695, %v981_v12  ;;  %1376 = vmatprep.mubr.f32.mxu1 %v8103_v31  ;;  %v14706_v48 = vmax.f32 %v14704_v23, %v14705_v42  ;;  %v14707_v33 = vld [vmem:[#allocation6_spill] sm:$0xff] }
 0x385   : > { %v8107_v9 = vpop.eup %8106  ;;  %v920_v27 = vpop.xlane.xlu0 %919  ;;  %1174 = vadd.xlane.f32.xlu1 %v11191_v40 }
 0x386   : > { %8116 = vpow2.f32 %v1100_v41  ;;  %v984_v4 = vsub.f32 %v10280_v35, %v920_v27  ;;  %v985_v45 = vsub.f32 %v14703_v62, %v920_v27  ;;  %2179 = vmax.xlane.f32.xlu0 %v14706_v48  ;;  %v11292_v10 = vadd.f32 %v8107_v9, %v8105_v11  ;;  %v14708_v41 = vld [vmem:[#allocation101_spill] sm:$0xff]  ;;  %v14710_v62 = vld [vmem:[#allocation92_spill] sm:$0xff] }
 0x387   : > { %8118 = vpow2.f32 %v1102_v6  ;;  %1377 = vmatmul.mubr.f32.gmra.mrb[40].mxu1 %v8101_v54  ;;  %v14709_v35 = vmax.f32 %v14707_v33, %v14708_v41 }
 0x388   : > { %v8109_v39 = vpop.eup %8108  ;;  %v1108_v16 = vmul.f32 1.442695, %v984_v4  ;;  %v1110_v31 = vmul.f32 1.442695, %v985_v45  ;;  %1381 = vmatprep.mubr.f32.mxu1 %v11195_v28 }
 0x389   : > { %v8111_v12 = vpop.eup %8110  ;;  %v2144_v40 = vpop.xlane.xlu0 %2143  ;;  %2224 = vmax.xlane.f32.xlu1 %v14709_v35  ;;  %v14711_v35 = vld [vmem:[#allocation80_spill] sm:$0xff] }
 0x38a   : > { %8120 = vpow2.f32 %v1108_v16  ;;  %v2238_v27 = vsub.f32 %v10484_v47, %v2144_v40  ;;  %v2239_v48 = vsub.f32 %v10487_v57, %v2144_v40  ;;  %1135 = vadd.xlane.f32.xlu0 %v14710_v62  ;;  %v11301_v6 = vadd.f32 %v8111_v12, %v8109_v39  ;;  %v14713_v40 = vld [vmem:[#allocation51_spill] sm:$0xff] }
 0x38b   : > { %8122 = vpow2.f32 %v1110_v31  ;;  %1382 = vmatmul.mubr.f32.gmra.mrb[42].mxu1 %v11193_v15  ;;  %v979_v16 = vsub.f32 %v14711_v35, %v11184_v55  ;;  %v14712_v15 = vld [vmem:[#allocation72_spill] sm:$0xff] }
 0x38c   : > { %v11304_v54 = vpop.eup %8112  ;;  %v2302_v28 = vmul.f32 1.442695, %v2238_v27  ;;  %v2304_v4 = vmul.f32 1.442695, %v2239_v48  ;;  %1386 = vmatprep.mubr.f32.mxu1 %v8107_v9  ;;  %v14714_v27 = vmax.f32 %v14712_v15, %v14713_v40  ;;  %v14716_v48 = vld [vmem:[#allocation79_spill] sm:$0xff]  ;;  %v14718_v40 = vld [vmem:[#allocation105_spill] sm:$0xff] }
 0x38d   : > { %v8115_v45 = vpop.eup %8114  ;;  %v4758_v41 = vpop.permute.xlu0 %4757  ;;  %1180 = vadd.xlane.f32.xlu1 %v11202_v49  ;;  %v978_v62 = vsub.f32 %v14716_v48, %v11184_v55  ;;  %v1098_v35 = vmul.f32 1.442695, %v979_v16 }
 0x38e   : > { %v2147_v47 = vpop.xlane.xlu1 %2146  ;;  %8124 = vpow2.f32 %v2302_v28  ;;  %7067 = vmatprep.mubr.msk.f32.mxu0 %vm378_vm0, %v4758_v41  ;;  %2185 = vmax.xlane.f32.xlu0 %v14714_v27  ;;  %v11316_v9 = vadd.f32 %v8115_v45, %v11304_v54 }
 0x38f   : > { %v2240_v57 = vsub.f32 %v10497_v19, %v2147_v47  ;;  %v2241_v31 = vsub.f32 %v10499_v58, %v2147_v47  ;;  %8126 = vpow2.f32 %v2304_v4  ;;  %1387 = vmatmul.mubr.f32.gmra.mrb[44].mxu1 %v8105_v11  ;;  %7068 = vmatmul.mubr.msk.f32.gmra.mrb[210].mxu0 %vm378_vm0, %v4758_v41  ;;  %v14717_v47 = vld [vmem:[#allocation104_spill] sm:$0xff]  ;;  %v14720_v4 = vld [vmem:[#allocation114_spill] sm:$0xff] }
 0x390   : > { %14715 = vst [vmem:[#allocation47_spill] sm:$0xff] %v11316_v9  ;;  %v8117_v49 = vpop.eup %8116  ;;  %1391 = vmatprep.mubr.f32.mxu1 %v11206_v7  ;;  %v14719_v27 = vmax.f32 %v14717_v47, %v14718_v40 }
 0x391   : > { %v2306_v19 = vmul.f32 1.442695, %v2240_v57  ;;  %v2308_v28 = vmul.f32 1.442695, %v2241_v31  ;;  %v8119_v58 = vpop.eup %8118  ;;  %v1096_v57 = vmul.f32 1.442695, %v978_v62 }
 0x392   : > { %2230 = vmax.xlane.f32.xlu1 %v14719_v27  ;;  %v7845_v15 = vpop.permute.xlu1 %7844  ;;  %1141 = vadd.xlane.f32.xlu0 %v14720_v4  ;;  %v11326_v9 = vadd.f32 %v8119_v58, %v8117_v49  ;;  %v14722_v31 = vld [vmem:[#allocation84_spill] sm:$0xff]  ;;  %v14723_v27 = vld [vmem:[#allocation75_spill] sm:$0xff]  ;;  %v14728_v4 = vld [vmem:[#allocation141_spill] sm:$0xff] }
 0x393   : > { %8128 = vpow2.f32 %v2306_v19  ;;  %v7847_v11 = vunpack.i.h.bf16 %v7845_v15  ;;  %v7846_v41 = vunpack.i.l.bf16 %v7845_v15  ;;  %1392 = vmatmul.mubr.f32.gmra.mrb[46].mxu1 %v11204_v22  ;;  %v983_v48 = vsub.f32 %v14722_v31, %v11197_v53  ;;  %v14724_v19 = vld [vmem:[#allocation77_spill] sm:$0xff]  ;;  %v14731_v31 = vld [vmem:[#allocation55_spill] sm:$0xff] }
 0x394   : > { %14721 = vst [vmem:[#allocation5_spill] sm:$0xff] %v11326_v9  ;;  %8130 = vpow2.f32 %v2308_v28  ;;  %v8121_v55 = vpop.eup %8120  ;;  %1396 = vmatprep.mubr.f32.mxu1 %v8111_v12  ;;  %v14725_v40 = vmax.f32 %v14723_v27, %v14724_v19  ;;  %v14727_v12 = vld [vmem:[#allocation83_spill] sm:$0xff] }
 0x395   : > { %v7303_v7 = vpack.c.bf16 %v7847_v11, %v7846_v41  ;;  %v8123_v16 = vpop.eup %8122  ;;  %8132 = vpow2.f32 %v1098_v35  ;;  %v982_v62 = vsub.f32 %v14727_v12, %v11197_v53  ;;  %v1106_v35 = vmul.f32 1.442695, %v983_v48  ;;  %v14732_v53 = vld [vmem:[#allocation56_spill] sm:$0xff] }
 0x396   : > { %2191 = vmax.xlane.f32.xlu0 %v14725_v40  ;;  %v11334_v15 = vadd.f32 %v8123_v16, %v8121_v55  ;;  %8134 = vpow2.f32 %v1096_v57  ;;  %v14730_v57 = vld [vmem:[#allocation87_spill] sm:$0xff]  ;;  %v14733_v12 = vmax.f32 %v14731_v31, %v14732_v53 }
 0x397   : > { %7304 = vmatpush1.bf16.msra.mxu1 %v7303_v7  ;;  %v1104_v41 = vmul.f32 1.442695, %v982_v62  ;;  %8136 = vpow2.f32 %v1106_v35  ;;  %v987_v7 = vsub.f32 %v14730_v57, %v11208_v13  ;;  %v14737_v57 = vld [vmem:[#allocation12_spill] sm:$0xff] }
 0x398   : > { %14726 = vst [vmem:[#allocation43_spill] sm:$0xff] %v11334_v15  ;;  %1397 = vmatmul.mubr.f32.gmra.mrb[48].mxu1 %v8109_v39  ;;  %7353 = vmatprep.subr.bf16.mxu1 %v14364_v25  ;;  %v8125_v22 = vpop.eup %8124 }
 0x399   : > { %1401 = vmatprep.mubr.f32.mxu1 %v11219_v61  ;;  %v8127_v28 = vpop.eup %8126  ;;  %8138 = vpow2.f32 %v1104_v41  ;;  %v14739_v41 = vld [vmem:[#allocation91_spill] sm:$0xff] }
 0x39a   : > { %1147 = vadd.xlane.f32.xlu0 %v14728_v4  ;;  %v11341_v11 = vadd.f32 %v8127_v28, %v8125_v22  ;;  %v14736_v4 = vld [vmem:[#allocation159_spill] sm:$0xff] }
 0x39c   : > { %14729 = vst [vmem:[#allocation4_spill] sm:$0xff] %v11341_v11  ;;  %1402 = vmatmul.mubr.f32.gmra.mrb[50].mxu1 %v11217_v36  ;;  %v14735_v36 = vld [vmem:[#allocation86_spill] sm:$0xff]  ;;  %v14754_v11 = vld [vmem:[#allocation100_spill] sm:$0xff] }
 0x39d   : > { %v8129_v40 = vpop.eup %8128  ;;  %1406 = vmatprep.mubr.f32.mxu1 %v8115_v45  ;;  %v986_v62 = vsub.f32 %v14735_v36, %v11208_v13  ;;  %v1114_v45 = vmul.f32 1.442695, %v987_v7 }
 0x39e   : > { %v8131_v39 = vpop.eup %8130  ;;  %2197 = vmax.xlane.f32.xlu0 %v14733_v12 }
 0x39f   : > { %v11349_v61 = vadd.f32 %v8131_v39, %v8129_v40  ;;  %v11351_v48 = vpop.eup %8132  ;;  %v1112_v12 = vmul.f32 1.442695, %v986_v62  ;;  %8140 = vpow2.f32 %v1114_v45 }
 0x3a0   : > { %1407 = vmatmul.mubr.f32.gmra.mrb[52].mxu1 %v11304_v54  ;;  %v11357_v35 = vpop.eup %8134  ;;  %v14738_v54 = vld [vmem:[#allocation90_spill] sm:$0xff] }
 0x3a1   : > { %14734 = vst [vmem:[#allocation66_spill] sm:$0xff] %v11349_v61  ;;  %1411 = vmatprep.mubr.f32.mxu1 %v11351_v48  ;;  %v14740_v25 = vmax.f32 %v14738_v54, %v14739_v41  ;;  %v11366_v13 = vpop.eup %8136  ;;  %8142 = vpow2.f32 %v1112_v12 }
 0x3a2   : > { %1153 = vadd.xlane.f32.xlu0 %v14736_v4  ;;  %14741 = vst [vmem:[#allocation45_spill] sm:$0xff] %v11366_v13  ;;  %v14751_v4 = vld [vmem:[#allocation96_spill] sm:$0xff] }
 0x3a3   : > { %4763 = vrot.lane.b32.xlu1 %v14737_v57, %s8854_s25  ;;  %v11375_v62 = vpop.eup %8138 }
 0x3a4   : > { %1412 = vmatmul.mubr.f32.gmra.mrb[54].mxu1 %v11357_v35  ;;  %14744 = vst [vmem:[#allocation78_spill] sm:$0xff] %v11375_v62 }
 0x3a5   : > { %1416 = vmatprep.mubr.f32.mxu1 %v8119_v58  ;;  %v14746_v58 = vld [vmem:[#allocation59_spill] sm:$0xff] }
 0x3a6   : > { %2203 = vmax.xlane.f32.xlu0 %v14740_v25  ;;  %v14745_v25 = vld [vmem:[#allocation33_spill] sm:$0xff] }
 0x3a7   : > { %v11368_v7 = vpop.f32.mrb[204].mxu0 }
 0x3a8   : > { %1417 = vmatmul.mubr.f32.gmra.mrb[56].mxu1 %v8117_v49  ;;  %14742 = vst [vmem:[#allocation74_spill] sm:$0xff] %v11368_v7  ;;  %v11371_v36 = vpop.f32.mrb[205].mxu0  ;;  %v14747_v49 = vmax.f32 %v14745_v25, %v14746_v58 }
 0x3a9   : > { %1421 = vmatprep.mubr.f32.mxu1 %v11366_v13  ;;  %14743 = vst [vmem:[#allocation88_spill] sm:$0xff] %v11371_v36  ;;  %v11382_v45 = vpop.eup %8140 }
 0x3aa   : > { %1159 = vadd.xlane.f32.xlu0 %v11120_v63  ;;  %14748 = vst [vmem:[#allocation68_spill] sm:$0xff] %v11382_v45 }
 0x3ab   : > { %v11385_v57 = vpop.eup %8142 }
 0x3ac   : > { %1422 = vmatmul.mubr.f32.gmra.mrb[58].mxu1 %v11375_v62  ;;  %14749 = vst [vmem:[#allocation71_spill] sm:$0xff] %v11385_v57 }
 0x3ad   : > { %1426 = vmatprep.mubr.f32.mxu1 %v8123_v16  ;;  %v14750_v16 = vld [vmem:[#allocation95_spill] sm:$0xff] }
 0x3ae   : > { %2209 = vmax.xlane.f32.xlu0 %v14747_v49  ;;  %v14752_v36 = vmax.f32 %v14750_v16, %v14751_v4 }
 0x3b0   : > { %1427 = vmatmul.mubr.f32.gmra.mrb[60].mxu1 %v8121_v55 }
 0x3b1   : > { %1431 = vmatprep.mubr.f32.mxu1 %v11382_v45 }
 0x3b2   : > { %1165 = vadd.xlane.f32.xlu0 %v11169_v18  ;;  %v14753_v18 = vld [vmem:[#allocation99_spill] sm:$0xff] }
 0x3b3   : > { %v11388_v12 = vpop.f32.mrb[24].mxu1  ;;  %v14755_v61 = vmax.f32 %v14753_v18, %v14754_v11 }
 0x3b4   : > { %1432 = vmatmul.mubr.f32.gmra.mrb[62].mxu1 %v11385_v57  ;;  %v1340_v63 = vpop.f32.mrb[25].mxu1 }
 0x3b5   : > { %2718 = vmatprep.mubr.f32.mxu1 %v8127_v28 }
 0x3b6   : > { %2215 = vmax.xlane.f32.xlu0 %v14752_v36 }
 0x3b7   : > { %v11394_v49 = vpop.f32.mrb[26].mxu1 }
 0x3b8   : > { %2719 = vmatmul.mubr.f32.vlgmr.msra.gmra.mrb[64].mxu1 %v8125_v22  ;;  %v1345_v55 = vpop.f32.mrb[27].mxu1 }
 0x3b9   : > { %2723 = vmatprep.mubr.f32.mxu1 %v8131_v39 }
 0x3ba   : > { %1171 = vadd.xlane.f32.xlu0 %v11272_v60 }
 0x3bc   : > { %2724 = vmatmul.mubr.f32.gmra.mrb[66].mxu1 %v8129_v40 }
 0x3be   : > { %v2150_v7 = vpop.xlane.xlu0 %2149  ;;  %2221 = vmax.xlane.f32.xlu0 %v14755_v61 }
 0x3bf   : > { %v2242_v63 = vsub.f32 %v10509_v8, %v2150_v7  ;;  %v2243_v28 = vsub.f32 %v10511_v32, %v2150_v7 }
 0x3c1   : > { %v2310_v15 = vmul.f32 1.442695, %v2242_v63  ;;  %v2312_v57 = vmul.f32 1.442695, %v2243_v28  ;;  %v14756_v63 = vld [vmem:[#allocation102_spill] sm:$0xff]  ;;  %v14757_v28 = vld [vmem:[#allocation103_spill] sm:$0xff] }
 0x3c2   : > { %v2153_v36 = vpop.xlane.xlu0 %2152  ;;  %1177 = vadd.xlane.f32.xlu0 %v11283_v5  ;;  %v2159_v22 = vpop.xlane.xlu1 %2158  ;;  %v14758_v9 = vmax.f32 %v14756_v63, %v14757_v28 }
 0x3c3   : > { %8144 = vpow2.f32 %v2310_v15  ;;  %v2244_v39 = vsub.f32 %v10519_v14, %v2153_v36  ;;  %v2245_v60 = vsub.f32 %v10523_v0, %v2153_v36  ;;  %v2248_v40 = vsub.f32 %v10543_v3, %v2159_v22 }
 0x3c4   : > { %8146 = vpow2.f32 %v2312_v57  ;;  %v2249_v61 = vsub.f32 %v10545_v1, %v2159_v22 }
 0x3c5   : > { %v2314_v55 = vmul.f32 1.442695, %v2244_v39  ;;  %v2316_v8 = vmul.f32 1.442695, %v2245_v60  ;;  %v2322_v45 = vmul.f32 1.442695, %v2248_v40 }
 0x3c6   : > { %v2324_v32 = vmul.f32 1.442695, %v2249_v61  ;;  %v2156_v7 = vpop.xlane.xlu0 %2155  ;;  %2227 = vmax.xlane.f32.xlu0 %v14758_v9  ;;  %v2165_v5 = vpop.xlane.xlu1 %2164  ;;  %v14760_v39 = vld [vmem:[#allocation109_spill] sm:$0xff] }
 0x3c7   : > { %1186 = vadd.xlane.f32.xlu1 %v11215_v24  ;;  %8148 = vpow2.f32 %v2314_v55  ;;  %v2246_v14 = vsub.f32 %v10533_v17, %v2156_v7  ;;  %v2247_v0 = vsub.f32 %v10535_v38, %v2156_v7  ;;  %v2252_v3 = vsub.f32 %v10564_v20, %v2165_v5  ;;  %v14759_v24 = vld [vmem:[#allocation108_spill] sm:$0xff] }
 0x3c8   : > { %8150 = vpow2.f32 %v2316_v8  ;;  %v2253_v1 = vsub.f32 %v10566_v50, %v2165_v5  ;;  %v14761_v60 = vmax.f32 %v14759_v24, %v14760_v39  ;;  %v14762_v50 = vld [vmem:[#allocation106_spill] sm:$0xff] }
 0x3c9   : > { %8152 = vpow2.f32 %v2322_v45  ;;  %v2318_v15 = vmul.f32 1.442695, %v2246_v14  ;;  %v2320_v57 = vmul.f32 1.442695, %v2247_v0  ;;  %v2330_v36 = vmul.f32 1.442695, %v2252_v3 }
 0x3ca   : > { %8154 = vpow2.f32 %v2324_v32  ;;  %v2332_v22 = vmul.f32 1.442695, %v2253_v1  ;;  %v4760_v9 = vpop.permute.xlu0 %4759  ;;  %1183 = vadd.xlane.f32.xlu0 %v11292_v10  ;;  %v1121_v17 = vpop.xlane.xlu1 %1120  ;;  %v14763_v45 = vld [vmem:[#allocation107_spill] sm:$0xff] }
 0x3cb   : > { %2236 = vmax.xlane.f32.xlu1 %v14761_v60  ;;  %8156 = vpow2.f32 %v2318_v15  ;;  %7069 = vmatprep.mubr.msk.f32.mxu0 %vm378_vm0, %v4760_v9  ;;  %v14764_v40 = vmax.f32 %v14762_v50, %v14763_v45  ;;  %v14788_v45 = vld [vmem:[#allocation57_spill] sm:$0xff]  ;;  %v14789_v50 = vld [vmem:[#allocation58_spill] sm:$0xff] }
 0x3cc   : > { %8158 = vpow2.f32 %v2320_v57  ;;  %7070 = vmatmul.mubr.msk.f32.gmra.mrb[212].mxu0 %vm378_vm0, %v4760_v9 }
 0x3cd   : > { %v8145_v38 = vpop.eup %8144  ;;  %8160 = vpow2.f32 %v2330_v36 }
 0x3ce   : > { %v8147_v20 = vpop.eup %8146  ;;  %8162 = vpow2.f32 %v2332_v22  ;;  %2233 = vmax.xlane.f32.xlu0 %v14764_v40  ;;  %v2171_v10 = vpop.xlane.xlu1 %2170 }
 0x3cf   : > { %8164 = vrcp.f32 %v1121_v17  ;;  %v2256_v61 = vsub.f32 %v10594_v44, %v2171_v10  ;;  %v2257_v55 = vsub.f32 %v10596_v56, %v2171_v10  ;;  %2728 = vmatprep.mubr.f32.mxu1 %v8147_v20  ;;  %v11426_v8 = vadd.f32 %v8147_v20, %v8145_v38 }
 0x3d0   : > { %2729 = vmatmul.mubr.f32.gmra.mrb[68].mxu1 %v8145_v38 }
 0x3d1   : > { %14765 = vst [vmem:[#allocation82_spill] sm:$0xff] %v11426_v8  ;;  %v8149_v32 = vpop.eup %8148  ;;  %v2338_v7 = vmul.f32 1.442695, %v2256_v61  ;;  %v2340_v5 = vmul.f32 1.442695, %v2257_v55 }
 0x3d2   : > { %v8151_v14 = vpop.eup %8150  ;;  %v1127_v0 = vpop.xlane.xlu1 %1126 }
 0x3d3   : > { %v8153_v3 = vpop.eup %8152  ;;  %8166 = vpow2.f32 %v2338_v7  ;;  %2733 = vmatprep.mubr.f32.mxu1 %v8151_v14  ;;  %v11428_v1 = vadd.f32 %v8151_v14, %v8149_v32 }
 0x3d4   : > { %v8155_v15 = vpop.eup %8154  ;;  %8168 = vpow2.f32 %v2340_v5  ;;  %2734 = vmatmul.mubr.f32.gmra.mrb[70].mxu1 %v8149_v32 }
 0x3d5   : > { %14766 = vst [vmem:[#allocation63_spill] sm:$0xff] %v11428_v1  ;;  %v8157_v44 = vpop.eup %8156  ;;  %8170 = vrcp.f32 %v1127_v0  ;;  %v11430_v56 = vadd.f32 %v8155_v15, %v8153_v3 }
 0x3d6   : > { %v8159_v57 = vpop.eup %8158  ;;  %v2177_v36 = vpop.xlane.xlu1 %2176 }
 0x3d7   : > { %14767 = vst [vmem:[#allocation85_spill] sm:$0xff] %v11430_v56  ;;  %v11432_v22 = vpop.eup %8160  ;;  %v2260_v9 = vsub.f32 %v10614_v52, %v2177_v36  ;;  %v2261_v60 = vsub.f32 %v10616_v29, %v2177_v36  ;;  %2738 = vmatprep.mubr.f32.mxu1 %v8159_v57  ;;  %v11436_v38 = vadd.f32 %v8159_v57, %v8157_v44  ;;  %v14770_v52 = vld [vmem:[#allocation14_spill] sm:$0xff] }
 0x3d8   : > { %v11438_v20 = vpop.eup %8162  ;;  %2739 = vmatmul.mubr.f32.gmra.mrb[72].mxu1 %v8157_v44 }
 0x3d9   : > { %14768 = vst [vmem:[#allocation49_spill] sm:$0xff] %v11436_v38  ;;  %v8165_v40 = vpop.eup %8164  ;;  %v2346_v10 = vmul.f32 1.442695, %v2260_v9  ;;  %v2348_v61 = vmul.f32 1.442695, %v2261_v60  ;;  %2743 = vmatprep.mubr.f32.mxu1 %v8155_v15  ;;  %v11442_v55 = vadd.f32 %v11438_v20, %v11432_v22 }
 0x3da   : > { %v1470_v32 = vmul.f32 %v8165_v40, %v1121_v17  ;;  %v1133_v7 = vpop.xlane.xlu1 %1132  ;;  %v14776_v17 = vld [vmem:[#allocation62_spill] sm:$0xff] }
 0x3db   : > { %14769 = vst [vmem:[#allocation50_spill] sm:$0xff] %v11442_v55  ;;  %8172 = vpow2.f32 %v2346_v10 }
 0x3dc   : > { %4767 = vrot.lane.b32.xlu1 %v14770_v52, %s8854_s25  ;;  %v1502_v29 = vsub.f32 2.0, %v1470_v32  ;;  %8174 = vpow2.f32 %v2348_v61  ;;  %2744 = vmatmul.mubr.f32.gmra.mrb[74].mxu1 %v8153_v3  ;;  %v11446_v5 = vpop.f32.mrb[206].mxu0  ;;  %v14774_v32 = vld [vmem:[#allocation136_spill] sm:$0xff] }
 0x3dd   : > { %14771 = vst [vmem:[#allocation6_spill] sm:$0xff] %v11446_v5  ;;  %v11448_v14 = vpop.eup %8166  ;;  %8176 = vrcp.f32 %v1133_v7  ;;  %v11450_v44 = vpop.f32.mrb[207].mxu0 }
 0x3de   : > { %14772 = vst [vmem:[#allocation92_spill] sm:$0xff] %v11450_v44  ;;  %v11452_v15 = vpop.eup %8168  ;;  %v1534_v57 = vmul.f32 %v8165_v40, %v1502_v29  ;;  %v2183_v36 = vpop.xlane.xlu1 %2182 }
 0x3df   : > { %v8171_v9 = vpop.eup %8170  ;;  %v2264_v60 = vsub.f32 %v10636_v2, %v2183_v36  ;;  %v2265_v10 = vsub.f32 %v10640_v21, %v2183_v36  ;;  %v11460_v3 = vadd.f32 %v11452_v15, %v11448_v14  ;;  %v14775_v2 = vld [vmem:[#allocation13_spill] sm:$0xff] }
 0x3e0   : > { %v1472_v61 = vmul.f32 %v8171_v9, %v1127_v0  ;;  %v1566_v52 = vmul.f32 %v1534_v57, %v14774_v32 }
 0x3e1   : > { %14773 = vst [vmem:[#allocation80_spill] sm:$0xff] %v11460_v3  ;;  %v2354_v55 = vmul.f32 1.442695, %v2264_v60  ;;  %v2356_v38 = vmul.f32 1.442695, %v2265_v10 }
 0x3e2   : > { %v1504_v56 = vsub.f32 2.0, %v1472_v61  ;;  %v1139_v40 = vpop.xlane.xlu1 %1138  ;;  %1598 = vst.msk [vmem:[#allocation2 + $0x8] sm:$0xff] %vm378_vm0, %v1566_v52  ;;  %v14777_v61 = vld [vmem:[#allocation52_spill] sm:$0xff] }
 0x3e3   : > { %8178 = vpow2.f32 %v2354_v55 }
 0x3e4   : > { %v1536_v29 = vmul.f32 %v8171_v9, %v1504_v56  ;;  %8180 = vpow2.f32 %v2356_v38  ;;  %4761 = vrot.lane.b32.xlu0 %v14775_v2, %s8854_s25 }
 0x3e5   : > { %v11466_v21 = vpop.eup %8172  ;;  %8182 = vrcp.f32 %v1139_v40 }
 0x3e6   : > { %v11468_v36 = vpop.eup %8174  ;;  %v2189_v0 = vpop.xlane.xlu1 %2188  ;;  %v1568_v57 = vmul.f32 %v1536_v29, %v14776_v17 }
 0x3e7   : > { %v8177_v60 = vpop.eup %8176  ;;  %v2268_v10 = vsub.f32 %v10651_v30, %v2189_v0  ;;  %v2269_v32 = vsub.f32 %v14777_v61, %v2189_v0  ;;  %v11475_v56 = vadd.f32 %v11468_v36, %v11466_v21 }
 0x3e8   : > { %v1474_v38 = vmul.f32 %v8177_v60, %v1133_v7  ;;  %v11477_v55 = vpop.f32.mrb[28].mxu1  ;;  %1600 = vst.msk [vmem:[#allocation2 + $0x18] sm:$0xff] %vm378_vm0, %v1568_v57 }
 0x3e9   : > { %14778 = vst [vmem:[#allocation79_spill] sm:$0xff] %v11475_v56  ;;  %v2362_v9 = vmul.f32 1.442695, %v2268_v10  ;;  %v2364_v52 = vmul.f32 1.442695, %v2269_v32  ;;  %v1350_v2 = vpop.f32.mrb[29].mxu1 }
 0x3ea   : > { %v1506_v44 = vsub.f32 2.0, %v1474_v38  ;;  %v1145_v5 = vpop.xlane.xlu1 %1144  ;;  %v14779_v56 = vld [vmem:[#allocation39_spill] sm:$0xff]  ;;  %v14780_v10 = vld [vmem:[#allocation53_spill] sm:$0xff]  ;;  %v14781_v2 = vld [vmem:[#allocation54_spill] sm:$0xff] }
 0x3eb   : > { %8184 = vpow2.f32 %v2362_v9 }
 0x3ec   : > { %v1538_v17 = vmul.f32 %v8177_v60, %v1506_v44  ;;  %8186 = vpow2.f32 %v2364_v52  ;;  %v11480_v30 = vpop.f32.mrb[30].mxu1 }
 0x3ed   : > { %v11482_v29 = vpop.eup %8178  ;;  %8188 = vrcp.f32 %v1145_v5  ;;  %v1355_v0 = vpop.f32.mrb[31].mxu1 }
 0x3ee   : > { %v11484_v61 = vpop.eup %8180  ;;  %v2195_v7 = vpop.xlane.xlu1 %2194  ;;  %v1570_v3 = vmul.f32 %v1538_v17, %v14779_v56 }
 0x3ef   : > { %v8183_v57 = vpop.eup %8182  ;;  %v2272_v32 = vsub.f32 %v14780_v10, %v2195_v7  ;;  %v2273_v38 = vsub.f32 %v14781_v2, %v2195_v7  ;;  %v11491_v44 = vadd.f32 %v11484_v61, %v11482_v29  ;;  %v14783_v10 = vld [vmem:[#allocation168_spill] sm:$0xff] }
 0x3f0   : > { %v1476_v60 = vmul.f32 %v8183_v57, %v1139_v40  ;;  %1602 = vst.msk [vmem:[#allocation2 + $0x28] sm:$0xff] %vm378_vm0, %v1570_v3 }
 0x3f1   : > { %14782 = vst [vmem:[#allocation104_spill] sm:$0xff] %v11491_v44  ;;  %v2370_v9 = vmul.f32 1.442695, %v2272_v32  ;;  %v2372_v52 = vmul.f32 1.442695, %v2273_v38  ;;  %v14784_v44 = vld [vmem:[#allocation89_spill] sm:$0xff] }
 0x3f2   : > { %v1508_v0 = vsub.f32 2.0, %v1476_v60  ;;  %v1151_v8 = vpop.xlane.xlu1 %1150 }
 0x3f3   : > { %8190 = vpow2.f32 %v2370_v9 }
 0x3f4   : > { %v1540_v1 = vmul.f32 %v8183_v57, %v1508_v0  ;;  %8192 = vpow2.f32 %v2372_v52 }
 0x3f5   : > { %v11494_v56 = vpop.eup %8184  ;;  %8194 = vrcp.f32 %v1151_v8 }
 0x3f6   : > { %v11496_v17 = vpop.eup %8186  ;;  %v2201_v7 = vpop.xlane.xlu1 %2200  ;;  %v1572_v2 = vmul.f32 %v1540_v1, %v14783_v10 }
 0x3f7   : > { %v8189_v62 = vpop.eup %8188  ;;  %v2276_v40 = vsub.f32 %v14671_v26, %v2201_v7  ;;  %v2277_v3 = vsub.f32 %v14784_v44, %v2201_v7  ;;  %v11503_v32 = vadd.f32 %v11496_v17, %v11494_v56  ;;  %v14786_v26 = vld [vmem:[#allocation48_spill] sm:$0xff] }
 0x3f8   : > { %v1478_v38 = vmul.f32 %v8189_v62, %v1145_v5  ;;  %1604 = vst.msk [vmem:[#allocation2 + $0x38] sm:$0xff] %vm378_vm0, %v1572_v2 }
 0x3f9   : > { %14785 = vst [vmem:[#allocation114_spill] sm:$0xff] %v11503_v32  ;;  %v2378_v57 = vmul.f32 1.442695, %v2276_v40  ;;  %v2380_v60 = vmul.f32 1.442695, %v2277_v3  ;;  %v14787_v40 = vld [vmem:[#allocation172_spill] sm:$0xff] }
 0x3fa   : > { %v1510_v9 = vsub.f32 2.0, %v1478_v38  ;;  %v1157_v52 = vpop.xlane.xlu1 %1156 }
 0x3fb   : > { %8196 = vpow2.f32 %v2378_v57  ;;  %v2162_v0 = vpop.xlane.xlu0 %2161 }
 0x3fc   : > { %v1542_v13 = vmul.f32 %v8189_v62, %v1510_v9  ;;  %8198 = vpow2.f32 %v2380_v60  ;;  %v2250_v1 = vsub.f32 %v14674_v43, %v2162_v0  ;;  %v2251_v10 = vsub.f32 %v14786_v26, %v2162_v0  ;;  %v14790_v9 = vld [vmem:[#allocation10_spill] sm:$0xff] }
 0x3fd   : > { %v11508_v44 = vpop.eup %8190  ;;  %8200 = vrcp.f32 %v1157_v52 }
 0x3fe   : > { %v11510_v7 = vpop.eup %8192  ;;  %v2326_v5 = vmul.f32 1.442695, %v2250_v1  ;;  %v2328_v32 = vmul.f32 1.442695, %v2251_v10  ;;  %v2207_v2 = vpop.xlane.xlu1 %2206  ;;  %v1574_v3 = vmul.f32 %v1542_v13, %v14787_v40 }
 0x3ff   : > { %v8195_v38 = vpop.eup %8194  ;;  %v2280_v57 = vsub.f32 %v14788_v45, %v2207_v2  ;;  %v2281_v62 = vsub.f32 %v14789_v50, %v2207_v2  ;;  %v1118_v60 = vpop.xlane.xlu0 %1117  ;;  %v11518_v43 = vadd.f32 %v11510_v7, %v11508_v44 }
 0x400   : > { %1192 = vadd.xlane.f32.xlu1 %v14790_v9  ;;  %v1480_v0 = vmul.f32 %v8195_v38, %v1151_v8  ;;  %8202 = vpow2.f32 %v2326_v5  ;;  %1606 = vst.msk [vmem:[#allocation2 + $0x48] sm:$0xff] %vm378_vm0, %v1574_v3 }
 0x401   : > { %14791 = vst [vmem:[#allocation84_spill] sm:$0xff] %v11518_v43  ;;  %8204 = vpow2.f32 %v2328_v32  ;;  %v2386_v1 = vmul.f32 1.442695, %v2280_v57  ;;  %v2388_v26 = vmul.f32 1.442695, %v2281_v62 }
 0x402   : > { %v1512_v13 = vsub.f32 2.0, %v1480_v0  ;;  %8206 = vrcp.f32 %v1118_v60  ;;  %v1163_v10 = vpop.xlane.xlu1 %1162  ;;  %v14792_v0 = vld [vmem:[#allocation93_spill] sm:$0xff] }
 0x403   : > { %8208 = vpow2.f32 %v2386_v1  ;;  %v2168_v45 = vpop.xlane.xlu0 %2167  ;;  %1189 = vadd.xlane.f32.xlu0 %v11301_v6  ;;  %v14793_v6 = vld [vmem:[#allocation94_spill] sm:$0xff] }
 0x404   : > { %v1544_v50 = vmul.f32 %v8195_v38, %v1512_v13  ;;  %8210 = vpow2.f32 %v2388_v26  ;;  %v2254_v2 = vsub.f32 %v14684_v34, %v2168_v45  ;;  %v2255_v40 = vsub.f32 %v14685_v59, %v2168_v45 }
 0x405   : > { %v11524_v8 = vpop.eup %8196  ;;  %8212 = vrcp.f32 %v1163_v10 }
 0x406   : > { %v11526_v5 = vpop.eup %8198  ;;  %v2334_v32 = vmul.f32 1.442695, %v2254_v2  ;;  %v2336_v3 = vmul.f32 1.442695, %v2255_v40  ;;  %v2213_v57 = vpop.xlane.xlu1 %2212  ;;  %v1576_v62 = vmul.f32 %v1544_v50, %v11278_v51 }
 0x407   : > { %v8201_v9 = vpop.eup %8200  ;;  %v2284_v1 = vsub.f32 %v14792_v0, %v2213_v57  ;;  %v2285_v38 = vsub.f32 %v14793_v6, %v2213_v57  ;;  %v11531_v26 = vpop.xlane.xlu0 %1123  ;;  %v11535_v34 = vadd.f32 %v11526_v5, %v11524_v8 }
 0x408   : > { %v1482_v59 = vmul.f32 %v8201_v9, %v1157_v52  ;;  %8214 = vpow2.f32 %v2334_v32  ;;  %1608 = vst.msk [vmem:[#allocation2 + $0x58] sm:$0xff] %vm378_vm0, %v1576_v62 }
 0x409   : > { %14794 = vst [vmem:[#allocation75_spill] sm:$0xff] %v11535_v34  ;;  %8216 = vpow2.f32 %v2336_v3  ;;  %v2394_v13 = vmul.f32 1.442695, %v2284_v1  ;;  %v2396_v45 = vmul.f32 1.442695, %v2285_v38  ;;  %v14796_v34 = vld [vmem:[#allocation98_spill] sm:$0xff] }
 0x40a   : > { %v8203_v2 = vpop.eup %8202  ;;  %v1514_v51 = vsub.f32 2.0, %v1482_v59  ;;  %8218 = vrcp.f32 %v11531_v26  ;;  %v11539_v50 = vpop.xlane.xlu1 %1168 }
 0x40b   : > { %v8205_v40 = vpop.eup %8204  ;;  %8220 = vpow2.f32 %v2394_v13  ;;  %v2174_v57 = vpop.xlane.xlu0 %2173 }
 0x40c   : > { %v8207_v0 = vpop.eup %8206  ;;  %v1546_v6 = vmul.f32 %v8201_v9, %v1514_v51  ;;  %8222 = vpow2.f32 %v2396_v45  ;;  %v2258_v52 = vsub.f32 %v14695_v37, %v2174_v57  ;;  %v2259_v32 = vsub.f32 %v14696_v46, %v2174_v57  ;;  %2748 = vmatprep.mubr.f32.mxu1 %v8205_v40  ;;  %v14795_v51 = vld [vmem:[#allocation97_spill] sm:$0xff] }
 0x40d   : > { %v11543_v3 = vpop.eup %8208  ;;  %v1469_v62 = vmul.f32 %v8207_v0, %v1118_v60  ;;  %8224 = vrcp.f32 %v11539_v50  ;;  %2749 = vmatmul.mubr.f32.gmra.mrb[76].mxu1 %v8203_v2  ;;  %v11546_v1 = vadd.f32 %v8205_v40, %v8203_v2 }
 0x40e   : > { %v11548_v38 = vpop.eup %8210  ;;  %v2342_v59 = vmul.f32 1.442695, %v2258_v52  ;;  %v2344_v13 = vmul.f32 1.442695, %v2259_v32  ;;  %2753 = vmatprep.mubr.f32.mxu1 %v11438_v20  ;;  %v2219_v9 = vpop.xlane.xlu1 %2218  ;;  %v1578_v37 = vmul.f32 %v1546_v6, %v11394_v49  ;;  %v14798_v52 = vld [vmem:[#allocation16_spill] sm:$0xff] }
 0x40f   : > { %v8213_v45 = vpop.eup %8212  ;;  %v1501_v46 = vsub.f32 2.0, %v1469_v62  ;;  %v2288_v57 = vsub.f32 %v14795_v51, %v2219_v9  ;;  %v2289_v60 = vsub.f32 %v14796_v34, %v2219_v9  ;;  %v11554_v43 = vpop.xlane.xlu0 %1129  ;;  %v11558_v2 = vadd.f32 %v11548_v38, %v11543_v3 }
 0x410   : > { %v1484_v40 = vmul.f32 %v8213_v45, %v1163_v10  ;;  %8226 = vpow2.f32 %v2342_v59  ;;  %1610 = vst.msk [vmem:[#allocation2 + $0x68] sm:$0xff] %vm378_vm0, %v1578_v37  ;;  %v14801_v37 = vld [vmem:[#allocation133_spill] sm:$0xff] }
 0x411   : > { %14797 = vst [vmem:[#allocation77_spill] sm:$0xff] %v11558_v2  ;;  %4771 = vrot.lane.b32.xlu1 %v14798_v52, %s8854_s25  ;;  %v1533_v49 = vmul.f32 %v8207_v0, %v1501_v46  ;;  %8228 = vpow2.f32 %v2344_v13  ;;  %v2402_v20 = vmul.f32 1.442695, %v2288_v57  ;;  %v2404_v6 = vmul.f32 1.442695, %v2289_v60  ;;  %2754 = vmatmul.mubr.f32.gmra.mrb[78].mxu1 %v11432_v22  ;;  %v11564_v34 = vpop.f32.mrb[208].mxu0 }
 0x412   : > { %14799 = vst [vmem:[#allocation83_spill] sm:$0xff] %v11564_v34  ;;  %v8215_v32 = vpop.eup %8214  ;;  %v1516_v62 = vsub.f32 2.0, %v1484_v40  ;;  %8230 = vrcp.f32 %v11554_v43  ;;  %v11567_v9 = vpop.f32.mrb[209].mxu0 }
 0x413   : > { %14800 = vst [vmem:[#allocation141_spill] sm:$0xff] %v11567_v9  ;;  %v11569_v10 = vpop.xlane.xlu1 %1174  ;;  %v8217_v59 = vpop.eup %8216  ;;  %8232 = vpow2.f32 %v2402_v20  ;;  %v1565_v46 = vmul.f32 %v1533_v49, %v14801_v37 }
 0x414   : > { %v2180_v13 = vpop.xlane.xlu0 %2179  ;;  %v8219_v51 = vpop.eup %8218  ;;  %v1548_v22 = vmul.f32 %v8213_v45, %v1516_v62  ;;  %8234 = vpow2.f32 %v2404_v6  ;;  %2758 = vmatprep.mubr.f32.mxu1 %v8217_v59  ;;  %v11579_v20 = vadd.f32 %v8217_v59, %v8215_v32 }
 0x415   : > { %v2262_v57 = vsub.f32 %v14704_v23, %v2180_v13  ;;  %v2263_v60 = vsub.f32 %v14705_v42, %v2180_v13  ;;  %v11576_v40 = vpop.eup %8220  ;;  %v1471_v52 = vmul.f32 %v8219_v51, %v11531_v26  ;;  %2759 = vmatmul.mubr.f32.gmra.mrb[80].mxu1 %v8215_v32  ;;  %1597 = vst.msk [vmem:[#allocation2] sm:$0xff] %vm378_vm0, %v1565_v46  ;;  %v14802_v13 = vld [vmem:[#allocation101_spill] sm:$0xff] }
 0x416   : > { %v11582_v0 = vpop.eup %8222  ;;  %2763 = vmatprep.mubr.f32.mxu1 %v11452_v15  ;;  %v1580_v23 = vmul.f32 %v1548_v22, %v11480_v30 }
 0x417   : > { %v2350_v49 = vmul.f32 1.442695, %v2262_v57  ;;  %v2352_v37 = vmul.f32 1.442695, %v2263_v60  ;;  %v2225_v45 = vpop.xlane.xlu1 %2224  ;;  %v8225_v42 = vpop.eup %8224  ;;  %v1503_v6 = vsub.f32 2.0, %v1471_v52  ;;  %v11592_v32 = vadd.f32 %v11582_v0, %v11576_v40  ;;  %v14805_v52 = vld [vmem:[#allocation139_spill] sm:$0xff] }
 0x418   : > { %v2292_v62 = vsub.f32 %v14707_v33, %v2225_v45  ;;  %v2293_v26 = vsub.f32 %v14802_v13, %v2225_v45  ;;  %v11588_v9 = vpop.xlane.xlu0 %1135  ;;  %v1486_v59 = vmul.f32 %v8225_v42, %v11539_v50  ;;  %1612 = vst.msk [vmem:[#allocation2 + $0x78] sm:$0xff] %vm378_vm0, %v1580_v23  ;;  %v14804_v33 = vld [vmem:[#allocation15_spill] sm:$0xff] }
 0x419   : > { %14803 = vst [vmem:[#allocation87_spill] sm:$0xff] %v11592_v32  ;;  %8236 = vpow2.f32 %v2350_v49  ;;  %v1535_v15 = vmul.f32 %v8219_v51, %v1503_v6  ;;  %2764 = vmatmul.mubr.f32.gmra.mrb[82].mxu1 %v11448_v14  ;;  %4765 = vrot.lane.b32.xlu0 %v14804_v33, %s8854_s25  ;;  %v14807_v6 = vld [vmem:[#allocation51_spill] sm:$0xff] }
 0x41a   : > { %8238 = vpow2.f32 %v2352_v37  ;;  %v2410_v30 = vmul.f32 1.442695, %v2292_v62  ;;  %v2412_v46 = vmul.f32 1.442695, %v2293_v26  ;;  %v8227_v22 = vpop.eup %8226  ;;  %v1518_v51 = vsub.f32 2.0, %v1486_v59  ;;  %v14806_v37 = vld [vmem:[#allocation72_spill] sm:$0xff] }
 0x41b   : > { %8240 = vrcp.f32 %v11588_v9  ;;  %v11600_v57 = vpop.xlane.xlu1 %1180  ;;  %v8229_v60 = vpop.eup %8228  ;;  %v1567_v49 = vmul.f32 %v1535_v15, %v14805_v52 }
 0x41c   : > { %8242 = vpow2.f32 %v2410_v30  ;;  %v2186_v50 = vpop.xlane.xlu0 %2185  ;;  %v8231_v45 = vpop.eup %8230  ;;  %2768 = vmatprep.mubr.f32.mxu1 %v8229_v60  ;;  %v11610_v33 = vadd.f32 %v8229_v60, %v8227_v22  ;;  %v1550_v60 = vmul.f32 %v8225_v42, %v1518_v51 }
 0x41d   : > { %8244 = vpow2.f32 %v2412_v46  ;;  %v2266_v23 = vsub.f32 %v14806_v37, %v2186_v50  ;;  %v2267_v14 = vsub.f32 %v14807_v6, %v2186_v50  ;;  %v11605_v62 = vpop.eup %8232  ;;  %v1473_v13 = vmul.f32 %v8231_v45, %v11554_v43  ;;  %v11608_v26 = vpop.f32.mrb[32].mxu1  ;;  %2769 = vmatmul.mubr.f32.gmra.mrb[84].mxu1 %v8227_v22  ;;  %1599 = vst.msk [vmem:[#allocation2 + $0x10] sm:$0xff] %vm378_vm0, %v1567_v49  ;;  %v14809_v6 = vld [vmem:[#allocation105_spill] sm:$0xff] }
 0x41e   : > { %14808 = vst [vmem:[#allocation55_spill] sm:$0xff] %v11610_v33  ;;  %v11613_v15 = vpop.eup %8234  ;;  %v1360_v46 = vpop.f32.mrb[33].mxu1  ;;  %2773 = vmatprep.mubr.f32.mxu1 %v11468_v36 }
 0x41f   : > { %v2358_v59 = vmul.f32 1.442695, %v2266_v23  ;;  %v2360_v30 = vmul.f32 1.442695, %v2267_v14  ;;  %v2231_v50 = vpop.xlane.xlu1 %2230  ;;  %v1505_v52 = vsub.f32 2.0, %v1473_v13  ;;  %v11620_v22 = vadd.f32 %v11613_v15, %v11605_v62 }
 0x420   : > { %v2296_v37 = vsub.f32 %v14717_v47, %v2231_v50  ;;  %v2297_v43 = vsub.f32 %v14809_v6, %v2231_v50  ;;  %v1142_v34 = vpop.xlane.xlu0 %1141  ;;  %v14810_v6 = vld [vmem:[#allocation156_spill] sm:$0xff] }
 0x421   : > { %8246 = vpow2.f32 %v2358_v59  ;;  %v1537_v49 = vmul.f32 %v8231_v45, %v1505_v52  ;;  %v1363_v46 = vpop.f32.mrb[34].mxu1  ;;  %2774 = vmatmul.mubr.f32.gmra.mrb[86].mxu1 %v11466_v21 }
 0x422   : > { %8248 = vpow2.f32 %v2360_v30  ;;  %v2418_v23 = vmul.f32 1.442695, %v2296_v37  ;;  %v2420_v14 = vmul.f32 1.442695, %v2297_v43  ;;  %v1582_v13 = vmul.f32 %v1550_v60, %v1363_v46  ;;  %v1365_v47 = vpop.f32.mrb[35].mxu1 }
 0x423   : > { %v8237_v36 = vpop.eup %8236  ;;  %8250 = vrcp.f32 %v1142_v34  ;;  %v1569_v2 = vmul.f32 %v1537_v49, %v14810_v6  ;;  %v14811_v49 = vld [vmem:[#allocation11_spill] sm:$0xff] }
 0x424   : > { %v8239_v32 = vpop.eup %8238  ;;  %8252 = vpow2.f32 %v2418_v23  ;;  %v2192_v50 = vpop.xlane.xlu0 %2191  ;;  %1614 = vst.msk [vmem:[#allocation2 + $0x88] sm:$0xff] %vm378_vm0, %v1582_v13 }
 0x425   : > { %v8241_v33 = vpop.eup %8240  ;;  %8254 = vpow2.f32 %v2420_v14  ;;  %v2270_v42 = vsub.f32 %v14723_v27, %v2192_v50  ;;  %v2271_v45 = vsub.f32 %v14724_v19, %v2192_v50  ;;  %2778 = vmatprep.mubr.f32.mxu1 %v8239_v32  ;;  %v11630_v59 = vadd.f32 %v8239_v32, %v8237_v36  ;;  %1601 = vst.msk [vmem:[#allocation2 + $0x20] sm:$0xff] %vm378_vm0, %v1569_v2 }
 0x426   : > { %v11627_v51 = vpop.eup %8242  ;;  %v1475_v21 = vmul.f32 %v8241_v33, %v11588_v9  ;;  %2779 = vmatmul.mubr.f32.gmra.mrb[88].mxu1 %v8237_v36 }
 0x427   : > { %v11633_v30 = vpop.eup %8244  ;;  %v2366_v52 = vmul.f32 1.442695, %v2270_v42  ;;  %v2368_v37 = vmul.f32 1.442695, %v2271_v45  ;;  %2783 = vmatprep.mubr.f32.mxu1 %v11484_v61  ;;  %v1197_v45 = vadd.f32 %v11357_v35, %v11351_v48 }
 0x428   : > { %v1507_v43 = vsub.f32 2.0, %v1475_v21  ;;  %v1148_v27 = vpop.xlane.xlu0 %1147  ;;  %v11638_v19 = vadd.f32 %v11633_v30, %v11627_v51 }
 0x429   : > { %8256 = vpow2.f32 %v2366_v52 }
 0x42a   : > { %v1539_v60 = vmul.f32 %v8241_v33, %v1507_v43  ;;  %8258 = vpow2.f32 %v2368_v37  ;;  %2784 = vmatmul.mubr.f32.gmra.mrb[90].mxu1 %v11482_v29  ;;  %v14813_v37 = vld [vmem:[#allocation171_spill] sm:$0xff] }
 0x42b   : > { %v8247_v9 = vpop.eup %8246  ;;  %8260 = vrcp.f32 %v1148_v27 }
 0x42c   : > { %v8249_v2 = vpop.eup %8248  ;;  %v2198_v32 = vpop.xlane.xlu0 %2197  ;;  %v1571_v23 = vmul.f32 %v1539_v60, %v14811_v49 }
 0x42d   : > { %v8251_v14 = vpop.eup %8250  ;;  %v2274_v61 = vsub.f32 %v14731_v31, %v2198_v32  ;;  %v2275_v46 = vsub.f32 %v14732_v53, %v2198_v32  ;;  %2788 = vmatprep.mubr.f32.mxu1 %v8249_v2  ;;  %v11644_v36 = vadd.f32 %v8249_v2, %v8247_v9 }
 0x42e   : > { %v11646_v13 = vpop.eup %8252  ;;  %v1477_v33 = vmul.f32 %v8251_v14, %v1142_v34  ;;  %2789 = vmatmul.mubr.f32.gmra.mrb[92].mxu1 %v8247_v9  ;;  %1603 = vst.msk [vmem:[#allocation2 + $0x30] sm:$0xff] %vm378_vm0, %v1571_v23  ;;  %v14814_v23 = vld [vmem:[#allocation47_spill] sm:$0xff] }
 0x42f   : > { %v11649_v29 = vpop.eup %8254  ;;  %v2374_v47 = vmul.f32 1.442695, %v2274_v61  ;;  %v2376_v50 = vmul.f32 1.442695, %v2275_v46  ;;  %2793 = vmatprep.mubr.f32.mxu1 %v11496_v17  ;;  %v14815_v61 = vld [vmem:[#allocation7_spill] sm:$0xff] }
 0x430   : > { %v1509_v6 = vsub.f32 2.0, %v1477_v33  ;;  %v1154_v42 = vpop.xlane.xlu0 %1153  ;;  %v11654_v31 = vadd.f32 %v11649_v29, %v11646_v13 }
 0x431   : > { %8262 = vpow2.f32 %v2374_v47 }
 0x432   : > { %14812 = vst [vmem:[#allocation56_spill] sm:$0xff] %v11654_v31  ;;  %v1541_v53 = vmul.f32 %v8251_v14, %v1509_v6  ;;  %8264 = vpow2.f32 %v2376_v50  ;;  %2794 = vmatmul.mubr.f32.gmra.mrb[94].mxu1 %v11494_v56 }
 0x433   : > { %v8257_v34 = vpop.eup %8256  ;;  %8266 = vrcp.f32 %v1154_v42 }
 0x434   : > { %v8259_v21 = vpop.eup %8258  ;;  %v2204_v52 = vpop.xlane.xlu0 %2203  ;;  %v1573_v17 = vmul.f32 %v1541_v53, %v14813_v37 }
 0x435   : > { %v8261_v43 = vpop.eup %8260  ;;  %v2278_v60 = vsub.f32 %v14738_v54, %v2204_v52  ;;  %v2279_v9 = vsub.f32 %v14739_v41, %v2204_v52  ;;  %2798 = vmatprep.mubr.f32.mxu1 %v8259_v21  ;;  %1198 = vadd.xlane.f32.xlu1 %v1197_v45  ;;  %v11662_v2 = vadd.f32 %v8259_v21, %v8257_v34 }
 0x436   : > { %v1479_v32 = vmul.f32 %v8261_v43, %v1148_v27  ;;  %2799 = vmatmul.mubr.f32.gmra.mrb[96].mxu1 %v8257_v34  ;;  %1605 = vst.msk [vmem:[#allocation2 + $0x40] sm:$0xff] %vm378_vm0, %v1573_v17 }
 0x437   : > { %v2382_v56 = vmul.f32 1.442695, %v2278_v60  ;;  %v2384_v49 = vmul.f32 1.442695, %v2279_v9  ;;  %2803 = vmatprep.mubr.f32.mxu1 %v11510_v7  ;;  %v14816_v9 = vld [vmem:[#allocation18_spill] sm:$0xff] }
 0x438   : > { %v1511_v48 = vsub.f32 2.0, %v1479_v32  ;;  %v1160_v35 = vpop.xlane.xlu0 %1159  ;;  %1195 = vadd.xlane.f32.xlu0 %v14814_v23 }
 0x439   : > { %8268 = vpow2.f32 %v2382_v56 }
 0x43a   : > { %v1543_v54 = vmul.f32 %v8261_v43, %v1511_v48  ;;  %8270 = vpow2.f32 %v2384_v49  ;;  %2804 = vmatmul.mubr.f32.gmra.mrb[98].mxu1 %v11508_v44 }
 0x43b   : > { %v8263_v41 = vpop.eup %8262  ;;  %8272 = vrcp.f32 %v1160_v35 }
 0x43c   : > { %v8265_v14 = vpop.eup %8264  ;;  %v2210_v27 = vpop.xlane.xlu0 %2209  ;;  %v1575_v46 = vmul.f32 %v1543_v54, %v14815_v61  ;;  %8274 = vrcp.f32 %v11569_v10 }
 0x43d   : > { %v8267_v33 = vpop.eup %8266  ;;  %v2282_v47 = vsub.f32 %v14745_v25, %v2210_v27  ;;  %v2283_v7 = vsub.f32 %v14746_v58, %v2210_v27  ;;  %2808 = vmatprep.mubr.f32.mxu1 %v8265_v14  ;;  %v11671_v50 = vadd.f32 %v8265_v14, %v8263_v41 }
 0x43e   : > { %v1481_v6 = vmul.f32 %v8267_v33, %v1154_v42  ;;  %2809 = vmatmul.mubr.f32.gmra.mrb[100].mxu1 %v8263_v41  ;;  %1607 = vst.msk [vmem:[#allocation2 + $0x50] sm:$0xff] %vm378_vm0, %v1575_v46 }
 0x43f   : > { %v2390_v53 = vmul.f32 1.442695, %v2282_v47  ;;  %v2392_v44 = vmul.f32 1.442695, %v2283_v7  ;;  %2813 = vmatprep.mubr.f32.mxu1 %v11526_v5  ;;  %v11698_v47 = vpop.permute.xlu1 %4763 }
 0x440   : > { %v1513_v34 = vsub.f32 2.0, %v1481_v6  ;;  %v1166_v45 = vpop.xlane.xlu0 %1165 }
 0x441   : > { %8276 = vpow2.f32 %v2390_v53 }
 0x442   : > { %v1545_v21 = vmul.f32 %v8267_v33, %v1513_v34  ;;  %8278 = vpow2.f32 %v2392_v44  ;;  %2814 = vmatmul.mubr.f32.gmra.mrb[102].mxu1 %v11524_v8 }
 0x443   : > { %v8269_v25 = vpop.eup %8268  ;;  %8280 = vrcp.f32 %v1166_v45 }
 0x444   : > { %v8271_v58 = vpop.eup %8270  ;;  %v2216_v42 = vpop.xlane.xlu0 %2215  ;;  %v1577_v52 = vmul.f32 %v1545_v21, %v11388_v12  ;;  %8282 = vrcp.f32 %v11600_v57 }
 0x445   : > { %v8273_v37 = vpop.eup %8272  ;;  %v2286_v17 = vsub.f32 %v14750_v16, %v2216_v42  ;;  %v2287_v5 = vsub.f32 %v14751_v4, %v2216_v42  ;;  %2818 = vmatprep.mubr.f32.mxu1 %v8271_v58  ;;  %v11680_v43 = vadd.f32 %v8271_v58, %v8269_v25 }
 0x446   : > { %v1483_v60 = vmul.f32 %v8273_v37, %v1160_v35  ;;  %2819 = vmatmul.mubr.f32.gmra.mrb[104].mxu1 %v8269_v25  ;;  %4775 = vrot.lane.b32.xlu1 %v14816_v9, %s8854_s25  ;;  %1609 = vst.msk [vmem:[#allocation2 + $0x60] sm:$0xff] %vm378_vm0, %v1577_v52  ;;  %v8275_v4 = vpop.eup %8274 }
 0x447   : > { %v2398_v8 = vmul.f32 1.442695, %v2286_v17  ;;  %v2400_v32 = vmul.f32 1.442695, %v2287_v5  ;;  %2823 = vmatprep.mubr.f32.mxu1 %v11548_v38  ;;  %v1488_v27 = vmul.f32 %v8275_v4, %v11569_v10 }
 0x448   : > { %v1515_v12 = vsub.f32 2.0, %v1483_v60  ;;  %v1172_v16 = vpop.xlane.xlu0 %1171 }
 0x449   : > { %8284 = vpow2.f32 %v2398_v8  ;;  %v1520_v7 = vsub.f32 2.0, %v1488_v27  ;;  %v14818_v27 = vld [vmem:[#allocation106_spill] sm:$0xff] }
 0x44a   : > { %v1547_v56 = vmul.f32 %v8273_v37, %v1515_v12  ;;  %8286 = vpow2.f32 %v2400_v32  ;;  %2824 = vmatmul.mubr.f32.gmra.mrb[106].mxu1 %v11543_v3 }
 0x44b   : > { %v8277_v49 = vpop.eup %8276  ;;  %8288 = vrcp.f32 %v1172_v16  ;;  %v1552_v17 = vmul.f32 %v8275_v4, %v1520_v7 }
 0x44c   : > { %v8279_v48 = vpop.eup %8278  ;;  %v2222_v35 = vpop.xlane.xlu0 %2221  ;;  %v1579_v23 = vmul.f32 %v1547_v56, %v11477_v55  ;;  %v14817_v55 = vld [vmem:[#allocation17_spill] sm:$0xff] }
 0x44d   : > { %v8281_v54 = vpop.eup %8280  ;;  %v2290_v41 = vsub.f32 %v14753_v18, %v2222_v35  ;;  %v2291_v38 = vsub.f32 %v14754_v11, %v2222_v35  ;;  %2828 = vmatprep.mubr.f32.mxu1 %v8279_v48  ;;  %v11691_v14 = vadd.f32 %v8279_v48, %v8277_v49 }
 0x44e   : > { %v1485_v61 = vmul.f32 %v8281_v54, %v1166_v45  ;;  %2829 = vmatmul.mubr.f32.gmra.mrb[108].mxu1 %v8277_v49  ;;  %1611 = vst.msk [vmem:[#allocation2 + $0x70] sm:$0xff] %vm378_vm0, %v1579_v23  ;;  %4769 = vrot.lane.b32.xlu0 %v14817_v55, %s8854_s25  ;;  %v8283_v11 = vpop.eup %8282 }
 0x44f   : > { %v2406_v3 = vmul.f32 1.442695, %v2290_v41  ;;  %v2408_v46 = vmul.f32 1.442695, %v2291_v38  ;;  %2833 = vmatprep.mubr.f32.mxu1 %v11582_v0  ;;  %v1490_v25 = vmul.f32 %v8283_v11, %v11600_v57 }
 0x450   : > { %v1517_v33 = vsub.f32 2.0, %v1485_v61  ;;  %v1178_v18 = vpop.xlane.xlu0 %1177 }
 0x451   : > { %8290 = vpow2.f32 %v2406_v3  ;;  %v14819_v3 = vld [vmem:[#allocation107_spill] sm:$0xff] }
 0x452   : > { %v1549_v6 = vmul.f32 %v8281_v54, %v1517_v33  ;;  %8292 = vpow2.f32 %v2408_v46  ;;  %2834 = vmatmul.mubr.f32.gmra.mrb[110].mxu1 %v11576_v40  ;;  %v1368_v53 = vpop.f32.mrb[36].mxu1 }
 0x453   : > { %v8285_v10 = vpop.eup %8284  ;;  %8294 = vrcp.f32 %v1178_v18  ;;  %v1370_v34 = vpop.f32.mrb[37].mxu1 }
 0x454   : > { %v8287_v44 = vpop.eup %8286  ;;  %v2228_v0 = vpop.xlane.xlu0 %2227  ;;  %v1581_v45 = vmul.f32 %v1549_v6, %v11608_v26 }
 0x455   : > { %v8289_v21 = vpop.eup %8288  ;;  %v2294_v58 = vsub.f32 %v14756_v63, %v2228_v0  ;;  %v2295_v42 = vsub.f32 %v14757_v28, %v2228_v0  ;;  %v1187_v52 = vpop.xlane.xlu1 %1186  ;;  %2838 = vmatprep.mubr.f32.mxu1 %v8287_v44  ;;  %v11705_v37 = vadd.f32 %v8287_v44, %v8285_v10  ;;  %v1522_v28 = vsub.f32 2.0, %v1490_v25 }
 0x456   : > { %v1487_v40 = vmul.f32 %v8289_v21, %v1172_v16  ;;  %8296 = vrcp.f32 %v1187_v52  ;;  %2839 = vmatmul.mubr.f32.gmra.mrb[112].mxu1 %v8285_v10  ;;  %1613 = vst.msk [vmem:[#allocation2 + $0x80] sm:$0xff] %vm378_vm0, %v1581_v45  ;;  %v1373_v26 = vpop.f32.mrb[38].mxu1 }
 0x457   : > { %v2414_v5 = vmul.f32 1.442695, %v2294_v58  ;;  %v2416_v60 = vmul.f32 1.442695, %v2295_v42  ;;  %2843 = vmatprep.mubr.f32.mxu1 %v11613_v15  ;;  %v1584_v9 = vmul.f32 %v1552_v17, %v1373_v26  ;;  %v1375_v63 = vpop.f32.mrb[39].mxu1 }
 0x458   : > { %v1519_v57 = vsub.f32 2.0, %v1487_v40  ;;  %v1184_v8 = vpop.xlane.xlu0 %1183 }
 0x459   : > { %8298 = vpow2.f32 %v2414_v5  ;;  %v2237_v32 = vpop.xlane.xlu1 %2236  ;;  %1616 = vst.msk [vmem:[#allocation2 + $0x98] sm:$0xff] %vm378_vm0, %v1584_v9 }
 0x45a   : > { %v1551_v12 = vmul.f32 %v8289_v21, %v1519_v57  ;;  %8300 = vpow2.f32 %v2416_v60  ;;  %v2300_v16 = vsub.f32 %v14759_v24, %v2237_v32  ;;  %v2301_v4 = vsub.f32 %v14760_v39, %v2237_v32  ;;  %2844 = vmatmul.mubr.f32.gmra.mrb[114].mxu1 %v11605_v62  ;;  %v1378_v15 = vpop.f32.mrb[40].mxu1  ;;  %v14822_v32 = vld [vmem:[#allocation45_spill] sm:$0xff] }
 0x45b   : > { %v8291_v56 = vpop.eup %8290  ;;  %8302 = vrcp.f32 %v1184_v8  ;;  %v1380_v54 = vpop.f32.mrb[41].mxu1  ;;  %v1554_v62 = vmul.f32 %v8283_v11, %v1522_v28 }
 0x45c   : > { %v8293_v49 = vpop.eup %8292  ;;  %v1583_v48 = vmul.f32 %v1551_v12, %v1368_v53  ;;  %v2426_v35 = vmul.f32 1.442695, %v2300_v16  ;;  %v2428_v23 = vmul.f32 1.442695, %v2301_v4  ;;  %v2234_v41 = vpop.xlane.xlu0 %2233  ;;  %v14823_v12 = vld [vmem:[#allocation78_spill] sm:$0xff] }
 0x45d   : > { %v8295_v38 = vpop.eup %8294  ;;  %v2298_v61 = vsub.f32 %v14818_v27, %v2234_v41  ;;  %v2299_v46 = vsub.f32 %v14819_v3, %v2234_v41  ;;  %2848 = vmatprep.mubr.f32.mxu1 %v8293_v49  ;;  %v11715_v24 = vadd.f32 %v8293_v49, %v8291_v56  ;;  %v1203_v16 = vadd.f32 %v14823_v12, %v14822_v32 }
 0x45e   : > { %v1489_v39 = vmul.f32 %v8295_v38, %v1178_v18  ;;  %1615 = vst.msk [vmem:[#allocation2 + $0x90] sm:$0xff] %vm378_vm0, %v1583_v48  ;;  %8304 = vpow2.f32 %v2426_v35  ;;  %2849 = vmatmul.mubr.f32.gmra.mrb[116].mxu1 %v8291_v56  ;;  %v1383_v7 = vpop.f32.mrb[42].mxu1 }
 0x45f   : > { %8306 = vpow2.f32 %v2428_v23  ;;  %v2422_v55 = vmul.f32 1.442695, %v2298_v61  ;;  %v2424_v33 = vmul.f32 1.442695, %v2299_v46  ;;  %2853 = vmatprep.mubr.f32.mxu1 %v11633_v30  ;;  %v1586_v53 = vmul.f32 %v1554_v62, %v1383_v7  ;;  %v1385_v44 = vpop.f32.mrb[43].mxu1  ;;  %v14826_v23 = vld [vmem:[#allocation5_spill] sm:$0xff] }
 0x460   : > { %v8297_v6 = vpop.eup %8296  ;;  %v1521_v10 = vsub.f32 2.0, %v1489_v39  ;;  %v4762_v34 = vpop.permute.xlu0 %4761  ;;  %v14827_v46 = vld [vmem:[#allocation20_spill] sm:$0xff] }
 0x461   : > { %v1492_v0 = vmul.f32 %v8297_v6, %v1187_v52  ;;  %8308 = vpow2.f32 %v2422_v55  ;;  %7071 = vmatprep.mubr.msk.f32.mxu0 %vm378_vm0, %v4762_v34  ;;  %1618 = vst.msk [vmem:[#allocation2 + $0xa8] sm:$0xff] %vm378_vm0, %v1586_v53  ;;  %v4768_v44 = vpop.permute.xlu1 %4767 }
 0x462   : > { %v1553_v18 = vmul.f32 %v8295_v38, %v1521_v10  ;;  %8310 = vpow2.f32 %v2424_v33  ;;  %2854 = vmatmul.mubr.f32.gmra.mrb[118].mxu1 %v11627_v51  ;;  %7072 = vmatmul.mubr.msk.f32.gmra.mrb[214].mxu0 %vm378_vm0, %v4762_v34  ;;  %v1388_v30 = vpop.f32.mrb[44].mxu1  ;;  %v11723_v21 = vpop.f32.mrb[210].mxu0 }
 0x463   : > { %v8299_v11 = vpop.eup %8298  ;;  %v1524_v45 = vsub.f32 2.0, %v1492_v0  ;;  %14820 = vst [vmem:[#allocation86_spill] sm:$0xff] %v11723_v21  ;;  %7073 = vmatprep.mubr.msk.f32.mxu0 %vm378_vm0, %v11698_v47  ;;  %v1390_v42 = vpop.f32.mrb[45].mxu1 }
 0x464   : > { %v8301_v25 = vpop.eup %8300  ;;  %v1585_v58 = vmul.f32 %v1553_v18, %v1378_v15  ;;  %v11727_v52 = vpop.f32.mrb[211].mxu0 }
 0x465   : > { %14821 = vst [vmem:[#allocation159_spill] sm:$0xff] %v11727_v52  ;;  %v8303_v40 = vpop.eup %8302  ;;  %2858 = vmatprep.mubr.f32.mxu1 %v8301_v25  ;;  %v1556_v17 = vmul.f32 %v8297_v6, %v1524_v45  ;;  %v11731_v5 = vadd.f32 %v8301_v25, %v8299_v11  ;;  %v14828_v6 = vld [vmem:[#allocation19_spill] sm:$0xff] }
 0x466   : > { %v1491_v60 = vmul.f32 %v8303_v40, %v1184_v8  ;;  %1617 = vst.msk [vmem:[#allocation2 + $0xa0] sm:$0xff] %vm378_vm0, %v1585_v58  ;;  %2859 = vmatmul.mubr.f32.gmra.mrb[120].mxu1 %v8299_v11  ;;  %7074 = vmatmul.mubr.msk.f32.gmra.mrb[216].mxu0 %vm378_vm0, %v11698_v47  ;;  %v1393_v26 = vpop.f32.mrb[46].mxu1  ;;  %v15032_v52 = vld [vmem:[#allocation147_spill] sm:$0xff] }
 0x467   : > { %2863 = vmatprep.mubr.f32.mxu1 %v11649_v29  ;;  %v1588_v63 = vmul.f32 %v1556_v17, %v1393_v26  ;;  %v1395_v28 = vpop.f32.mrb[47].mxu1 }
 0x468   : > { %v8305_v57 = vpop.eup %8304  ;;  %v1523_v9 = vsub.f32 2.0, %v1491_v60 }
 0x469   : > { %v8307_v4 = vpop.eup %8306  ;;  %1620 = vst.msk [vmem:[#allocation2 + $0xb8] sm:$0xff] %vm378_vm0, %v1588_v63 }
 0x46a   : > { %v1555_v56 = vmul.f32 %v8303_v40, %v1523_v9  ;;  %2864 = vmatmul.mubr.f32.gmra.mrb[122].mxu1 %v11646_v13  ;;  %1204 = vadd.xlane.f32.xlu1 %v1203_v16  ;;  %v11741_v8 = vadd.f32 %v8307_v4, %v8305_v57  ;;  %v14832_v9 = vld [vmem:[#allocation71_spill] sm:$0xff] }
 0x46b   : > { %v8309_v47 = vpop.eup %8308  ;;  %v1398_v15 = vpop.f32.mrb[48].mxu1 }
 0x46c   : > { %14824 = vst [vmem:[#allocation12_spill] sm:$0xff] %v11741_v8  ;;  %v8311_v49 = vpop.eup %8310  ;;  %v1587_v29 = vmul.f32 %v1555_v56, %v1388_v30  ;;  %v1400_v48 = vpop.f32.mrb[49].mxu1 }
 0x46d   : > { %2868 = vmatprep.mubr.f32.mxu1 %v8311_v49  ;;  %v11743_v35 = vadd.f32 %v8311_v49, %v8309_v47  ;;  %1201 = vadd.xlane.f32.xlu0 %v14826_v23 }
 0x46e   : > { %1619 = vst.msk [vmem:[#allocation2 + $0xb0] sm:$0xff] %vm378_vm0, %v1587_v29  ;;  %2869 = vmatmul.mubr.f32.gmra.mrb[124].mxu1 %v8309_v47  ;;  %v14835_v47 = vld [vmem:[#allocation43_spill] sm:$0xff] }
 0x46f   : > { %14825 = vst [vmem:[#allocation90_spill] sm:$0xff] %v11743_v35  ;;  %v1403_v54 = vpop.f32.mrb[50].mxu1  ;;  %2873 = vmatprep.mubr.f32.mxu1 %v8307_v4  ;;  %v8805_v35 = vld [vmem:[%s9517_s28 + $0x98] sm:$0xff] }
 0x470   : > { %v1405_v41 = vpop.f32.mrb[51].mxu1 }
 0x472   : > { %2874 = vmatmul.mubr.f32.gmra.mrb[126].mxu1 %v8305_v57  ;;  %v14831_v57 = vld [vmem:[#allocation68_spill] sm:$0xff] }
 0x473   : > { %v11747_v13 = vpop.f32.mrb[52].mxu1  ;;  %v1209_v63 = vadd.f32 %v14832_v9, %v14831_v57 }
 0x474   : > { %v1410_v38 = vpop.f32.mrb[53].mxu1 }
 0x477   : > { %v11749_v27 = vpop.f32.mrb[54].mxu1 }
 0x478   : > { %v1415_v61 = vpop.f32.mrb[55].mxu1 }
 0x47b   : > { %v11751_v3 = vpop.f32.mrb[56].mxu1  ;;  %4779 = vrot.lane.b32.xlu1 %v14827_v46, %s8854_s25  ;;  %v14840_v46 = vld [vmem:[#allocation22_spill] sm:$0xff] }
 0x47c   : > { %v1420_v39 = vpop.f32.mrb[57].mxu1 }
 0x47f   : > { %v11755_v62 = vpop.f32.mrb[58].mxu1 }
 0x480   : > { %v1425_v55 = vpop.f32.mrb[59].mxu1 }
 0x481   : > { %v14841_v55 = vld [vmem:[#allocation21_spill] sm:$0xff] }
 0x483   : > { %v11757_v33 = vpop.f32.mrb[60].mxu1  ;;  %4773 = vrot.lane.b32.xlu0 %v14828_v6, %s8854_s25 }
 0x484   : > { %v1430_v7 = vpop.f32.mrb[61].mxu1 }
 0x487   : > { %v11761_v10 = vpop.f32.mrb[62].mxu1 }
 0x488   : > { %v1435_v53 = vpop.f32.mrb[63].mxu1 }
 0x48b   : > { %v11763_v34 = vpop.f32.mrb[64].mxu1 }
 0x48c   : > { %14829 = vst [vmem:[#allocation91_spill] sm:$0xff] %v11763_v34  ;;  %v2722_v0 = vpop.f32.mrb[65].mxu1 }
 0x48d   : > { %v1193_v18 = vpop.xlane.xlu1 %1192 }
 0x48e   : > { %8312 = vrcp.f32 %v1193_v18 }
 0x48f   : > { %v11765_v11 = vpop.f32.mrb[66].mxu1 }
 0x490   : > { %14830 = vst [vmem:[#allocation33_spill] sm:$0xff] %v11765_v11  ;;  %v2727_v45 = vpop.f32.mrb[67].mxu1  ;;  %v1190_v30 = vpop.xlane.xlu0 %1189 }
 0x491   : > { %8314 = vrcp.f32 %v1190_v30 }
 0x494   : > { %v4766_v25 = vpop.permute.xlu0 %4765 }
 0x495   : > { %7075 = vmatprep.mubr.msk.f32.mxu0 %vm378_vm0, %v4766_v25 }
 0x496   : > { %7076 = vmatmul.mubr.msk.f32.gmra.mrb[218].mxu0 %vm378_vm0, %v4766_v25 }
 0x497   : > { %7077 = vmatprep.mubr.msk.f32.mxu0 %vm378_vm0, %v4768_v44 }
 0x498   : > { %v8313_v58 = vpop.eup %8312 }
 0x499   : > { %v1494_v42 = vmul.f32 %v8313_v58, %v1193_v18 }
 0x49a   : > { %7078 = vmatmul.mubr.msk.f32.gmra.mrb[220].mxu0 %vm378_vm0, %v4768_v44 }
 0x49b   : > { %v1526_v40 = vsub.f32 2.0, %v1494_v42  ;;  %v8315_v17 = vpop.eup %8314  ;;  %v14842_v42 = vld [vmem:[#allocation66_spill] sm:$0xff] }
 0x49c   : > { %v1493_v26 = vmul.f32 %v8315_v17, %v1190_v30 }
 0x49d   : > { %v1558_v60 = vmul.f32 %v8313_v58, %v1526_v40 }
 0x49e   : > { %v1525_v28 = vsub.f32 2.0, %v1493_v26 }
 0x49f   : > { %1210 = vadd.xlane.f32.xlu1 %v1209_v63  ;;  %v1590_v32 = vmul.f32 %v1558_v60, %v1403_v54  ;;  %v11773_v12 = vpop.f32.mrb[212].mxu0  ;;  %v14843_v60 = vld [vmem:[#allocation4_spill] sm:$0xff] }
 0x4a0   : > { %14833 = vst [vmem:[#allocation59_spill] sm:$0xff] %v11773_v12  ;;  %v1557_v16 = vmul.f32 %v8315_v17, %v1525_v28  ;;  %v11775_v4 = vpop.f32.mrb[213].mxu0  ;;  %v14846_v28 = vld [vmem:[#allocation24_spill] sm:$0xff] }
 0x4a1   : > { %14834 = vst [vmem:[#allocation95_spill] sm:$0xff] %v11775_v4  ;;  %1622 = vst.msk [vmem:[#allocation2 + $0xc8] sm:$0xff] %vm378_vm0, %v1590_v32  ;;  %v15029_v12 = vld [vmem:[#allocation40_spill] sm:$0xff] }
 0x4a2   : > { %1207 = vadd.xlane.f32.xlu0 %v14835_v47  ;;  %v1589_v49 = vmul.f32 %v1557_v16, %v1398_v15  ;;  %v4772_v15 = vpop.permute.xlu1 %4771 }
 0x4a3   : > { %v11781_v29 = vpop.f32.mrb[68].mxu1 }
 0x4a4   : > { %14836 = vst [vmem:[#allocation96_spill] sm:$0xff] %v11781_v29  ;;  %v2732_v48 = vpop.f32.mrb[69].mxu1  ;;  %1621 = vst.msk [vmem:[#allocation2 + $0xc0] sm:$0xff] %vm378_vm0, %v1589_v49 }
 0x4a5   : > { %v14849_v48 = vld [vmem:[#allocation23_spill] sm:$0xff] }
 0x4a7   : > { %v11784_v23 = vpop.f32.mrb[70].mxu1 }
 0x4a8   : > { %14837 = vst [vmem:[#allocation99_spill] sm:$0xff] %v11784_v23  ;;  %v2737_v54 = vpop.f32.mrb[71].mxu1 }
 0x4ab   : > { %v11786_v41 = vpop.f32.mrb[72].mxu1 }
 0x4ac   : > { %14838 = vst [vmem:[#allocation100_spill] sm:$0xff] %v11786_v41  ;;  %v2742_v38 = vpop.f32.mrb[73].mxu1 }
 0x4af   : > { %v11788_v61 = vpop.f32.mrb[74].mxu1 }
 0x4b0   : > { %14839 = vst [vmem:[#allocation102_spill] sm:$0xff] %v11788_v61  ;;  %4783 = vrot.lane.b32.xlu1 %v14840_v46, %s8854_s25  ;;  %v2747_v39 = vpop.f32.mrb[75].mxu1 }
 0x4b8   : > { %4777 = vrot.lane.b32.xlu0 %v14841_v55, %s8854_s25 }
 0x4c2   : > { %v1199_v7 = vpop.xlane.xlu1 %1198 }
 0x4c3   : > { %8316 = vrcp.f32 %v1199_v7 }
 0x4c5   : > { %v1196_v6 = vpop.xlane.xlu0 %1195 }
 0x4c6   : > { %8318 = vrcp.f32 %v1196_v6  ;;  %v4776_v38 = vpop.permute.xlu1 %4775 }
 0x4c9   : > { %v4770_v53 = vpop.permute.xlu0 %4769 }
 0x4ca   : > { %7079 = vmatprep.mubr.msk.f32.mxu0 %vm378_vm0, %v4770_v53 }
 0x4cb   : > { %7080 = vmatmul.mubr.msk.f32.gmra.mrb[222].mxu0 %vm378_vm0, %v4770_v53 }
 0x4cc   : > { %7081 = vmatprep.mubr.msk.f32.mxu0 %vm378_vm0, %v4772_v15 }
 0x4cd   : > { %v8317_v44 = vpop.eup %8316 }
 0x4ce   : > { %v1496_v0 = vmul.f32 %v8317_v44, %v1199_v7 }
 0x4cf   : > { %7082 = vmatmul.mubr.msk.f32.gmra.mrb[224].mxu0 %vm378_vm0, %v4772_v15 }
 0x4d0   : > { %v1528_v18 = vsub.f32 2.0, %v1496_v0  ;;  %v8319_v45 = vpop.eup %8318 }
 0x4d1   : > { %v1495_v25 = vmul.f32 %v8319_v45, %v1196_v6 }
 0x4d2   : > { %v1560_v30 = vmul.f32 %v8317_v44, %v1528_v18 }
 0x4d3   : > { %v1527_v58 = vsub.f32 2.0, %v1495_v25 }
 0x4d4   : > { %2434 = vadd.xlane.f32.xlu1 %v14842_v42  ;;  %v1592_v40 = vmul.f32 %v1560_v30, %v11749_v27 }
 0x4d5   : > { %v1559_v17 = vmul.f32 %v8319_v45, %v1527_v58 }
 0x4d6   : > { %1624 = vst.msk [vmem:[#allocation2 + $0xd8] sm:$0xff] %vm378_vm0, %v1592_v40 }
 0x4d7   : > { %2431 = vadd.xlane.f32.xlu0 %v14843_v60  ;;  %v1591_v26 = vmul.f32 %v1559_v17, %v11747_v13 }
 0x4d9   : > { %1623 = vst.msk [vmem:[#allocation2 + $0xd0] sm:$0xff] %vm378_vm0, %v1591_v26 }
 0x4e0   : > { %v11804_v57 = vpop.f32.mrb[76].mxu1 }
 0x4e1   : > { %14844 = vst [vmem:[#allocation103_spill] sm:$0xff] %v11804_v57  ;;  %v2752_v9 = vpop.f32.mrb[77].mxu1 }
 0x4e4   : > { %v11806_v63 = vpop.f32.mrb[78].mxu1 }
 0x4e5   : > { %14845 = vst [vmem:[#allocation108_spill] sm:$0xff] %v11806_v63  ;;  %4787 = vrot.lane.b32.xlu1 %v14846_v28, %s8854_s25  ;;  %v2757_v32 = vpop.f32.mrb[79].mxu1  ;;  %v14907_v63 = vld [vmem:[#allocation55_spill] sm:$0xff] }
 0x4e6   : > { %v14857_v32 = vld [vmem:[#allocation63_spill] sm:$0xff] }
 0x4e8   : > { %v11810_v16 = vpop.f32.mrb[80].mxu1 }
 0x4e9   : > { %14847 = vst [vmem:[#allocation109_spill] sm:$0xff] %v11810_v16  ;;  %v2762_v27 = vpop.f32.mrb[81].mxu1 }
 0x4ec   : > { %v11812_v47 = vpop.f32.mrb[82].mxu1 }
 0x4ed   : > { %14848 = vst [vmem:[#allocation14_spill] sm:$0xff] %v11812_v47  ;;  %v2767_v49 = vpop.f32.mrb[83].mxu1  ;;  %4781 = vrot.lane.b32.xlu0 %v14849_v48, %s8854_s25  ;;  %v14903_v47 = vmov 0.0|0.0  }
 0x4f0   : > { %v11816_v13 = vpop.f32.mrb[84].mxu1 }
 0x4f1   : > { %14850 = vst [vmem:[#allocation136_spill] sm:$0xff] %v11816_v13  ;;  %v2772_v54 = vpop.f32.mrb[85].mxu1 }
 0x4f4   : > { %v11818_v46 = vpop.f32.mrb[86].mxu1 }
 0x4f5   : > { %14851 = vst [vmem:[#allocation13_spill] sm:$0xff] %v11818_v46  ;;  %v2777_v39 = vpop.f32.mrb[87].mxu1 }
 0x4f6   : > { %v14859_v39 = vld [vmem:[#allocation82_spill] sm:$0xff] }
 0x4f7   : > { %v1205_v55 = vpop.xlane.xlu1 %1204 }
 0x4f8   : > { %8320 = vrcp.f32 %v1205_v55 }
 0x4f9   : > { %v11820_v15 = vpop.f32.mrb[88].mxu1 }
 0x4fa   : > { %14852 = vst [vmem:[#allocation62_spill] sm:$0xff] %v11820_v15  ;;  %v2782_v7 = vpop.f32.mrb[89].mxu1  ;;  %v1202_v6 = vpop.xlane.xlu0 %1201 }
 0x4fb   : > { %8322 = vrcp.f32 %v1202_v6 }
 0x4fd   : > { %v11822_v53 = vpop.f32.mrb[90].mxu1 }
 0x4fe   : > { %14853 = vst [vmem:[#allocation52_spill] sm:$0xff] %v11822_v53  ;;  %v2787_v44 = vpop.f32.mrb[91].mxu1  ;;  %v4774_v0 = vpop.permute.xlu0 %4773 }
 0x4ff   : > { %7083 = vmatprep.mubr.msk.f32.mxu0 %vm378_vm0, %v4774_v0 }
 0x500   : > { %7084 = vmatmul.mubr.msk.f32.gmra.mrb[226].mxu0 %vm378_vm0, %v4774_v0 }
 0x501   : > { %v11825_v18 = vpop.f32.mrb[92].mxu1  ;;  %7085 = vmatprep.mubr.msk.f32.mxu0 %vm378_vm0, %v4776_v38 }
 0x502   : > { %14854 = vst [vmem:[#allocation39_spill] sm:$0xff] %v11825_v18  ;;  %v8321_v45 = vpop.eup %8320  ;;  %v2792_v30 = vpop.f32.mrb[93].mxu1  ;;  %v8795_v18 = vld [vmem:[%s9517_s28 + $0x48] sm:$0xff] }
 0x503   : > { %v1498_v25 = vmul.f32 %v8321_v45, %v1205_v55  ;;  %v14863_v30 = vld [vmem:[#allocation26_spill] sm:$0xff] }
 0x504   : > { %7086 = vmatmul.mubr.msk.f32.gmra.mrb[228].mxu0 %vm378_vm0, %v4776_v38 }
 0x505   : > { %v1530_v58 = vsub.f32 2.0, %v1498_v25  ;;  %v11829_v42 = vpop.f32.mrb[94].mxu1  ;;  %v8323_v40 = vpop.eup %8322 }
 0x506   : > { %14855 = vst [vmem:[#allocation53_spill] sm:$0xff] %v11829_v42  ;;  %v2797_v17 = vpop.f32.mrb[95].mxu1  ;;  %v1497_v26 = vmul.f32 %v8323_v40, %v1202_v6  ;;  %v14880_v42 = vld [vmem:[#allocation49_spill] sm:$0xff] }
 0x507   : > { %v1562_v60 = vmul.f32 %v8321_v45, %v1530_v58  ;;  %v14866_v17 = vld [vmem:[#allocation25_spill] sm:$0xff] }
 0x508   : > { %v1529_v9 = vsub.f32 2.0, %v1497_v26 }
 0x509   : > { %v11832_v28 = vpop.f32.mrb[96].mxu1  ;;  %2440 = vadd.xlane.f32.xlu1 %v14857_v32  ;;  %v1594_v27 = vmul.f32 %v1562_v60, %v11755_v62 }
 0x50a   : > { %14856 = vst [vmem:[#allocation54_spill] sm:$0xff] %v11832_v28  ;;  %v2802_v49 = vpop.f32.mrb[97].mxu1  ;;  %v1561_v48 = vmul.f32 %v8323_v40, %v1529_v9  ;;  %v4780_v9 = vpop.permute.xlu1 %4779 }
 0x50b   : > { %1626 = vst.msk [vmem:[#allocation2 + $0xe8] sm:$0xff] %vm378_vm0, %v1594_v27 }
 0x50c   : > { %2437 = vadd.xlane.f32.xlu0 %v14859_v39  ;;  %v1593_v38 = vmul.f32 %v1561_v48, %v11751_v3 }
 0x50d   : > { %v11837_v54 = vpop.f32.mrb[98].mxu1 }
 0x50e   : > { %14858 = vst [vmem:[#allocation168_spill] sm:$0xff] %v11837_v54  ;;  %v2807_v55 = vpop.f32.mrb[99].mxu1  ;;  %1625 = vst.msk [vmem:[#allocation2 + $0xe0] sm:$0xff] %vm378_vm0, %v1593_v38 }
 0x511   : > { %v11842_v7 = vpop.f32.mrb[100].mxu1 }
 0x512   : > { %14860 = vst [vmem:[#allocation89_spill] sm:$0xff] %v11842_v7  ;;  %v2812_v6 = vpop.f32.mrb[101].mxu1 }
 0x515   : > { %v11844_v44 = vpop.f32.mrb[102].mxu1 }
 0x516   : > { %14861 = vst [vmem:[#allocation48_spill] sm:$0xff] %v11844_v44  ;;  %v2817_v0 = vpop.f32.mrb[103].mxu1  ;;  %v14878_v44 = vld [vmem:[#allocation85_spill] sm:$0xff] }
 0x519   : > { %v11846_v62 = vpop.f32.mrb[104].mxu1 }
 0x51a   : > { %14862 = vst [vmem:[#allocation172_spill] sm:$0xff] %v11846_v62  ;;  %v2822_v45 = vpop.f32.mrb[105].mxu1  ;;  %4791 = vrot.lane.b32.xlu1 %v14863_v30, %s8854_s25  ;;  %v8793_v62 = vld [vmem:[%s9517_s28 + $0x38] sm:$0xff] }
 0x51d   : > { %v11850_v25 = vpop.f32.mrb[106].mxu1 }
 0x51e   : > { %14864 = vst [vmem:[#allocation57_spill] sm:$0xff] %v11850_v25  ;;  %v2827_v58 = vpop.f32.mrb[107].mxu1 }
 0x521   : > { %v11852_v40 = vpop.f32.mrb[108].mxu1 }
 0x522   : > { %14865 = vst [vmem:[#allocation58_spill] sm:$0xff] %v11852_v40  ;;  %v2832_v3 = vpop.f32.mrb[109].mxu1  ;;  %4785 = vrot.lane.b32.xlu0 %v14866_v17, %s8854_s25  ;;  %v14908_v40 = vld [vmem:[#allocation31_spill] sm:$0xff] }
 0x525   : > { %v11856_v60 = vpop.f32.mrb[110].mxu1 }
 0x526   : > { %14867 = vst [vmem:[#allocation10_spill] sm:$0xff] %v11856_v60  ;;  %v2837_v26 = vpop.f32.mrb[111].mxu1 }
 0x529   : > { %v11858_v32 = vpop.f32.mrb[112].mxu1 }
 0x52a   : > { %14868 = vst [vmem:[#allocation93_spill] sm:$0xff] %v11858_v32  ;;  %v2842_v27 = vpop.f32.mrb[113].mxu1 }
 0x52c   : > { %v1211_v49 = vpop.xlane.xlu1 %1210 }
 0x52d   : > { %8324 = vrcp.f32 %v1211_v49  ;;  %v11860_v48 = vpop.f32.mrb[114].mxu1 }
 0x52e   : > { %14869 = vst [vmem:[#allocation94_spill] sm:$0xff] %v11860_v48  ;;  %v2847_v39 = vpop.f32.mrb[115].mxu1 }
 0x52f   : > { %v1208_v38 = vpop.xlane.xlu0 %1207 }
 0x530   : > { %8326 = vrcp.f32 %v1208_v38 }
 0x531   : > { %v11862_v55 = vpop.f32.mrb[116].mxu1 }
 0x532   : > { %14870 = vst [vmem:[#allocation97_spill] sm:$0xff] %v11862_v55  ;;  %v2852_v6 = vpop.f32.mrb[117].mxu1 }
 0x533   : > { %v4778_v0 = vpop.permute.xlu0 %4777 }
 0x534   : > { %7087 = vmatprep.mubr.msk.f32.mxu0 %vm378_vm0, %v4778_v0 }
 0x535   : > { %v11864_v45 = vpop.f32.mrb[118].mxu1  ;;  %v11866_v30 = vpop.f32.mrb[214].mxu0  ;;  %7088 = vmatmul.mubr.msk.f32.gmra.mrb[230].mxu0 %vm378_vm0, %v4778_v0 }
 0x536   : > { %14871 = vst [vmem:[#allocation98_spill] sm:$0xff] %v11864_v45  ;;  %14872 = vst [vmem:[#allocation16_spill] sm:$0xff] %v11866_v30  ;;  %v2857_v58 = vpop.f32.mrb[119].mxu1  ;;  %v11869_v3 = vpop.f32.mrb[215].mxu0  ;;  %7089 = vmatprep.mubr.msk.f32.mxu0 %vm378_vm0, %v4780_v9 }
 0x537   : > { %14873 = vst [vmem:[#allocation133_spill] sm:$0xff] %v11869_v3  ;;  %v8325_v17 = vpop.eup %8324  ;;  %v15023_v3 = vld [vmem:[#allocation36_spill] sm:$0xff] }
 0x538   : > { %v1500_v27 = vmul.f32 %v8325_v17, %v1211_v49 }
 0x539   : > { %v11875_v39 = vpop.f32.mrb[120].mxu1  ;;  %v11877_v6 = vpop.f32.mrb[216].mxu0  ;;  %7090 = vmatmul.mubr.msk.f32.gmra.mrb[232].mxu0 %vm378_vm0, %v4780_v9 }
 0x53a   : > { %14874 = vst [vmem:[#allocation101_spill] sm:$0xff] %v11875_v39  ;;  %14875 = vst [vmem:[#allocation15_spill] sm:$0xff] %v11877_v6  ;;  %v1532_v56 = vsub.f32 2.0, %v1500_v27  ;;  %v2862_v51 = vpop.f32.mrb[121].mxu1  ;;  %v11879_v45 = vpop.f32.mrb[217].mxu0  ;;  %v15022_v6 = vld [vmem:[#allocation142_spill] sm:$0xff] }
 0x53b   : > { %14876 = vst [vmem:[#allocation139_spill] sm:$0xff] %v11879_v45  ;;  %v8327_v58 = vpop.eup %8326  ;;  %v15024_v30 = vmax.f32 %v15022_v6, %v15023_v3 }
 0x53c   : > { %v1564_v48 = vmul.f32 %v8325_v17, %v1532_v56  ;;  %v1499_v26 = vmul.f32 %v8327_v58, %v1208_v38 }
 0x53d   : > { %v11884_v60 = vpop.f32.mrb[122].mxu1 }
 0x53e   : > { %14877 = vst [vmem:[#allocation72_spill] sm:$0xff] %v11884_v60  ;;  %v1531_v49 = vsub.f32 2.0, %v1499_v26  ;;  %v2867_v25 = vpop.f32.mrb[123].mxu1  ;;  %2446 = vadd.xlane.f32.xlu1 %v14878_v44  ;;  %v1596_v51 = vmul.f32 %v1564_v48, %v11761_v10  ;;  %v8787_v26 = vld [vmem:[%s9517_s28 + $0x8] sm:$0xff]  ;;  %v14882_v10 = vld [vmem:[#allocation27_spill] sm:$0xff]  ;;  %v4784_v48 = vpop.permute.xlu1 %4783 }
 0x53f   : > { %v8786_v25 = vld [vmem:[%s9517_s28] sm:$0xff]  ;;  %v14896_v60 = vld [vmem:[#allocation80_spill] sm:$0xff] }
 0x540   : > { %v1563_v27 = vmul.f32 %v8327_v58, %v1531_v49  ;;  %1628 = vst.msk [vmem:[#allocation2 + $0xf8] sm:$0xff] %vm378_vm0, %v1596_v51  ;;  %v11898_v44 = vpack.i.bf16 %v8787_v26, %v8786_v25  ;;  %v8788_v25 = vld [vmem:[%s9517_s28 + $0x10] sm:$0xff]  ;;  %v8789_v26 = vld [vmem:[%s9517_s28 + $0x18] sm:$0xff] }
 0x541   : > { %v11889_v9 = vpop.f32.mrb[124].mxu1  ;;  %2443 = vadd.xlane.f32.xlu0 %v14880_v42 }
 0x542   : > { %14879 = vst [vmem:[#allocation51_spill] sm:$0xff] %v11889_v9  ;;  %v2872_v54 = vpop.f32.mrb[125].mxu1  ;;  %v1595_v56 = vmul.f32 %v1563_v27, %v11757_v33  ;;  %v8790_v9 = vld [vmem:[%s9517_s28 + $0x20] sm:$0xff] }
 0x544   : > { %1627 = vst.msk [vmem:[#allocation2 + $0xf0] sm:$0xff] %vm378_vm0, %v1595_v56 }
 0x545   : > { %v11894_v38 = vpop.f32.mrb[126].mxu1 }
 0x546   : > { %14881 = vst [vmem:[#allocation105_spill] sm:$0xff] %v11894_v38  ;;  %v2877_v17 = vpop.f32.mrb[127].mxu1 }
 0x547   : > { %v14888_v17 = vld [vmem:[#allocation50_spill] sm:$0xff] }
 0x54f   : > { %7849 = vrot.lane.b32.xlu1 %v11898_v44, %s8853_s24 }
 0x557   : > { %4789 = vrot.lane.b32.xlu0 %v14882_v10, %s8854_s25  ;;  %v11926_v10 = vpack.i.bf16 %v8789_v26, %v8788_v25  ;;  %v14897_v26 = vld [vmem:[#allocation28_spill] sm:$0xff] }
 0x564   : > { %v11904_v54 = vpop.xlane.xlu0 %2431 }
 0x565   : > { %14883 = vst [vmem:[#allocation156_spill] sm:$0xff] %v11904_v54  ;;  %v8804_v54 = vld [vmem:[%s9517_s28 + $0x90] sm:$0xff] }
 0x566   : > { %v12116_v8 = vpack.i.bf16 %v8805_v35, %v8804_v54  ;;  %v14947_v54 = vld [vmem:[#allocation110_spill] sm:$0xff] }
 0x568   : > { %v4782_v33 = vpop.permute.xlu0 %4781 }
 0x569   : > { %v11906_v42 = vpop.f32.mrb[218].mxu0  ;;  %7091 = vmatprep.mubr.msk.f32.mxu0 %vm378_vm0, %v4782_v33 }
 0x56a   : > { %14884 = vst [vmem:[#allocation11_spill] sm:$0xff] %v11906_v42  ;;  %v11909_v58 = vpop.f32.mrb[219].mxu0  ;;  %7092 = vmatmul.mubr.msk.f32.gmra.mrb[234].mxu0 %vm378_vm0, %v4782_v33  ;;  %v14889_v33 = vld [vmem:[#allocation29_spill] sm:$0xff] }
 0x56b   : > { %14885 = vst [vmem:[#allocation171_spill] sm:$0xff] %v11909_v58  ;;  %7093 = vmatprep.mubr.msk.f32.mxu0 %vm378_vm0, %v4784_v48  ;;  %v15018_v58 = vld [vmem:[#allocation42_spill] sm:$0xff] }
 0x56d   : > { %v11915_v51 = vpop.f32.mrb[220].mxu0 }
 0x56e   : > { %14886 = vst [vmem:[#allocation47_spill] sm:$0xff] %v11915_v51  ;;  %v11917_v27 = vpop.f32.mrb[221].mxu0  ;;  %7094 = vmatmul.mubr.msk.f32.gmra.mrb[236].mxu0 %vm378_vm0, %v4784_v48  ;;  %v11934_v48 = vpop.xlane.xlu1 %2434 }
 0x56f   : > { %14887 = vst [vmem:[#allocation7_spill] sm:$0xff] %v11917_v27  ;;  %14891 = vst [vmem:[#allocation17_spill] sm:$0xff] %v11934_v48  ;;  %v15015_v27 = vld [vmem:[#allocation138_spill] sm:$0xff] }
 0x573   : > { %2452 = vadd.xlane.f32.xlu1 %v14888_v17 }
 0x576   : > { %2449 = vadd.xlane.f32.xlu0 %v11546_v1  ;;  %v4788_v1 = vpop.permute.xlu1 %4787 }
 0x584   : > { %7854 = vrot.lane.b32.xlu1 %v11926_v10, %s8853_s24 }
 0x58c   : > { %4793 = vrot.lane.b32.xlu0 %v14889_v33, %s8854_s25 }
 0x596   : > { %v11962_v53 = vpop.xlane.xlu1 %2440 }
 0x597   : > { %14898 = vst [vmem:[#allocation5_spill] sm:$0xff] %v11962_v53 }
 0x599   : > { %v11932_v49 = vpop.xlane.xlu0 %2437 }
 0x59a   : > { %14890 = vst [vmem:[#allocation18_spill] sm:$0xff] %v11932_v49 }
 0x59d   : > { %v4786_v56 = vpop.permute.xlu0 %4785 }
 0x59e   : > { %v11936_v17 = vpop.f32.mrb[222].mxu0  ;;  %7095 = vmatprep.mubr.msk.f32.mxu0 %vm378_vm0, %v4786_v56 }
 0x59f   : > { %14892 = vst [vmem:[#allocation106_spill] sm:$0xff] %v11936_v17  ;;  %v11939_v25 = vpop.f32.mrb[223].mxu0  ;;  %7096 = vmatmul.mubr.msk.f32.gmra.mrb[238].mxu0 %vm378_vm0, %v4786_v56  ;;  %v8791_v56 = vld [vmem:[%s9517_s28 + $0x28] sm:$0xff] }
 0x5a0   : > { %14893 = vst [vmem:[#allocation107_spill] sm:$0xff] %v11939_v25  ;;  %7097 = vmatprep.mubr.msk.f32.mxu0 %vm378_vm0, %v4788_v1  ;;  %v11956_v39 = vpack.i.bf16 %v8791_v56, %v8790_v9  ;;  %v15000_v25 = vld [vmem:[#allocation140_spill] sm:$0xff] }
 0x5a2   : > { %v11945_v33 = vpop.f32.mrb[224].mxu0 }
 0x5a3   : > { %14894 = vst [vmem:[#allocation45_spill] sm:$0xff] %v11945_v33  ;;  %v11947_v0 = vpop.f32.mrb[225].mxu0  ;;  %7098 = vmatmul.mubr.msk.f32.gmra.mrb[240].mxu0 %vm378_vm0, %v4788_v1  ;;  %v4792_v1 = vpop.permute.xlu1 %4791 }
 0x5a4   : > { %14895 = vst [vmem:[#allocation78_spill] sm:$0xff] %v11947_v0 }
 0x5a8   : > { %2458 = vadd.xlane.f32.xlu1 %v14896_v60 }
 0x5ab   : > { %2455 = vadd.xlane.f32.xlu0 %v11579_v20 }
 0x5b9   : > { %7859 = vrot.lane.b32.xlu1 %v11956_v39, %s8853_s24 }
 0x5c1   : > { %4795 = vrot.lane.b32.xlu0 %v14897_v26, %s8854_s25 }
 0x5cb   : > { %v11964_v55 = vpop.xlane.xlu1 %2446 }
 0x5cc   : > { %14899 = vst [vmem:[#allocation20_spill] sm:$0xff] %v11964_v55 }
 0x5ce   : > { %v11966_v38 = vpop.xlane.xlu0 %2443 }
 0x5cf   : > { %14900 = vst [vmem:[#allocation19_spill] sm:$0xff] %v11966_v38  ;;  %v7850_v60 = vpop.permute.xlu1 %7849  ;;  %v8803_v38 = vld [vmem:[%s9517_s28 + $0x78] sm:$0xff] }
 0x5d0   : > { %v7852_v46 = vunpack.i.h.bf16 %v7850_v60  ;;  %v7851_v20 = vunpack.i.l.bf16 %v7850_v60 }
 0x5d2   : > { %v7354_v32 = vpack.c.bf16 %v7852_v46, %v7851_v20  ;;  %v4790_v9 = vpop.permute.xlu0 %4789  ;;  %v14906_v20 = vld [vmem:[#allocation79_spill] sm:$0xff] }
 0x5d3   : > { %v11968_v56 = vpop.f32.mrb[226].mxu0  ;;  %7099 = vmatprep.mubr.msk.f32.mxu0 %vm378_vm0, %v4790_v9 }
 0x5d4   : > { %14901 = vst [vmem:[#allocation68_spill] sm:$0xff] %v11968_v56  ;;  %7355 = vmatpush1.bf16.msra.mxu1 %v7354_v32  ;;  %v11971_v26 = vpop.f32.mrb[227].mxu0  ;;  %7100 = vmatmul.mubr.msk.f32.gmra.mrb[242].mxu0 %vm378_vm0, %v4790_v9  ;;  %v8792_v9 = vld [vmem:[%s9517_s28 + $0x30] sm:$0xff] }
 0x5d5   : > { %14902 = vst [vmem:[#allocation71_spill] sm:$0xff] %v11971_v26  ;;  %7356 = vmatprep.subr.bf16.mxu1 %v14903_v47  ;;  %7101 = vmatprep.mubr.msk.f32.mxu0 %vm378_vm0, %v4792_v1  ;;  %v11989_v61 = vpack.i.bf16 %v8793_v62, %v8792_v9 }
 0x5d7   : > { %v11978_v46 = vpop.f32.mrb[228].mxu0 }
 0x5d8   : > { %14904 = vst [vmem:[#allocation43_spill] sm:$0xff] %v11978_v46  ;;  %v11980_v60 = vpop.f32.mrb[229].mxu0  ;;  %7102 = vmatmul.mubr.msk.f32.gmra.mrb[244].mxu0 %vm378_vm0, %v4792_v1  ;;  %v15008_v46 = vld [vmem:[#allocation38_spill] sm:$0xff] }
 0x5d9   : > { %14905 = vst [vmem:[#allocation22_spill] sm:$0xff] %v11980_v60 }
 0x5dd   : > { %2464 = vadd.xlane.f32.xlu1 %v14906_v20 }
 0x5e0   : > { %2461 = vadd.xlane.f32.xlu0 %v14907_v63 }
 0x5ee   : > { %7864 = vrot.lane.b32.xlu1 %v11989_v61, %s8853_s24 }
 0x5f6   : > { %4797 = vrot.lane.b32.xlu0 %v14908_v40, %s8854_s25 }
 0x600   : > { %v11995_v7 = vpop.xlane.xlu1 %2452 }
 0x601   : > { %14909 = vst [vmem:[#allocation21_spill] sm:$0xff] %v11995_v7 }
 0x603   : > { %v11997_v1 = vpop.xlane.xlu0 %2449 }
 0x604   : > { %14910 = vst [vmem:[#allocation66_spill] sm:$0xff] %v11997_v1  ;;  %v7855_v23 = vpop.permute.xlu1 %7854 }
 0x605   : > { %v7857_v32 = vunpack.i.h.bf16 %v7855_v23  ;;  %v7856_v20 = vunpack.i.l.bf16 %v7855_v23 }
 0x607   : > { %v7357_v63 = vpack.c.bf16 %v7857_v32, %v7856_v20  ;;  %v4794_v28 = vpop.permute.xlu0 %4793  ;;  %v14915_v20 = vld [vmem:[#allocation104_spill] sm:$0xff] }
 0x608   : > { %v11999_v29 = vpop.f32.mrb[230].mxu0  ;;  %7103 = vmatprep.mubr.msk.f32.mxu0 %vm378_vm0, %v4794_v28 }
 0x609   : > { %14911 = vst [vmem:[#allocation4_spill] sm:$0xff] %v11999_v29  ;;  %7358 = vmatpush1.bf16.msra.mxu1 %v7357_v63  ;;  %v12002_v62 = vpop.f32.mrb[231].mxu0  ;;  %7104 = vmatmul.mubr.msk.f32.gmra.mrb[246].mxu0 %vm378_vm0, %v4794_v28  ;;  %v8794_v63 = vld [vmem:[%s9517_s28 + $0x40] sm:$0xff]  ;;  %v14916_v28 = vld [vmem:[#allocation30_spill] sm:$0xff]  ;;  %v8815_v29 = vld [vmem:[%s9517_s28 + $0xe8] sm:$0xff] }
 0x60a   : > { %14912 = vst [vmem:[#allocation24_spill] sm:$0xff] %v12002_v62  ;;  %7359 = vmatprep.subr.bf16.mxu1 %v14903_v47  ;;  %v12018_v11 = vpack.i.bf16 %v8795_v18, %v8794_v63 }
 0x60c   : > { %v12008_v9 = vpop.f32.mrb[232].mxu0 }
 0x60d   : > { %14913 = vst [vmem:[#allocation23_spill] sm:$0xff] %v12008_v9  ;;  %v12010_v23 = vpop.f32.mrb[233].mxu0  ;;  %v15005_v9 = vld [vmem:[#allocation135_spill] sm:$0xff] }
 0x60e   : > { %14914 = vst [vmem:[#allocation63_spill] sm:$0xff] %v12010_v23 }
 0x612   : > { %2470 = vadd.xlane.f32.xlu1 %v14915_v20 }
 0x615   : > { %2467 = vadd.xlane.f32.xlu0 %v11630_v59 }
 0x623   : > { %7869 = vrot.lane.b32.xlu1 %v12018_v11, %s8853_s24 }
 0x62b   : > { %4799 = vrot.lane.b32.xlu0 %v14916_v28, %s8854_s25 }
 0x635   : > { %v12024_v40 = vpop.xlane.xlu1 %2458 }
 0x636   : > { %14917 = vst [vmem:[#allocation82_spill] sm:$0xff] %v12024_v40  ;;  %v8797_v40 = vld [vmem:[%s9517_s28 + $0x68] sm:$0xff] }
 0x638   : > { %v12026_v15 = vpop.xlane.xlu0 %2455 }
 0x639   : > { %14918 = vst [vmem:[#allocation26_spill] sm:$0xff] %v12026_v15  ;;  %v7860_v13 = vpop.permute.xlu1 %7859 }
 0x63a   : > { %v7862_v32 = vunpack.i.h.bf16 %v7860_v13  ;;  %v7861_v20 = vunpack.i.l.bf16 %v7860_v13 }
 0x63c   : > { %v7360_v59 = vpack.c.bf16 %v7862_v32, %v7861_v20  ;;  %v4796_v16 = vpop.permute.xlu0 %4795  ;;  %v14923_v20 = vld [vmem:[#allocation114_spill] sm:$0xff] }
 0x63d   : > { %v12028_v7 = vpop.f32.mrb[234].mxu0  ;;  %7105 = vmatprep.mubr.msk.f32.mxu0 %vm378_vm0, %v4796_v16 }
 0x63e   : > { %14919 = vst [vmem:[#allocation25_spill] sm:$0xff] %v12028_v7  ;;  %7361 = vmatpush1.bf16.msra.mxu1 %v7360_v59  ;;  %v12031_v18 = vpop.f32.mrb[235].mxu0  ;;  %7106 = vmatmul.mubr.msk.f32.gmra.mrb[248].mxu0 %vm378_vm0, %v4796_v16  ;;  %v8796_v59 = vld [vmem:[%s9517_s28 + $0x60] sm:$0xff]  ;;  %v14924_v16 = vld [vmem:[#allocation32_spill] sm:$0xff]  ;;  %v14966_v7 = vld [vmem:[#allocation117_spill] sm:$0xff] }
 0x63f   : > { %14920 = vst [vmem:[#allocation85_spill] sm:$0xff] %v12031_v18  ;;  %7362 = vmatprep.subr.bf16.mxu1 %v14903_v47  ;;  %v12047_v57 = vpack.i.bf16 %v8797_v40, %v8796_v59  ;;  %v8801_v59 = vld [vmem:[%s9517_s28 + $0x58] sm:$0xff]  ;;  %v14965_v18 = vld [vmem:[#allocation61_spill] sm:$0xff] }
 0x641   : > { %v12037_v28 = vpop.f32.mrb[236].mxu0 }
 0x642   : > { %14921 = vst [vmem:[#allocation49_spill] sm:$0xff] %v12037_v28  ;;  %v12039_v13 = vpop.f32.mrb[237].mxu0 }
 0x643   : > { %14922 = vst [vmem:[#allocation27_spill] sm:$0xff] %v12039_v13  ;;  %v14997_v13 = vld [vmem:[#allocation131_spill] sm:$0xff] }
 0x647   : > { %2476 = vadd.xlane.f32.xlu1 %v14923_v20 }
 0x64a   : > { %2473 = vadd.xlane.f32.xlu0 %v11644_v36 }
 0x658   : > { %7879 = vrot.lane.b32.xlu1 %v12047_v57, %s8853_s24 }
 0x660   : > { %4801 = vrot.lane.b32.xlu0 %v14924_v16, %s8854_s25 }
 0x66a   : > { %v12053_v63 = vpop.xlane.xlu1 %2464 }
 0x66b   : > { %14925 = vst [vmem:[#allocation50_spill] sm:$0xff] %v12053_v63  ;;  %v8799_v63 = vld [vmem:[%s9517_s28 + $0x88] sm:$0xff] }
 0x66d   : > { %v12055_v55 = vpop.xlane.xlu0 %2461 }
 0x66e   : > { %14926 = vst [vmem:[#allocation29_spill] sm:$0xff] %v12055_v55  ;;  %v7865_v41 = vpop.permute.xlu1 %7864 }
 0x66f   : > { %v7867_v32 = vunpack.i.h.bf16 %v7865_v41  ;;  %v7866_v20 = vunpack.i.l.bf16 %v7865_v41 }
 0x671   : > { %v7363_v36 = vpack.c.bf16 %v7867_v32, %v7866_v20  ;;  %v4798_v53 = vpop.permute.xlu0 %4797  ;;  %v14931_v20 = vld [vmem:[#allocation84_spill] sm:$0xff] }
 0x672   : > { %v12057_v49 = vpop.f32.mrb[238].mxu0  ;;  %7107 = vmatprep.mubr.msk.f32.mxu0 %vm378_vm0, %v4798_v53 }
 0x673   : > { %14927 = vst [vmem:[#allocation80_spill] sm:$0xff] %v12057_v49  ;;  %7364 = vmatpush1.bf16.msra.mxu1 %v7363_v36  ;;  %v12060_v40 = vpop.f32.mrb[239].mxu0  ;;  %7108 = vmatmul.mubr.msk.f32.gmra.mrb[250].mxu0 %vm378_vm0, %v4798_v53  ;;  %v8798_v36 = vld [vmem:[%s9517_s28 + $0x80] sm:$0xff]  ;;  %v8800_v53 = vld [vmem:[%s9517_s28 + $0x50] sm:$0xff] }
 0x674   : > { %14928 = vst [vmem:[#allocation28_spill] sm:$0xff] %v12060_v40  ;;  %7365 = vmatprep.subr.bf16.mxu1 %v14903_v47  ;;  %v12076_v34 = vpack.i.bf16 %v8799_v63, %v8798_v36  ;;  %v12082_v48 = vpack.i.bf16 %v8801_v59, %v8800_v53 }
 0x676   : > { %v12066_v41 = vpop.f32.mrb[240].mxu0  ;;  %14932 = vst [vmem:[#allocation31_spill] sm:$0xff] %v12076_v34 }
 0x677   : > { %14929 = vst [vmem:[#allocation79_spill] sm:$0xff] %v12066_v41  ;;  %v12068_v32 = vpop.f32.mrb[241].mxu0 }
 0x678   : > { %14930 = vst [vmem:[#allocation55_spill] sm:$0xff] %v12068_v32 }
 0x67c   : > { %2482 = vadd.xlane.f32.xlu1 %v14931_v20 }
 0x67f   : > { %2479 = vadd.xlane.f32.xlu0 %v11662_v2 }
 0x68d   : > { %7889 = vrot.lane.b32.xlu1 %v12076_v34, %s8853_s24 }
 0x695   : > { %7874 = vrot.lane.b32.xlu0 %v12082_v48, %s8853_s24 }
 0x69f   : > { %v12086_v55 = vpop.xlane.xlu1 %2470 }
 0x6a0   : > { %14933 = vst [vmem:[#allocation104_spill] sm:$0xff] %v12086_v55  ;;  %v14939_v55 = vld [vmem:[#allocation75_spill] sm:$0xff] }
 0x6a2   : > { %v12088_v16 = vpop.xlane.xlu0 %2467 }
 0x6a3   : > { %14934 = vst [vmem:[#allocation30_spill] sm:$0xff] %v12088_v16  ;;  %v7870_v20 = vpop.permute.xlu1 %7869  ;;  %v14941_v16 = vld [vmem:[#allocation87_spill] sm:$0xff] }
 0x6a4   : > { %v7872_v2 = vunpack.i.h.bf16 %v7870_v20  ;;  %v7871_v15 = vunpack.i.l.bf16 %v7870_v20 }
 0x6a6   : > { %v7366_v1 = vpack.c.bf16 %v7872_v2, %v7871_v15  ;;  %v4800_v63 = vpop.permute.xlu0 %4799 }
 0x6a7   : > { %v12090_v36 = vpop.f32.mrb[242].mxu0  ;;  %7109 = vmatprep.mubr.msk.f32.mxu0 %vm378_vm0, %v4800_v63 }
 0x6a8   : > { %14935 = vst [vmem:[#allocation114_spill] sm:$0xff] %v12090_v36  ;;  %7367 = vmatpush1.bf16.msra.mxu1 %v7366_v1  ;;  %v12093_v59 = vpop.f32.mrb[243].mxu0  ;;  %7110 = vmatmul.mubr.msk.f32.gmra.mrb[252].mxu0 %vm378_vm0, %v4800_v63  ;;  %v14940_v1 = vld [vmem:[#allocation77_spill] sm:$0xff] }
 0x6a9   : > { %14936 = vst [vmem:[#allocation32_spill] sm:$0xff] %v12093_v59  ;;  %7368 = vmatprep.subr.bf16.mxu1 %v14903_v47  ;;  %v8802_v63 = vld [vmem:[%s9517_s28 + $0x70] sm:$0xff]  ;;  %14943 = vst [vmem:[#allocation77_spill] sm:$0xff] %v12116_v8  ;;  %v8811_v59 = vld [vmem:[%s9517_s28 + $0xc8] sm:$0xff] }
 0x6aa   : > { %v12112_v53 = vpack.i.bf16 %v8803_v38, %v8802_v63  ;;  %v14950_v63 = vld [vmem:[#allocation112_spill] sm:$0xff] }
 0x6ab   : > { %v12099_v15 = vpop.f32.mrb[244].mxu0 }
 0x6ac   : > { %14937 = vst [vmem:[#allocation84_spill] sm:$0xff] %v12099_v15  ;;  %v12101_v20 = vpop.f32.mrb[245].mxu0  ;;  %14942 = vst [vmem:[#allocation75_spill] sm:$0xff] %v12112_v53 }
 0x6ad   : > { %14938 = vst [vmem:[#allocation173_spill] sm:$0xff] %v12101_v20 }
 0x6b1   : > { %2488 = vadd.xlane.f32.xlu1 %v14939_v55 }
 0x6b4   : > { %2485 = vadd.xlane.f32.xlu0 %v11671_v50 }
 0x6b5   : > { %2494 = vadd.xlane.f32.xlu1 %v14940_v1 }
 0x6b9   : > { %2500 = vadd.xlane.f32.xlu1 %v14941_v16  ;;  %v14948_v16 = vld [vmem:[#allocation111_spill] sm:$0xff] }
 0x6ba   : > { %v14949_v1 = vmax.f32 %v14947_v54, %v14948_v16 }
 0x6bd   : > { %2506 = vadd.xlane.f32.xlu1 %v11620_v22 }
 0x6ca   : > { %7884 = vrot.lane.b32.xlu0 %v12112_v53, %s8853_s24 }
 0x6ce   : > { %7894 = vrot.lane.b32.xlu1 %v12116_v8, %s8853_s24 }
 0x6d7   : > { %v12122_v50 = vpop.xlane.xlu0 %2473 }
 0x6d8   : > { %14944 = vst [vmem:[#allocation87_spill] sm:$0xff] %v12122_v50  ;;  %v8807_v50 = vld [vmem:[%s9517_s28 + $0xb8] sm:$0xff] }
 0x6db   : > { %v4802_v55 = vpop.permute.xlu0 %4801 }
 0x6dc   : > { %v12124_v22 = vpop.f32.mrb[246].mxu0  ;;  %7111 = vmatprep.mubr.msk.f32.mxu0 %vm378_vm0, %v4802_v55 }
 0x6dd   : > { %14945 = vst [vmem:[#allocation174_spill] sm:$0xff] %v12124_v22  ;;  %v12127_v38 = vpop.f32.mrb[247].mxu0  ;;  %7112 = vmatmul.mubr.msk.f32.gmra.mrb[254].mxu0 %vm378_vm0, %v4802_v55  ;;  %v14951_v55 = vld [vmem:[#allocation113_spill] sm:$0xff]  ;;  %v8809_v22 = vld [vmem:[%s9517_s28 + $0xa8] sm:$0xff] }
 0x6de   : > { %14946 = vst [vmem:[#allocation175_spill] sm:$0xff] %v12127_v38  ;;  %v14952_v35 = vmax.f32 %v14950_v63, %v14951_v55  ;;  %v8808_v38 = vld [vmem:[%s9517_s28 + $0xa0] sm:$0xff] }
 0x6e9   : > { %2491 = vadd.xlane.f32.xlu0 %v11680_v43  ;;  %v14953_v43 = vld [vmem:[#allocation115_spill] sm:$0xff] }
 0x6ed   : > { %2497 = vadd.xlane.f32.xlu0 %v11691_v14  ;;  %v14954_v14 = vld [vmem:[#allocation35_spill] sm:$0xff] }
 0x6ee   : > { %v14955_v2 = vmax.f32 %v14953_v43, %v14954_v14 }
 0x6f1   : > { %2503 = vadd.xlane.f32.xlu0 %v11705_v37  ;;  %v8806_v37 = vld [vmem:[%s9517_s28 + $0xb0] sm:$0xff] }
 0x6f2   : > { %2512 = vadd.xlane.f32.xlu1 %v11638_v19  ;;  %v7903_v19 = vpack.i.bf16 %v8807_v50, %v8806_v37 }
 0x6f5   : > { %2509 = vadd.xlane.f32.xlu0 %v11715_v24  ;;  %v12151_v24 = vpack.i.bf16 %v8809_v22, %v8808_v38 }
 0x6f6   : > { %2515 = vadd.xlane.f32.xlu1 %v11731_v5  ;;  %v12153_v5 = vpop.xlane.xlu1 %2476 }
 0x6f7   : > { %14956 = vst [vmem:[#allocation110_spill] sm:$0xff] %v12151_v24  ;;  %14957 = vst [vmem:[#allocation111_spill] sm:$0xff] %v12153_v5 }
 0x6f9   : > { %3714 = vmax.xlane.f32.xlu0 %v14949_v1  ;;  %v8810_v1 = vld [vmem:[%s9517_s28 + $0xc0] sm:$0xff] }
 0x6fa   : > { %3717 = vmax.xlane.f32.xlu1 %v14952_v35  ;;  %v7908_v35 = vpack.i.bf16 %v8811_v59, %v8810_v1 }
 0x6fe   : > { %3720 = vmax.xlane.f32.xlu1 %v14955_v2  ;;  %v7880_v2 = vpop.permute.xlu1 %7879 }
 0x6ff   : > { %v7882_v38 = vunpack.i.h.bf16 %v7880_v2 }
 0x709   : > { %v12174_v49 = vpop.xlane.xlu1 %2482 }
 0x70a   : > { %14964 = vst [vmem:[#allocation35_spill] sm:$0xff] %v12174_v49 }
 0x70c   : > { %v12155_v31 = vpop.xlane.xlu0 %2479 }
 0x70d   : > { %14958 = vst [vmem:[#allocation112_spill] sm:$0xff] %v12155_v31  ;;  %v14962_v31 = vld [vmem:[#allocation34_spill] sm:$0xff] }
 0x70f   : > { %7904 = vrot.lane.b32.xlu1 %v7903_v19, %s8853_s24  ;;  %7899 = vrot.lane.b32.xlu0 %v12151_v24, %s8853_s24  ;;  %v7881_v19 = vunpack.i.l.bf16 %v7880_v2  ;;  %v14967_v2 = vmax.f32 %v14965_v18, %v14966_v7 }
 0x710   : > { %v7875_v36 = vpop.permute.xlu0 %7874 }
 0x711   : > { %v7877_v40 = vunpack.i.h.bf16 %v7875_v36  ;;  %v7876_v50 = vunpack.i.l.bf16 %v7875_v36  ;;  %v12162_v37 = vpop.f32.mrb[248].mxu0  ;;  %v7372_v1 = vpack.c.bf16 %v7882_v38, %v7881_v19  ;;  %v14961_v36 = vld [vmem:[#allocation116_spill] sm:$0xff]  ;;  %v8812_v19 = vld [vmem:[%s9517_s28 + $0xd0] sm:$0xff] }
 0x712   : > { %14959 = vst [vmem:[#allocation113_spill] sm:$0xff] %v12162_v37  ;;  %v12165_v22 = vpop.f32.mrb[249].mxu0 }
 0x713   : > { %7909 = vrot.lane.b32.xlu1 %v7908_v35, %s8853_s24  ;;  %14960 = vst [vmem:[#allocation115_spill] sm:$0xff] %v12165_v22  ;;  %v7369_v5 = vpack.c.bf16 %v7877_v40, %v7876_v50  ;;  %v14963_v35 = vmax.f32 %v14961_v36, %v14962_v31  ;;  %v7890_v40 = vpop.permute.xlu1 %7889  ;;  %v14968_v50 = vld [vmem:[#allocation118_spill] sm:$0xff] }
 0x715   : > { %7370 = vmatpush1.bf16.msra.mxu1 %v7369_v5  ;;  %v14969_v5 = vld [vmem:[#allocation119_spill] sm:$0xff] }
 0x716   : > { %7371 = vmatprep.subr.bf16.mxu1 %v14903_v47  ;;  %v14970_v59 = vmax.f32 %v14968_v50, %v14969_v5 }
 0x719   : > { %7373 = vmatpush1.bf16.msra.mxu1 %v7372_v1  ;;  %v8813_v1 = vld [vmem:[%s9517_s28 + $0xd8] sm:$0xff] }
 0x71a   : > { %7374 = vmatprep.subr.bf16.mxu1 %v14903_v47  ;;  %v7913_v22 = vpack.i.bf16 %v8813_v1, %v8812_v19  ;;  %v7892_v1 = vunpack.i.h.bf16 %v7890_v40 }
 0x72e   : > { %3723 = vmax.xlane.f32.xlu0 %v14963_v35 }
 0x737   : > { %3726 = vmax.xlane.f32.xlu1 %v14967_v2 }
 0x73b   : > { %3729 = vmax.xlane.f32.xlu1 %v14970_v59 }
 0x73e   : > { %v12182_v38 = vpop.xlane.xlu1 %2488 }
 0x73f   : > { %14971 = vst [vmem:[#allocation116_spill] sm:$0xff] %v12182_v38  ;;  %v8814_v38 = vld [vmem:[%s9517_s28 + $0xe0] sm:$0xff] }
 0x740   : > { %v7918_v19 = vpack.i.bf16 %v8815_v29, %v8814_v38 }
 0x741   : > { %v12186_v37 = vpop.xlane.xlu0 %2485 }
 0x742   : > { %14972 = vst [vmem:[#allocation34_spill] sm:$0xff] %v12186_v37  ;;  %v12188_v35 = vpop.xlane.xlu1 %2494  ;;  %v7891_v37 = vunpack.i.l.bf16 %v7890_v40 }
 0x743   : > { %14973 = vst [vmem:[#allocation61_spill] sm:$0xff] %v12188_v35 }
 0x744   : > { %7914 = vrot.lane.b32.xlu0 %v7913_v22, %s8853_s24  ;;  %v7378_v26 = vpack.c.bf16 %v7892_v1, %v7891_v37  ;;  %v14982_v22 = vld [vmem:[#allocation124_spill] sm:$0xff]  ;;  %v14984_v37 = vld [vmem:[#allocation125_spill] sm:$0xff] }
 0x745   : > { %v7885_v49 = vpop.permute.xlu0 %7884 }
 0x746   : > { %v12191_v2 = vpop.xlane.xlu1 %2500  ;;  %v7887_v20 = vunpack.i.h.bf16 %v7885_v49  ;;  %v7886_v15 = vunpack.i.l.bf16 %v7885_v49  ;;  %v12193_v62 = vpop.f32.mrb[250].mxu0  ;;  %v8816_v49 = vld [vmem:[%s9517_s28 + $0xf0] sm:$0xff] }
 0x747   : > { %14974 = vst [vmem:[#allocation117_spill] sm:$0xff] %v12191_v2  ;;  %14975 = vst [vmem:[#allocation118_spill] sm:$0xff] %v12193_v62  ;;  %v12195_v59 = vpop.f32.mrb[251].mxu0  ;;  %v8817_v2 = vld [vmem:[%s9517_s28 + $0xf8] sm:$0xff] }
 0x748   : > { %14976 = vst [vmem:[#allocation119_spill] sm:$0xff] %v12195_v59  ;;  %v7375_v32 = vpack.c.bf16 %v7887_v20, %v7886_v15  ;;  %v7923_v41 = vpack.i.bf16 %v8817_v2, %v8816_v49  ;;  %v14979_v20 = vld [vmem:[#allocation121_spill] sm:$0xff]  ;;  %v14994_v59 = vld [vmem:[#allocation123_spill] sm:$0xff] }
 0x74a   : > { %v12201_v35 = vpop.xlane.xlu1 %2506  ;;  %7376 = vmatpush1.bf16.msra.mxu1 %v7375_v32  ;;  %v14978_v32 = vld [vmem:[#allocation120_spill] sm:$0xff] }
 0x74b   : > { %14977 = vst [vmem:[#allocation176_spill] sm:$0xff] %v12201_v35  ;;  %7377 = vmatprep.subr.bf16.mxu1 %v14903_v47  ;;  %v14980_v40 = vmax.f32 %v14978_v32, %v14979_v20  ;;  %v14993_v35 = vld [vmem:[#allocation122_spill] sm:$0xff] }
 0x74c   : > { %7919 = vrot.lane.b32.xlu1 %v7918_v19, %s8853_s24  ;;  %v14981_v19 = vld [vmem:[#allocation9_spill] sm:$0xff]  ;;  %v14995_v62 = vmax.f32 %v14993_v35, %v14994_v59 }
 0x74d   : > { %v14983_v2 = vmax.f32 %v14981_v19, %v14982_v22 }
 0x74e   : > { %v7895_v56 = vpop.permute.xlu1 %7894  ;;  %7379 = vmatpush1.bf16.msra.mxu1 %v7378_v26  ;;  %v14985_v26 = vld [vmem:[#allocation126_spill] sm:$0xff] }
 0x74f   : > { %v7897_v29 = vunpack.i.h.bf16 %v7895_v56  ;;  %v7896_v38 = vunpack.i.l.bf16 %v7895_v56  ;;  %7380 = vmatprep.subr.bf16.mxu1 %v14903_v47  ;;  %v14986_v1 = vmax.f32 %v14984_v37, %v14985_v26  ;;  %v14987_v56 = vld [vmem:[#allocation127_spill] sm:$0xff] }
 0x750   : > { %7924 = vrot.lane.b32.xlu1 %v7923_v41, %s8853_s24  ;;  %v14988_v41 = vld [vmem:[#allocation128_spill] sm:$0xff] }
 0x751   : > { %v7381_v15 = vpack.c.bf16 %v7897_v29, %v7896_v38  ;;  %v14989_v49 = vmax.f32 %v14987_v56, %v14988_v41  ;;  %v14990_v29 = vld [vmem:[#allocation129_spill] sm:$0xff]  ;;  %v14991_v38 = vld [vmem:[#allocation130_spill] sm:$0xff] }
 0x753   : > { %7382 = vmatpush1.bf16.msra.mxu1 %v7381_v15  ;;  %v14992_v15 = vmax.f32 %v14990_v29, %v14991_v38 }
 0x754   : > { %7383 = vmatprep.subr.bf16.mxu1 %v14903_v47 }
 0x763   : > { %3732 = vmax.xlane.f32.xlu0 %v14980_v40 }
 0x767   : > { %3738 = vmax.xlane.f32.xlu0 %v14983_v2  ;;  %v14998_v2 = vld [vmem:[#allocation132_spill] sm:$0xff] }
 0x768   : > { %v14999_v28 = vmax.f32 %v14997_v13, %v14998_v2 }
 0x76b   : > { %3741 = vmax.xlane.f32.xlu0 %v14986_v1  ;;  %v15001_v1 = vld [vmem:[#allocation37_spill] sm:$0xff] }
 0x76c   : > { %v15002_v17 = vmax.f32 %v15000_v25, %v15001_v1 }
 0x76f   : > { %3744 = vmax.xlane.f32.xlu0 %v14989_v49  ;;  %v15004_v49 = vld [vmem:[#allocation134_spill] sm:$0xff] }
 0x770   : > { %v15006_v60 = vmax.f32 %v15004_v49, %v15005_v9 }
 0x773   : > { %3747 = vmax.xlane.f32.xlu0 %v14992_v15  ;;  %v15007_v15 = vld [vmem:[#allocation64_spill] sm:$0xff] }
 0x774   : > { %3735 = vmax.xlane.f32.xlu1 %v14995_v62  ;;  %v15009_v0 = vmax.f32 %v15007_v15, %v15008_v46 }
 0x776   : > { %v12228_v40 = vpop.xlane.xlu0 %2491 }
 0x777   : > { %14996 = vst [vmem:[#allocation120_spill] sm:$0xff] %v12228_v40  ;;  %3750 = vmax.xlane.f32.xlu0 %v14999_v28  ;;  %v15025_v28 = vld [vmem:[#allocation76_spill] sm:$0xff] }
 0x778   : > { %3759 = vmax.xlane.f32.xlu1 %v15002_v17 }
 0x77a   : > { %v12236_v23 = vpop.xlane.xlu0 %2497 }
 0x77b   : > { %15003 = vst [vmem:[#allocation121_spill] sm:$0xff] %v12236_v23  ;;  %3753 = vmax.xlane.f32.xlu0 %v15006_v60  ;;  %v12244_v62 = vpop.f32.mrb[252].mxu0  ;;  %v15014_v23 = vld [vmem:[#allocation137_spill] sm:$0xff]  ;;  %v15017_v60 = vld [vmem:[#allocation70_spill] sm:$0xff] }
 0x77c   : > { %3765 = vmax.xlane.f32.xlu1 %v15009_v0  ;;  %15010 = vst [vmem:[#allocation9_spill] sm:$0xff] %v12244_v62  ;;  %v12246_v40 = vpop.f32.mrb[253].mxu0  ;;  %v15016_v51 = vmax.f32 %v15014_v23, %v15015_v27  ;;  %v15019_v42 = vmax.f32 %v15017_v60, %v15018_v58 }
 0x77d   : > { %15011 = vst [vmem:[#allocation124_spill] sm:$0xff] %v12246_v40 }
 0x77e   : > { %v12250_v33 = vpop.xlane.xlu0 %2503 }
 0x77f   : > { %15012 = vst [vmem:[#allocation125_spill] sm:$0xff] %v12250_v33  ;;  %v12252_v17 = vpop.xlane.xlu1 %2512  ;;  %3756 = vmax.xlane.f32.xlu0 %v15016_v51  ;;  %v15026_v33 = vld [vmem:[#allocation8_spill] sm:$0xff] }
 0x780   : > { %15013 = vst [vmem:[#allocation126_spill] sm:$0xff] %v12252_v17  ;;  %3771 = vmax.xlane.f32.xlu1 %v15019_v42  ;;  %v15027_v40 = vmax.f32 %v15025_v28, %v15026_v33  ;;  %v15028_v42 = vld [vmem:[#allocation67_spill] sm:$0xff]  ;;  %v15034_v33 = vld [vmem:[#allocation73_spill] sm:$0xff] }
 0x782   : > { %v12260_v0 = vpop.xlane.xlu0 %2509 }
 0x783   : > { %15020 = vst [vmem:[#allocation127_spill] sm:$0xff] %v12260_v0  ;;  %v12262_v45 = vpop.xlane.xlu1 %2515  ;;  %3762 = vmax.xlane.f32.xlu0 %v15024_v30  ;;  %v15030_v0 = vmax.f32 %v15028_v42, %v15029_v12 }
 0x784   : > { %15021 = vst [vmem:[#allocation128_spill] sm:$0xff] %v12262_v45  ;;  %3777 = vmax.xlane.f32.xlu1 %v15027_v40  ;;  %v15031_v45 = vld [vmem:[#allocation146_spill] sm:$0xff] }
 0x785   : > { %v15033_v21 = vmax.f32 %v15031_v45, %v15032_v52 }
 0x786   : > { %v3715_v17 = vpop.xlane.xlu0 %3714 }
 0x787   : > { %v12270_v62 = vpop.xlane.xlu1 %3717  ;;  %v3809_v51 = vsub.f32 %v14947_v54, %v3715_v17  ;;  %v3810_v4 = vsub.f32 %v14948_v16, %v3715_v17  ;;  %3768 = vmax.xlane.f32.xlu0 %v15030_v0  ;;  %v15035_v54 = vld [vmem:[#allocation44_spill] sm:$0xff]  ;;  %v15038_v17 = vld [vmem:[#allocation149_spill] sm:$0xff] }
 0x788   : > { %3783 = vmax.xlane.f32.xlu1 %v15033_v21  ;;  %v15036_v28 = vmax.f32 %v15034_v33, %v15035_v54  ;;  %v15037_v16 = vld [vmem:[#allocation148_spill] sm:$0xff] }
 0x789   : > { %v3873_v30 = vmul.f32 1.442695, %v3809_v51  ;;  %v3875_v24 = vmul.f32 1.442695, %v3810_v4  ;;  %v15039_v0 = vmax.f32 %v15037_v16, %v15038_v17  ;;  %v15040_v21 = vld [vmem:[#allocation144_spill] sm:$0xff]  ;;  %v15041_v51 = vld [vmem:[#allocation145_spill] sm:$0xff] }
 0x78a   : > { %v7900_v8 = vpop.permute.xlu0 %7899  ;;  %v15042_v4 = vmax.f32 %v15040_v21, %v15041_v51 }
 0x78b   : > { %v12280_v34 = vpop.xlane.xlu1 %3720  ;;  %8328 = vpow2.f32 %v3873_v30  ;;  %v7902_v40 = vunpack.i.h.bf16 %v7900_v8  ;;  %v7901_v53 = vunpack.i.l.bf16 %v7900_v8  ;;  %3774 = vmax.xlane.f32.xlu0 %v15036_v28 }
 0x78c   : > { %8330 = vpow2.f32 %v3875_v24  ;;  %3786 = vmax.xlane.f32.xlu1 %v15039_v0 }
 0x78d   : > { %v7384_v12 = vpack.c.bf16 %v7902_v40, %v7901_v53 }
 0x78f   : > { %v7905_v52 = vpop.permute.xlu1 %7904  ;;  %3780 = vmax.xlane.f32.xlu0 %v15042_v4  ;;  %7385 = vmatpush1.bf16.msra.mxu1 %v7384_v12 }
 0x790   : > { %v7907_v45 = vunpack.i.h.bf16 %v7905_v52  ;;  %v7906_v30 = vunpack.i.l.bf16 %v7905_v52  ;;  %7386 = vmatprep.subr.bf16.mxu1 %v14903_v47 }
 0x792   : > { %v7387_v8 = vpack.c.bf16 %v7907_v45, %v7906_v30 }
 0x793   : > { %v7910_v42 = vpop.permute.xlu1 %7909 }
 0x794   : > { %v7912_v54 = vunpack.i.h.bf16 %v7910_v42  ;;  %v7911_v28 = vunpack.i.l.bf16 %v7910_v42  ;;  %7388 = vmatpush1.bf16.msra.mxu1 %v7387_v8  ;;  %v3812_v8 = vsub.f32 %v14951_v55, %v12270_v62  ;;  %v3811_v55 = vsub.f32 %v14950_v63, %v12270_v62 }
 0x795   : > { %v12292_v24 = vpop.eup %8328  ;;  %7389 = vmatprep.subr.bf16.mxu1 %v14903_v47  ;;  %v3813_v62 = vsub.f32 %v14953_v43, %v12280_v34 }
 0x796   : > { %v7390_v17 = vpack.c.bf16 %v7912_v54, %v7911_v28  ;;  %v8331_v53 = vpop.eup %8330  ;;  %v3877_v63 = vmul.f32 1.442695, %v3811_v55 }
 0x797   : > { %4257 = vmatprep.mubr.f32.mxu1 %v8331_v53  ;;  %v12296_v40 = vadd.f32 %v8331_v53, %v12292_v24 }
 0x798   : > { %7391 = vmatpush1.bf16.msra.mxu1 %v7390_v17 }
 0x799   : > { %15043 = vst [vmem:[#allocation129_spill] sm:$0xff] %v12296_v40  ;;  %7392 = vmatprep.subr.bf16.mxu1 %v14903_v47  ;;  %v15045_v40 = vld [vmem:[#allocation150_spill] sm:$0xff] }
 0x79d   : > { %7934 = vrot.lane.b32.xlu1 %v11926_v10, %s8854_s25 }
 0x7a1   : > { %7939 = vrot.lane.b32.xlu1 %v11956_v39, %s8854_s25 }
 0x7a5   : > { %7929 = vrot.lane.b32.xlu0 %v11898_v44, %s8854_s25 }
 0x7b0   : > { %v12305_v52 = vpop.f32.mrb[254].mxu0 }
 0x7b1   : > { %v12307_v12 = vpop.f32.mrb[255].mxu0 }
 0x7b2   : > { %15044 = vst [vmem:[#allocation130_spill] sm:$0xff] %v12307_v12 }
 0x7bb   : > { %v3724_v42 = vpop.xlane.xlu0 %3723 }
 0x7bc   : > { %v3815_v54 = vsub.f32 %v14961_v36, %v3724_v42  ;;  %v3816_v17 = vsub.f32 %v14962_v31, %v3724_v42  ;;  %v15046_v36 = vld [vmem:[#allocation151_spill] sm:$0xff]  ;;  %v15048_v31 = vld [vmem:[#allocation152_spill] sm:$0xff]  ;;  %v15049_v42 = vld [vmem:[#allocation153_spill] sm:$0xff] }
 0x7bd   : > { %v15047_v12 = vmax.f32 %v15045_v40, %v15046_v36 }
 0x7be   : > { %v3885_v0 = vmul.f32 1.442695, %v3815_v54  ;;  %v3887_v10 = vmul.f32 1.442695, %v3816_v17  ;;  %v15050_v54 = vmax.f32 %v15048_v31, %v15049_v42 }
 0x7bf   : > { %v7915_v4 = vpop.permute.xlu0 %7914 }
 0x7c0   : > { %8332 = vpow2.f32 %v3885_v0  ;;  %v7917_v39 = vunpack.i.h.bf16 %v7915_v4  ;;  %v7916_v30 = vunpack.i.l.bf16 %v7915_v4 }
 0x7c1   : > { %8334 = vpow2.f32 %v3887_v10  ;;  %v3879_v10 = vmul.f32 1.442695, %v3812_v8 }
 0x7c2   : > { %v7393_v44 = vpack.c.bf16 %v7917_v39, %v7916_v30  ;;  %v15051_v39 = vld [vmem:[#allocation154_spill] sm:$0xff]  ;;  %v15052_v30 = vld [vmem:[#allocation155_spill] sm:$0xff] }
 0x7c4   : > { %v3727_v28 = vpop.xlane.xlu1 %3726  ;;  %3789 = vmax.xlane.f32.xlu0 %v15047_v12  ;;  %7394 = vmatpush1.bf16.msra.mxu1 %v7393_v44  ;;  %v3814_v12 = vsub.f32 %v14954_v14, %v12280_v34  ;;  %v15053_v44 = vmax.f32 %v15051_v39, %v15052_v30 }
 0x7c5   : > { %v3817_v53 = vsub.f32 %v14965_v18, %v3727_v28  ;;  %v3818_v45 = vsub.f32 %v14966_v7, %v3727_v28  ;;  %3792 = vmax.xlane.f32.xlu1 %v15050_v54  ;;  %7395 = vmatprep.subr.bf16.mxu1 %v14903_v47 }
 0x7c6   : > { %v3883_v14 = vmul.f32 1.442695, %v3814_v12 }
 0x7c7   : > { %v3889_v17 = vmul.f32 1.442695, %v3817_v53  ;;  %v3891_v0 = vmul.f32 1.442695, %v3818_v45 }
 0x7c8   : > { %v3730_v18 = vpop.xlane.xlu1 %3729 }
 0x7c9   : > { %8336 = vpow2.f32 %v3889_v17  ;;  %v3819_v7 = vsub.f32 %v14968_v50, %v3730_v18  ;;  %v3820_v4 = vsub.f32 %v14969_v5, %v3730_v18  ;;  %3795 = vmax.xlane.f32.xlu1 %v15053_v44  ;;  %v3881_v44 = vmul.f32 1.442695, %v3813_v62 }
 0x7ca   : > { %8338 = vpow2.f32 %v3891_v0  ;;  %v8333_v28 = vpop.eup %8332 }
 0x7cb   : > { %v3893_v45 = vmul.f32 1.442695, %v3819_v7  ;;  %v3895_v53 = vmul.f32 1.442695, %v3820_v4  ;;  %v8335_v54 = vpop.eup %8334  ;;  %8340 = vpow2.f32 %v3879_v10 }
 0x7cc   : > { %v7920_v50 = vpop.permute.xlu1 %7919  ;;  %v12335_v17 = vadd.f32 %v8335_v54, %v8333_v28 }
 0x7cd   : > { %8342 = vpow2.f32 %v3893_v45  ;;  %v7922_v5 = vunpack.i.h.bf16 %v7920_v50  ;;  %v7921_v8 = vunpack.i.l.bf16 %v7920_v50 }
 0x7ce   : > { %8344 = vpow2.f32 %v3895_v53 }
 0x7cf   : > { %v7396_v0 = vpack.c.bf16 %v7922_v5, %v7921_v8  ;;  %8346 = vpow2.f32 %v3877_v63 }
 0x7d0   : > { %v7925_v18 = vpop.permute.xlu1 %7924  ;;  %8348 = vpow2.f32 %v3883_v14 }
 0x7d1   : > { %v7927_v7 = vunpack.i.h.bf16 %v7925_v18  ;;  %v7926_v4 = vunpack.i.l.bf16 %v7925_v18  ;;  %7397 = vmatpush1.bf16.msra.mxu1 %v7396_v0  ;;  %8350 = vpow2.f32 %v3881_v44 }
 0x7d2   : > { %7398 = vmatprep.subr.bf16.mxu1 %v14903_v47 }
 0x7d3   : > { %v8337_v55 = vpop.eup %8336  ;;  %v7399_v34 = vpack.c.bf16 %v7927_v7, %v7926_v4 }
 0x7d4   : > { %v8339_v43 = vpop.eup %8338 }
 0x7d5   : > { %7400 = vmatpush1.bf16.msra.mxu1 %v7399_v34  ;;  %v12338_v10 = vadd.f32 %v8339_v43, %v8337_v55  ;;  %v12340_v45 = vpop.eup %8340 }
 0x7d6   : > { %7449 = vmatprep.subr.bf16.mxu1 %v14903_v47 }
 0x7d7   : > { %v8343_v12 = vpop.eup %8342 }
 0x7d8   : > { %v8345_v53 = vpop.eup %8344  ;;  %4258 = vmatmul.mubr.f32.vlgmr.msra.gmra.mrb[128].mxu1 %v12292_v24 }
 0x7d9   : > { %4262 = vmatprep.mubr.f32.mxu1 %v12340_v45  ;;  %v12345_v63 = vadd.f32 %v8345_v53, %v8343_v12  ;;  %v12347_v62 = vpop.eup %8346 }
 0x7da   : > { %7949 = vrot.lane.b32.xlu1 %v12018_v11, %s8854_s25  ;;  %7944 = vrot.lane.b32.xlu0 %v11989_v61, %s8854_s25  ;;  %v12353_v50 = vpop.eup %8348 }
 0x7db   : > { %v12357_v5 = vpop.eup %8350 }
 0x7dc   : > { %4263 = vmatmul.mubr.f32.gmra.mrb[130].mxu1 %v12347_v62 }
 0x7dd   : > { %4267 = vmatprep.mubr.f32.mxu1 %v12353_v50 }
 0x7de   : > { %7954 = vrot.lane.b32.xlu1 %v12082_v48, %s8854_s25 }
 0x7e0   : > { %4268 = vmatmul.mubr.f32.gmra.mrb[132].mxu1 %v12357_v5 }
 0x7e1   : > { %4272 = vmatprep.mubr.f32.mxu1 %v8335_v54 }
 0x7e4   : > { %4273 = vmatmul.mubr.f32.gmra.mrb[134].mxu1 %v8333_v28 }
 0x7e5   : > { %4277 = vmatprep.mubr.f32.mxu1 %v8339_v43 }
 0x7e8   : > { %4278 = vmatmul.mubr.f32.gmra.mrb[136].mxu1 %v8337_v55  ;;  %v15055_v55 = vld [vmem:[#allocation158_spill] sm:$0xff] }
 0x7e9   : > { %4282 = vmatprep.mubr.f32.mxu1 %v8345_v53 }
 0x7ec   : > { %4283 = vmatmul.mubr.f32.gmra.mrb[138].mxu1 %v8343_v12 }
 0x7f0   : > { %v3733_v11 = vpop.xlane.xlu0 %3732 }
 0x7f1   : > { %v3821_v61 = vsub.f32 %v14978_v32, %v3733_v11  ;;  %v3822_v24 = vsub.f32 %v14979_v20, %v3733_v11  ;;  %v15054_v32 = vld [vmem:[#allocation157_spill] sm:$0xff] }
 0x7f2   : > { %v15056_v20 = vmax.f32 %v15054_v32, %v15055_v55 }
 0x7f3   : > { %v3897_v8 = vmul.f32 1.442695, %v3821_v61  ;;  %v3899_v14 = vmul.f32 1.442695, %v3822_v24 }
 0x7f4   : > { %v3739_v0 = vpop.xlane.xlu0 %3738 }
 0x7f5   : > { %8352 = vpow2.f32 %v3897_v8  ;;  %v3825_v18 = vsub.f32 %v14981_v19, %v3739_v0  ;;  %v3826_v48 = vsub.f32 %v14982_v22, %v3739_v0 }
 0x7f6   : > { %8354 = vpow2.f32 %v3899_v14 }
 0x7f7   : > { %v3905_v54 = vmul.f32 1.442695, %v3825_v18  ;;  %v3907_v28 = vmul.f32 1.442695, %v3826_v48  ;;  %v15057_v18 = vld [vmem:[#allocation65_spill] sm:$0xff] }
 0x7f8   : > { %v3742_v44 = vpop.xlane.xlu0 %3741 }
 0x7f9   : > { %8356 = vpow2.f32 %v3905_v54  ;;  %v3827_v7 = vsub.f32 %v14984_v37, %v3742_v44  ;;  %v3828_v4 = vsub.f32 %v14985_v26, %v3742_v44  ;;  %3798 = vmax.xlane.f32.xlu0 %v15056_v20 }
 0x7fa   : > { %8358 = vpow2.f32 %v3907_v28 }
 0x7fb   : > { %v3909_v34 = vmul.f32 1.442695, %v3827_v7  ;;  %v3911_v43 = vmul.f32 1.442695, %v3828_v4 }
 0x7fc   : > { %v3745_v12 = vpop.xlane.xlu0 %3744 }
 0x7fd   : > { %8360 = vpow2.f32 %v3909_v34  ;;  %v3829_v22 = vsub.f32 %v14987_v56, %v3745_v12  ;;  %v3830_v19 = vsub.f32 %v14988_v41, %v3745_v12  ;;  %v15058_v41 = vld [vmem:[#allocation160_spill] sm:$0xff] }
 0x7fe   : > { %8362 = vpow2.f32 %v3911_v43  ;;  %v15059_v48 = vmax.f32 %v15057_v18, %v15058_v41 }
 0x7ff   : > { %v8353_v53 = vpop.eup %8352  ;;  %v3913_v11 = vmul.f32 1.442695, %v3829_v22  ;;  %v3915_v61 = vmul.f32 1.442695, %v3830_v19  ;;  %v15060_v22 = vld [vmem:[#allocation41_spill] sm:$0xff] }
 0x800   : > { %v8355_v37 = vpop.eup %8354  ;;  %v3748_v24 = vpop.xlane.xlu0 %3747  ;;  %v15061_v19 = vld [vmem:[#allocation69_spill] sm:$0xff] }
 0x801   : > { %v3736_v26 = vpop.xlane.xlu1 %3735  ;;  %8364 = vpow2.f32 %v3913_v11  ;;  %v3831_v8 = vsub.f32 %v14990_v29, %v3748_v24  ;;  %v3832_v14 = vsub.f32 %v14991_v38, %v3748_v24  ;;  %4287 = vmatprep.mubr.f32.mxu1 %v8355_v37  ;;  %v12380_v54 = vadd.f32 %v8355_v37, %v8353_v53 }
 0x802   : > { %v3823_v0 = vsub.f32 %v14993_v35, %v3736_v26  ;;  %8366 = vpow2.f32 %v3915_v61  ;;  %v3824_v56 = vsub.f32 %v14994_v59, %v3736_v26  ;;  %3801 = vmax.xlane.f32.xlu1 %v15059_v48  ;;  %4288 = vmatmul.mubr.f32.gmra.mrb[140].mxu1 %v8353_v53  ;;  %v15062_v53 = vmax.f32 %v15060_v22, %v15061_v19 }
 0x803   : > { %v12382_v28 = vpop.eup %8356  ;;  %v3917_v44 = vmul.f32 1.442695, %v3831_v8  ;;  %v3919_v7 = vmul.f32 1.442695, %v3832_v14 }
 0x804   : > { %v3901_v29 = vmul.f32 1.442695, %v3823_v0  ;;  %v12384_v4 = vpop.eup %8358  ;;  %v3903_v38 = vmul.f32 1.442695, %v3824_v56  ;;  %v3751_v35 = vpop.xlane.xlu0 %3750 }
 0x805   : > { %v3760_v20 = vpop.xlane.xlu1 %3759  ;;  %8368 = vpow2.f32 %v3917_v44  ;;  %v3833_v59 = vsub.f32 %v14997_v13, %v3751_v35  ;;  %v3834_v34 = vsub.f32 %v14998_v2, %v3751_v35  ;;  %v12395_v11 = vadd.f32 %v12384_v4, %v12382_v28 }
 0x806   : > { %v3839_v43 = vsub.f32 %v15000_v25, %v3760_v20  ;;  %8370 = vpow2.f32 %v3919_v7  ;;  %v3840_v12 = vsub.f32 %v15001_v1, %v3760_v20  ;;  %3804 = vmax.xlane.f32.xlu1 %v15062_v53 }
 0x807   : > { %v12397_v61 = vpop.eup %8360  ;;  %8372 = vpow2.f32 %v3901_v29  ;;  %v3921_v37 = vmul.f32 1.442695, %v3833_v59  ;;  %v3923_v13 = vmul.f32 1.442695, %v3834_v34 }
 0x808   : > { %v3933_v24 = vmul.f32 1.442695, %v3839_v43  ;;  %v12399_v2 = vpop.eup %8362  ;;  %8374 = vpow2.f32 %v3903_v38  ;;  %v3935_v25 = vmul.f32 1.442695, %v3840_v12  ;;  %v3754_v26 = vpop.xlane.xlu0 %3753 }
 0x809   : > { %v3766_v1 = vpop.xlane.xlu1 %3765  ;;  %8376 = vpow2.f32 %v3921_v37  ;;  %v3835_v8 = vsub.f32 %v15004_v49, %v3754_v26  ;;  %v3836_v14 = vsub.f32 %v15005_v9, %v3754_v26  ;;  %v12407_v48 = vadd.f32 %v12399_v2, %v12397_v61 }
 0x80a   : > { %v3843_v0 = vsub.f32 %v15007_v15, %v3766_v1  ;;  %8378 = vpow2.f32 %v3923_v13  ;;  %v3844_v56 = vsub.f32 %v15008_v46, %v3766_v1  ;;  %v15063_v1 = vld [vmem:[#allocation76_spill] sm:$0xff] }
 0x80b   : > { %v12409_v44 = vpop.eup %8364  ;;  %8380 = vpow2.f32 %v3933_v24  ;;  %v3925_v7 = vmul.f32 1.442695, %v3835_v8  ;;  %v3927_v29 = vmul.f32 1.442695, %v3836_v14 }
 0x80c   : > { %v3941_v38 = vmul.f32 1.442695, %v3843_v0  ;;  %v12411_v35 = vpop.eup %8366  ;;  %8382 = vpow2.f32 %v3935_v25  ;;  %v3943_v49 = vmul.f32 1.442695, %v3844_v56  ;;  %v3757_v9 = vpop.xlane.xlu0 %3756  ;;  %v15064_v0 = vld [vmem:[#allocation8_spill] sm:$0xff] }
 0x80d   : > { %v3772_v20 = vpop.xlane.xlu1 %3771  ;;  %8384 = vpow2.f32 %v3925_v7  ;;  %v3837_v15 = vsub.f32 %v15014_v23, %v3757_v9  ;;  %v3838_v46 = vsub.f32 %v15015_v27, %v3757_v9  ;;  %v12419_v43 = vadd.f32 %v12411_v35, %v12409_v44 }
 0x80e   : > { %v3847_v59 = vsub.f32 %v15017_v60, %v3772_v20  ;;  %8386 = vpow2.f32 %v3927_v29  ;;  %v3848_v34 = vsub.f32 %v15018_v58, %v3772_v20 }
 0x80f   : > { %v12421_v12 = vpop.eup %8368  ;;  %8388 = vpow2.f32 %v3941_v38  ;;  %v3929_v53 = vmul.f32 1.442695, %v3837_v15  ;;  %v3931_v37 = vmul.f32 1.442695, %v3838_v46  ;;  %7959 = vrot.lane.b32.xlu0 %v12047_v57, %s8854_s25  ;;  %v15065_v46 = vld [vmem:[#allocation67_spill] sm:$0xff] }
 0x810   : > { %v3949_v13 = vmul.f32 1.442695, %v3847_v59  ;;  %v12425_v23 = vpop.eup %8370  ;;  %8390 = vpow2.f32 %v3943_v49  ;;  %v3951_v27 = vmul.f32 1.442695, %v3848_v34  ;;  %v3763_v60 = vpop.xlane.xlu0 %3762  ;;  %v15066_v34 = vld [vmem:[#allocation40_spill] sm:$0xff] }
 0x811   : > { %v3778_v24 = vpop.xlane.xlu1 %3777  ;;  %v8373_v58 = vpop.eup %8372  ;;  %8392 = vpow2.f32 %v3929_v53  ;;  %v3841_v25 = vsub.f32 %v15022_v6, %v3763_v60  ;;  %v3842_v26 = vsub.f32 %v15023_v3, %v3763_v60  ;;  %v12433_v57 = vadd.f32 %v12425_v23, %v12421_v12  ;;  %v15068_v60 = vld [vmem:[#allocation146_spill] sm:$0xff] }
 0x812   : > { %v3851_v8 = vsub.f32 %v15063_v1, %v3778_v24  ;;  %v8375_v14 = vpop.eup %8374  ;;  %8394 = vpow2.f32 %v3931_v37  ;;  %v3852_v56 = vsub.f32 %v15064_v0, %v3778_v24 }
 0x813   : > { %v12435_v7 = vpop.eup %8376  ;;  %8396 = vpow2.f32 %v3949_v13  ;;  %v3937_v29 = vmul.f32 1.442695, %v3841_v25  ;;  %v3939_v38 = vmul.f32 1.442695, %v3842_v26  ;;  %4292 = vmatprep.mubr.f32.mxu1 %v8375_v14  ;;  %v12439_v20 = vadd.f32 %v8375_v14, %v8373_v58 }
 0x814   : > { %v3957_v49 = vmul.f32 1.442695, %v3851_v8  ;;  %v12437_v6 = vpop.eup %8378  ;;  %8398 = vpow2.f32 %v3951_v27  ;;  %v3959_v3 = vmul.f32 1.442695, %v3852_v56  ;;  %4293 = vmatmul.mubr.f32.gmra.mrb[142].mxu1 %v8373_v58  ;;  %v3769_v9 = vpop.xlane.xlu0 %3768  ;;  %v15069_v58 = vld [vmem:[#allocation147_spill] sm:$0xff] }
 0x815   : > { %v12441_v15 = vpop.eup %8380  ;;  %8400 = vpow2.f32 %v3937_v29  ;;  %4297 = vmatprep.mubr.f32.mxu1 %v12384_v4  ;;  %v3845_v59 = vsub.f32 %v15065_v46, %v3769_v9  ;;  %v3846_v53 = vsub.f32 %v15066_v34, %v3769_v9  ;;  %v3784_v37 = vpop.xlane.xlu1 %3783  ;;  %v12448_v13 = vadd.f32 %v12437_v6, %v12435_v7  ;;  %v15070_v8 = vld [vmem:[#allocation75_spill] sm:$0xff]  ;;  %v15071_v46 = vld [vmem:[#allocation44_spill] sm:$0xff] }
 0x816   : > { %v12450_v27 = vpop.eup %8382  ;;  %8402 = vpow2.f32 %v3939_v38  ;;  %v3855_v24 = vsub.f32 %v15068_v60, %v3784_v37  ;;  %v3856_v25 = vsub.f32 %v15069_v58, %v3784_v37  ;;  %v15072_v37 = vld [vmem:[#allocation149_spill] sm:$0xff] }
 0x817   : > { %15067 = vst [vmem:[#allocation122_spill] sm:$0xff] %v12448_v13  ;;  %v12454_v26 = vpop.eup %8384  ;;  %8404 = vpow2.f32 %v3957_v49  ;;  %v3945_v4 = vmul.f32 1.442695, %v3845_v59  ;;  %v3947_v1 = vmul.f32 1.442695, %v3846_v53  ;;  %7964 = vrot.lane.b32.xlu1 %v15070_v8, %s8854_s25  ;;  %v12460_v14 = vadd.f32 %v12450_v27, %v12441_v15 }
 0x818   : > { %v12462_v0 = vpop.eup %8386  ;;  %8406 = vpow2.f32 %v3959_v3  ;;  %v3965_v56 = vmul.f32 1.442695, %v3855_v24  ;;  %v3967_v29 = vmul.f32 1.442695, %v3856_v25  ;;  %4298 = vmatmul.mubr.f32.gmra.mrb[144].mxu1 %v12382_v28  ;;  %v3775_v38 = vpop.xlane.xlu0 %3774 }
 0x819   : > { %v12465_v9 = vpop.eup %8388  ;;  %8408 = vpow2.f32 %v3945_v4  ;;  %4302 = vmatprep.mubr.f32.mxu1 %v12399_v2  ;;  %v3849_v49 = vsub.f32 %v15034_v33, %v3775_v38  ;;  %v3850_v59 = vsub.f32 %v15071_v46, %v3775_v38  ;;  %v3787_v34 = vpop.xlane.xlu1 %3786  ;;  %v12472_v53 = vadd.f32 %v12462_v0, %v12454_v26  ;;  %v15073_v33 = vld [vmem:[#allocation31_spill] sm:$0xff] }
 0x81a   : > { %v12474_v3 = vpop.eup %8390  ;;  %8410 = vpow2.f32 %v3947_v1  ;;  %v3857_v28 = vsub.f32 %v15037_v16, %v3787_v34  ;;  %v3858_v60 = vsub.f32 %v15072_v37, %v3787_v34 }
 0x81b   : > { %v12478_v24 = vpop.eup %8392  ;;  %8412 = vpow2.f32 %v3965_v56  ;;  %v3953_v2 = vmul.f32 1.442695, %v3849_v49  ;;  %v3955_v58 = vmul.f32 1.442695, %v3850_v59  ;;  %7969 = vrot.lane.b32.xlu1 %v15073_v33, %s8854_s25  ;;  %v12484_v25 = vadd.f32 %v12474_v3, %v12465_v9 }
 0x81c   : > { %v12486_v4 = vpop.eup %8394  ;;  %8414 = vpow2.f32 %v3967_v29  ;;  %v3969_v1 = vmul.f32 1.442695, %v3857_v28  ;;  %v3971_v8 = vmul.f32 1.442695, %v3858_v60  ;;  %4303 = vmatmul.mubr.f32.gmra.mrb[146].mxu1 %v12397_v61  ;;  %v3781_v16 = vpop.xlane.xlu0 %3780 }
 0x81d   : > { %v12489_v38 = vpop.eup %8396  ;;  %8416 = vpow2.f32 %v3953_v2  ;;  %4307 = vmatprep.mubr.f32.mxu1 %v12411_v35  ;;  %v3853_v56 = vsub.f32 %v15040_v21, %v3781_v16  ;;  %v3854_v49 = vsub.f32 %v15041_v51, %v3781_v16  ;;  %v7935_v46 = vpop.permute.xlu1 %7934  ;;  %v12496_v59 = vadd.f32 %v12486_v4, %v12478_v24 }
 0x81e   : > { %v12498_v29 = vpop.eup %8398  ;;  %8418 = vpow2.f32 %v3955_v58  ;;  %v7937_v51 = vunpack.i.h.bf16 %v7935_v46  ;;  %v7936_v60 = vunpack.i.l.bf16 %v7935_v46 }
 0x81f   : > { %15074 = vst [vmem:[#allocation123_spill] sm:$0xff] %v12496_v59  ;;  %v8401_v34 = vpop.eup %8400  ;;  %8420 = vpow2.f32 %v3969_v1  ;;  %v3961_v61 = vmul.f32 1.442695, %v3853_v56  ;;  %v3963_v28 = vmul.f32 1.442695, %v3854_v49  ;;  %v12502_v37 = vadd.f32 %v12498_v29, %v12489_v38 }
 0x820   : > { %v8403_v35 = vpop.eup %8402  ;;  %8422 = vpow2.f32 %v3971_v8  ;;  %4308 = vmatmul.mubr.f32.gmra.mrb[148].mxu1 %v12409_v44  ;;  %v7930_v21 = vpop.permute.xlu0 %7929  ;;  %v7453_v46 = vpack.c.bf16 %v7937_v51, %v7936_v60 }
 0x821   : > { %15075 = vst [vmem:[#allocation131_spill] sm:$0xff] %v12502_v37  ;;  %v8405_v2 = vpop.eup %8404  ;;  %8424 = vpow2.f32 %v3961_v61  ;;  %4312 = vmatprep.mubr.f32.mxu1 %v12425_v23  ;;  %v7932_v58 = vunpack.i.h.bf16 %v7930_v21  ;;  %v7931_v33 = vunpack.i.l.bf16 %v7930_v21  ;;  %v12506_v1 = vadd.f32 %v8403_v35, %v8401_v34  ;;  %v7940_v56 = vpop.permute.xlu1 %7939 }
 0x822   : > { %v8407_v16 = vpop.eup %8406  ;;  %8426 = vpow2.f32 %v3963_v28  ;;  %v7942_v23 = vunpack.i.h.bf16 %v7940_v56  ;;  %v7941_v61 = vunpack.i.l.bf16 %v7940_v56 }
 0x823   : > { %15076 = vst [vmem:[#allocation132_spill] sm:$0xff] %v12506_v1  ;;  %v8409_v49 = vpop.eup %8408  ;;  %v7450_v59 = vpack.c.bf16 %v7932_v58, %v7931_v33  ;;  %v12508_v37 = vadd.f32 %v8407_v16, %v8405_v2 }
 0x824   : > { %v8411_v8 = vpop.eup %8410  ;;  %4313 = vmatmul.mubr.f32.gmra.mrb[150].mxu1 %v12421_v12  ;;  %v7456_v12 = vpack.c.bf16 %v7942_v23, %v7941_v61 }
 0x825   : > { %v8413_v44 = vpop.eup %8412  ;;  %4317 = vmatprep.mubr.f32.mxu1 %v12437_v6  ;;  %7451 = vmatpush1.bf16.msra.mxu1 %v7450_v59  ;;  %v12512_v21 = vadd.f32 %v8411_v8, %v8409_v49 }
 0x826   : > { %v8415_v1 = vpop.eup %8414  ;;  %7452 = vmatprep.subr.bf16.mxu1 %v14903_v47 }
 0x827   : > { %15077 = vst [vmem:[#allocation140_spill] sm:$0xff] %v12512_v21  ;;  %v8417_v28 = vpop.eup %8416  ;;  %v12515_v13 = vadd.f32 %v8415_v1, %v8413_v44  ;;  %v15078_v21 = vld [vmem:[#allocation3_spill] sm:$0xff] }
 0x828   : > { %v8419_v58 = vpop.eup %8418  ;;  %4318 = vmatmul.mubr.f32.gmra.mrb[152].mxu1 %v12435_v7 }
 0x829   : > { %v8421_v33 = vpop.eup %8420  ;;  %4322 = vmatprep.mubr.f32.mxu1 %v12462_v0  ;;  %7454 = vmatpush1.bf16.msra.mxu1 %v7453_v46  ;;  %v12519_v6 = vadd.f32 %v8419_v58, %v8417_v28  ;;  %v15079_v0 = vld [vmem:[#allocation161_spill] sm:$0xff] }
 0x82a   : > { %v8423_v59 = vpop.eup %8422  ;;  %7455 = vmatprep.subr.bf16.mxu1 %v14903_v47  ;;  %v15080_v23 = vmax.f32 %v15078_v21, %v15079_v0 }
 0x82b   : > { %v8425_v51 = vpop.eup %8424  ;;  %v12522_v60 = vadd.f32 %v8423_v59, %v8421_v33 }
 0x82c   : > { %v8427_v56 = vpop.eup %8426  ;;  %4323 = vmatmul.mubr.f32.gmra.mrb[154].mxu1 %v12454_v26  ;;  %v15081_v26 = vld [vmem:[#allocation162_spill] sm:$0xff] }
 0x82d   : > { %4327 = vmatprep.mubr.f32.mxu1 %v12486_v4  ;;  %7457 = vmatpush1.bf16.msra.mxu1 %v7456_v12  ;;  %v12526_v7 = vadd.f32 %v8427_v56, %v8425_v51  ;;  %v15082_v4 = vld [vmem:[#allocation163_spill] sm:$0xff] }
 0x82e   : > { %3807 = vmax.xlane.f32.xlu0 %v15080_v23  ;;  %7458 = vmatprep.subr.bf16.mxu1 %v14903_v47  ;;  %v15083_v46 = vmax.f32 %v15081_v26, %v15082_v4 }
 0x830   : > { %4328 = vmatmul.mubr.f32.gmra.mrb[156].mxu1 %v12478_v24 }
 0x831   : > { %4332 = vmatprep.mubr.f32.mxu1 %v12450_v27  ;;  %v15084_v27 = vld [vmem:[#allocation77_spill] sm:$0xff] }
 0x834   : > { %4333 = vmatmul.mubr.f32.gmra.mrb[158].mxu1 %v12441_v15  ;;  %v15085_v15 = vld [vmem:[#allocation110_spill] sm:$0xff] }
 0x835   : > { %4337 = vmatprep.mubr.f32.mxu1 %v8403_v35 }
 0x838   : > { %4338 = vmatmul.mubr.f32.gmra.mrb[160].mxu1 %v8401_v34 }
 0x839   : > { %4342 = vmatprep.mubr.f32.mxu1 %v12474_v3 }
 0x83c   : > { %4343 = vmatmul.mubr.f32.gmra.mrb[162].mxu1 %v12465_v9 }
 0x83d   : > { %4347 = vmatprep.mubr.f32.mxu1 %v8411_v8 }
 0x83f   : > { %5253 = vmax.xlane.f32.xlu1 %v15083_v46 }
 0x840   : > { %4348 = vmatmul.mubr.f32.gmra.mrb[164].mxu1 %v8409_v49 }
 0x841   : > { %4352 = vmatprep.mubr.f32.mxu1 %v12498_v29 }
 0x844   : > { %4353 = vmatmul.mubr.f32.gmra.mrb[166].mxu1 %v12489_v38  ;;  %7974 = vrot.lane.b32.xlu0 %v15084_v27, %s8854_s25 }
 0x845   : > { %4357 = vmatprep.mubr.f32.mxu1 %v8419_v58 }
 0x848   : > { %4358 = vmatmul.mubr.f32.gmra.mrb[168].mxu1 %v8417_v28 }
 0x849   : > { %4362 = vmatprep.mubr.f32.mxu1 %v8407_v16 }
 0x84c   : > { %4363 = vmatmul.mubr.f32.gmra.mrb[170].mxu1 %v8405_v2 }
 0x84d   : > { %4367 = vmatprep.mubr.f32.mxu1 %v8427_v56 }
 0x850   : > { %4368 = vmatmul.mubr.f32.gmra.mrb[172].mxu1 %v8425_v51  ;;  %7979 = vrot.lane.b32.xlu1 %v15085_v15, %s8854_s25 }
 0x851   : > { %4372 = vmatprep.mubr.f32.mxu1 %v8415_v1  ;;  %v3790_v9 = vpop.xlane.xlu0 %3789 }
 0x852   : > { %v3859_v3 = vsub.f32 %v15045_v40, %v3790_v9  ;;  %v3860_v24 = vsub.f32 %v15046_v36, %v3790_v9  ;;  %v3793_v29 = vpop.xlane.xlu1 %3792 }
 0x853   : > { %v3861_v38 = vsub.f32 %v15048_v31, %v3793_v29  ;;  %v3862_v34 = vsub.f32 %v15049_v42, %v3793_v29 }
 0x854   : > { %v3973_v35 = vmul.f32 1.442695, %v3859_v3  ;;  %v3975_v49 = vmul.f32 1.442695, %v3860_v24  ;;  %4373 = vmatmul.mubr.f32.gmra.mrb[174].mxu1 %v8413_v44  ;;  %v15086_v3 = vld [vmem:[#allocation46_spill] sm:$0xff]  ;;  %v15087_v24 = vld [vmem:[#allocation164_spill] sm:$0xff] }
 0x855   : > { %v3977_v2 = vmul.f32 1.442695, %v3861_v38  ;;  %v3979_v16 = vmul.f32 1.442695, %v3862_v34  ;;  %4377 = vmatprep.mubr.f32.mxu1 %v8423_v59  ;;  %v7945_v8 = vpop.permute.xlu0 %7944  ;;  %v15088_v29 = vmax.f32 %v15086_v3, %v15087_v24 }
 0x856   : > { %8428 = vpow2.f32 %v3973_v35  ;;  %v7947_v61 = vunpack.i.h.bf16 %v7945_v8  ;;  %v7946_v1 = vunpack.i.l.bf16 %v7945_v8  ;;  %v3796_v28 = vpop.xlane.xlu1 %3795 }
 0x857   : > { %8430 = vpow2.f32 %v3975_v49  ;;  %v3863_v40 = vsub.f32 %v15051_v39, %v3796_v28  ;;  %v3864_v36 = vsub.f32 %v15052_v30, %v3796_v28 }
 0x858   : > { %8432 = vpow2.f32 %v3977_v2  ;;  %v7459_v31 = vpack.c.bf16 %v7947_v61, %v7946_v1  ;;  %4378 = vmatmul.mubr.f32.gmra.mrb[176].mxu1 %v8421_v33  ;;  %v15089_v2 = vld [vmem:[#allocation81_spill] sm:$0xff]  ;;  %v8819_v1 = vld [vmem:[%s9517_s28 + $0xb8] sm:$0xff] }
 0x859   : > { %8434 = vpow2.f32 %v3979_v16  ;;  %v3981_v42 = vmul.f32 1.442695, %v3863_v40  ;;  %v3983_v58 = vmul.f32 1.442695, %v3864_v36  ;;  %v15090_v16 = vld [vmem:[#allocation165_spill] sm:$0xff]  ;;  %v8820_v40 = vld [vmem:[%s9517_s28 + $0xc0] sm:$0xff] }
 0x85a   : > { %7460 = vmatpush1.bf16.msra.mxu1 %v7459_v31  ;;  %v7950_v44 = vpop.permute.xlu1 %7949  ;;  %v15091_v8 = vmax.f32 %v15089_v2, %v15090_v16  ;;  %v8818_v61 = vld [vmem:[%s9517_s28 + $0xb0] sm:$0xff]  ;;  %v8821_v36 = vld [vmem:[%s9517_s28 + $0xc8] sm:$0xff] }
 0x85b   : > { %8436 = vpow2.f32 %v3981_v42  ;;  %v7952_v12 = vunpack.i.h.bf16 %v7950_v44  ;;  %v7951_v59 = vunpack.i.l.bf16 %v7950_v44  ;;  %7461 = vmatprep.subr.bf16.mxu1 %v14903_v47  ;;  %v7983_v28 = vpack.i.bf16 %v8819_v1, %v8818_v61 }
 0x85c   : > { %8438 = vpow2.f32 %v3983_v58  ;;  %v7988_v31 = vpack.i.bf16 %v8821_v36, %v8820_v40 }
 0x85d   : > { %v7462_v51 = vpack.c.bf16 %v7952_v12, %v7951_v59 }
 0x85e   : > { %v7955_v56 = vpop.permute.xlu1 %7954 }
 0x85f   : > { %v7957_v23 = vunpack.i.h.bf16 %v7955_v56  ;;  %v7956_v39 = vunpack.i.l.bf16 %v7955_v56  ;;  %7463 = vmatpush1.bf16.msra.mxu1 %v7462_v51 }
 0x860   : > { %v8429_v30 = vpop.eup %8428  ;;  %7464 = vmatprep.subr.bf16.mxu1 %v14903_v47 }
 0x861   : > { %v8431_v33 = vpop.eup %8430  ;;  %v7465_v46 = vpack.c.bf16 %v7957_v23, %v7956_v39 }
 0x862   : > { %v8433_v27 = vpop.eup %8432  ;;  %4382 = vmatprep.mubr.f32.mxu1 %v8431_v33  ;;  %v12554_v15 = vadd.f32 %v8431_v33, %v8429_v30 }
 0x863   : > { %v8435_v9 = vpop.eup %8434  ;;  %4383 = vmatmul.mubr.f32.gmra.mrb[178].mxu1 %v8429_v30  ;;  %5256 = vmax.xlane.f32.xlu0 %v15088_v29 }
 0x864   : > { %4387 = vmatprep.mubr.f32.mxu1 %v8435_v9  ;;  %7466 = vmatpush1.bf16.msra.mxu1 %v7465_v46  ;;  %v12559_v38 = vadd.f32 %v8435_v9, %v8433_v27 }
 0x865   : > { %v8437_v34 = vpop.eup %8436  ;;  %7467 = vmatprep.subr.bf16.mxu1 %v14903_v47 }
 0x866   : > { %v8439_v35 = vpop.eup %8438 }
 0x867   : > { %4388 = vmatmul.mubr.f32.gmra.mrb[180].mxu1 %v8433_v27  ;;  %v12562_v49 = vadd.f32 %v8439_v35, %v8437_v34 }
 0x868   : > { %4392 = vmatprep.mubr.f32.mxu1 %v8439_v35 }
 0x86b   : > { %4393 = vmatmul.mubr.f32.gmra.mrb[182].mxu1 %v8437_v34 }
 0x874   : > { %5259 = vmax.xlane.f32.xlu1 %v15091_v8 }
 0x879   : > { %7984 = vrot.lane.b32.xlu0 %v7983_v28, %s8854_s25  ;;  %v15093_v28 = vld [vmem:[#allocation167_spill] sm:$0xff] }
 0x885   : > { %7989 = vrot.lane.b32.xlu1 %v7988_v31, %s8854_s25 }
 0x886   : > { %v3799_v42 = vpop.xlane.xlu0 %3798 }
 0x887   : > { %v3865_v58 = vsub.f32 %v15054_v32, %v3799_v42  ;;  %v3866_v44 = vsub.f32 %v15055_v55, %v3799_v42 }
 0x889   : > { %v3985_v12 = vmul.f32 1.442695, %v3865_v58  ;;  %v3987_v59 = vmul.f32 1.442695, %v3866_v44 }
 0x88a   : > { %v7960_v51 = vpop.permute.xlu0 %7959 }
 0x88b   : > { %8440 = vpow2.f32 %v3985_v12  ;;  %v7962_v56 = vunpack.i.h.bf16 %v7960_v51  ;;  %v7961_v23 = vunpack.i.l.bf16 %v7960_v51 }
 0x88c   : > { %8442 = vpow2.f32 %v3987_v59 }
 0x88d   : > { %v7468_v39 = vpack.c.bf16 %v7962_v56, %v7961_v23 }
 0x88f   : > { %v3802_v30 = vpop.xlane.xlu1 %3801  ;;  %7469 = vmatpush1.bf16.msra.mxu1 %v7468_v39 }
 0x890   : > { %v3867_v33 = vsub.f32 %v15057_v18, %v3802_v30  ;;  %v3868_v46 = vsub.f32 %v15058_v41, %v3802_v30  ;;  %7470 = vmatprep.subr.bf16.mxu1 %v14903_v47  ;;  %v15092_v41 = vld [vmem:[#allocation166_spill] sm:$0xff]  ;;  %v15095_v30 = vld [vmem:[#allocation169_spill] sm:$0xff] }
 0x891   : > { %v15094_v40 = vmax.f32 %v15092_v41, %v15093_v28 }
 0x892   : > { %v3989_v27 = vmul.f32 1.442695, %v3867_v33  ;;  %v3991_v32 = vmul.f32 1.442695, %v3868_v46  ;;  %v15096_v33 = vld [vmem:[#allocation170_spill] sm:$0xff] }
 0x893   : > { %v3805_v9 = vpop.xlane.xlu1 %3804  ;;  %v15097_v46 = vmax.f32 %v15095_v30, %v15096_v33 }
 0x894   : > { %8444 = vpow2.f32 %v3989_v27  ;;  %v3869_v55 = vsub.f32 %v15060_v22, %v3805_v9  ;;  %v3870_v29 = vsub.f32 %v15061_v19, %v3805_v9  ;;  %v8823_v9 = vld [vmem:[%s9517_s28 + $0xd8] sm:$0xff] }
 0x895   : > { %v8441_v34 = vpop.eup %8440  ;;  %8446 = vpow2.f32 %v3991_v32  ;;  %v8822_v32 = vld [vmem:[%s9517_s28 + $0xd0] sm:$0xff] }
 0x896   : > { %v8443_v35 = vpop.eup %8442  ;;  %v3993_v8 = vmul.f32 1.442695, %v3869_v55  ;;  %v3995_v61 = vmul.f32 1.442695, %v3870_v29  ;;  %v7993_v55 = vpack.i.bf16 %v8823_v9, %v8822_v32 }
 0x897   : > { %4397 = vmatprep.mubr.f32.mxu1 %v8443_v35  ;;  %v7965_v1 = vpop.permute.xlu1 %7964  ;;  %v12580_v18 = vadd.f32 %v8443_v35, %v8441_v34 }
 0x898   : > { %8448 = vpow2.f32 %v3993_v8  ;;  %4398 = vmatmul.mubr.f32.gmra.mrb[184].mxu1 %v8441_v34  ;;  %5262 = vmax.xlane.f32.xlu0 %v15094_v40  ;;  %v7967_v36 = vunpack.i.h.bf16 %v7965_v1  ;;  %v7966_v31 = vunpack.i.l.bf16 %v7965_v1  ;;  %v8824_v40 = vld [vmem:[%s9517_s28 + $0xe0] sm:$0xff] }
 0x899   : > { %8450 = vpow2.f32 %v3995_v61 }
 0x89a   : > { %v7471_v22 = vpack.c.bf16 %v7967_v36, %v7966_v31  ;;  %v8825_v36 = vld [vmem:[%s9517_s28 + $0xe8] sm:$0xff] }
 0x89b   : > { %v7970_v19 = vpop.permute.xlu1 %7969  ;;  %v7998_v31 = vpack.i.bf16 %v8825_v36, %v8824_v40 }
 0x89c   : > { %v7972_v42 = vunpack.i.h.bf16 %v7970_v19  ;;  %v7971_v58 = vunpack.i.l.bf16 %v7970_v19  ;;  %7472 = vmatpush1.bf16.msra.mxu1 %v7471_v22 }
 0x89d   : > { %7473 = vmatprep.subr.bf16.mxu1 %v14903_v47 }
 0x89e   : > { %v8445_v44 = vpop.eup %8444  ;;  %v7474_v12 = vpack.c.bf16 %v7972_v42, %v7971_v58 }
 0x89f   : > { %v8447_v59 = vpop.eup %8446 }
 0x8a0   : > { %4402 = vmatprep.mubr.f32.mxu1 %v8447_v59  ;;  %7475 = vmatpush1.bf16.msra.mxu1 %v7474_v12  ;;  %v12586_v51 = vadd.f32 %v8447_v59, %v8445_v44 }
 0x8a1   : > { %4403 = vmatmul.mubr.f32.gmra.mrb[186].mxu1 %v8445_v44  ;;  %7476 = vmatprep.subr.bf16.mxu1 %v14903_v47 }
 0x8a2   : > { %v8449_v56 = vpop.eup %8448 }
 0x8a3   : > { %v8451_v23 = vpop.eup %8450 }
 0x8a4   : > { %4407 = vmatprep.mubr.f32.mxu1 %v8451_v23  ;;  %v12589_v39 = vadd.f32 %v8451_v23, %v8449_v56 }
 0x8a5   : > { %4408 = vmatmul.mubr.f32.gmra.mrb[188].mxu1 %v8449_v56 }
 0x8a9   : > { %5265 = vmax.xlane.f32.xlu1 %v15097_v46 }
 0x8ab   : > { %v12594_v27 = vpop.f32.mrb[128].mxu1 }
 0x8ac   : > { %15098 = vst [vmem:[#allocation37_spill] sm:$0xff] %v12594_v27  ;;  %v4261_v29 = vpop.f32.mrb[129].mxu1 }
 0x8ae   : > { %7994 = vrot.lane.b32.xlu0 %v7993_v55, %s8854_s25 }
 0x8af   : > { %v12599_v34 = vpop.f32.mrb[130].mxu1 }
 0x8b0   : > { %15099 = vst [vmem:[#allocation134_spill] sm:$0xff] %v12599_v34  ;;  %v4266_v35 = vpop.f32.mrb[131].mxu1  ;;  %v15123_v34 = vld [vmem:[#allocation133_spill] sm:$0xff] }
 0x8b3   : > { %v12601_v8 = vpop.f32.mrb[132].mxu1 }
 0x8b4   : > { %15100 = vst [vmem:[#allocation135_spill] sm:$0xff] %v12601_v8  ;;  %v4271_v61 = vpop.f32.mrb[133].mxu1  ;;  %v15127_v8 = vld [vmem:[#allocation139_spill] sm:$0xff] }
 0x8b7   : > { %v12603_v1 = vpop.f32.mrb[134].mxu1 }
 0x8b8   : > { %15101 = vst [vmem:[#allocation64_spill] sm:$0xff] %v12603_v1  ;;  %v4276_v22 = vpop.f32.mrb[135].mxu1 }
 0x8b9   : > { %v15105_v22 = vld [vmem:[#allocation143_spill] sm:$0xff] }
 0x8ba   : > { %7999 = vrot.lane.b32.xlu1 %v7998_v31, %s8854_s25  ;;  %v15104_v31 = vld [vmem:[#allocation60_spill] sm:$0xff] }
 0x8bb   : > { %v12608_v19 = vpop.f32.mrb[136].mxu1  ;;  %v3808_v42 = vpop.xlane.xlu0 %3807 }
 0x8bc   : > { %15102 = vst [vmem:[#allocation38_spill] sm:$0xff] %v12608_v19  ;;  %v4281_v58 = vpop.f32.mrb[137].mxu1  ;;  %v3871_v44 = vsub.f32 %v15078_v21, %v3808_v42  ;;  %v3872_v12 = vsub.f32 %v15079_v0, %v3808_v42  ;;  %v15106_v42 = vmax.f32 %v15104_v31, %v15105_v22 }
 0x8be   : > { %v3997_v59 = vmul.f32 1.442695, %v3871_v44  ;;  %v3999_v56 = vmul.f32 1.442695, %v3872_v12 }
 0x8bf   : > { %v12612_v23 = vpop.f32.mrb[138].mxu1  ;;  %v7975_v46 = vpop.permute.xlu0 %7974 }
 0x8c0   : > { %15103 = vst [vmem:[#allocation137_spill] sm:$0xff] %v12612_v23  ;;  %v4286_v32 = vpop.f32.mrb[139].mxu1  ;;  %8452 = vpow2.f32 %v3997_v59  ;;  %v7977_v9 = vunpack.i.h.bf16 %v7975_v46  ;;  %v7976_v55 = vunpack.i.l.bf16 %v7975_v46  ;;  %v15119_v23 = vld [vmem:[#allocation95_spill] sm:$0xff] }
 0x8c1   : > { %8454 = vpow2.f32 %v3999_v56 }
 0x8c2   : > { %v7477_v29 = vpack.c.bf16 %v7977_v9, %v7976_v55 }
 0x8c4   : > { %7478 = vmatpush1.bf16.msra.mxu1 %v7477_v29  ;;  %v15108_v29 = vld [vmem:[#allocation74_spill] sm:$0xff] }
 0x8c5   : > { %7479 = vmatprep.subr.bf16.mxu1 %v14903_v47 }
 0x8ca   : > { %v8453_v35 = vpop.eup %8452 }
 0x8cb   : > { %v8455_v61 = vpop.eup %8454 }
 0x8cc   : > { %v5254_v40 = vpop.xlane.xlu1 %5253  ;;  %4412 = vmatprep.mubr.f32.mxu1 %v8455_v61  ;;  %v12615_v21 = vadd.f32 %v8455_v61, %v8453_v35 }
 0x8cd   : > { %v5348_v0 = vsub.f32 %v15081_v26, %v5254_v40  ;;  %v5349_v36 = vsub.f32 %v15082_v4, %v5254_v40  ;;  %4413 = vmatmul.mubr.f32.gmra.mrb[190].mxu1 %v8453_v35  ;;  %5268 = vmax.xlane.f32.xlu0 %v15106_v42  ;;  %v15109_v35 = vld [vmem:[#allocation88_spill] sm:$0xff]  ;;  %v8826_v40 = vld [vmem:[%s9517_s28 + $0xf0] sm:$0xff]  ;;  %v15111_v42 = vld [vmem:[#allocation83_spill] sm:$0xff] }
 0x8ce   : > { %v15110_v61 = vmax.f32 %v15108_v29, %v15109_v35 }
 0x8cf   : > { %v5412_v58 = vmul.f32 1.442695, %v5348_v0  ;;  %v5414_v44 = vmul.f32 1.442695, %v5349_v36  ;;  %v8827_v0 = vld [vmem:[%s9517_s28 + $0xf8] sm:$0xff] }
 0x8d0   : > { %v7980_v12 = vpop.permute.xlu1 %7979  ;;  %v8003_v36 = vpack.i.bf16 %v8827_v0, %v8826_v40  ;;  %v15122_v0 = vld [vmem:[#allocation16_spill] sm:$0xff] }
 0x8d1   : > { %8456 = vpow2.f32 %v5412_v58  ;;  %v7982_v59 = vunpack.i.h.bf16 %v7980_v12  ;;  %v7981_v56 = vunpack.i.l.bf16 %v7980_v12  ;;  %v15112_v58 = vld [vmem:[#allocation141_spill] sm:$0xff]  ;;  %v15114_v12 = vld [vmem:[#allocation86_spill] sm:$0xff] }
 0x8d2   : > { %8458 = vpow2.f32 %v5414_v44  ;;  %v15113_v44 = vmax.f32 %v15111_v42, %v15112_v58 }
 0x8d3   : > { %v7480_v46 = vpack.c.bf16 %v7982_v59, %v7981_v56  ;;  %v15115_v59 = vld [vmem:[#allocation159_spill] sm:$0xff] }
 0x8d4   : > { %v15116_v56 = vmax.f32 %v15114_v12, %v15115_v59  ;;  %v15150_v59 = vld [vmem:[#allocation63_spill] sm:$0xff] }
 0x8d5   : > { %v12622_v32 = vpop.f32.mrb[140].mxu1  ;;  %7481 = vmatpush1.bf16.msra.mxu1 %v7480_v46 }
 0x8d6   : > { %15107 = vst [vmem:[#allocation138_spill] sm:$0xff] %v12622_v32  ;;  %v4291_v26 = vpop.f32.mrb[141].mxu1  ;;  %7482 = vmatprep.subr.bf16.mxu1 %v14903_v47  ;;  %v15124_v32 = vmax.f32 %v15122_v0, %v15123_v34 }
 0x8db   : > { %v12625_v4 = vpop.eup %8456 }
 0x8dc   : > { %v8459_v9 = vpop.eup %8458 }
 0x8dd   : > { %5796 = vmatprep.mubr.f32.mxu1 %v8459_v9  ;;  %v12628_v55 = vadd.f32 %v8459_v9, %v12625_v4  ;;  %v15118_v9 = vld [vmem:[#allocation59_spill] sm:$0xff] }
 0x8de   : > { %5271 = vmax.xlane.f32.xlu1 %v15110_v61  ;;  %v15120_v1 = vmax.f32 %v15118_v9, %v15119_v23 }
 0x8e2   : > { %5277 = vmax.xlane.f32.xlu1 %v15113_v44 }
 0x8e3   : > { %8004 = vrot.lane.b32.xlu0 %v8003_v36, %s8854_s25 }
 0x8e6   : > { %5280 = vmax.xlane.f32.xlu1 %v15116_v56 }
 0x8e7   : > { %v12642_v46 = vpop.f32.mrb[142].mxu1 }
 0x8e8   : > { %15117 = vst [vmem:[#allocation70_spill] sm:$0xff] %v12642_v46  ;;  %v4296_v26 = vpop.f32.mrb[143].mxu1 }
 0x8e9   : > { %v15126_v26 = vld [vmem:[#allocation15_spill] sm:$0xff] }
 0x8ea   : > { %5283 = vmax.xlane.f32.xlu1 %v15120_v1  ;;  %v15128_v27 = vmax.f32 %v15126_v26, %v15127_v8  ;;  %v15149_v26 = vld [vmem:[#allocation23_spill] sm:$0xff] }
 0x8eb   : > { %v12647_v61 = vpop.f32.mrb[144].mxu1 }
 0x8ec   : > { %15121 = vst [vmem:[#allocation42_spill] sm:$0xff] %v12647_v61  ;;  %v4301_v40 = vpop.f32.mrb[145].mxu1 }
 0x8ee   : > { %5286 = vmax.xlane.f32.xlu1 %v15124_v32 }
 0x8ef   : > { %v12652_v44 = vpop.f32.mrb[146].mxu1 }
 0x8f0   : > { %15125 = vst [vmem:[#allocation142_spill] sm:$0xff] %v12652_v44  ;;  %v4306_v36 = vpop.f32.mrb[147].mxu1  ;;  %v5257_v19 = vpop.xlane.xlu0 %5256  ;;  %v15131_v44 = vld [vmem:[#allocation171_spill] sm:$0xff] }
 0x8f1   : > { %v5350_v56 = vsub.f32 %v15086_v3, %v5257_v19  ;;  %v5351_v46 = vsub.f32 %v15087_v24, %v5257_v19  ;;  %v15130_v36 = vld [vmem:[#allocation11_spill] sm:$0xff] }
 0x8f2   : > { %5289 = vmax.xlane.f32.xlu1 %v15128_v27  ;;  %v15132_v0 = vmax.f32 %v15130_v36, %v15131_v44  ;;  %v15134_v27 = vld [vmem:[#allocation47_spill] sm:$0xff] }
 0x8f3   : > { %v5416_v1 = vmul.f32 1.442695, %v5350_v56  ;;  %v5418_v23 = vmul.f32 1.442695, %v5351_v46  ;;  %v12659_v61 = vpop.f32.mrb[148].mxu1  ;;  %v15135_v56 = vld [vmem:[#allocation7_spill] sm:$0xff] }
 0x8f4   : > { %15129 = vst [vmem:[#allocation36_spill] sm:$0xff] %v12659_v61  ;;  %v4311_v40 = vpop.f32.mrb[149].mxu1  ;;  %v7985_v9 = vpop.permute.xlu0 %7984  ;;  %v15136_v46 = vmax.f32 %v15134_v27, %v15135_v56 }
 0x8f5   : > { %8460 = vpow2.f32 %v5416_v1  ;;  %v7987_v32 = vunpack.i.h.bf16 %v7985_v9  ;;  %v7986_v34 = vunpack.i.l.bf16 %v7985_v9  ;;  %v15138_v9 = vld [vmem:[#allocation45_spill] sm:$0xff] }
 0x8f6   : > { %8462 = vpow2.f32 %v5418_v23  ;;  %5292 = vmax.xlane.f32.xlu1 %v15132_v0  ;;  %v15139_v23 = vld [vmem:[#allocation78_spill] sm:$0xff] }
 0x8f7   : > { %v7483_v3 = vpack.c.bf16 %v7987_v32, %v7986_v34  ;;  %v12664_v24 = vpop.f32.mrb[150].mxu1  ;;  %v15140_v61 = vmax.f32 %v15138_v9, %v15139_v23  ;;  %v15146_v9 = vld [vmem:[#allocation92_spill] sm:$0xff] }
 0x8f8   : > { %15133 = vst [vmem:[#allocation73_spill] sm:$0xff] %v12664_v24  ;;  %v4316_v19 = vpop.f32.mrb[151].mxu1  ;;  %v15142_v24 = vld [vmem:[#allocation43_spill] sm:$0xff] }
 0x8f9   : > { %7484 = vmatpush1.bf16.msra.mxu1 %v7483_v3 }
 0x8fa   : > { %5295 = vmax.xlane.f32.xlu1 %v15136_v46  ;;  %7485 = vmatprep.subr.bf16.mxu1 %v14903_v47 }
 0x8fb   : > { %v12670_v40 = vpop.f32.mrb[152].mxu1 }
 0x8fc   : > { %15137 = vst [vmem:[#allocation148_spill] sm:$0xff] %v12670_v40  ;;  %v4321_v1 = vpop.f32.mrb[153].mxu1  ;;  %v15143_v40 = vld [vmem:[#allocation22_spill] sm:$0xff] }
 0x8fd   : > { %v15144_v23 = vmax.f32 %v15142_v24, %v15143_v40 }
 0x8fe   : > { %5301 = vmax.xlane.f32.xlu1 %v15140_v61  ;;  %v15145_v61 = vld [vmem:[#allocation6_spill] sm:$0xff] }
 0x8ff   : > { %v12675_v44 = vpop.eup %8460  ;;  %v12677_v34 = vpop.f32.mrb[154].mxu1  ;;  %v15147_v56 = vmax.f32 %v15145_v61, %v15146_v9  ;;  %v15160_v61 = vld [vmem:[#allocation71_spill] sm:$0xff] }
 0x900   : > { %15141 = vst [vmem:[#allocation144_spill] sm:$0xff] %v12677_v34  ;;  %v12679_v0 = vpop.eup %8462  ;;  %v4326_v32 = vpop.f32.mrb[155].mxu1 }
 0x901   : > { %v5260_v3 = vpop.xlane.xlu1 %5259  ;;  %v12683_v19 = vadd.f32 %v12679_v0, %v12675_v44 }
 0x902   : > { %v5352_v46 = vsub.f32 %v15089_v2, %v5260_v3  ;;  %v5353_v1 = vsub.f32 %v15090_v16, %v5260_v3  ;;  %5307 = vmax.xlane.f32.xlu1 %v15144_v23  ;;  %5274 = vmax.xlane.f32.xlu0 %v15147_v56  ;;  %v15151_v2 = vmax.f32 %v15149_v26, %v15150_v59  ;;  %v15152_v16 = vld [vmem:[#allocation106_spill] sm:$0xff]  ;;  %v15153_v3 = vld [vmem:[#allocation107_spill] sm:$0xff]  ;;  %v15188_v59 = vld [vmem:[#allocation32_spill] sm:$0xff] }
 0x903   : > { %v12693_v34 = vpop.f32.mrb[156].mxu1  ;;  %v15154_v12 = vmax.f32 %v15152_v16, %v15153_v3 }
 0x904   : > { %15148 = vst [vmem:[#allocation145_spill] sm:$0xff] %v12693_v34  ;;  %v5420_v32 = vmul.f32 1.442695, %v5352_v46  ;;  %v5422_v27 = vmul.f32 1.442695, %v5353_v1  ;;  %v4331_v36 = vpop.f32.mrb[157].mxu1 }
 0x905   : > { %v7990_v8 = vpop.permute.xlu1 %7989  ;;  %v15156_v46 = vld [vmem:[#allocation49_spill] sm:$0xff]  ;;  %v15157_v1 = vld [vmem:[#allocation27_spill] sm:$0xff] }
 0x906   : > { %8464 = vpow2.f32 %v5420_v32  ;;  %5313 = vmax.xlane.f32.xlu1 %v15151_v2  ;;  %5298 = vmax.xlane.f32.xlu0 %v15154_v12  ;;  %v7992_v23 = vunpack.i.h.bf16 %v7990_v8  ;;  %v7991_v40 = vunpack.i.l.bf16 %v7990_v8  ;;  %v15158_v36 = vmax.f32 %v15156_v46, %v15157_v1  ;;  %v15159_v32 = vld [vmem:[#allocation68_spill] sm:$0xff]  ;;  %v15163_v8 = vld [vmem:[#allocation79_spill] sm:$0xff]  ;;  %v15174_v1 = vld [vmem:[#allocation85_spill] sm:$0xff] }
 0x907   : > { %8466 = vpow2.f32 %v5422_v27  ;;  %v12701_v9 = vpop.f32.mrb[158].mxu1  ;;  %v15161_v24 = vmax.f32 %v15159_v32, %v15160_v61  ;;  %v15164_v12 = vld [vmem:[#allocation55_spill] sm:$0xff]  ;;  %v15173_v32 = vld [vmem:[#allocation25_spill] sm:$0xff] }
 0x908   : > { %15155 = vst [vmem:[#allocation150_spill] sm:$0xff] %v12701_v9  ;;  %v4336_v56 = vpop.f32.mrb[159].mxu1  ;;  %v7486_v34 = vpack.c.bf16 %v7992_v23, %v7991_v40  ;;  %v15165_v27 = vmax.f32 %v15163_v8, %v15164_v12  ;;  %v15167_v40 = vld [vmem:[#allocation24_spill] sm:$0xff]  ;;  %v15175_v46 = vmax.f32 %v15173_v32, %v15174_v1  ;;  %v15184_v1 = vld [vmem:[#allocation9_spill] sm:$0xff] }
 0x909   : > { %v15166_v56 = vld [vmem:[#allocation4_spill] sm:$0xff] }
 0x90a   : > { %5319 = vmax.xlane.f32.xlu1 %v15158_v36  ;;  %5304 = vmax.xlane.f32.xlu0 %v15161_v24  ;;  %v15168_v23 = vmax.f32 %v15166_v56, %v15167_v40  ;;  %v15177_v40 = vld [vmem:[#allocation113_spill] sm:$0xff]  ;;  %v15178_v56 = vld [vmem:[#allocation115_spill] sm:$0xff]  ;;  %v15180_v12 = vld [vmem:[#allocation80_spill] sm:$0xff] }
 0x90b   : > { %v12709_v2 = vpop.f32.mrb[160].mxu1  ;;  %7487 = vmatpush1.bf16.msra.mxu1 %v7486_v34  ;;  %v15171_v34 = vld [vmem:[#allocation173_spill] sm:$0xff]  ;;  %v15181_v8 = vld [vmem:[#allocation28_spill] sm:$0xff] }
 0x90c   : > { %15162 = vst [vmem:[#allocation151_spill] sm:$0xff] %v12709_v2  ;;  %v4341_v3 = vpop.f32.mrb[161].mxu1  ;;  %7488 = vmatprep.subr.bf16.mxu1 %v14903_v47  ;;  %v15170_v2 = vld [vmem:[#allocation84_spill] sm:$0xff]  ;;  %v15182_v16 = vmax.f32 %v15180_v12, %v15181_v8 }
 0x90d   : > { %v15172_v3 = vmax.f32 %v15170_v2, %v15171_v34  ;;  %v15187_v2 = vld [vmem:[#allocation114_spill] sm:$0xff] }
 0x90e   : > { %5325 = vmax.xlane.f32.xlu1 %v15165_v27  ;;  %5310 = vmax.xlane.f32.xlu0 %v15168_v23  ;;  %v15189_v26 = vmax.f32 %v15187_v2, %v15188_v59 }
 0x90f   : > { %v12718_v9 = vpop.f32.mrb[162].mxu1 }
 0x910   : > { %15169 = vst [vmem:[#allocation152_spill] sm:$0xff] %v12718_v9  ;;  %v12720_v36 = vpop.eup %8464  ;;  %v4346_v61 = vpop.f32.mrb[163].mxu1 }
 0x911   : > { %v12722_v24 = vpop.eup %8466  ;;  %v15179_v61 = vmax.f32 %v15177_v40, %v15178_v56  ;;  %v15191_v56 = vld [vmem:[#allocation56_spill] sm:$0xff]  ;;  %v15193_v40 = vld [vmem:[#allocation175_spill] sm:$0xff] }
 0x912   : > { %5331 = vmax.xlane.f32.xlu1 %v15172_v3  ;;  %5316 = vmax.xlane.f32.xlu0 %v15175_v46  ;;  %v12732_v27 = vadd.f32 %v12722_v24, %v12720_v36  ;;  %v15185_v46 = vld [vmem:[#allocation124_spill] sm:$0xff] }
 0x913   : > { %v12734_v23 = vpop.f32.mrb[164].mxu1  ;;  %v15186_v32 = vmax.f32 %v15184_v1, %v15185_v46  ;;  %v15197_v46 = vld [vmem:[#allocation118_spill] sm:$0xff] }
 0x914   : > { %15176 = vst [vmem:[#allocation153_spill] sm:$0xff] %v12734_v23  ;;  %v4351_v9 = vpop.f32.mrb[165].mxu1 }
 0x916   : > { %5337 = vmax.xlane.f32.xlu1 %v15179_v61  ;;  %5322 = vmax.xlane.f32.xlu0 %v15182_v16  ;;  %v15192_v61 = vld [vmem:[#allocation174_spill] sm:$0xff] }
 0x917   : > { %v12742_v3 = vpop.f32.mrb[166].mxu1  ;;  %v15194_v8 = vmax.f32 %v15192_v61, %v15193_v40 }
 0x918   : > { %15183 = vst [vmem:[#allocation154_spill] sm:$0xff] %v12742_v3  ;;  %v4356_v34 = vpop.f32.mrb[167].mxu1  ;;  %v15196_v3 = vld [vmem:[#allocation12_spill] sm:$0xff] }
 0x91a   : > { %5343 = vmax.xlane.f32.xlu1 %v15186_v32  ;;  %5328 = vmax.xlane.f32.xlu0 %v15189_v26  ;;  %v15198_v32 = vld [vmem:[#allocation119_spill] sm:$0xff] }
 0x91b   : > { %v12750_v9 = vpop.f32.mrb[168].mxu1  ;;  %v15199_v1 = vmax.f32 %v15197_v46, %v15198_v32 }
 0x91c   : > { %15190 = vst [vmem:[#allocation155_spill] sm:$0xff] %v12750_v9  ;;  %v4361_v23 = vpop.f32.mrb[169].mxu1 }
 0x91d   : > { %v4004_v23 = vadd.f32 %v12347_v62, %v12340_v45  ;;  %v15204_v45 = vld [vmem:[#allocation90_spill] sm:$0xff] }
 0x91e   : > { %2518 = vadd.xlane.f32.xlu1 %v15191_v56  ;;  %5334 = vmax.xlane.f32.xlu0 %v15194_v8 }
 0x91f   : > { %v12756_v16 = vpop.f32.mrb[170].mxu1 }
 0x920   : > { %15195 = vst [vmem:[#allocation157_spill] sm:$0xff] %v12756_v16  ;;  %v4366_v34 = vpop.f32.mrb[171].mxu1 }
 0x921   : > { %v15201_v34 = vld [vmem:[#allocation130_spill] sm:$0xff] }
 0x922   : > { %2524 = vadd.xlane.f32.xlu1 %v15196_v3  ;;  %5340 = vmax.xlane.f32.xlu0 %v15199_v1  ;;  %v15202_v16 = vmax.f32 %v12305_v52, %v15201_v34 }
 0x923   : > { %v12762_v59 = vpop.f32.mrb[172].mxu1 }
 0x924   : > { %15200 = vst [vmem:[#allocation158_spill] sm:$0xff] %v12762_v59  ;;  %v4371_v26 = vpop.f32.mrb[173].mxu1 }
 0x925   : > { %v5263_v56 = vpop.xlane.xlu0 %5262 }
 0x926   : > { %v5354_v9 = vsub.f32 %v15092_v41, %v5263_v56  ;;  %v5355_v8 = vsub.f32 %v15093_v28, %v5263_v56  ;;  %4005 = vadd.xlane.f32.xlu1 %v4004_v23  ;;  %5346 = vmax.xlane.f32.xlu0 %v15202_v16  ;;  %v15206_v16 = vld [vmem:[#allocation129_spill] sm:$0xff] }
 0x927   : > { %v12771_v3 = vpop.f32.mrb[174].mxu1 }
 0x928   : > { %15203 = vst [vmem:[#allocation65_spill] sm:$0xff] %v12771_v3  ;;  %v5424_v32 = vmul.f32 1.442695, %v5354_v9  ;;  %v5426_v1 = vmul.f32 1.442695, %v5355_v8  ;;  %v4376_v46 = vpop.f32.mrb[175].mxu1 }
 0x929   : > { %v7995_v59 = vpop.permute.xlu0 %7994  ;;  %v4007_v46 = vadd.f32 %v12357_v5, %v12353_v50 }
 0x92a   : > { %8468 = vpow2.f32 %v5424_v32  ;;  %v7997_v26 = vunpack.i.h.bf16 %v7995_v59  ;;  %v7996_v40 = vunpack.i.l.bf16 %v7995_v59  ;;  %4011 = vadd.xlane.f32.xlu1 %v12335_v17  ;;  %2521 = vadd.xlane.f32.xlu0 %v15204_v45  ;;  %v15210_v45 = vld [vmem:[#allocation122_spill] sm:$0xff] }
 0x92b   : > { %8470 = vpow2.f32 %v5426_v1  ;;  %v12775_v62 = vpop.f32.mrb[176].mxu1 }
 0x92c   : > { %15205 = vst [vmem:[#allocation160_spill] sm:$0xff] %v12775_v62  ;;  %v7489_v41 = vpack.c.bf16 %v7997_v26, %v7996_v40  ;;  %v4381_v28 = vpop.f32.mrb[177].mxu1 }
 0x92e   : > { %4017 = vadd.xlane.f32.xlu1 %v12345_v63  ;;  %4002 = vadd.xlane.f32.xlu0 %v15206_v16 }
 0x92f   : > { %7490 = vmatpush1.bf16.msra.mxu1 %v7489_v41  ;;  %v15212_v41 = vld [vmem:[#allocation123_spill] sm:$0xff] }
 0x930   : > { %7491 = vmatprep.subr.bf16.mxu1 %v14903_v47 }
 0x932   : > { %4023 = vadd.xlane.f32.xlu1 %v12439_v20  ;;  %4008 = vadd.xlane.f32.xlu0 %v4007_v46 }
 0x934   : > { %v12783_v17 = vpop.eup %8468 }
 0x935   : > { %v12785_v59 = vpop.eup %8470 }
 0x936   : > { %4029 = vadd.xlane.f32.xlu1 %v12407_v48  ;;  %v5266_v40 = vpop.xlane.xlu1 %5265  ;;  %v12788_v9 = vpop.f32.mrb[178].mxu1  ;;  %4014 = vadd.xlane.f32.xlu0 %v12338_v10  ;;  %v5549_v63 = vadd.f32 %v12785_v59, %v12783_v17 }
 0x937   : > { %15207 = vst [vmem:[#allocation41_spill] sm:$0xff] %v12788_v9  ;;  %v5356_v50 = vsub.f32 %v15095_v30, %v5266_v40  ;;  %v5357_v5 = vsub.f32 %v15096_v33, %v5266_v40  ;;  %v4386_v20 = vpop.f32.mrb[179].mxu1  ;;  %v15217_v40 = vld [vmem:[#allocation159_spill] sm:$0xff] }
 0x938   : > { %v15269_v9 = vld [vmem:[#allocation87_spill] sm:$0xff] }
 0x939   : > { %v5428_v32 = vmul.f32 1.442695, %v5356_v50  ;;  %v5430_v23 = vmul.f32 1.442695, %v5357_v5  ;;  %v15220_v5 = vld [vmem:[#allocation95_spill] sm:$0xff] }
 0x93a   : > { %4035 = vadd.xlane.f32.xlu1 %v12433_v57  ;;  %v12796_v56 = vpop.f32.mrb[180].mxu1  ;;  %4020 = vadd.xlane.f32.xlu0 %v12380_v54  ;;  %v8000_v48 = vpop.permute.xlu1 %7999 }
 0x93b   : > { %15208 = vst [vmem:[#allocation69_spill] sm:$0xff] %v12796_v56  ;;  %8472 = vpow2.f32 %v5428_v32  ;;  %v4391_v8 = vpop.f32.mrb[181].mxu1  ;;  %v8002_v10 = vunpack.i.h.bf16 %v8000_v48  ;;  %v8001_v1 = vunpack.i.l.bf16 %v8000_v48  ;;  %v15280_v56 = vld [vmem:[#allocation21_spill] sm:$0xff] }
 0x93c   : > { %8474 = vpow2.f32 %v5430_v23 }
 0x93d   : > { %v7492_v26 = vpack.c.bf16 %v8002_v10, %v8001_v1 }
 0x93e   : > { %4041 = vadd.xlane.f32.xlu1 %v12472_v53  ;;  %v12800_v30 = vpop.f32.mrb[182].mxu1  ;;  %4026 = vadd.xlane.f32.xlu0 %v12395_v11  ;;  %v15211_v11 = vld [vmem:[#allocation131_spill] sm:$0xff] }
 0x93f   : > { %15209 = vst [vmem:[#allocation76_spill] sm:$0xff] %v12800_v30  ;;  %v4396_v33 = vpop.f32.mrb[183].mxu1  ;;  %7493 = vmatpush1.bf16.msra.mxu1 %v7492_v26  ;;  %v15268_v30 = vld [vmem:[#allocation17_spill] sm:$0xff] }
 0x940   : > { %7494 = vmatprep.subr.bf16.mxu1 %v14903_v47  ;;  %v15213_v47 = vld [vmem:[#allocation132_spill] sm:$0xff] }
 0x941   : > { %v15222_v33 = vld [vmem:[#allocation16_spill] sm:$0xff] }
 0x942   : > { %4047 = vadd.xlane.f32.xlu1 %v12460_v14  ;;  %4032 = vadd.xlane.f32.xlu0 %v12419_v43  ;;  %v15214_v43 = vld [vmem:[#allocation140_spill] sm:$0xff] }
 0x945   : > { %v12806_v54 = vpop.eup %8472 }
 0x946   : > { %v12808_v57 = vpop.eup %8474  ;;  %4053 = vadd.xlane.f32.xlu1 %v12484_v25  ;;  %4038 = vadd.xlane.f32.xlu0 %v15210_v45 }
 0x947   : > { %v12814_v53 = vadd.f32 %v12808_v57, %v12806_v54 }
 0x94a   : > { %4059 = vadd.xlane.f32.xlu1 %v15211_v11  ;;  %4044 = vadd.xlane.f32.xlu0 %v15212_v41 }
 0x94e   : > { %4065 = vadd.xlane.f32.xlu1 %v12508_v37  ;;  %4050 = vadd.xlane.f32.xlu0 %v15213_v47 }
 0x952   : > { %4071 = vadd.xlane.f32.xlu1 %v12515_v13  ;;  %4056 = vadd.xlane.f32.xlu0 %v15214_v43 }
 0x956   : > { %4077 = vadd.xlane.f32.xlu1 %v12554_v15  ;;  %4062 = vadd.xlane.f32.xlu0 %v12519_v6 }
 0x95a   : > { %4083 = vadd.xlane.f32.xlu1 %v12562_v49  ;;  %v5269_v14 = vpop.xlane.xlu0 %5268  ;;  %4068 = vadd.xlane.f32.xlu0 %v12526_v7 }
 0x95b   : > { %v5358_v25 = vsub.f32 %v15104_v31, %v5269_v14  ;;  %v5359_v28 = vsub.f32 %v15105_v22, %v5269_v14 }
 0x95d   : > { %v5432_v37 = vmul.f32 1.442695, %v5358_v25  ;;  %v5434_v16 = vmul.f32 1.442695, %v5359_v28  ;;  %v15224_v25 = vld [vmem:[#allocation15_spill] sm:$0xff] }
 0x95e   : > { %4089 = vadd.xlane.f32.xlu1 %v12586_v51  ;;  %v8005_v13 = vpop.permute.xlu0 %8004  ;;  %4074 = vadd.xlane.f32.xlu0 %v12522_v60 }
 0x95f   : > { %8476 = vpow2.f32 %v5432_v37  ;;  %v8007_v15 = vunpack.i.h.bf16 %v8005_v13  ;;  %v8006_v46 = vunpack.i.l.bf16 %v8005_v13  ;;  %v15225_v37 = vld [vmem:[#allocation139_spill] sm:$0xff] }
 0x960   : > { %8478 = vpow2.f32 %v5434_v16 }
 0x961   : > { %v7495_v6 = vpack.c.bf16 %v8007_v15, %v8006_v46 }
 0x962   : > { %4095 = vadd.xlane.f32.xlu1 %v12615_v21  ;;  %4080 = vadd.xlane.f32.xlu0 %v12559_v38 }
 0x963   : > { %7496 = vmatpush1.bf16.msra.mxu1 %v7495_v6 }
 0x966   : > { %5544 = vadd.xlane.f32.xlu1 %v12683_v19  ;;  %4086 = vadd.xlane.f32.xlu0 %v12580_v18 }
 0x967   : > { %5797 = vmatmul.mubr.f32.vlgmr.msra.gmra.mrb[192].mxu1 %v12625_v4 }
 0x968   : > { %5801 = vmatprep.mubr.f32.mxu1 %v12679_v0 }
 0x969   : > { %v8477_v7 = vpop.eup %8476 }
 0x96a   : > { %v8479_v60 = vpop.eup %8478  ;;  %5550 = vadd.xlane.f32.xlu1 %v5549_v63  ;;  %4092 = vadd.xlane.f32.xlu0 %v12589_v39 }
 0x96b   : > { %v5272_v49 = vpop.xlane.xlu1 %5271  ;;  %v12837_v51 = vpop.f32.mrb[184].mxu1  ;;  %5802 = vmatmul.mubr.f32.gmra.mrb[194].mxu1 %v12675_v44  ;;  %v5555_v38 = vadd.f32 %v8479_v60, %v8477_v7 }
 0x96c   : > { %15215 = vst [vmem:[#allocation8_spill] sm:$0xff] %v12837_v51  ;;  %v5360_v21 = vsub.f32 %v15108_v29, %v5272_v49  ;;  %v5361_v31 = vsub.f32 %v15109_v35, %v5272_v49  ;;  %v4401_v18 = vpop.f32.mrb[185].mxu1  ;;  %5806 = vmatprep.mubr.f32.mxu1 %v12722_v24  ;;  %v15226_v49 = vld [vmem:[#allocation11_spill] sm:$0xff]  ;;  %v15277_v51 = vld [vmem:[#allocation20_spill] sm:$0xff] }
 0x96e   : > { %v5436_v22 = vmul.f32 1.442695, %v5360_v21  ;;  %v5438_v4 = vmul.f32 1.442695, %v5361_v31  ;;  %5556 = vadd.xlane.f32.xlu1 %v5555_v38  ;;  %5541 = vadd.xlane.f32.xlu0 %v12628_v55  ;;  %v15216_v55 = vld [vmem:[#allocation86_spill] sm:$0xff]  ;;  %v15227_v21 = vld [vmem:[#allocation171_spill] sm:$0xff] }
 0x96f   : > { %v5278_v0 = vpop.xlane.xlu1 %5277  ;;  %5807 = vmatmul.mubr.f32.gmra.mrb[196].mxu1 %v12720_v36 }
 0x970   : > { %8480 = vpow2.f32 %v5436_v22  ;;  %v5364_v39 = vsub.f32 %v15111_v42, %v5278_v0  ;;  %v5365_v44 = vsub.f32 %v15112_v58, %v5278_v0  ;;  %5811 = vmatprep.mubr.f32.mxu1 %v12785_v59 }
 0x971   : > { %8482 = vpow2.f32 %v5438_v4 }
 0x972   : > { %v5444_v29 = vmul.f32 1.442695, %v5364_v39  ;;  %v5446_v35 = vmul.f32 1.442695, %v5365_v44  ;;  %5547 = vadd.xlane.f32.xlu0 %v12732_v27  ;;  %v15219_v27 = vld [vmem:[#allocation59_spill] sm:$0xff] }
 0x973   : > { %v5281_v19 = vpop.xlane.xlu1 %5280  ;;  %5812 = vmatmul.mubr.f32.gmra.mrb[198].mxu1 %v12783_v17 }
 0x974   : > { %8484 = vpow2.f32 %v5444_v29  ;;  %v5366_v24 = vsub.f32 %v15216_v55, %v5281_v19  ;;  %v5367_v36 = vsub.f32 %v15217_v40, %v5281_v19  ;;  %v12852_v63 = vpop.f32.mrb[186].mxu1  ;;  %5816 = vmatprep.mubr.f32.mxu1 %v12808_v57  ;;  %v15228_v29 = vld [vmem:[#allocation47_spill] sm:$0xff] }
 0x975   : > { %15218 = vst [vmem:[#allocation67_spill] sm:$0xff] %v12852_v63  ;;  %8486 = vpow2.f32 %v5446_v35  ;;  %v4406_v42 = vpop.f32.mrb[187].mxu1  ;;  %v15229_v19 = vld [vmem:[#allocation7_spill] sm:$0xff]  ;;  %v15267_v63 = vld [vmem:[#allocation30_spill] sm:$0xff] }
 0x976   : > { %v5448_v58 = vmul.f32 1.442695, %v5366_v24  ;;  %v5450_v59 = vmul.f32 1.442695, %v5367_v36  ;;  %5553 = vadd.xlane.f32.xlu0 %v12814_v53 }
 0x977   : > { %v5284_v50 = vpop.xlane.xlu1 %5283  ;;  %5817 = vmatmul.mubr.f32.gmra.mrb[200].mxu1 %v12806_v54  ;;  %v15223_v54 = vld [vmem:[#allocation133_spill] sm:$0xff] }
 0x978   : > { %8488 = vpow2.f32 %v5448_v58  ;;  %v5368_v17 = vsub.f32 %v15219_v27, %v5284_v50  ;;  %v5369_v20 = vsub.f32 %v15220_v5, %v5284_v50  ;;  %v12859_v32 = vpop.f32.mrb[188].mxu1  ;;  %5821 = vmatprep.mubr.f32.mxu1 %v8479_v60  ;;  %v15230_v50 = vld [vmem:[#allocation45_spill] sm:$0xff] }
 0x979   : > { %15221 = vst [vmem:[#allocation40_spill] sm:$0xff] %v12859_v32  ;;  %8490 = vpow2.f32 %v5450_v59  ;;  %v4411_v23 = vpop.f32.mrb[189].mxu1 }
 0x97a   : > { %v8481_v48 = vpop.eup %8480  ;;  %v5452_v8 = vmul.f32 1.442695, %v5368_v17  ;;  %v5454_v10 = vmul.f32 1.442695, %v5369_v20  ;;  %v15231_v17 = vld [vmem:[#allocation78_spill] sm:$0xff] }
 0x97b   : > { %v8483_v1 = vpop.eup %8482  ;;  %v5287_v26 = vpop.xlane.xlu1 %5286  ;;  %5822 = vmatmul.mubr.f32.gmra.mrb[202].mxu1 %v8477_v7 }
 0x97c   : > { %8492 = vpow2.f32 %v5452_v8  ;;  %v5370_v57 = vsub.f32 %v15222_v33, %v5287_v26  ;;  %v5371_v45 = vsub.f32 %v15223_v54, %v5287_v26  ;;  %5826 = vmatprep.mubr.f32.mxu1 %v8483_v1  ;;  %v5558_v53 = vadd.f32 %v8483_v1, %v8481_v48  ;;  %v15232_v33 = vld [vmem:[#allocation43_spill] sm:$0xff]  ;;  %v15233_v54 = vld [vmem:[#allocation22_spill] sm:$0xff] }
 0x97d   : > { %8494 = vpow2.f32 %v5454_v10 }
 0x97e   : > { %v12863_v11 = vpop.eup %8484  ;;  %v5456_v41 = vmul.f32 1.442695, %v5370_v57  ;;  %v5458_v47 = vmul.f32 1.442695, %v5371_v45  ;;  %5559 = vadd.xlane.f32.xlu0 %v5558_v53  ;;  %v15234_v53 = vld [vmem:[#allocation6_spill] sm:$0xff] }
 0x97f   : > { %v12865_v43 = vpop.eup %8486  ;;  %v5290_v14 = vpop.xlane.xlu1 %5289  ;;  %5827 = vmatmul.mubr.f32.gmra.mrb[204].mxu1 %v8481_v48 }
 0x980   : > { %8496 = vpow2.f32 %v5456_v41  ;;  %v5372_v28 = vsub.f32 %v15224_v25, %v5290_v14  ;;  %v5373_v16 = vsub.f32 %v15225_v37, %v5290_v14  ;;  %v5564_v13 = vadd.f32 %v12865_v43, %v12863_v11 }
 0x981   : > { %8498 = vpow2.f32 %v5458_v47  ;;  %v15235_v47 = vld [vmem:[#allocation92_spill] sm:$0xff] }
 0x982   : > { %v12871_v15 = vpop.eup %8488  ;;  %v5460_v46 = vmul.f32 1.442695, %v5372_v28  ;;  %v5462_v6 = vmul.f32 1.442695, %v5373_v16  ;;  %5565 = vadd.xlane.f32.xlu0 %v5564_v13 }
 0x983   : > { %v12873_v7 = vpop.eup %8490  ;;  %v5293_v60 = vpop.xlane.xlu1 %5292 }
 0x984   : > { %8500 = vpow2.f32 %v5460_v46  ;;  %v5374_v38 = vsub.f32 %v15226_v49, %v5293_v60  ;;  %v5375_v31 = vsub.f32 %v15227_v21, %v5293_v60  ;;  %v12879_v18 = vadd.f32 %v12873_v7, %v12871_v15 }
 0x985   : > { %8502 = vpow2.f32 %v5462_v6 }
 0x986   : > { %v12881_v22 = vpop.eup %8492  ;;  %v5464_v4 = vmul.f32 1.442695, %v5374_v38  ;;  %v5466_v0 = vmul.f32 1.442695, %v5375_v31  ;;  %v15236_v38 = vld [vmem:[#allocation23_spill] sm:$0xff] }
 0x987   : > { %v12883_v39 = vpop.eup %8494  ;;  %v5296_v44 = vpop.xlane.xlu1 %5295  ;;  %v15237_v31 = vld [vmem:[#allocation63_spill] sm:$0xff] }
 0x988   : > { %8504 = vpow2.f32 %v5464_v4  ;;  %v5376_v35 = vsub.f32 %v15228_v29, %v5296_v44  ;;  %v5377_v55 = vsub.f32 %v15229_v19, %v5296_v44  ;;  %v5570_v24 = vadd.f32 %v12883_v39, %v12881_v22  ;;  %v15239_v29 = vld [vmem:[#allocation107_spill] sm:$0xff] }
 0x989   : > { %8506 = vpow2.f32 %v5466_v0  ;;  %v15238_v0 = vld [vmem:[#allocation106_spill] sm:$0xff] }
 0x98a   : > { %v12889_v40 = vpop.eup %8496  ;;  %v5468_v36 = vmul.f32 1.442695, %v5376_v35  ;;  %v5470_v42 = vmul.f32 1.442695, %v5377_v55  ;;  %5571 = vadd.xlane.f32.xlu0 %v5570_v24 }
 0x98b   : > { %v12891_v58 = vpop.eup %8498  ;;  %v5302_v59 = vpop.xlane.xlu1 %5301 }
 0x98c   : > { %8508 = vpow2.f32 %v5468_v36  ;;  %v5380_v27 = vsub.f32 %v15230_v50, %v5302_v59  ;;  %v5381_v5 = vsub.f32 %v15231_v17, %v5302_v59  ;;  %v12897_v20 = vadd.f32 %v12891_v58, %v12889_v40 }
 0x98d   : > { %8510 = vpow2.f32 %v5470_v42 }
 0x98e   : > { %v12899_v23 = vpop.eup %8500  ;;  %v5476_v48 = vmul.f32 1.442695, %v5380_v27  ;;  %v5478_v8 = vmul.f32 1.442695, %v5381_v5  ;;  %v15240_v5 = vld [vmem:[#allocation49_spill] sm:$0xff] }
 0x98f   : > { %v12901_v10 = vpop.eup %8502  ;;  %v5308_v1 = vpop.xlane.xlu1 %5307 }
 0x990   : > { %v5275_v26 = vpop.xlane.xlu0 %5274  ;;  %8512 = vpow2.f32 %v5476_v48  ;;  %v5384_v57 = vsub.f32 %v15232_v33, %v5308_v1  ;;  %v5385_v45 = vsub.f32 %v15233_v54, %v5308_v1  ;;  %v5576_v25 = vadd.f32 %v12901_v10, %v12899_v23 }
 0x991   : > { %v5362_v41 = vsub.f32 %v15234_v53, %v5275_v26  ;;  %8514 = vpow2.f32 %v5478_v8  ;;  %v5363_v14 = vsub.f32 %v15235_v47, %v5275_v26  ;;  %v15241_v8 = vld [vmem:[#allocation27_spill] sm:$0xff]  ;;  %v15242_v26 = vld [vmem:[#allocation68_spill] sm:$0xff] }
 0x992   : > { %v12909_v28 = vpop.eup %8504  ;;  %v5484_v37 = vmul.f32 1.442695, %v5384_v57  ;;  %v5486_v16 = vmul.f32 1.442695, %v5385_v45  ;;  %5577 = vadd.xlane.f32.xlu0 %v5576_v25  ;;  %v15243_v57 = vld [vmem:[#allocation71_spill] sm:$0xff] }
 0x993   : > { %v5440_v13 = vmul.f32 1.442695, %v5362_v41  ;;  %v12911_v46 = vpop.eup %8506  ;;  %v5442_v6 = vmul.f32 1.442695, %v5363_v14  ;;  %v5314_v60 = vpop.xlane.xlu1 %5313 }
 0x994   : > { %v5299_v49 = vpop.xlane.xlu0 %5298  ;;  %8516 = vpow2.f32 %v5484_v37  ;;  %v5388_v21 = vsub.f32 %v15236_v38, %v5314_v60  ;;  %v5389_v4 = vsub.f32 %v15237_v31, %v5314_v60  ;;  %v12919_v19 = vadd.f32 %v12911_v46, %v12909_v28 }
 0x995   : > { %v5378_v44 = vsub.f32 %v15238_v0, %v5299_v49  ;;  %8518 = vpow2.f32 %v5486_v16  ;;  %v5379_v35 = vsub.f32 %v15239_v29, %v5299_v49  ;;  %v15245_v49 = vld [vmem:[#allocation55_spill] sm:$0xff] }
 0x996   : > { %v12921_v55 = vpop.eup %8508  ;;  %8520 = vpow2.f32 %v5440_v13  ;;  %v5492_v24 = vmul.f32 1.442695, %v5388_v21  ;;  %v5494_v36 = vmul.f32 1.442695, %v5389_v4  ;;  %v15246_v21 = vld [vmem:[#allocation4_spill] sm:$0xff] }
 0x997   : > { %v5472_v42 = vmul.f32 1.442695, %v5378_v44  ;;  %v12923_v59 = vpop.eup %8510  ;;  %8522 = vpow2.f32 %v5442_v6  ;;  %v5474_v50 = vmul.f32 1.442695, %v5379_v35  ;;  %v5320_v27 = vpop.xlane.xlu1 %5319  ;;  %v15244_v6 = vld [vmem:[#allocation79_spill] sm:$0xff]  ;;  %v15247_v4 = vld [vmem:[#allocation24_spill] sm:$0xff] }
 0x998   : > { %v5305_v17 = vpop.xlane.xlu0 %5304  ;;  %8524 = vpow2.f32 %v5492_v24  ;;  %v5392_v48 = vsub.f32 %v15240_v5, %v5320_v27  ;;  %v5393_v1 = vsub.f32 %v15241_v8, %v5320_v27  ;;  %v5582_v45 = vadd.f32 %v12923_v59, %v12921_v55 }
 0x999   : > { %v5382_v33 = vsub.f32 %v15242_v26, %v5305_v17  ;;  %8526 = vpow2.f32 %v5494_v36  ;;  %v5383_v54 = vsub.f32 %v15243_v57, %v5305_v17 }
 0x99a   : > { %v12931_v53 = vpop.eup %8512  ;;  %8528 = vpow2.f32 %v5472_v42  ;;  %v5500_v41 = vmul.f32 1.442695, %v5392_v48  ;;  %v5502_v47 = vmul.f32 1.442695, %v5393_v1  ;;  %5583 = vadd.xlane.f32.xlu0 %v5582_v45  ;;  %v15248_v48 = vld [vmem:[#allocation84_spill] sm:$0xff]  ;;  %v15249_v1 = vld [vmem:[#allocation173_spill] sm:$0xff] }
 0x99b   : > { %v5480_v14 = vmul.f32 1.442695, %v5382_v33  ;;  %v12933_v25 = vpop.eup %8514  ;;  %8530 = vpow2.f32 %v5474_v50  ;;  %v5482_v37 = vmul.f32 1.442695, %v5383_v54  ;;  %v5326_v16 = vpop.xlane.xlu1 %5325  ;;  %v15250_v33 = vld [vmem:[#allocation25_spill] sm:$0xff] }
 0x99c   : > { %v5311_v13 = vpop.xlane.xlu0 %5310  ;;  %8532 = vpow2.f32 %v5500_v41  ;;  %v5396_v60 = vsub.f32 %v15244_v6, %v5326_v16  ;;  %v5397_v38 = vsub.f32 %v15245_v49, %v5326_v16  ;;  %v5588_v44 = vadd.f32 %v12933_v25, %v12931_v53  ;;  %v15252_v41 = vld [vmem:[#allocation85_spill] sm:$0xff] }
 0x99d   : > { %v5386_v31 = vsub.f32 %v15246_v21, %v5311_v13  ;;  %8534 = vpow2.f32 %v5502_v47  ;;  %v5387_v0 = vsub.f32 %v15247_v4, %v5311_v13 }
 0x99e   : > { %v12941_v29 = vpop.eup %8516  ;;  %8536 = vpow2.f32 %v5480_v14  ;;  %v5508_v35 = vmul.f32 1.442695, %v5396_v60  ;;  %v5510_v24 = vmul.f32 1.442695, %v5397_v38  ;;  %5589 = vadd.xlane.f32.xlu0 %v5588_v44  ;;  %v15253_v44 = vld [vmem:[#allocation113_spill] sm:$0xff] }
 0x99f   : > { %v5488_v36 = vmul.f32 1.442695, %v5386_v31  ;;  %v12943_v42 = vpop.eup %8518  ;;  %8538 = vpow2.f32 %v5482_v37  ;;  %v5490_v50 = vmul.f32 1.442695, %v5387_v0  ;;  %v5332_v27 = vpop.xlane.xlu1 %5331 }
 0x9a0   : > { %v5317_v17 = vpop.xlane.xlu0 %5316  ;;  %v8521_v5 = vpop.eup %8520  ;;  %8540 = vpow2.f32 %v5508_v35  ;;  %v5400_v8 = vsub.f32 %v15248_v48, %v5332_v27  ;;  %v5401_v26 = vsub.f32 %v15249_v1, %v5332_v27  ;;  %v5594_v14 = vadd.f32 %v12943_v42, %v12941_v29 }
 0x9a1   : > { %v5390_v57 = vsub.f32 %v15250_v33, %v5317_v17  ;;  %v12948_v54 = vpop.f32.mrb[190].mxu1  ;;  %v8523_v45 = vpop.eup %8522  ;;  %8542 = vpow2.f32 %v5510_v24  ;;  %v5391_v47 = vsub.f32 %v15252_v41, %v5317_v17  ;;  %v15254_v24 = vld [vmem:[#allocation115_spill] sm:$0xff] }
 0x9a2   : > { %15251 = vst [vmem:[#allocation146_spill] sm:$0xff] %v12948_v54  ;;  %v4416_v37 = vpop.f32.mrb[191].mxu1  ;;  %v12953_v16 = vpop.eup %8524  ;;  %8544 = vpow2.f32 %v5488_v36  ;;  %v5516_v13 = vmul.f32 1.442695, %v5400_v8  ;;  %v5518_v6 = vmul.f32 1.442695, %v5401_v26  ;;  %5831 = vmatprep.mubr.f32.mxu1 %v8523_v45  ;;  %5595 = vadd.xlane.f32.xlu0 %v5594_v14  ;;  %v5561_v21 = vadd.f32 %v8523_v45, %v8521_v5 }
 0x9a3   : > { %v5496_v60 = vmul.f32 1.442695, %v5390_v57  ;;  %v12955_v49 = vpop.eup %8526  ;;  %8546 = vpow2.f32 %v5490_v50  ;;  %v5498_v38 = vmul.f32 1.442695, %v5391_v47  ;;  %5832 = vmatmul.mubr.f32.gmra.mrb[206].mxu1 %v8521_v5  ;;  %v5338_v31 = vpop.xlane.xlu1 %5337  ;;  %v15255_v50 = vld [vmem:[#allocation28_spill] sm:$0xff]  ;;  %v15256_v14 = vld [vmem:[#allocation9_spill] sm:$0xff] }
 0x9a4   : > { %v5323_v4 = vpop.xlane.xlu0 %5322  ;;  %v12957_v0 = vpop.eup %8528  ;;  %8548 = vpow2.f32 %v5516_v13  ;;  %5836 = vmatprep.mubr.f32.mxu1 %v12865_v43  ;;  %v5404_v35 = vsub.f32 %v15253_v44, %v5338_v31  ;;  %v5405_v36 = vsub.f32 %v15254_v24, %v5338_v31  ;;  %5562 = vadd.xlane.f32.xlu1 %v5561_v21  ;;  %v5600_v5 = vadd.f32 %v12955_v49, %v12953_v16  ;;  %v15257_v13 = vld [vmem:[#allocation124_spill] sm:$0xff] }
 0x9a5   : > { %v5394_v27 = vsub.f32 %v15180_v12, %v5323_v4  ;;  %v12963_v17 = vpop.eup %8530  ;;  %8550 = vpow2.f32 %v5518_v6  ;;  %v5395_v48 = vsub.f32 %v15255_v50, %v5323_v4 }
 0x9a6   : > { %v12968_v8 = vpop.eup %8532  ;;  %8552 = vpow2.f32 %v5496_v60  ;;  %v5524_v1 = vmul.f32 1.442695, %v5404_v35  ;;  %v5526_v43 = vmul.f32 1.442695, %v5405_v36  ;;  %5601 = vadd.xlane.f32.xlu0 %v5600_v5  ;;  %v12975_v41 = vadd.f32 %v12963_v17, %v12957_v0 }
 0x9a7   : > { %v5504_v26 = vmul.f32 1.442695, %v5394_v27  ;;  %v12970_v33 = vpop.eup %8534  ;;  %8554 = vpow2.f32 %v5498_v38  ;;  %v5506_v57 = vmul.f32 1.442695, %v5395_v48  ;;  %5837 = vmatmul.mubr.f32.gmra.mrb[208].mxu1 %v12863_v11  ;;  %v5344_v12 = vpop.xlane.xlu1 %5343  ;;  %v15258_v11 = vld [vmem:[#allocation32_spill] sm:$0xff]  ;;  %v15259_v48 = vld [vmem:[#allocation175_spill] sm:$0xff] }
 0x9a8   : > { %v5329_v45 = vpop.xlane.xlu0 %5328  ;;  %v12977_v47 = vpop.eup %8536  ;;  %8556 = vpow2.f32 %v5524_v1  ;;  %5841 = vmatprep.mubr.f32.mxu1 %v12873_v7  ;;  %v5408_v37 = vsub.f32 %v15256_v14, %v5344_v12  ;;  %v5409_v6 = vsub.f32 %v15257_v13, %v5344_v12  ;;  %5568 = vadd.xlane.f32.xlu1 %v12879_v18  ;;  %v5606_v31 = vadd.f32 %v12970_v33, %v12968_v8 }
 0x9a9   : > { %v5398_v60 = vsub.f32 %v15187_v2, %v5329_v45  ;;  %v12983_v38 = vpop.eup %8538  ;;  %8558 = vpow2.f32 %v5526_v43  ;;  %v5399_v21 = vsub.f32 %v15258_v11, %v5329_v45 }
 0x9aa   : > { %v12989_v4 = vpop.eup %8540  ;;  %8560 = vpow2.f32 %v5504_v26  ;;  %v5532_v7 = vmul.f32 1.442695, %v5408_v37  ;;  %v5534_v44 = vmul.f32 1.442695, %v5409_v6  ;;  %5607 = vadd.xlane.f32.xlu0 %v5606_v31  ;;  %v5591_v18 = vadd.f32 %v12983_v38, %v12977_v47  ;;  %v15261_v37 = vld [vmem:[#allocation119_spill] sm:$0xff] }
 0x9ab   : > { %v5512_v35 = vmul.f32 1.442695, %v5398_v60  ;;  %v12991_v24 = vpop.eup %8542  ;;  %8562 = vpow2.f32 %v5506_v57  ;;  %v5514_v2 = vmul.f32 1.442695, %v5399_v21  ;;  %5842 = vmatmul.mubr.f32.gmra.mrb[210].mxu1 %v12871_v15 }
 0x9ac   : > { %v5335_v36 = vpop.xlane.xlu0 %5334  ;;  %v12996_v27 = vpop.eup %8544  ;;  %8564 = vpow2.f32 %v5532_v7  ;;  %5846 = vmatprep.mubr.f32.mxu1 %v12883_v39  ;;  %v5612_v1 = vadd.f32 %v12991_v24, %v12989_v4  ;;  %5574 = vadd.xlane.f32.xlu1 %v12897_v20  ;;  %v15260_v20 = vld [vmem:[#allocation118_spill] sm:$0xff]  ;;  %v15262_v7 = vld [vmem:[#allocation156_spill] sm:$0xff] }
 0x9ad   : > { %v5402_v50 = vsub.f32 %v15192_v61, %v5335_v36  ;;  %v5403_v5 = vsub.f32 %v15259_v48, %v5335_v36  ;;  %v13003_v43 = vpop.eup %8546  ;;  %8566 = vpow2.f32 %v5534_v44 }
 0x9ae   : > { %v13006_v15 = vpop.eup %8548  ;;  %8568 = vpow2.f32 %v5512_v35  ;;  %v5597_v39 = vadd.f32 %v13003_v43, %v12996_v27  ;;  %5613 = vadd.xlane.f32.xlu0 %v5612_v1 }
 0x9af   : > { %v5520_v26 = vmul.f32 1.442695, %v5402_v50  ;;  %v5522_v57 = vmul.f32 1.442695, %v5403_v5  ;;  %v13010_v12 = vpop.eup %8550  ;;  %8570 = vpow2.f32 %v5514_v2  ;;  %5847 = vmatmul.mubr.f32.gmra.mrb[212].mxu1 %v12881_v22 }
 0x9b0   : > { %v5341_v61 = vpop.xlane.xlu0 %5340  ;;  %v13013_v45 = vpop.eup %8552  ;;  %5851 = vmatprep.mubr.f32.mxu1 %v12891_v58  ;;  %v5618_v6 = vadd.f32 %v13010_v12, %v13006_v15  ;;  %5580 = vadd.xlane.f32.xlu1 %v12919_v19 }
 0x9b1   : > { %v5406_v14 = vsub.f32 %v15260_v20, %v5341_v61  ;;  %v5407_v13 = vsub.f32 %v15261_v37, %v5341_v61  ;;  %v13020_v60 = vpop.eup %8554  ;;  %8572 = vpow2.f32 %v5520_v26  ;;  %v15263_v61 = vld [vmem:[#allocation19_spill] sm:$0xff] }
 0x9b2   : > { %v13023_v11 = vpop.eup %8556  ;;  %8574 = vpow2.f32 %v5522_v57  ;;  %v5603_v58 = vadd.f32 %v13020_v60, %v13013_v45  ;;  %5619 = vadd.xlane.f32.xlu0 %v5618_v6 }
 0x9b3   : > { %v5528_v22 = vmul.f32 1.442695, %v5406_v14  ;;  %v5530_v21 = vmul.f32 1.442695, %v5407_v13  ;;  %v13027_v31 = vpop.eup %8558  ;;  %8576 = vrcp.f32 %v15262_v7  ;;  %5852 = vmatmul.mubr.f32.gmra.mrb[214].mxu1 %v12889_v40  ;;  %v13043_v40 = vpop.xlane.xlu1 %2518 }
 0x9b4   : > { %v5347_v44 = vpop.xlane.xlu0 %5346  ;;  %v13031_v35 = vpop.eup %8560  ;;  %5856 = vmatprep.mubr.f32.mxu1 %v12901_v10  ;;  %v5624_v36 = vadd.f32 %v13027_v31, %v13023_v11  ;;  %5586 = vadd.xlane.f32.xlu1 %v12975_v41 }
 0x9b5   : > { %8578 = vpow2.f32 %v5528_v22  ;;  %v5410_v19 = vsub.f32 %v12305_v52, %v5347_v44  ;;  %v5411_v2 = vsub.f32 %v15201_v34, %v5347_v44  ;;  %v13038_v50 = vpop.eup %8562  ;;  %v15264_v22 = vld [vmem:[#allocation66_spill] sm:$0xff] }
 0x9b6   : > { %8580 = vpow2.f32 %v5530_v21  ;;  %v13041_v48 = vpop.eup %8564  ;;  %v5609_v10 = vadd.f32 %v13038_v50, %v13031_v35  ;;  %5625 = vadd.xlane.f32.xlu0 %v5624_v36 }
 0x9b7   : > { %v5536_v5 = vmul.f32 1.442695, %v5410_v19  ;;  %v5538_v1 = vmul.f32 1.442695, %v5411_v2  ;;  %v13047_v52 = vpop.eup %8566  ;;  %5857 = vmatmul.mubr.f32.gmra.mrb[216].mxu1 %v12899_v23  ;;  %v13069_v37 = vpop.xlane.xlu1 %2524  ;;  %v15265_v19 = vld [vmem:[#allocation26_spill] sm:$0xff] }
 0x9b8   : > { %v13050_v34 = vpop.xlane.xlu0 %2521  ;;  %v13052_v26 = vpop.eup %8568  ;;  %5861 = vmatprep.mubr.f32.mxu1 %v12911_v46  ;;  %v5630_v41 = vadd.f32 %v13047_v52, %v13041_v48  ;;  %5592 = vadd.xlane.f32.xlu1 %v5591_v18 }
 0x9b9   : > { %8582 = vpow2.f32 %v5536_v5  ;;  %v13057_v57 = vpop.eup %8570 }
 0x9ba   : > { %8584 = vpow2.f32 %v5538_v1  ;;  %v5615_v20 = vadd.f32 %v13057_v57, %v13052_v26  ;;  %5631 = vadd.xlane.f32.xlu0 %v5630_v41  ;;  %v15266_v1 = vld [vmem:[#allocation29_spill] sm:$0xff] }
 0x9bb   : > { %8586 = vrcp.f32 %v15263_v61  ;;  %v13062_v23 = vpop.eup %8572  ;;  %5862 = vmatmul.mubr.f32.gmra.mrb[218].mxu1 %v12909_v28  ;;  %v13089_v2 = vpop.xlane.xlu1 %4005 }
 0x9bc   : > { %v13065_v14 = vpop.xlane.xlu0 %4002  ;;  %v13067_v46 = vpop.eup %8574  ;;  %5866 = vmatprep.mubr.f32.mxu1 %v12923_v59  ;;  %5598 = vadd.xlane.f32.xlu1 %v5597_v39  ;;  %8588 = vrcp.f32 %v15264_v22 }
 0x9bd   : > { %v8577_v13 = vpop.eup %8576  ;;  %v5621_v18 = vadd.f32 %v13067_v46, %v13062_v23  ;;  %8590 = vrcp.f32 %v15265_v19 }
 0x9be   : > { %v2911_v44 = vmul.f32 %v8577_v13, %v15262_v7  ;;  %8592 = vrcp.f32 %v15266_v1 }
 0x9bf   : > { %v13074_v6 = vpop.eup %8578  ;;  %5867 = vmatmul.mubr.f32.gmra.mrb[220].mxu1 %v12921_v55  ;;  %8594 = vrcp.f32 %v15267_v63 }
 0x9c0   : > { %v13077_v21 = vpop.eup %8580  ;;  %v13080_v28 = vpop.xlane.xlu0 %4008  ;;  %5871 = vmatprep.mubr.f32.mxu1 %v12963_v17  ;;  %5604 = vadd.xlane.f32.xlu1 %v5603_v58  ;;  %v2943_v58 = vsub.f32 2.0, %v2911_v44  ;;  %8596 = vrcp.f32 %v15268_v30 }
 0x9c1   : > { %v5627_v59 = vadd.f32 %v13077_v21, %v13074_v6  ;;  %8598 = vrcp.f32 %v15269_v9 }
 0x9c3   : > { %v13085_v39 = vpop.eup %8582  ;;  %5872 = vmatmul.mubr.f32.gmra.mrb[222].mxu1 %v12957_v0  ;;  %v13104_v0 = vpop.xlane.xlu1 %4011 }
 0x9c4   : > { %v13091_v36 = vpop.eup %8584  ;;  %v13094_v55 = vpop.xlane.xlu0 %4014  ;;  %5876 = vmatprep.mubr.f32.mxu1 %v12933_v25  ;;  %5610 = vadd.xlane.f32.xlu1 %v5609_v10  ;;  %v2975_v25 = vmul.f32 %v8577_v13, %v2943_v58  ;;  %v15272_v58 = vld [vmem:[#allocation18_spill] sm:$0xff] }
 0x9c5   : > { %v8587_v5 = vpop.eup %8586  ;;  %v5633_v17 = vadd.f32 %v13091_v36, %v13085_v39  ;;  %8600 = vrcp.f32 %v15272_v58 }
 0x9c6   : > { %v2915_v7 = vmul.f32 %v8587_v5, %v15263_v61  ;;  %v8589_v54 = vpop.eup %8588 }
 0x9c7   : > { %5877 = vmatmul.mubr.f32.gmra.mrb[224].mxu1 %v12931_v53  ;;  %v2917_v44 = vmul.f32 %v8589_v54, %v15264_v22  ;;  %v8591_v53 = vpop.eup %8590 }
 0x9c8   : > { %v13102_v41 = vpop.xlane.xlu0 %4020  ;;  %5881 = vmatprep.mubr.f32.mxu1 %v12983_v38  ;;  %5616 = vadd.xlane.f32.xlu1 %v5615_v20  ;;  %v2947_v10 = vsub.f32 2.0, %v2915_v7  ;;  %v13115_v38 = vpop.xlane.xlu1 %4017  ;;  %v15271_v20 = vld [vmem:[#allocation91_spill] sm:$0xff]  ;;  %v2919_v22 = vmul.f32 %v8591_v53, %v15265_v19 }
 0x9c9   : > { %15270 = vst [vmem:[#allocation147_spill] sm:$0xff] %v13115_v38  ;;  %v3007_v13 = vmul.f32 %v2975_v25, %v15271_v20  ;;  %v2949_v7 = vsub.f32 2.0, %v2917_v44  ;;  %v8593_v32 = vpop.eup %8592 }
 0x9ca   : > { %v2979_v3 = vmul.f32 %v8587_v5, %v2947_v10  ;;  %v2951_v5 = vsub.f32 2.0, %v2919_v22  ;;  %v2921_v10 = vmul.f32 %v8593_v32, %v15266_v1  ;;  %v8595_v20 = vpop.eup %8594 }
 0x9cb   : > { %5882 = vmatmul.mubr.f32.gmra.mrb[226].mxu1 %v12977_v47  ;;  %v2981_v25 = vmul.f32 %v8589_v54, %v2949_v7  ;;  %v15278_v54 = vld [vmem:[#allocation34_spill] sm:$0xff] }
 0x9cc   : > { %v13111_v61 = vpop.xlane.xlu0 %4026  ;;  %5886 = vmatprep.mubr.f32.mxu1 %v12943_v42  ;;  %5622 = vadd.xlane.f32.xlu1 %v5621_v18  ;;  %v15273_v42 = vld [vmem:[#allocation5_spill] sm:$0xff]  ;;  %v15274_v18 = vld [vmem:[#allocation112_spill] sm:$0xff]  ;;  %v2983_v1 = vmul.f32 %v8591_v53, %v2951_v5 }
 0x9cd   : > { %8602 = vrcp.f32 %v15273_v42  ;;  %v15281_v53 = vld [vmem:[#allocation120_spill] sm:$0xff] }
 0x9ce   : > { %8604 = vrcp.f32 %v15274_v18 }
 0x9cf   : > { %5887 = vmatmul.mubr.f32.gmra.mrb[228].mxu1 %v12941_v29  ;;  %v15275_v29 = vld [vmem:[#allocation100_spill] sm:$0xff]  ;;  %8606 = vrcp.f32 %v15277_v51 }
 0x9d0   : > { %v13121_v47 = vpop.xlane.xlu0 %4032  ;;  %5891 = vmatprep.mubr.f32.mxu1 %v13003_v43  ;;  %5628 = vadd.xlane.f32.xlu1 %v5627_v59  ;;  %v3011_v19 = vmul.f32 %v2979_v3, %v15275_v29  ;;  %v13132_v43 = vpop.xlane.xlu1 %4023  ;;  %8608 = vrcp.f32 %v15278_v54  ;;  %v15279_v3 = vld [vmem:[#allocation103_spill] sm:$0xff] }
 0x9d1   : > { %3071 = vrot.lane.b32.xlu0 %v3007_v13, %s8856_s29  ;;  %15276 = vst [vmem:[#allocation75_spill] sm:$0xff] %v13132_v43  ;;  %v8597_v59 = vpop.eup %8596  ;;  %v2953_v13 = vsub.f32 2.0, %v2921_v10  ;;  %v3013_v7 = vmul.f32 %v2981_v25, %v15279_v3  ;;  %8610 = vrcp.f32 %v15280_v56 }
 0x9d2   : > { %v8599_v29 = vpop.eup %8598  ;;  %8612 = vrcp.f32 %v15281_v53 }
 0x9d3   : > { %5892 = vmatmul.mubr.f32.gmra.mrb[230].mxu1 %v12996_v27  ;;  %v2923_v27 = vmul.f32 %v8595_v20, %v15267_v63  ;;  %v2925_v25 = vmul.f32 %v8599_v29, %v15269_v9 }
 0x9d4   : > { %v13130_v44 = vpop.xlane.xlu0 %4038  ;;  %5896 = vmatprep.mubr.f32.mxu1 %v12955_v49  ;;  %5634 = vadd.xlane.f32.xlu1 %v5633_v17  ;;  %v2912_v49 = vmul.f32 %v8597_v59, %v15268_v30  ;;  %v8601_v17 = vpop.eup %8600 }
 0x9d5   : > { %3079 = vrot.lane.b32.xlu0 %v3011_v19, %s8856_s29  ;;  %v13148_v5 = vpop.xlane.xlu1 %4029  ;;  %v2955_v10 = vsub.f32 2.0, %v2923_v27  ;;  %v15283_v19 = vld [vmem:[#allocation109_spill] sm:$0xff]  ;;  %v2913_v43 = vmul.f32 %v8601_v17, %v15272_v58  ;;  %v2957_v27 = vsub.f32 2.0, %v2925_v25 }
 0x9d6   : > { %15282 = vst [vmem:[#allocation44_spill] sm:$0xff] %v13148_v5  ;;  %v3015_v30 = vmul.f32 %v2983_v1, %v15283_v19  ;;  %v2944_v62 = vsub.f32 2.0, %v2912_v49  ;;  %v15287_v1 = vld [vmem:[#allocation136_spill] sm:$0xff] }
 0x9d7   : > { %5897 = vmatmul.mubr.f32.gmra.mrb[232].mxu1 %v12953_v16  ;;  %v8603_v63 = vpop.eup %8602  ;;  %v2985_v16 = vmul.f32 %v8593_v32, %v2953_v13  ;;  %v15286_v32 = vld [vmem:[#allocation121_spill] sm:$0xff]  ;;  %v2987_v9 = vmul.f32 %v8595_v20, %v2955_v10  ;;  %v2945_v38 = vsub.f32 2.0, %v2913_v43  ;;  %v2989_v20 = vmul.f32 %v8599_v29, %v2957_v27 }
 0x9d8   : > { %v13141_v22 = vpop.xlane.xlu0 %4044  ;;  %5901 = vmatprep.mubr.f32.mxu1 %v13020_v60  ;;  %v8605_v60 = vpop.eup %8604  ;;  %v2976_v5 = vmul.f32 %v8597_v59, %v2944_v62  ;;  %v15292_v62 = vld [vmem:[#allocation62_spill] sm:$0xff] }
 0x9d9   : > { %3083 = vrot.lane.b32.xlu0 %v3013_v7, %s8856_s29  ;;  %v15285_v7 = vld [vmem:[#allocation82_spill] sm:$0xff]  ;;  %v8607_v13 = vpop.eup %8606  ;;  %v3017_v19 = vmul.f32 %v2985_v16, %v15287_v1 }
 0x9da   : > { %8614 = vrcp.f32 %v15285_v7  ;;  %v8609_v58 = vpop.eup %8608  ;;  %v2916_v1 = vmul.f32 %v8607_v13, %v15277_v51  ;;  %v15296_v51 = vld [vmem:[#allocation39_spill] sm:$0xff] }
 0x9db   : > { %5902 = vmatmul.mubr.f32.gmra.mrb[234].mxu1 %v13013_v45  ;;  %8616 = vrcp.f32 %v15286_v32  ;;  %v2927_v45 = vmul.f32 %v8605_v60, %v15274_v18  ;;  %v15291_v18 = vld [vmem:[#allocation125_spill] sm:$0xff]  ;;  %v2929_v10 = vmul.f32 %v8609_v58, %v15278_v54  ;;  %v15295_v54 = vld [vmem:[#allocation127_spill] sm:$0xff] }
 0x9dc   : > { %v13153_v3 = vpop.xlane.xlu0 %4050  ;;  %5906 = vmatprep.mubr.f32.mxu1 %v12970_v33  ;;  %v2914_v33 = vmul.f32 %v8603_v63, %v15273_v42  ;;  %v3019_v42 = vmul.f32 %v2987_v9, %v15292_v62  ;;  %v15297_v62 = vld [vmem:[#allocation96_spill] sm:$0xff] }
 0x9dd   : > { %15284 = vst [vmem:[#allocation149_spill] sm:$0xff] %v13153_v3  ;;  %3087 = vrot.lane.b32.xlu0 %v3015_v30, %s8856_s29  ;;  %v13166_v3 = vpop.xlane.xlu1 %4035  ;;  %v15290_v30 = vld [vmem:[#allocation50_spill] sm:$0xff]  ;;  %v2959_v16 = vsub.f32 2.0, %v2927_v45  ;;  %v2961_v27 = vsub.f32 2.0, %v2929_v10  ;;  %v2948_v45 = vsub.f32 2.0, %v2916_v1 }
 0x9de   : > { %15289 = vst [vmem:[#allocation3_spill] sm:$0xff] %v13166_v3  ;;  %8618 = vrcp.f32 %v15290_v30  ;;  %v2946_v25 = vsub.f32 2.0, %v2914_v33 }
 0x9df   : > { %5907 = vmatmul.mubr.f32.gmra.mrb[236].mxu1 %v12968_v8  ;;  %8620 = vrcp.f32 %v15291_v18  ;;  %v8611_v8 = vpop.eup %8610  ;;  %v2991_v9 = vmul.f32 %v8605_v60, %v2959_v16  ;;  %v2993_v60 = vmul.f32 %v8609_v58, %v2961_v27  ;;  %v2980_v10 = vmul.f32 %v8607_v13, %v2948_v45 }
 0x9e0   : > { %v13163_v49 = vpop.xlane.xlu0 %4056  ;;  %5911 = vmatprep.mubr.f32.mxu1 %v13038_v50  ;;  %v8613_v59 = vpop.eup %8612  ;;  %v2977_v50 = vmul.f32 %v8601_v17, %v2945_v38  ;;  %v2918_v33 = vmul.f32 %v8611_v8, %v15280_v56  ;;  %v15300_v56 = vld [vmem:[#allocation54_spill] sm:$0xff] }
 0x9e1   : > { %15288 = vst [vmem:[#allocation31_spill] sm:$0xff] %v13163_v49  ;;  %3091 = vrot.lane.b32.xlu0 %v3017_v19, %s8856_s29  ;;  %v15293_v19 = vld [vmem:[#allocation33_spill] sm:$0xff]  ;;  %v15294_v49 = vld [vmem:[#allocation104_spill] sm:$0xff]  ;;  %v2931_v38 = vmul.f32 %v8613_v59, %v15281_v53 }
 0x9e2   : > { %v3008_v3 = vmul.f32 %v2976_v5, %v15293_v19  ;;  %8622 = vrcp.f32 %v15294_v49  ;;  %v2978_v5 = vmul.f32 %v8603_v63, %v2946_v25  ;;  %v15299_v53 = vld [vmem:[#allocation128_spill] sm:$0xff]  ;;  %v2950_v25 = vsub.f32 2.0, %v2918_v33  ;;  %v15304_v33 = vld [vmem:[#allocation102_spill] sm:$0xff] }
 0x9e3   : > { %5912 = vmatmul.mubr.f32.gmra.mrb[238].mxu1 %v13031_v35  ;;  %8624 = vrcp.f32 %v15295_v54  ;;  %v13183_v35 = vpop.xlane.xlu1 %4041  ;;  %v2963_v63 = vsub.f32 2.0, %v2931_v38 }
 0x9e4   : > { %v13175_v43 = vpop.xlane.xlu0 %4062  ;;  %5916 = vmatprep.mubr.f32.mxu1 %v12991_v24  ;;  %v8615_v29 = vpop.eup %8614  ;;  %v3021_v24 = vmul.f32 %v2989_v20, %v15296_v51  ;;  %v15301_v51 = vld [vmem:[#allocation99_spill] sm:$0xff]  ;;  %v2982_v38 = vmul.f32 %v8611_v8, %v2950_v25 }
 0x9e5   : > { %3095 = vrot.lane.b32.xlu0 %v3019_v42, %s8856_s29  ;;  %3073 = vrot.lane.b32.xlu1 %v3008_v3, %s8856_s29  ;;  %v8617_v17 = vpop.eup %8616  ;;  %v3009_v42 = vmul.f32 %v2977_v50, %v15297_v62  ;;  %v15298_v3 = vld [vmem:[#allocation111_spill] sm:$0xff]  ;;  %v2920_v50 = vmul.f32 %v8615_v29, %v15285_v7  ;;  %v2995_v13 = vmul.f32 %v8613_v59, %v2963_v63 }
 0x9e6   : > { %8626 = vrcp.f32 %v15298_v3  ;;  %v2933_v20 = vmul.f32 %v8617_v17, %v15286_v32  ;;  %v15302_v62 = vld [vmem:[#allocation35_spill] sm:$0xff] }
 0x9e7   : > { %5917 = vmatmul.mubr.f32.gmra.mrb[240].mxu1 %v12989_v4  ;;  %8628 = vrcp.f32 %v15299_v53  ;;  %v13202_v1 = vpop.xlane.xlu1 %4047 }
 0x9e8   : > { %5921 = vmatprep.mubr.f32.mxu1 %v13057_v57  ;;  %v13192_v19 = vpop.xlane.xlu0 %4068  ;;  %v8619_v4 = vpop.eup %8618  ;;  %v3023_v57 = vmul.f32 %v2991_v9, %v15300_v56  ;;  %8630 = vrcp.f32 %v15302_v62  ;;  %v2965_v58 = vsub.f32 2.0, %v2933_v20  ;;  %v15305_v56 = vld [vmem:[#allocation116_spill] sm:$0xff] }
 0x9e9   : > { %3099 = vrot.lane.b32.xlu0 %v3021_v24, %s8856_s29  ;;  %3075 = vrot.lane.b32.xlu1 %v3009_v42, %s8856_s29  ;;  %v8621_v16 = vpop.eup %8620  ;;  %v3010_v24 = vmul.f32 %v2978_v5, %v15301_v51  ;;  %8632 = vrcp.f32 %v13050_v34  ;;  %v2952_v5 = vsub.f32 2.0, %v2920_v50  ;;  %v2922_v45 = vmul.f32 %v8619_v4, %v15290_v30  ;;  %v15307_v50 = vld [vmem:[#allocation108_spill] sm:$0xff] }
 0x9ea   : > { %v2935_v7 = vmul.f32 %v8621_v16, %v15291_v18  ;;  %v3012_v42 = vmul.f32 %v2980_v10, %v15304_v33  ;;  %8634 = vrcp.f32 %v15305_v56  ;;  %v2997_v59 = vmul.f32 %v8617_v17, %v2965_v58 }
 0x9eb   : > { %5922 = vmatmul.mubr.f32.gmra.mrb[242].mxu1 %v13052_v26  ;;  %8636 = vrcp.f32 %v13065_v14  ;;  %v13221_v18 = vpop.xlane.xlu1 %4053  ;;  %v2984_v20 = vmul.f32 %v8615_v29, %v2952_v5  ;;  %v3014_v51 = vmul.f32 %v2982_v38, %v15307_v50  ;;  %v15310_v38 = vld [vmem:[#allocation14_spill] sm:$0xff] }
 0x9ec   : > { %5926 = vmatprep.mubr.f32.mxu1 %v13010_v12  ;;  %v13210_v26 = vpop.xlane.xlu0 %4074  ;;  %v8623_v32 = vpop.eup %8622  ;;  %v15303_v12 = vld [vmem:[#allocation89_spill] sm:$0xff]  ;;  %v2967_v8 = vsub.f32 2.0, %v2935_v7 }
 0x9ed   : > { %3103 = vrot.lane.b32.xlu0 %v3023_v57, %s8856_s29  ;;  %3077 = vrot.lane.b32.xlu1 %v3010_v24, %s8856_s29  ;;  %v3025_v9 = vmul.f32 %v2993_v60, %v15303_v12  ;;  %v8625_v27 = vpop.eup %8624  ;;  %v2954_v57 = vsub.f32 2.0, %v2922_v45  ;;  %v2924_v10 = vmul.f32 %v8623_v32, %v15294_v49  ;;  %v15308_v24 = vld [vmem:[#allocation61_spill] sm:$0xff]  ;;  %v15309_v49 = vld [vmem:[#allocation58_spill] sm:$0xff]  ;;  %v3016_v5 = vmul.f32 %v2984_v20, %v15310_v38  ;;  %v15314_v20 = vld [vmem:[#allocation176_spill] sm:$0xff] }
 0x9ee   : > { %v2937_v60 = vmul.f32 %v8625_v27, %v15295_v54  ;;  %8638 = vrcp.f32 %v15308_v24  ;;  %v2999_v54 = vmul.f32 %v8621_v16, %v2967_v8  ;;  %v15311_v45 = vld [vmem:[#allocation117_spill] sm:$0xff] }
 0x9ef   : > { %5927 = vmatmul.mubr.f32.gmra.mrb[244].mxu1 %v13006_v15  ;;  %8640 = vrcp.f32 %v13080_v28  ;;  %v2986_v58 = vmul.f32 %v8619_v4, %v2954_v57  ;;  %v2956_v7 = vsub.f32 2.0, %v2924_v10 }
 0x9f0   : > { %5931 = vmatprep.mubr.f32.mxu1 %v13067_v46  ;;  %v8627_v15 = vpop.eup %8626  ;;  %v15306_v46 = vld [vmem:[#allocation172_spill] sm:$0xff]  ;;  %v13228_v25 = vpop.xlane.xlu0 %4080  ;;  %v2969_v29 = vsub.f32 2.0, %v2937_v60  ;;  %8642 = vrcp.f32 %v15311_v45 }
 0x9f1   : > { %3107 = vrot.lane.b32.xlu0 %v3025_v9, %s8856_s29  ;;  %3081 = vrot.lane.b32.xlu1 %v3012_v42, %s8856_s29  ;;  %v3027_v30 = vmul.f32 %v2995_v13, %v15306_v46  ;;  %v8629_v63 = vpop.eup %8628  ;;  %v3029_v13 = vmul.f32 %v2997_v59, %v15309_v49  ;;  %v2926_v12 = vmul.f32 %v8627_v15, %v15298_v3  ;;  %v13240_v9 = vpop.xlane.xlu1 %4059  ;;  %8644 = vrcp.f32 %v13094_v55  ;;  %v15313_v46 = vld [vmem:[#allocation13_spill] sm:$0xff] }
 0x9f2   : > { %v2939_v17 = vmul.f32 %v8629_v63, %v15299_v53  ;;  %v3001_v4 = vmul.f32 %v8625_v27, %v2969_v29  ;;  %v2988_v59 = vmul.f32 %v8623_v32, %v2956_v7  ;;  %8646 = vrcp.f32 %v15314_v20 }
 0x9f3   : > { %5932 = vmatmul.mubr.f32.gmra.mrb[246].mxu1 %v13062_v23  ;;  %v8631_v23 = vpop.eup %8630  ;;  %v2958_v8 = vsub.f32 2.0, %v2926_v12  ;;  %8648 = vrcp.f32 %v13102_v41 }
 0x9f4   : > { %5936 = vmatprep.mubr.f32.mxu1 %v13027_v31  ;;  %v8633_v31 = vpop.eup %8632  ;;  %v2971_v16 = vsub.f32 2.0, %v2939_v17  ;;  %v2928_v60 = vmul.f32 %v8631_v23, %v15302_v62  ;;  %v15316_v17 = vld [vmem:[#allocation52_spill] sm:$0xff] }
 0x9f5   : > { %3111 = vrot.lane.b32.xlu0 %v3027_v30, %s8856_s29  ;;  %3085 = vrot.lane.b32.xlu1 %v3014_v51, %s8856_s29  ;;  %v8635_v53 = vpop.eup %8634  ;;  %v2941_v3 = vmul.f32 %v8633_v31, %v13050_v34  ;;  %v3018_v30 = vmul.f32 %v2986_v58, %v15313_v46  ;;  %v13259_v34 = vpop.xlane.xlu1 %4065  ;;  %v2990_v50 = vmul.f32 %v8627_v15, %v2958_v8  ;;  %v15321_v46 = vld [vmem:[#allocation168_spill] sm:$0xff] }
 0x9f6   : > { %v8637_v42 = vpop.eup %8636  ;;  %v3003_v27 = vmul.f32 %v8629_v63, %v2971_v16  ;;  %v2960_v51 = vsub.f32 2.0, %v2928_v60  ;;  %v3020_v49 = vmul.f32 %v2988_v59, %v15316_v17  ;;  %v15323_v17 = vld [vmem:[#allocation48_spill] sm:$0xff] }
 0x9f7   : > { %5937 = vmatmul.mubr.f32.gmra.mrb[248].mxu1 %v13023_v11  ;;  %v13247_v11 = vpop.xlane.xlu0 %4086  ;;  %v2973_v32 = vsub.f32 2.0, %v2941_v3  ;;  %v4450_v57 = vmul.f32 %v8637_v42, %v13065_v14 }
 0x9f8   : > { %5941 = vmatprep.mubr.f32.mxu1 %v13077_v21  ;;  %v15312_v21 = vld [vmem:[#allocation93_spill] sm:$0xff]  ;;  %v2992_v7 = vmul.f32 %v8631_v23, %v2960_v51 }
 0x9f9   : > { %3115 = vrot.lane.b32.xlu0 %v3029_v13, %s8856_s29  ;;  %3089 = vrot.lane.b32.xlu1 %v3016_v5, %s8856_s29  ;;  %v3031_v33 = vmul.f32 %v2999_v54, %v15312_v21  ;;  %v2930_v54 = vmul.f32 %v8635_v53, %v15305_v56  ;;  %v15317_v13 = vld [vmem:[#allocation126_spill] sm:$0xff]  ;;  %v3005_v14 = vmul.f32 %v8633_v31, %v2973_v32  ;;  %v4482_v15 = vsub.f32 2.0, %v4450_v57  ;;  %v15318_v56 = vld [vmem:[#allocation101_spill] sm:$0xff]  ;;  %v13278_v5 = vpop.xlane.xlu1 %4071 }
 0x9fa   : > { %8650 = vrcp.f32 %v15317_v13  ;;  %v3035_v58 = vmul.f32 %v3003_v27, %v15318_v56  ;;  %v15322_v57 = vld [vmem:[#allocation37_spill] sm:$0xff] }
 0x9fb   : > { %5942 = vmatmul.mubr.f32.gmra.mrb[250].mxu1 %v13074_v6  ;;  %v8639_v6 = vpop.eup %8638  ;;  %v13266_v29 = vpop.xlane.xlu0 %4092  ;;  %8652 = vrcp.f32 %v13111_v61  ;;  %v2962_v12 = vsub.f32 2.0, %v2930_v54  ;;  %v4514_v31 = vmul.f32 %v8637_v42, %v4482_v15  ;;  %v15324_v15 = vld [vmem:[#allocation135_spill] sm:$0xff] }
 0x9fc   : > { %5946 = vmatprep.mubr.f32.mxu1 %v13047_v52  ;;  %v15315_v52 = vld [vmem:[#allocation97_spill] sm:$0xff]  ;;  %v8641_v10 = vpop.eup %8640  ;;  %v2932_v38 = vmul.f32 %v8639_v6, %v15308_v24  ;;  %8654 = vrcp.f32 %v13043_v40  ;;  %v15320_v24 = vld [vmem:[#allocation51_spill] sm:$0xff] }
 0x9fd   : > { %3119 = vrot.lane.b32.xlu0 %v3031_v33, %s8856_s29  ;;  %3093 = vrot.lane.b32.xlu1 %v3018_v30, %s8856_s29  ;;  %v3033_v62 = vmul.f32 %v3001_v4, %v15315_v52  ;;  %v4452_v63 = vmul.f32 %v8641_v10, %v13080_v28  ;;  %v15319_v4 = vld [vmem:[#allocation53_spill] sm:$0xff]  ;;  %8656 = vrcp.f32 %v13121_v47  ;;  %v3037_v21 = vmul.f32 %v3005_v14, %v15320_v24  ;;  %v13294_v27 = vpop.xlane.xlu1 %4077 }
 0x9fe   : > { %v3022_v16 = vmul.f32 %v2990_v50, %v15319_v4  ;;  %v2994_v59 = vmul.f32 %v8635_v53, %v2962_v12  ;;  %v2964_v8 = vsub.f32 2.0, %v2932_v38  ;;  %v3024_v30 = vmul.f32 %v2992_v7, %v15321_v46  ;;  %v15325_v38 = vld [vmem:[#allocation57_spill] sm:$0xff] }
 0x9ff   : > { %5947 = vmatmul.mubr.f32.gmra.mrb[252].mxu1 %v13041_v48  ;;  %v8643_v48 = vpop.eup %8642  ;;  %v13284_v28 = vpop.xlane.xlu0 %5541  ;;  %v4484_v23 = vsub.f32 2.0, %v4452_v63  ;;  %8658 = vrcp.f32 %v13069_v37  ;;  %v4546_v52 = vmul.f32 %v4514_v31, %v15322_v57 }
 0xa00   : > { %5951 = vmatprep.mubr.f32.mxu1 %v13091_v36  ;;  %v8645_v36 = vpop.eup %8644  ;;  %v2934_v60 = vmul.f32 %v8643_v48, %v15311_v45  ;;  %8660 = vrcp.f32 %v13130_v44 }
 0xa01   : > { %3123 = vrot.lane.b32.xlu0 %v3033_v62, %s8856_s29  ;;  %3097 = vrot.lane.b32.xlu1 %v3020_v49, %s8856_s29  ;;  %v4454_v3 = vmul.f32 %v8645_v36, %v13094_v55  ;;  %v4516_v42 = vmul.f32 %v8641_v10, %v4484_v23  ;;  %v2996_v62 = vmul.f32 %v8639_v6, %v2964_v8  ;;  %8662 = vrcp.f32 %v13089_v2  ;;  %v13310_v12 = vpop.xlane.xlu1 %4083 }
 0xa02   : > { %v2966_v50 = vsub.f32 2.0, %v2934_v60  ;;  %v3026_v49 = vmul.f32 %v2994_v59, %v15323_v17  ;;  %8664 = vrcp.f32 %v13141_v22  ;;  %v15328_v60 = vld [vmem:[#allocation10_spill] sm:$0xff] }
 0xa03   : > { %5952 = vmatmul.mubr.f32.gmra.mrb[254].mxu1 %v13085_v39  ;;  %v8647_v39 = vpop.eup %8646  ;;  %v4486_v32 = vsub.f32 2.0, %v4454_v3  ;;  %v13300_v54 = vpop.xlane.xlu0 %5547  ;;  %v3028_v4 = vmul.f32 %v2996_v62, %v15325_v38  ;;  %8666 = vrcp.f32 %v13104_v0 }
 0xa04   : > { %v8649_v33 = vpop.eup %8648  ;;  %v2936_v51 = vmul.f32 %v8647_v39, %v15314_v20  ;;  %v4548_v20 = vmul.f32 %v4516_v42, %v15324_v15  ;;  %v2998_v56 = vmul.f32 %v8643_v48, %v2966_v50  ;;  %v15330_v42 = vld [vmem:[#allocation31_spill] sm:$0xff] }
 0xa05   : > { %3127 = vrot.lane.b32.xlu0 %v3035_v58, %s8856_s29  ;;  %3101 = vrot.lane.b32.xlu1 %v3022_v16, %s8856_s29  ;;  %v8651_v55 = vpop.eup %8650  ;;  %v4456_v53 = vmul.f32 %v8649_v33, %v13102_v41  ;;  %v4518_v10 = vmul.f32 %v8645_v36, %v4486_v32  ;;  %v15326_v16 = vld [vmem:[#allocation149_spill] sm:$0xff]  ;;  %v13326_v32 = vpop.xlane.xlu1 %4089 }
 0xa06   : > { %v8653_v45 = vpop.eup %8652  ;;  %v2968_v58 = vsub.f32 2.0, %v2936_v51  ;;  %v2938_v7 = vmul.f32 %v8651_v55, %v15317_v13  ;;  %8668 = vrcp.f32 %v15326_v16  ;;  %v15327_v13 = vld [vmem:[#allocation38_spill] sm:$0xff]  ;;  %v3030_v46 = vmul.f32 %v2998_v56, %v15328_v60 }
 0xa07   : > { %v8655_v41 = vpop.eup %8654  ;;  %v4488_v14 = vsub.f32 2.0, %v4456_v53  ;;  %v4458_v6 = vmul.f32 %v8653_v45, %v13111_v61  ;;  %v13316_v36 = vpop.xlane.xlu0 %5553  ;;  %v4550_v3 = vmul.f32 %v4518_v10, %v15327_v13 }
 0xa08   : > { %v8657_v63 = vpop.eup %8656  ;;  %v2970_v59 = vsub.f32 2.0, %v2938_v7  ;;  %v2940_v8 = vmul.f32 %v8655_v41, %v13043_v40  ;;  %v15331_v40 = vld [vmem:[#allocation138_spill] sm:$0xff] }
 0xa09   : > { %3131 = vrot.lane.b32.xlu0 %v3037_v21, %s8856_s29  ;;  %3105 = vrot.lane.b32.xlu1 %v3024_v30, %s8856_s29  ;;  %v8659_v61 = vpop.eup %8658  ;;  %v4520_v31 = vmul.f32 %v8649_v33, %v4488_v14  ;;  %v4490_v48 = vsub.f32 2.0, %v4458_v6  ;;  %v4460_v23 = vmul.f32 %v8657_v63, %v13121_v47  ;;  %v3000_v21 = vmul.f32 %v8647_v39, %v2968_v58  ;;  %v15329_v30 = vld [vmem:[#allocation147_spill] sm:$0xff]  ;;  %v13342_v38 = vpop.xlane.xlu1 %4095 }
 0xa0a   : > { %v8661_v24 = vpop.eup %8660  ;;  %8670 = vrcp.f32 %v15329_v30  ;;  %v3002_v50 = vmul.f32 %v8651_v55, %v2970_v59  ;;  %v2972_v51 = vsub.f32 2.0, %v2940_v8  ;;  %v2942_v17 = vmul.f32 %v8659_v61, %v13069_v37  ;;  %v15333_v14 = vld [vmem:[#allocation75_spill] sm:$0xff] }
 0xa0b   : > { %8672 = vrcp.f32 %v15330_v42  ;;  %v13328_v33 = vpop.xlane.xlu0 %5559  ;;  %v8663_v47 = vpop.eup %8662  ;;  %v4522_v53 = vmul.f32 %v8653_v45, %v4490_v48  ;;  %v4492_v39 = vsub.f32 2.0, %v4460_v23  ;;  %v4462_v57 = vmul.f32 %v8661_v24, %v13130_v44  ;;  %v15336_v23 = vld [vmem:[#allocation44_spill] sm:$0xff] }
 0xa0c   : > { %v8665_v62 = vpop.eup %8664  ;;  %8674 = vrcp.f32 %v15333_v14  ;;  %v3004_v58 = vmul.f32 %v8655_v41, %v2972_v51  ;;  %v2974_v37 = vsub.f32 2.0, %v2942_v17  ;;  %v4451_v7 = vmul.f32 %v8663_v47, %v13089_v2  ;;  %v15337_v2 = vld [vmem:[#allocation36_spill] sm:$0xff] }
 0xa0d   : > { %4610 = vrot.lane.b32.xlu0 %v4546_v52, %s8857_s30  ;;  %3109 = vrot.lane.b32.xlu1 %v3026_v49, %s8856_s29  ;;  %v4552_v52 = vmul.f32 %v4520_v31, %v15331_v40  ;;  %v15332_v49 = vld [vmem:[#allocation94_spill] sm:$0xff]  ;;  %8676 = vrcp.f32 %v13175_v43  ;;  %v8667_v45 = vpop.eup %8666  ;;  %v4524_v6 = vmul.f32 %v8657_v63, %v4492_v39  ;;  %v4494_v44 = vsub.f32 2.0, %v4462_v57  ;;  %v15339_v57 = vld [vmem:[#allocation3_spill] sm:$0xff] }
 0xa0e   : > { %v3032_v10 = vmul.f32 %v3000_v21, %v15332_v49  ;;  %v4464_v15 = vmul.f32 %v8665_v62, %v13141_v22  ;;  %v15335_v31 = vld [vmem:[#allocation98_spill] sm:$0xff]  ;;  %8678 = vrcp.f32 %v15336_v23  ;;  %v3006_v59 = vmul.f32 %v8659_v61, %v2974_v37 }
 0xa0f   : > { %v3034_v48 = vmul.f32 %v3002_v50, %v15335_v31  ;;  %8680 = vrcp.f32 %v13192_v19  ;;  %v4526_v63 = vmul.f32 %v8661_v24, %v4494_v44  ;;  %v4483_v8 = vsub.f32 2.0, %v4451_v7  ;;  %v13360_v24 = vpop.xlane.xlu1 %5544  ;;  %v15341_v44 = vld [vmem:[#allocation105_spill] sm:$0xff] }
 0xa10   : > { %v8669_v56 = vpop.eup %8668  ;;  %v4496_v41 = vsub.f32 2.0, %v4464_v15  ;;  %v4453_v60 = vmul.f32 %v8667_v45, %v13104_v0  ;;  %8682 = vrcp.f32 %v15339_v57  ;;  %v15340_v0 = vld [vmem:[#allocation148_spill] sm:$0xff]  ;;  %v3038_v15 = vmul.f32 %v3006_v59, %v15341_v44 }
 0xa11   : > { %4614 = vrot.lane.b32.xlu0 %v4548_v20, %s8857_s30  ;;  %3113 = vrot.lane.b32.xlu1 %v3028_v4, %s8856_s29  ;;  %v15334_v20 = vld [vmem:[#allocation42_spill] sm:$0xff]  ;;  %v13344_v4 = vpop.xlane.xlu0 %5565  ;;  %v4466_v13 = vmul.f32 %v8669_v56, %v15326_v16  ;;  %8684 = vrcp.f32 %v13210_v26  ;;  %v4558_v50 = vmul.f32 %v4526_v63, %v15340_v0  ;;  %v4515_v17 = vmul.f32 %v8663_v47, %v4483_v8 }
 0xa12   : > { %v4554_v55 = vmul.f32 %v4522_v53, %v15334_v20  ;;  %v15338_v53 = vld [vmem:[#allocation72_spill] sm:$0xff]  ;;  %v4528_v40 = vmul.f32 %v8665_v62, %v4496_v41  ;;  %v4485_v49 = vsub.f32 2.0, %v4453_v60  ;;  %8686 = vrcp.f32 %v13183_v35  ;;  %v15343_v41 = vld [vmem:[#allocation134_spill] sm:$0xff] }
 0xa13   : > { %v3036_v39 = vmul.f32 %v3004_v58, %v15338_v53  ;;  %v4498_v61 = vsub.f32 2.0, %v4466_v13  ;;  %8688 = vrcp.f32 %v13228_v25  ;;  %v4547_v13 = vmul.f32 %v4515_v17, %v15343_v41 }
 0xa14   : > { %v8671_v22 = vpop.eup %8670  ;;  %v4517_v37 = vmul.f32 %v8667_v45, %v4485_v49  ;;  %8690 = vrcp.f32 %v13202_v1 }
 0xa15   : > { %4618 = vrot.lane.b32.xlu0 %v4550_v3, %s8857_s30  ;;  %3117 = vrot.lane.b32.xlu1 %v3030_v46, %s8856_s29  ;;  %v4556_v3 = vmul.f32 %v4524_v6, %v15337_v2  ;;  %v8673_v21 = vpop.eup %8672  ;;  %v4530_v62 = vmul.f32 %v8669_v56, %v4498_v61  ;;  %8692 = vrcp.f32 %v13247_v11 }
 0xa16   : > { %v8675_v16 = vpop.eup %8674  ;;  %8694 = vrcp.f32 %v13221_v18 }
 0xa17   : > { %v13354_v46 = vpop.xlane.xlu0 %5571  ;;  %v8677_v51 = vpop.eup %8676  ;;  %v4457_v31 = vmul.f32 %v8675_v16, %v15333_v14  ;;  %v15344_v14 = vld [vmem:[#allocation151_spill] sm:$0xff]  ;;  %8696 = vrcp.f32 %v13266_v29 }
 0xa18   : > { %v4470_v47 = vmul.f32 %v8677_v51, %v13175_v43  ;;  %8698 = vrcp.f32 %v13240_v9 }
 0xa19   : > { %4622 = vrot.lane.b32.xlu0 %v4552_v52, %s8857_s30  ;;  %3121 = vrot.lane.b32.xlu1 %v3032_v10, %s8856_s29  ;;  %v4468_v52 = vmul.f32 %v8673_v21, %v15330_v42  ;;  %v4455_v10 = vmul.f32 %v8671_v22, %v15329_v30  ;;  %v8679_v42 = vpop.eup %8678  ;;  %v4489_v60 = vsub.f32 2.0, %v4457_v31  ;;  %8700 = vrcp.f32 %v13284_v28 }
 0xa1a   : > { %v8681_v30 = vpop.eup %8680  ;;  %v4502_v45 = vsub.f32 2.0, %v4470_v47  ;;  %v4459_v53 = vmul.f32 %v8679_v42, %v15336_v23  ;;  %v15346_v23 = vld [vmem:[#allocation153_spill] sm:$0xff]  ;;  %8702 = vrcp.f32 %v13259_v34 }
 0xa1b   : > { %v4500_v20 = vsub.f32 2.0, %v4468_v52  ;;  %v4487_v7 = vsub.f32 2.0, %v4455_v10  ;;  %v8683_v43 = vpop.eup %8682  ;;  %v4472_v2 = vmul.f32 %v8681_v30, %v13192_v19  ;;  %v4521_v49 = vmul.f32 %v8675_v16, %v4489_v60 }
 0xa1c   : > { %v8685_v59 = vpop.eup %8684  ;;  %v4534_v52 = vmul.f32 %v8677_v51, %v4502_v45  ;;  %v4491_v10 = vsub.f32 2.0, %v4459_v53  ;;  %v4461_v44 = vmul.f32 %v8683_v43, %v15339_v57  ;;  %v15348_v57 = vld [vmem:[#allocation155_spill] sm:$0xff]  ;;  %8704 = vrcp.f32 %v13300_v54 }
 0xa1d   : > { %4626 = vrot.lane.b32.xlu0 %v4554_v55, %s8857_s30  ;;  %3125 = vrot.lane.b32.xlu1 %v3034_v48, %s8856_s29  ;;  %v15342_v55 = vld [vmem:[#allocation145_spill] sm:$0xff]  ;;  %v13376_v48 = vpop.xlane.xlu1 %5550  ;;  %v4532_v56 = vmul.f32 %v8673_v21, %v4500_v20  ;;  %v4519_v8 = vmul.f32 %v8671_v22, %v4487_v7  ;;  %v8687_v19 = vpop.eup %8686  ;;  %v4504_v22 = vsub.f32 2.0, %v4472_v2  ;;  %v4474_v0 = vmul.f32 %v8685_v59, %v13210_v26 }
 0xa1e   : > { %v4560_v58 = vmul.f32 %v4528_v40, %v15342_v55  ;;  %v15345_v40 = vld [vmem:[#allocation64_spill] sm:$0xff]  ;;  %v8689_v17 = vpop.eup %8688  ;;  %v4463_v47 = vmul.f32 %v8687_v19, %v13183_v35  ;;  %v4523_v31 = vmul.f32 %v8679_v42, %v4491_v10  ;;  %v4493_v41 = vsub.f32 2.0, %v4461_v44  ;;  %v15349_v35 = vld [vmem:[#allocation70_spill] sm:$0xff] }
 0xa1f   : > { %v13366_v6 = vpop.xlane.xlu0 %5577  ;;  %v4549_v61 = vmul.f32 %v4517_v37, %v15345_v40  ;;  %v8691_v26 = vpop.eup %8690  ;;  %v4536_v55 = vmul.f32 %v8681_v30, %v4504_v22  ;;  %v4506_v16 = vsub.f32 2.0, %v4474_v0  ;;  %v4566_v37 = vmul.f32 %v4534_v52, %v15348_v57  ;;  %v15351_v52 = vld [vmem:[#allocation142_spill] sm:$0xff] }
 0xa20   : > { %v8693_v7 = vpop.eup %8692  ;;  %v4495_v45 = vsub.f32 2.0, %v4463_v47  ;;  %v4525_v53 = vmul.f32 %v8683_v43, %v4493_v41  ;;  %v4465_v40 = vmul.f32 %v8691_v26, %v13202_v1  ;;  %v4555_v22 = vmul.f32 %v4523_v31, %v15351_v52  ;;  %v15353_v47 = vld [vmem:[#allocation73_spill] sm:$0xff] }
 0xa21   : > { %4630 = vrot.lane.b32.xlu0 %v4556_v3, %s8857_s30  ;;  %3129 = vrot.lane.b32.xlu1 %v3036_v39, %s8856_s29  ;;  %v4562_v3 = vmul.f32 %v4530_v62, %v15344_v14  ;;  %v13394_v21 = vpop.xlane.xlu1 %5556  ;;  %v15347_v62 = vld [vmem:[#allocation137_spill] sm:$0xff]  ;;  %v4538_v2 = vmul.f32 %v8685_v59, %v4506_v16  ;;  %v4478_v42 = vmul.f32 %v8693_v7, %v13247_v11  ;;  %8706 = vrcp.f32 %v13278_v5 }
 0xa22   : > { %v4551_v20 = vmul.f32 %v4519_v8, %v15347_v62  ;;  %v4527_v0 = vmul.f32 %v8687_v19, %v4495_v45  ;;  %v4497_v62 = vsub.f32 2.0, %v4465_v40  ;;  %8708 = vrcp.f32 %v13316_v36  ;;  %v15355_v31 = vld [vmem:[#allocation69_spill] sm:$0xff]  ;;  %v15356_v40 = vld [vmem:[#allocation8_spill] sm:$0xff] }
 0xa23   : > { %8710 = vrcp.f32 %v13294_v27 }
 0xa24   : > { %v4529_v45 = vmul.f32 %v8691_v26, %v4497_v62  ;;  %8712 = vrcp.f32 %v13328_v33 }
 0xa25   : > { %4634 = vrot.lane.b32.xlu0 %v4558_v50, %s8857_s30  ;;  %3133 = vrot.lane.b32.xlu1 %v3038_v15, %s8856_s29  ;;  %v4564_v50 = vmul.f32 %v4532_v56, %v15346_v23  ;;  %v4553_v56 = vmul.f32 %v4521_v49, %v15349_v35  ;;  %v4510_v23 = vsub.f32 2.0, %v4478_v42  ;;  %8714 = vrcp.f32 %v13310_v12 }
 0xa26   : > { %8716 = vrcp.f32 %v13326_v32 }
 0xa27   : > { %v13378_v63 = vpop.xlane.xlu0 %5583  ;;  %8718 = vrcp.f32 %v13342_v38 }
 0xa28   : > { %8720 = vrcp.f32 %v13360_v24 }
 0xa29   : > { %4638 = vrot.lane.b32.xlu0 %v4560_v58, %s8857_s30  ;;  %4612 = vrot.lane.b32.xlu1 %v4547_v13, %s8857_s30  ;;  %v4476_v58 = vmul.f32 %v8689_v17, %v13228_v25  ;;  %v8695_v25 = vpop.eup %8694  ;;  %8722 = vrcp.f32 %v13376_v48 }
 0xa2a   : > { %v8697_v60 = vpop.eup %8696  ;;  %8724 = vrcp.f32 %v13394_v21 }
 0xa2b   : > { %v13388_v39 = vpop.xlane.xlu0 %5589  ;;  %v4508_v14 = vsub.f32 2.0, %v4476_v58  ;;  %v4480_v1 = vmul.f32 %v8697_v60, %v13266_v29  ;;  %v8699_v44 = vpop.eup %8698  ;;  %v15354_v58 = vld [vmem:[#allocation144_spill] sm:$0xff] }
 0xa2c   : > { %v8701_v16 = vpop.eup %8700  ;;  %v4559_v57 = vmul.f32 %v4527_v0, %v15354_v58 }
 0xa2d   : > { %4642 = vrot.lane.b32.xlu0 %v4562_v3, %s8857_s30  ;;  %4616 = vrot.lane.b32.xlu1 %v4549_v61, %s8857_s30  ;;  %v15350_v3 = vld [vmem:[#allocation158_spill] sm:$0xff]  ;;  %v4540_v43 = vmul.f32 %v8689_v17, %v4508_v14  ;;  %v4469_v14 = vmul.f32 %v8699_v44, %v13240_v9 }
 0xa2e   : > { %v4568_v8 = vmul.f32 %v4536_v55, %v15350_v3  ;;  %v4557_v55 = vmul.f32 %v4525_v53, %v15353_v47  ;;  %v5989_v3 = vmul.f32 %v8701_v16, %v13284_v28 }
 0xa2f   : > { %v13400_v15 = vpop.xlane.xlu0 %5595  ;;  %v4572_v41 = vmul.f32 %v4540_v43, %v15355_v31  ;;  %v4501_v43 = vsub.f32 2.0, %v4469_v14 }
 0xa31   : > { %4646 = vrot.lane.b32.xlu0 %v4564_v50, %s8857_s30  ;;  %v13406_v51 = vpop.xlane.xlu1 %5562  ;;  %4620 = vrot.lane.b32.xlu1 %v4551_v20, %s8857_s30  ;;  %v15352_v50 = vld [vmem:[#allocation160_spill] sm:$0xff]  ;;  %v4467_v20 = vmul.f32 %v8695_v25, %v13221_v18  ;;  %v4542_v18 = vmul.f32 %v8693_v7, %v4510_v23 }
 0xa32   : > { %v4570_v49 = vmul.f32 %v4538_v2, %v15352_v50  ;;  %8726 = vrcp.f32 %v13406_v51 }
 0xa33   : > { %v13412_v13 = vpop.xlane.xlu0 %5601  ;;  %v4499_v2 = vsub.f32 2.0, %v4467_v20  ;;  %v4574_v52 = vmul.f32 %v4542_v18, %v15356_v40  ;;  %8728 = vrcp.f32 %v13344_v4 }
 0xa35   : > { %4650 = vrot.lane.b32.xlu0 %v4566_v37, %s8857_s30  ;;  %v13417_v30 = vpop.xlane.xlu1 %5568  ;;  %4624 = vrot.lane.b32.xlu1 %v4553_v56, %s8857_s30  ;;  %v4512_v37 = vsub.f32 2.0, %v4480_v1  ;;  %v8703_v56 = vpop.eup %8702  ;;  %v4531_v0 = vmul.f32 %v8695_v25, %v4499_v2  ;;  %v15357_v1 = vld [vmem:[#allocation150_spill] sm:$0xff]  ;;  %v15358_v25 = vld [vmem:[#allocation40_spill] sm:$0xff] }
 0xa36   : > { %v4471_v23 = vmul.f32 %v8703_v56, %v13259_v34  ;;  %v4561_v50 = vmul.f32 %v4529_v45, %v15357_v1  ;;  %8730 = vrcp.f32 %v13417_v30 }
 0xa37   : > { %v13424_v61 = vpop.xlane.xlu0 %5607  ;;  %v4544_v26 = vmul.f32 %v8697_v60, %v4512_v37  ;;  %8732 = vrcp.f32 %v13354_v46 }
 0xa38   : > { %v4503_v58 = vsub.f32 2.0, %v4471_v23 }
 0xa39   : > { %4654 = vrot.lane.b32.xlu0 %v4568_v8, %s8857_s30  ;;  %v13429_v59 = vpop.xlane.xlu1 %5574  ;;  %4628 = vrot.lane.b32.xlu1 %v4555_v22, %s8857_s30  ;;  %v8705_v8 = vpop.eup %8704  ;;  %v4576_v34 = vmul.f32 %v4544_v26, %v15358_v25 }
 0xa3a   : > { %v13432_v11 = vpop.f32.mrb[192].mxu1  ;;  %v8707_v22 = vpop.eup %8706  ;;  %v4535_v26 = vmul.f32 %v8703_v56, %v4503_v58  ;;  %8734 = vrcp.f32 %v13429_v59 }
 0xa3b   : > { %v5800_v10 = vpop.f32.mrb[193].mxu1  ;;  %v13438_v19 = vpop.xlane.xlu0 %5613  ;;  %8736 = vrcp.f32 %v13366_v6 }
 0xa3c   : > { %v5991_v10 = vmul.f32 %v8705_v8, %v13300_v54  ;;  %v8709_v62 = vpop.eup %8708  ;;  %v15359_v54 = vld [vmem:[#allocation152_spill] sm:$0xff] }
 0xa3d   : > { %4658 = vrot.lane.b32.xlu0 %v4570_v49, %s8857_s30  ;;  %v13442_v17 = vpop.xlane.xlu1 %5580  ;;  %4632 = vrot.lane.b32.xlu1 %v4557_v55, %s8857_s30  ;;  %v6021_v49 = vsub.f32 2.0, %v5989_v3  ;;  %v4533_v55 = vmul.f32 %v8699_v44, %v4501_v43  ;;  %v4563_v37 = vmul.f32 %v4531_v0, %v15359_v54  ;;  %v8711_v31 = vpop.eup %8710 }
 0xa3e   : > { %v13445_v29 = vpop.f32.mrb[194].mxu1  ;;  %v8713_v2 = vpop.eup %8712  ;;  %8738 = vrcp.f32 %v13442_v17 }
 0xa3f   : > { %v5805_v35 = vpop.f32.mrb[195].mxu1  ;;  %v13452_v42 = vpop.xlane.xlu0 %5619  ;;  %v6053_v45 = vmul.f32 %v8701_v16, %v6021_v49  ;;  %v15360_v16 = vld [vmem:[#allocation154_spill] sm:$0xff]  ;;  %v5995_v23 = vmul.f32 %v8713_v2, %v13328_v33  ;;  %v15361_v33 = vld [vmem:[#allocation157_spill] sm:$0xff]  ;;  %8740 = vrcp.f32 %v13378_v63 }
 0xa40   : > { %v5993_v35 = vmul.f32 %v8709_v62, %v13316_v36  ;;  %v8715_v0 = vpop.eup %8714 }
 0xa41   : > { %4662 = vrot.lane.b32.xlu0 %v4572_v41, %s8857_s30  ;;  %v13456_v53 = vpop.xlane.xlu1 %5586  ;;  %4636 = vrot.lane.b32.xlu1 %v4559_v57, %s8857_s30  ;;  %v4473_v57 = vmul.f32 %v8707_v22, %v13278_v5  ;;  %v6023_v41 = vsub.f32 2.0, %v5991_v10  ;;  %v6085_v5 = vmul.f32 %v6053_v45, %v13432_v11  ;;  %v4477_v25 = vmul.f32 %v8715_v0, %v13310_v12  ;;  %v15362_v45 = vld [vmem:[#allocation65_spill] sm:$0xff] }
 0xa42   : > { %v5808_v7 = vpop.f32.mrb[196].mxu1  ;;  %v6025_v43 = vsub.f32 2.0, %v5993_v35  ;;  %8742 = vrcp.f32 %v13456_v53 }
 0xa43   : > { %v5810_v9 = vpop.f32.mrb[197].mxu1  ;;  %v13462_v28 = vpop.xlane.xlu0 %5625  ;;  %v4505_v40 = vsub.f32 2.0, %v4473_v57  ;;  %v6055_v1 = vmul.f32 %v8705_v8, %v6023_v41  ;;  %v4567_v8 = vmul.f32 %v4535_v26, %v15361_v33  ;;  %8744 = vrcp.f32 %v13388_v39 }
 0xa44   : > { %v4565_v9 = vmul.f32 %v4533_v55, %v15360_v16  ;;  %v6027_v55 = vsub.f32 2.0, %v5995_v23  ;;  %v6057_v58 = vmul.f32 %v8709_v62, %v6025_v43 }
 0xa45   : > { %4666 = vrot.lane.b32.xlu0 %v4574_v52, %s8857_s30  ;;  %v13467_v20 = vpop.xlane.xlu1 %5592  ;;  %4640 = vrot.lane.b32.xlu1 %v4561_v50, %s8857_s30  ;;  %v4475_v52 = vmul.f32 %v8711_v31, %v13294_v27  ;;  %v6087_v27 = vmul.f32 %v6055_v1, %v5808_v7  ;;  %v4537_v49 = vmul.f32 %v8707_v22, %v4505_v40  ;;  %v15364_v1 = vld [vmem:[#allocation76_spill] sm:$0xff] }
 0xa46   : > { %v13470_v60 = vpop.f32.mrb[198].mxu1  ;;  %v6059_v62 = vmul.f32 %v8713_v2, %v6027_v55  ;;  %8746 = vrcp.f32 %v13467_v20 }
 0xa47   : > { %v5815_v47 = vpop.f32.mrb[199].mxu1  ;;  %v13475_v18 = vpop.xlane.xlu0 %5631  ;;  %v4507_v10 = vsub.f32 2.0, %v4475_v52 }
 0xa48   : > { %v8717_v47 = vpop.eup %8716  ;;  %8748 = vrcp.f32 %v13400_v15 }
 0xa49   : > { %4670 = vrot.lane.b32.xlu0 %v4576_v34, %s8857_s30  ;;  %v13480_v14 = vpop.xlane.xlu1 %5598  ;;  %4644 = vrot.lane.b32.xlu1 %v4563_v37, %s8857_s30  ;;  %v4539_v12 = vmul.f32 %v8711_v31, %v4507_v10  ;;  %v4509_v37 = vsub.f32 2.0, %v4477_v25  ;;  %v4479_v41 = vmul.f32 %v8717_v47, %v13326_v32 }
 0xa4a   : > { %v5818_v44 = vpop.f32.mrb[200].mxu1 }
 0xa4b   : > { %v5820_v3 = vpop.f32.mrb[201].mxu1  ;;  %v3072_v36 = vpop.permute.xlu0 %3071  ;;  %v6089_v22 = vmul.f32 %v6057_v58, %v5818_v44  ;;  %v4541_v31 = vmul.f32 %v8715_v0, %v4509_v37  ;;  %v4511_v40 = vsub.f32 2.0, %v4479_v41 }
 0xa4c   : > { %3168 = vst.msk [vmem:[#allocation2] sm:$0xff] %vm3167_vm2, %v3072_v36  ;;  %v8719_v3 = vpop.eup %8718  ;;  %v15363_v36 = vld [vmem:[#allocation41_spill] sm:$0xff]  ;;  %8750 = vrcp.f32 %v13480_v14 }
 0xa4d   : > { %6149 = vrot.lane.b32.xlu0 %v6085_v5, %s8858_s4  ;;  %v13490_v50 = vpop.xlane.xlu1 %5604  ;;  %4648 = vrot.lane.b32.xlu1 %v4565_v9, %s8857_s30  ;;  %v4569_v5 = vmul.f32 %v4537_v49, %v15362_v45  ;;  %v4481_v32 = vmul.f32 %v8719_v3, %v13342_v38  ;;  %v4571_v16 = vmul.f32 %v4539_v12, %v15363_v36  ;;  %v8721_v9 = vpop.eup %8720  ;;  %8752 = vrcp.f32 %v13412_v13 }
 0xa4e   : > { %v13493_v11 = vpop.f32.mrb[202].mxu1  ;;  %v4543_v43 = vmul.f32 %v8717_v47, %v4511_v40  ;;  %v5990_v38 = vmul.f32 %v8721_v9, %v13360_v24  ;;  %v8723_v49 = vpop.eup %8722  ;;  %8754 = vrcp.f32 %v13490_v50 }
 0xa4f   : > { %v5825_v56 = vpop.f32.mrb[203].mxu1  ;;  %v3080_v34 = vpop.permute.xlu0 %3079  ;;  %v4513_v23 = vsub.f32 2.0, %v4481_v32  ;;  %v5992_v47 = vmul.f32 %v8723_v49, %v13376_v48 }
 0xa50   : > { %3172 = vst.msk [vmem:[#allocation2 + $0x20] sm:$0xff] %vm3167_vm2, %v3080_v34  ;;  %v15365_v34 = vld [vmem:[#allocation67_spill] sm:$0xff]  ;;  %v8725_v24 = vpop.eup %8724  ;;  %8756 = vrcp.f32 %v13424_v61 }
 0xa51   : > { %6153 = vrot.lane.b32.xlu0 %v6087_v27, %s8858_s4  ;;  %v13500_v57 = vpop.xlane.xlu1 %5610  ;;  %4652 = vrot.lane.b32.xlu1 %v4567_v8, %s8857_s30  ;;  %v4573_v27 = vmul.f32 %v4541_v31, %v15364_v1  ;;  %v4545_v10 = vmul.f32 %v8719_v3, %v4513_v23  ;;  %v4575_v33 = vmul.f32 %v4543_v43, %v15365_v34  ;;  %v6022_v8 = vsub.f32 2.0, %v5990_v38  ;;  %v8727_v45 = vpop.eup %8726 }
 0xa52   : > { %v5828_v7 = vpop.f32.mrb[204].mxu1  ;;  %v5994_v12 = vmul.f32 %v8725_v24, %v13394_v21  ;;  %v5996_v31 = vmul.f32 %v8727_v45, %v13406_v51  ;;  %8758 = vrcp.f32 %v13500_v57 }
 0xa53   : > { %v5830_v54 = vpop.f32.mrb[205].mxu1  ;;  %v3084_v35 = vpop.permute.xlu0 %3083  ;;  %v6091_v44 = vmul.f32 %v6059_v62, %v5828_v7  ;;  %v15366_v7 = vld [vmem:[#allocation146_spill] sm:$0xff]  ;;  %v6054_v37 = vmul.f32 %v8721_v9, %v6022_v8 }
 0xa54   : > { %3174 = vst.msk [vmem:[#allocation2 + $0x30] sm:$0xff] %vm3167_vm2, %v3084_v35  ;;  %v6024_v54 = vsub.f32 2.0, %v5992_v47 }
 0xa55   : > { %6157 = vrot.lane.b32.xlu0 %v6089_v22, %s8858_s4  ;;  %v13508_v26 = vpop.xlane.xlu1 %5616  ;;  %4656 = vrot.lane.b32.xlu1 %v4569_v5, %s8857_s30  ;;  %v4577_v22 = vmul.f32 %v4545_v10, %v15366_v7  ;;  %v6086_v48 = vmul.f32 %v6054_v37, %v13445_v29  ;;  %v6026_v5 = vsub.f32 2.0, %v5994_v12  ;;  %v8729_v29 = vpop.eup %8728  ;;  %8760 = vrcp.f32 %v13438_v19 }
 0xa56   : > { %v6056_v3 = vmul.f32 %v8723_v49, %v6024_v54  ;;  %v8731_v51 = vpop.eup %8730  ;;  %8762 = vrcp.f32 %v13508_v26 }
 0xa57   : > { %v3088_v52 = vpop.permute.xlu0 %3087  ;;  %v6058_v40 = vmul.f32 %v8725_v24, %v6026_v5  ;;  %v8733_v1 = vpop.eup %8732  ;;  %8764 = vrcp.f32 %v13452_v42 }
 0xa58   : > { %3176 = vst.msk [vmem:[#allocation2 + $0x40] sm:$0xff] %vm3167_vm2, %v3088_v52  ;;  %v6088_v21 = vmul.f32 %v6056_v3, %v13470_v60  ;;  %v6028_v60 = vsub.f32 2.0, %v5996_v31 }
 0xa59   : > { %6161 = vrot.lane.b32.xlu0 %v6091_v44, %s8858_s4  ;;  %v13516_v2 = vpop.xlane.xlu1 %5622  ;;  %4660 = vrot.lane.b32.xlu1 %v4571_v16, %s8857_s30  ;;  %v6090_v52 = vmul.f32 %v6058_v40, %v13493_v11  ;;  %v5997_v16 = vmul.f32 %v8729_v29, %v13344_v4 }
 0xa5a   : > { %v6060_v11 = vmul.f32 %v8727_v45, %v6028_v60 }
 0xa5b   : > { %v3092_v0 = vpop.permute.xlu0 %3091  ;;  %v6029_v23 = vsub.f32 2.0, %v5997_v16 }
 0xa5c   : > { %3178 = vst.msk [vmem:[#allocation2 + $0x50] sm:$0xff] %vm3167_vm2, %v3092_v0  ;;  %v5998_v0 = vmul.f32 %v8731_v51, %v13417_v30 }
 0xa5d   : > { %v13522_v56 = vpop.xlane.xlu1 %5628  ;;  %4664 = vrot.lane.b32.xlu1 %v4573_v27, %s8857_s30  ;;  %v6061_v30 = vmul.f32 %v8729_v29, %v6029_v23 }
 0xa5e   : > { %v6030_v34 = vsub.f32 2.0, %v5998_v0 }
 0xa5f   : > { %v3096_v25 = vpop.permute.xlu0 %3095 }
 0xa60   : > { %3180 = vst.msk [vmem:[#allocation2 + $0x60] sm:$0xff] %vm3167_vm2, %v3096_v25  ;;  %v5999_v25 = vmul.f32 %v8733_v1, %v13354_v46  ;;  %v6062_v46 = vmul.f32 %v8731_v51, %v6030_v34 }
 0xa61   : > { %v13529_v55 = vpop.xlane.xlu1 %5634  ;;  %4668 = vrot.lane.b32.xlu1 %v4575_v33, %s8857_s30  ;;  %v8735_v33 = vpop.eup %8734  ;;  %8766 = vrcp.f32 %v13516_v2 }
 0xa62   : > { %v6000_v54 = vmul.f32 %v8735_v33, %v13429_v59  ;;  %v8737_v12 = vpop.eup %8736  ;;  %8768 = vrcp.f32 %v13462_v28 }
 0xa63   : > { %v3100_v58 = vpop.permute.xlu0 %3099  ;;  %v6001_v5 = vmul.f32 %v8737_v12, %v13366_v6 }
 0xa64   : > { %3182 = vst.msk [vmem:[#allocation2 + $0x70] sm:$0xff] %vm3167_vm2, %v3100_v58  ;;  %v6032_v3 = vsub.f32 2.0, %v6000_v54 }
 0xa65   : > { %v3074_v41 = vpop.permute.xlu1 %3073  ;;  %4672 = vrot.lane.b32.xlu1 %v4577_v22, %s8857_s30  ;;  %v6031_v22 = vsub.f32 2.0, %v5999_v25 }
 0xa66   : > { %3169 = vst.msk [vmem:[#allocation2 + $0x8] sm:$0xff] %vm3167_vm2, %v3074_v41  ;;  %v6064_v6 = vmul.f32 %v8735_v33, %v6032_v3 }
 0xa67   : > { %v3104_v35 = vpop.permute.xlu0 %3103  ;;  %v6063_v59 = vmul.f32 %v8733_v1, %v6031_v22 }
 0xa68   : > { %3184 = vst.msk [vmem:[#allocation2 + $0x80] sm:$0xff] %vm3167_vm2, %v3104_v35 }
 0xa69   : > { %v3076_v62 = vpop.permute.xlu1 %3075  ;;  %6151 = vrot.lane.b32.xlu1 %v6086_v48, %s8858_s4 }
 0xa6a   : > { %3170 = vst.msk [vmem:[#allocation2 + $0x10] sm:$0xff] %vm3167_vm2, %v3076_v62  ;;  %v8739_v62 = vpop.eup %8738  ;;  %8770 = vrcp.f32 %v13522_v56 }
 0xa6b   : > { %v3108_v44 = vpop.permute.xlu0 %3107 }
 0xa6c   : > { %3186 = vst.msk [vmem:[#allocation2 + $0x90] sm:$0xff] %vm3167_vm2, %v3108_v44 }
 0xa6d   : > { %v3078_v32 = vpop.permute.xlu1 %3077  ;;  %6155 = vrot.lane.b32.xlu1 %v6088_v21, %s8858_s4 }
 0xa6e   : > { %3171 = vst.msk [vmem:[#allocation2 + $0x18] sm:$0xff] %vm3167_vm2, %v3078_v32  ;;  %v6033_v32 = vsub.f32 2.0, %v6001_v5 }
 0xa6f   : > { %v3112_v36 = vpop.permute.xlu0 %3111 }
 0xa70   : > { %3188 = vst.msk [vmem:[#allocation2 + $0xa0] sm:$0xff] %vm3167_vm2, %v3112_v36  ;;  %v8741_v36 = vpop.eup %8740  ;;  %8772 = vrcp.f32 %v13475_v18 }
 0xa71   : > { %v3082_v9 = vpop.permute.xlu1 %3081  ;;  %6159 = vrot.lane.b32.xlu1 %v6090_v52, %s8858_s4  ;;  %v6002_v52 = vmul.f32 %v8739_v62, %v13442_v17  ;;  %v6003_v23 = vmul.f32 %v8741_v36, %v13378_v63  ;;  %v6065_v17 = vmul.f32 %v8737_v12, %v6033_v32 }
 0xa72   : > { %3173 = vst.msk [vmem:[#allocation2 + $0x28] sm:$0xff] %vm3167_vm2, %v3082_v9 }
 0xa73   : > { %v3116_v43 = vpop.permute.xlu0 %3115  ;;  %v6034_v0 = vsub.f32 2.0, %v6002_v52 }
 0xa74   : > { %3190 = vst.msk [vmem:[#allocation2 + $0xb0] sm:$0xff] %vm3167_vm2, %v3116_v43 }
 0xa75   : > { %v3086_v4 = vpop.permute.xlu1 %3085  ;;  %v6066_v63 = vmul.f32 %v8739_v62, %v6034_v0 }
 0xa76   : > { %v5833_v27 = vpop.f32.mrb[206].mxu1  ;;  %3175 = vst.msk [vmem:[#allocation2 + $0x38] sm:$0xff] %vm3167_vm2, %v3086_v4 }
 0xa77   : > { %v6092_v38 = vmul.f32 %v6060_v11, %v5833_v27  ;;  %v5835_v49 = vpop.f32.mrb[207].mxu1  ;;  %v3120_v10 = vpop.permute.xlu0 %3119 }
 0xa78   : > { %3192 = vst.msk [vmem:[#allocation2 + $0xc0] sm:$0xff] %vm3167_vm2, %v3120_v10  ;;  %v8743_v11 = vpop.eup %8742  ;;  %v6035_v10 = vsub.f32 2.0, %v6003_v23  ;;  %8774 = vrcp.f32 %v13529_v55 }
 0xa79   : > { %6163 = vrot.lane.b32.xlu1 %v6092_v38, %s8858_s4  ;;  %v3090_v8 = vpop.permute.xlu1 %3089  ;;  %v6004_v25 = vmul.f32 %v8743_v11, %v13456_v53  ;;  %v8745_v34 = vpop.eup %8744 }
 0xa7a   : > { %v5838_v47 = vpop.f32.mrb[208].mxu1  ;;  %3177 = vst.msk [vmem:[#allocation2 + $0x48] sm:$0xff] %vm3167_vm2, %v3090_v8  ;;  %v6067_v53 = vmul.f32 %v8741_v36, %v6035_v10  ;;  %v8747_v22 = vpop.eup %8746 }
 0xa7b   : > { %v6093_v24 = vmul.f32 %v6061_v30, %v5838_v47  ;;  %v5840_v58 = vpop.f32.mrb[209].mxu1  ;;  %v3124_v7 = vpop.permute.xlu0 %3123 }
 0xa7c   : > { %3194 = vst.msk [vmem:[#allocation2 + $0xd0] sm:$0xff] %vm3167_vm2, %v3124_v7  ;;  %v6005_v58 = vmul.f32 %v8745_v34, %v13388_v39  ;;  %v6036_v7 = vsub.f32 2.0, %v6004_v25 }
 0xa7d   : > { %6165 = vrot.lane.b32.xlu0 %v6093_v24, %s8858_s4  ;;  %v3094_v37 = vpop.permute.xlu1 %3093 }
 0xa7e   : > { %v5843_v41 = vpop.f32.mrb[210].mxu1  ;;  %3179 = vst.msk [vmem:[#allocation2 + $0x58] sm:$0xff] %vm3167_vm2, %v3094_v37  ;;  %v6068_v39 = vmul.f32 %v8743_v11, %v6036_v7 }
 0xa7f   : > { %v6094_v48 = vmul.f32 %v6062_v46, %v5843_v41  ;;  %v5845_v35 = vpop.f32.mrb[211].mxu1  ;;  %v3128_v45 = vpop.permute.xlu0 %3127 }
 0xa80   : > { %3196 = vst.msk [vmem:[#allocation2 + $0xe0] sm:$0xff] %vm3167_vm2, %v3128_v45  ;;  %v6006_v35 = vmul.f32 %v8747_v22, %v13467_v20  ;;  %v8749_v45 = vpop.eup %8748 }
 0xa81   : > { %6167 = vrot.lane.b32.xlu1 %v6094_v48, %s8858_s4  ;;  %v3098_v21 = vpop.permute.xlu1 %3097  ;;  %v6037_v48 = vsub.f32 2.0, %v6005_v58 }
 0xa82   : > { %v5848_v44 = vpop.f32.mrb[212].mxu1  ;;  %3181 = vst.msk [vmem:[#allocation2 + $0x68] sm:$0xff] %vm3167_vm2, %v3098_v21 }
 0xa83   : > { %v6095_v31 = vmul.f32 %v6063_v59, %v5848_v44  ;;  %v5850_v29 = vpop.f32.mrb[213].mxu1  ;;  %v3132_v40 = vpop.permute.xlu0 %3131  ;;  %v6007_v44 = vmul.f32 %v8749_v45, %v13400_v15  ;;  %v6069_v20 = vmul.f32 %v8745_v34, %v6037_v48 }
 0xa84   : > { %3198 = vst.msk [vmem:[#allocation2 + $0xf0] sm:$0xff] %vm3167_vm2, %v3132_v40  ;;  %v8751_v29 = vpop.eup %8750 }
 0xa85   : > { %6169 = vrot.lane.b32.xlu0 %v6095_v31, %s8858_s4  ;;  %v3102_v16 = vpop.permute.xlu1 %3101  ;;  %v6038_v31 = vsub.f32 2.0, %v6006_v35 }
 0xa86   : > { %v5853_v60 = vpop.f32.mrb[214].mxu1  ;;  %3183 = vst.msk [vmem:[#allocation2 + $0x78] sm:$0xff] %vm3167_vm2, %v3102_v16  ;;  %v6039_v16 = vsub.f32 2.0, %v6007_v44 }
 0xa87   : > { %v6096_v51 = vmul.f32 %v6064_v6, %v5853_v60  ;;  %v5855_v9 = vpop.f32.mrb[215].mxu1  ;;  %v4611_v43 = vpop.permute.xlu0 %4610  ;;  %v6008_v60 = vmul.f32 %v8751_v29, %v13480_v14  ;;  %v6070_v15 = vmul.f32 %v8747_v22, %v6038_v31 }
 0xa88   : > { %4707 = vst.msk [vmem:[#allocation2] sm:$0xff] %vm4706_vm3, %v4611_v43  ;;  %v6071_v14 = vmul.f32 %v8749_v45, %v6039_v16 }
 0xa89   : > { %6171 = vrot.lane.b32.xlu1 %v6096_v51, %s8858_s4  ;;  %v3106_v1 = vpop.permute.xlu1 %3105  ;;  %v8753_v51 = vpop.eup %8752 }
 0xa8a   : > { %v5858_v4 = vpop.f32.mrb[216].mxu1  ;;  %3185 = vst.msk [vmem:[#allocation2 + $0x88] sm:$0xff] %vm3167_vm2, %v3106_v1  ;;  %v6009_v11 = vmul.f32 %v8753_v51, %v13412_v13  ;;  %v6040_v1 = vsub.f32 2.0, %v6008_v60 }
 0xa8b   : > { %v6097_v27 = vmul.f32 %v6065_v17, %v5858_v4  ;;  %v5860_v38 = vpop.f32.mrb[217].mxu1  ;;  %v4615_v49 = vpop.permute.xlu0 %4614 }
 0xa8c   : > { %4709 = vst.msk [vmem:[#allocation2 + $0x10] sm:$0xff] %vm4706_vm3, %v4615_v49  ;;  %v8755_v4 = vpop.eup %8754  ;;  %v6072_v13 = vmul.f32 %v8751_v29, %v6040_v1 }
 0xa8d   : > { %6173 = vrot.lane.b32.xlu0 %v6097_v27, %s8858_s4  ;;  %v3110_v30 = vpop.permute.xlu1 %3109  ;;  %v6010_v34 = vmul.f32 %v8755_v4, %v13490_v50 }
 0xa8e   : > { %v5863_v33 = vpop.f32.mrb[218].mxu1  ;;  %3187 = vst.msk [vmem:[#allocation2 + $0x98] sm:$0xff] %vm3167_vm2, %v3110_v30  ;;  %v8757_v30 = vpop.eup %8756 }
 0xa8f   : > { %v6098_v8 = vmul.f32 %v6066_v63, %v5863_v33  ;;  %v5865_v47 = vpop.f32.mrb[219].mxu1  ;;  %v4619_v24 = vpop.permute.xlu0 %4618  ;;  %v6041_v63 = vsub.f32 2.0, %v6009_v11  ;;  %v6011_v7 = vmul.f32 %v8757_v30, %v13424_v61 }
 0xa90   : > { %4711 = vst.msk [vmem:[#allocation2 + $0x20] sm:$0xff] %vm4706_vm3, %v4619_v24  ;;  %v8759_v22 = vpop.eup %8758 }
 0xa91   : > { %6175 = vrot.lane.b32.xlu1 %v6098_v8, %s8858_s4  ;;  %v3114_v54 = vpop.permute.xlu1 %3113  ;;  %v6073_v50 = vmul.f32 %v8753_v51, %v6041_v63  ;;  %v6043_v48 = vsub.f32 2.0, %v6011_v7  ;;  %v6012_v35 = vmul.f32 %v8759_v22, %v13500_v57 }
 0xa92   : > { %v5868_v46 = vpop.f32.mrb[220].mxu1  ;;  %3189 = vst.msk [vmem:[#allocation2 + $0xa8] sm:$0xff] %vm3167_vm2, %v3114_v54 }
 0xa93   : > { %v6099_v12 = vmul.f32 %v6067_v53, %v5868_v46  ;;  %v5870_v37 = vpop.f32.mrb[221].mxu1  ;;  %v4623_v41 = vpop.permute.xlu0 %4622  ;;  %v6042_v53 = vsub.f32 2.0, %v6010_v34  ;;  %v6044_v44 = vsub.f32 2.0, %v6012_v35  ;;  %v6075_v57 = vmul.f32 %v8757_v30, %v6043_v48 }
 0xa94   : > { %4713 = vst.msk [vmem:[#allocation2 + $0x30] sm:$0xff] %vm4706_vm3, %v4623_v41 }
 0xa95   : > { %6177 = vrot.lane.b32.xlu0 %v6099_v12, %s8858_s4  ;;  %v3118_v5 = vpop.permute.xlu1 %3117  ;;  %v6074_v61 = vmul.f32 %v8755_v4, %v6042_v53 }
 0xa96   : > { %v5873_v3 = vpop.f32.mrb[222].mxu1  ;;  %3191 = vst.msk [vmem:[#allocation2 + $0xb8] sm:$0xff] %vm3167_vm2, %v3118_v5 }
 0xa97   : > { %v6100_v59 = vmul.f32 %v6068_v39, %v5873_v3  ;;  %v5875_v62 = vpop.f32.mrb[223].mxu1  ;;  %v4627_v21 = vpop.permute.xlu0 %4626 }
 0xa98   : > { %4715 = vst.msk [vmem:[#allocation2 + $0x40] sm:$0xff] %vm4706_vm3, %v4627_v21  ;;  %v8761_v39 = vpop.eup %8760 }
 0xa99   : > { %6179 = vrot.lane.b32.xlu1 %v6100_v59, %s8858_s4  ;;  %v3122_v40 = vpop.permute.xlu1 %3121  ;;  %v6013_v21 = vmul.f32 %v8761_v39, %v13438_v19  ;;  %v8763_v31 = vpop.eup %8762  ;;  %v6076_v19 = vmul.f32 %v8759_v22, %v6044_v44 }
 0xa9a   : > { %v5878_v32 = vpop.f32.mrb[224].mxu1  ;;  %3193 = vst.msk [vmem:[#allocation2 + $0xc8] sm:$0xff] %vm3167_vm2, %v3122_v40  ;;  %v8765_v16 = vpop.eup %8764 }
 0xa9b   : > { %v6101_v52 = vmul.f32 %v6069_v20, %v5878_v32  ;;  %v5880_v6 = vpop.f32.mrb[225].mxu1  ;;  %v4631_v36 = vpop.permute.xlu0 %4630 }
 0xa9c   : > { %4717 = vst.msk [vmem:[#allocation2 + $0x50] sm:$0xff] %vm4706_vm3, %v4631_v36  ;;  %v6045_v6 = vsub.f32 2.0, %v6013_v21  ;;  %v6014_v36 = vmul.f32 %v8763_v31, %v13508_v26 }
 0xa9d   : > { %6181 = vrot.lane.b32.xlu0 %v6101_v52, %s8858_s4  ;;  %v3126_v9 = vpop.permute.xlu1 %3125 }
 0xa9e   : > { %v5883_v43 = vpop.f32.mrb[226].mxu1  ;;  %3195 = vst.msk [vmem:[#allocation2 + $0xd8] sm:$0xff] %vm3167_vm2, %v3126_v9  ;;  %v6077_v26 = vmul.f32 %v8761_v39, %v6045_v6 }
 0xa9f   : > { %v6102_v23 = vmul.f32 %v6070_v15, %v5883_v43  ;;  %v5885_v0 = vpop.f32.mrb[227].mxu1  ;;  %v4635_v17 = vpop.permute.xlu0 %4634 }
 0xaa0   : > { %4719 = vst.msk [vmem:[#allocation2 + $0x60] sm:$0xff] %vm4706_vm3, %v4635_v17  ;;  %v6046_v0 = vsub.f32 2.0, %v6014_v36  ;;  %v8767_v17 = vpop.eup %8766 }
 0xaa1   : > { %6183 = vrot.lane.b32.xlu1 %v6102_v23, %s8858_s4  ;;  %v3130_v27 = vpop.permute.xlu1 %3129  ;;  %v6015_v23 = vmul.f32 %v8765_v16, %v13452_v42 }
 0xaa2   : > { %v5888_v38 = vpop.f32.mrb[228].mxu1  ;;  %3197 = vst.msk [vmem:[#allocation2 + $0xe8] sm:$0xff] %vm3167_vm2, %v3130_v27  ;;  %v6078_v42 = vmul.f32 %v8763_v31, %v6046_v0 }
 0xaa3   : > { %v6103_v49 = vmul.f32 %v6071_v14, %v5888_v38  ;;  %v5890_v10 = vpop.f32.mrb[229].mxu1  ;;  %v4639_v25 = vpop.permute.xlu0 %4638  ;;  %v6047_v38 = vsub.f32 2.0, %v6015_v23 }
 0xaa4   : > { %4721 = vst.msk [vmem:[#allocation2 + $0x70] sm:$0xff] %vm4706_vm3, %v4639_v25  ;;  %v8769_v10 = vpop.eup %8768 }
 0xaa5   : > { %6185 = vrot.lane.b32.xlu0 %v6103_v49, %s8858_s4  ;;  %v3134_v33 = vpop.permute.xlu1 %3133  ;;  %v6016_v49 = vmul.f32 %v8767_v17, %v13516_v2  ;;  %v6079_v2 = vmul.f32 %v8765_v16, %v6047_v38 }
 0xaa6   : > { %v5893_v8 = vpop.f32.mrb[230].mxu1  ;;  %3199 = vst.msk [vmem:[#allocation2 + $0xf8] sm:$0xff] %vm3167_vm2, %v3134_v33  ;;  %v6017_v33 = vmul.f32 %v8769_v10, %v13462_v28 }
 0xaa7   : > { %v6104_v47 = vmul.f32 %v6072_v13, %v5893_v8  ;;  %v5895_v24 = vpop.f32.mrb[231].mxu1  ;;  %v4643_v58 = vpop.permute.xlu0 %4642  ;;  %v6048_v8 = vsub.f32 2.0, %v6016_v49 }
 0xaa8   : > { %4723 = vst.msk [vmem:[#allocation2 + $0x80] sm:$0xff] %vm4706_vm3, %v4643_v58  ;;  %v6049_v22 = vsub.f32 2.0, %v6017_v33 }
 0xaa9   : > { %6187 = vrot.lane.b32.xlu1 %v6104_v47, %s8858_s4  ;;  %v4613_v54 = vpop.permute.xlu1 %4612  ;;  %v8771_v47 = vpop.eup %8770  ;;  %v6080_v28 = vmul.f32 %v8767_v17, %v6048_v8 }
 0xaaa   : > { %v5898_v46 = vpop.f32.mrb[232].mxu1  ;;  %4708 = vst.msk [vmem:[#allocation2 + $0x8] sm:$0xff] %vm4706_vm3, %v4613_v54  ;;  %v6018_v54 = vmul.f32 %v8771_v47, %v13522_v56  ;;  %v6081_v56 = vmul.f32 %v8769_v10, %v6049_v22 }
 0xaab   : > { %v6105_v12 = vmul.f32 %v6073_v50, %v5898_v46  ;;  %v5900_v37 = vpop.f32.mrb[233].mxu1  ;;  %v4647_v41 = vpop.permute.xlu0 %4646 }
 0xaac   : > { %4725 = vst.msk [vmem:[#allocation2 + $0x90] sm:$0xff] %vm4706_vm3, %v4647_v41  ;;  %v8773_v46 = vpop.eup %8772  ;;  %v6050_v39 = vsub.f32 2.0, %v6018_v54 }
 0xaad   : > { %6189 = vrot.lane.b32.xlu0 %v6105_v12, %s8858_s4  ;;  %v4617_v45 = vpop.permute.xlu1 %4616 }
 0xaae   : > { %v5903_v5 = vpop.f32.mrb[234].mxu1  ;;  %4710 = vst.msk [vmem:[#allocation2 + $0x18] sm:$0xff] %vm4706_vm3, %v4617_v45  ;;  %v8775_v45 = vpop.eup %8774 }
 0xaaf   : > { %v6106_v3 = vmul.f32 %v6074_v61, %v5903_v5  ;;  %v5905_v59 = vpop.f32.mrb[235].mxu1  ;;  %v4651_v62 = vpop.permute.xlu0 %4650  ;;  %v6019_v61 = vmul.f32 %v8773_v46, %v13475_v18  ;;  %v6082_v18 = vmul.f32 %v8771_v47, %v6050_v39 }
 0xab0   : > { %4727 = vst.msk [vmem:[#allocation2 + $0xa0] sm:$0xff] %vm4706_vm3, %v4651_v62 }
 0xab1   : > { %6191 = vrot.lane.b32.xlu1 %v6106_v3, %s8858_s4  ;;  %v4621_v20 = vpop.permute.xlu1 %4620  ;;  %v6051_v44 = vsub.f32 2.0, %v6019_v61 }
 0xab2   : > { %v5908_v29 = vpop.f32.mrb[236].mxu1  ;;  %4712 = vst.msk [vmem:[#allocation2 + $0x28] sm:$0xff] %vm4706_vm3, %v4621_v20 }
 0xab3   : > { %v6107_v40 = vmul.f32 %v6075_v57, %v5908_v29  ;;  %v5910_v32 = vpop.f32.mrb[237].mxu1  ;;  %v4655_v52 = vpop.permute.xlu0 %4654  ;;  %v6020_v57 = vmul.f32 %v8775_v45, %v13529_v55  ;;  %v6083_v6 = vmul.f32 %v8773_v46, %v6051_v44 }
 0xab4   : > { %4729 = vst.msk [vmem:[#allocation2 + $0xb0] sm:$0xff] %vm4706_vm3, %v4655_v52 }
 0xab5   : > { %6193 = vrot.lane.b32.xlu0 %v6107_v40, %s8858_s4  ;;  %v4625_v60 = vpop.permute.xlu1 %4624  ;;  %v6052_v52 = vsub.f32 2.0, %v6020_v57 }
 0xab6   : > { %v5913_v15 = vpop.f32.mrb[238].mxu1  ;;  %4714 = vst.msk [vmem:[#allocation2 + $0x38] sm:$0xff] %vm4706_vm3, %v4625_v60 }
 0xab7   : > { %v6108_v51 = vmul.f32 %v6076_v19, %v5913_v15  ;;  %v5915_v9 = vpop.f32.mrb[239].mxu1  ;;  %v4659_v43 = vpop.permute.xlu0 %4658 }
 0xab8   : > { %4731 = vst.msk [vmem:[#allocation2 + $0xc0] sm:$0xff] %vm4706_vm3, %v4659_v43  ;;  %v6084_v9 = vmul.f32 %v8775_v45, %v6052_v52 }
 0xab9   : > { %6195 = vrot.lane.b32.xlu1 %v6108_v51, %s8858_s4  ;;  %v4629_v11 = vpop.permute.xlu1 %4628 }
 0xaba   : > { %v5918_v1 = vpop.f32.mrb[240].mxu1  ;;  %4716 = vst.msk [vmem:[#allocation2 + $0x48] sm:$0xff] %vm4706_vm3, %v4629_v11 }
 0xabb   : > { %v6109_v14 = vmul.f32 %v6077_v26, %v5918_v1  ;;  %v5920_v4 = vpop.f32.mrb[241].mxu1  ;;  %v4663_v27 = vpop.permute.xlu0 %4662 }
 0xabc   : > { %4733 = vst.msk [vmem:[#allocation2 + $0xd0] sm:$0xff] %vm4706_vm3, %v4663_v27 }
 0xabd   : > { %6197 = vrot.lane.b32.xlu0 %v6109_v14, %s8858_s4  ;;  %v4633_v25 = vpop.permute.xlu1 %4632 }
 0xabe   : > { %v5923_v63 = vpop.f32.mrb[242].mxu1  ;;  %4718 = vst.msk [vmem:[#allocation2 + $0x58] sm:$0xff] %vm4706_vm3, %v4633_v25 }
 0xabf   : > { %v6110_v34 = vmul.f32 %v6078_v42, %v5923_v63  ;;  %v5925_v13 = vpop.f32.mrb[243].mxu1  ;;  %v4667_v30 = vpop.permute.xlu0 %4666 }
 0xac0   : > { %4735 = vst.msk [vmem:[#allocation2 + $0xe0] sm:$0xff] %vm4706_vm3, %v4667_v30 }
 0xac1   : > { %6199 = vrot.lane.b32.xlu1 %v6110_v34, %s8858_s4  ;;  %v4637_v24 = vpop.permute.xlu1 %4636 }
 0xac2   : > { %v5928_v58 = vpop.f32.mrb[244].mxu1  ;;  %4720 = vst.msk [vmem:[#allocation2 + $0x68] sm:$0xff] %vm4706_vm3, %v4637_v24 }
 0xac3   : > { %v6111_v7 = vmul.f32 %v6079_v2, %v5928_v58  ;;  %v5930_v53 = vpop.f32.mrb[245].mxu1  ;;  %v4671_v50 = vpop.permute.xlu0 %4670 }
 0xac4   : > { %4737 = vst.msk [vmem:[#allocation2 + $0xf0] sm:$0xff] %vm4706_vm3, %v4671_v50 }
 0xac5   : > { %6201 = vrot.lane.b32.xlu0 %v6111_v7, %s8858_s4  ;;  %v4641_v12 = vpop.permute.xlu1 %4640 }
 0xac6   : > { %v5933_v37 = vpop.f32.mrb[246].mxu1  ;;  %4722 = vst.msk [vmem:[#allocation2 + $0x78] sm:$0xff] %vm4706_vm3, %v4641_v12 }
 0xac7   : > { %v6112_v41 = vmul.f32 %v6080_v28, %v5933_v37  ;;  %v5935_v48 = vpop.f32.mrb[247].mxu1  ;;  %v6150_v35 = vpop.permute.xlu0 %6149 }
 0xac8   : > { %6246 = vst.msk [vmem:[#allocation2] sm:$0xff] %vm6245_vm4, %v6150_v35 }
 0xac9   : > { %6203 = vrot.lane.b32.xlu1 %v6112_v41, %s8858_s4  ;;  %v4645_v5 = vpop.permute.xlu1 %4644 }
 0xaca   : > { %v5938_v3 = vpop.f32.mrb[248].mxu1  ;;  %4724 = vst.msk [vmem:[#allocation2 + $0x88] sm:$0xff] %vm4706_vm3, %v4645_v5 }
 0xacb   : > { %v6113_v59 = vmul.f32 %v6081_v56, %v5938_v3  ;;  %v5940_v62 = vpop.f32.mrb[249].mxu1  ;;  %v6154_v21 = vpop.permute.xlu0 %6153 }
 0xacc   : > { %6248 = vst.msk [vmem:[#allocation2 + $0x10] sm:$0xff] %vm6245_vm4, %v6154_v21 }
 0xacd   : > { %6205 = vrot.lane.b32.xlu0 %v6113_v59, %s8858_s4  ;;  %v4649_v31 = vpop.permute.xlu1 %4648 }
 0xace   : > { %v5943_v20 = vpop.f32.mrb[250].mxu1  ;;  %4726 = vst.msk [vmem:[#allocation2 + $0x98] sm:$0xff] %vm4706_vm3, %v4649_v31 }
 0xacf   : > { %v6114_v29 = vmul.f32 %v6082_v18, %v5943_v20  ;;  %v5945_v40 = vpop.f32.mrb[251].mxu1  ;;  %v6278_v55 = vld [vmem:[#allocation2] sm:$0xff]  ;;  %v6158_v32 = vpop.permute.xlu0 %6157 }
 0xad0   : > { %6311 = vst.msk [vmem:[%s13669_s7] sm:$0xff] %vm6310_vm5, %v6278_v55 }
 0xad1   : > { %6250 = vst.msk [vmem:[#allocation2 + $0x20] sm:$0xff] %vm6245_vm4, %v6158_v32  ;;  %6207 = vrot.lane.b32.xlu1 %v6114_v29, %s8858_s4  ;;  %v4653_v36 = vpop.permute.xlu1 %4652 }
 0xad2   : > { %v5948_v19 = vpop.f32.mrb[252].mxu1  ;;  %4728 = vst.msk [vmem:[#allocation2 + $0xa8] sm:$0xff] %vm4706_vm3, %v4653_v36 }
 0xad3   : > { %v6115_v16 = vmul.f32 %v6083_v6, %v5948_v19  ;;  %v5950_v60 = vpop.f32.mrb[253].mxu1  ;;  %v6280_v15 = vld [vmem:[#allocation2 + $0x10] sm:$0xff]  ;;  %v6162_v51 = vpop.permute.xlu0 %6161 }
 0xad4   : > { %6313 = vst.msk [vmem:[%s13669_s7 + $0x10] sm:$0xff] %vm6310_vm5, %v6280_v15 }
 0xad5   : > { %6252 = vst.msk [vmem:[#allocation2 + $0x30] sm:$0xff] %vm6245_vm4, %v6162_v51  ;;  %6209 = vrot.lane.b32.xlu0 %v6115_v16, %s8858_s4  ;;  %v4657_v43 = vpop.permute.xlu1 %4656 }
 0xad6   : > { %v5953_v23 = vpop.f32.mrb[254].mxu1  ;;  %4730 = vst.msk [vmem:[#allocation2 + $0xb8] sm:$0xff] %vm4706_vm3, %v4657_v43 }
 0xad7   : > { %v6116_v0 = vmul.f32 %v6084_v9, %v5953_v23  ;;  %v5955_v26 = vpop.f32.mrb[255].mxu1 }
 0xad8   : > { %v6282_v17 = vld [vmem:[#allocation2 + $0x20] sm:$0xff] }
 0xad9   : > { %6315 = vst.msk [vmem:[%s13669_s7 + $0x20] sm:$0xff] %vm6310_vm5, %v6282_v17  ;;  %6211 = vrot.lane.b32.xlu1 %v6116_v0, %s8858_s4  ;;  %v4661_v11 = vpop.permute.xlu1 %4660 }
 0xada   : > { %4732 = vst.msk [vmem:[#allocation2 + $0xc8] sm:$0xff] %vm4706_vm3, %v4661_v11 }
 0xadc   : > { %v6284_v1 = vld [vmem:[#allocation2 + $0x30] sm:$0xff] }
 0xadd   : > { %6317 = vst.msk [vmem:[%s13669_s7 + $0x30] sm:$0xff] %vm6310_vm5, %v6284_v1  ;;  %v4665_v14 = vpop.permute.xlu1 %4664 }
 0xade   : > { %4734 = vst.msk [vmem:[#allocation2 + $0xd8] sm:$0xff] %vm4706_vm3, %v4665_v14 }
 0xae1   : > { %v4669_v4 = vpop.permute.xlu1 %4668 }
 0xae2   : > { %4736 = vst.msk [vmem:[#allocation2 + $0xe8] sm:$0xff] %vm4706_vm3, %v4669_v4 }
 0xae5   : > { %v4673_v27 = vpop.permute.xlu1 %4672 }
 0xae6   : > { %4738 = vst.msk [vmem:[#allocation2 + $0xf8] sm:$0xff] %vm4706_vm3, %v4673_v27 }
 0xae9   : > { %v6152_v38 = vpop.permute.xlu1 %6151 }
 0xaea   : > { %6247 = vst.msk [vmem:[#allocation2 + $0x8] sm:$0xff] %vm6245_vm4, %v6152_v38 }
 0xaed   : > { %v6156_v49 = vpop.permute.xlu1 %6155 }
 0xaee   : > { %6249 = vst.msk [vmem:[#allocation2 + $0x18] sm:$0xff] %vm6245_vm4, %v6156_v49 }
 0xaef   : > { %v6166_v42 = vpop.permute.xlu0 %6165 }
 0xaf0   : > { %6254 = vst.msk [vmem:[#allocation2 + $0x40] sm:$0xff] %vm6245_vm4, %v6166_v42 }
 0xaf1   : > { %v6279_v10 = vld [vmem:[#allocation2 + $0x8] sm:$0xff]  ;;  %v6160_v25 = vpop.permute.xlu1 %6159 }
 0xaf2   : > { %6312 = vst.msk [vmem:[%s13669_s7 + $0x8] sm:$0xff] %vm6310_vm5, %v6279_v10 }
 0xaf3   : > { %6251 = vst.msk [vmem:[#allocation2 + $0x28] sm:$0xff] %vm6245_vm4, %v6160_v25 }
 0xaf5   : > { %v6281_v63 = vld [vmem:[#allocation2 + $0x18] sm:$0xff]  ;;  %v6164_v34 = vpop.permute.xlu1 %6163 }
 0xaf6   : > { %6314 = vst.msk [vmem:[%s13669_s7 + $0x18] sm:$0xff] %vm6310_vm5, %v6281_v63 }
 0xaf7   : > { %v6286_v13 = vld [vmem:[#allocation2 + $0x40] sm:$0xff]  ;;  %6253 = vst.msk [vmem:[#allocation2 + $0x38] sm:$0xff] %vm6245_vm4, %v6164_v34  ;;  %v6170_v30 = vpop.permute.xlu0 %6169 }
 0xaf8   : > { %6319 = vst.msk [vmem:[%s13669_s7 + $0x40] sm:$0xff] %vm6310_vm5, %v6286_v13 }
 0xaf9   : > { %6256 = vst.msk [vmem:[#allocation2 + $0x50] sm:$0xff] %vm6245_vm4, %v6170_v30  ;;  %v6168_v8 = vpop.permute.xlu1 %6167 }
 0xafa   : > { %v6283_v33 = vld [vmem:[#allocation2 + $0x28] sm:$0xff]  ;;  %6255 = vst.msk [vmem:[#allocation2 + $0x48] sm:$0xff] %vm6245_vm4, %v6168_v8 }
 0xafb   : > { %6316 = vst.msk [vmem:[%s13669_s7 + $0x28] sm:$0xff] %vm6310_vm5, %v6283_v33 }
 0xafd   : > { %v6172_v47 = vpop.permute.xlu1 %6171 }
 0xafe   : > { %v6285_v2 = vld [vmem:[#allocation2 + $0x38] sm:$0xff]  ;;  %6257 = vst.msk [vmem:[#allocation2 + $0x58] sm:$0xff] %vm6245_vm4, %v6172_v47 }
 0xaff   : > { %6318 = vst.msk [vmem:[%s13669_s7 + $0x38] sm:$0xff] %vm6310_vm5, %v6285_v2  ;;  %v6174_v58 = vpop.permute.xlu0 %6173 }
 0xb00   : > { %v6288_v24 = vld [vmem:[#allocation2 + $0x50] sm:$0xff]  ;;  %6258 = vst.msk [vmem:[#allocation2 + $0x60] sm:$0xff] %vm6245_vm4, %v6174_v58 }
 0xb01   : > { %6321 = vst.msk [vmem:[%s13669_s7 + $0x50] sm:$0xff] %vm6310_vm5, %v6288_v24  ;;  %v6287_v7 = vld [vmem:[#allocation2 + $0x48] sm:$0xff] }
 0xb02   : > { %6320 = vst.msk [vmem:[%s13669_s7 + $0x48] sm:$0xff] %vm6310_vm5, %v6287_v7 }
 0xb03   : > { %v6176_v53 = vpop.permute.xlu1 %6175 }
 0xb04   : > { %6259 = vst.msk [vmem:[#allocation2 + $0x68] sm:$0xff] %vm6245_vm4, %v6176_v53 }
 0xb05   : > { %v6289_v50 = vld [vmem:[#allocation2 + $0x58] sm:$0xff] }
 0xb06   : > { %6322 = vst.msk [vmem:[%s13669_s7 + $0x58] sm:$0xff] %vm6310_vm5, %v6289_v50 }
 0xb07   : > { %v6290_v22 = vld [vmem:[#allocation2 + $0x60] sm:$0xff]  ;;  %v6178_v54 = vpop.permute.xlu0 %6177 }
 0xb08   : > { %6323 = vst.msk [vmem:[%s13669_s7 + $0x60] sm:$0xff] %vm6310_vm5, %v6290_v22 }
 0xb09   : > { %6260 = vst.msk [vmem:[#allocation2 + $0x70] sm:$0xff] %vm6245_vm4, %v6178_v54 }
 0xb0b   : > { %v6291_v28 = vld [vmem:[#allocation2 + $0x68] sm:$0xff]  ;;  %v6180_v46 = vpop.permute.xlu1 %6179 }
 0xb0c   : > { %6324 = vst.msk [vmem:[%s13669_s7 + $0x68] sm:$0xff] %vm6310_vm5, %v6291_v28 }
 0xb0d   : > { %6261 = vst.msk [vmem:[#allocation2 + $0x78] sm:$0xff] %vm6245_vm4, %v6180_v46 }
 0xb0f   : > { %v6182_v37 = vpop.permute.xlu0 %6181 }
 0xb10   : > { %v6292_v12 = vld [vmem:[#allocation2 + $0x70] sm:$0xff]  ;;  %6262 = vst.msk [vmem:[#allocation2 + $0x80] sm:$0xff] %vm6245_vm4, %v6182_v37 }
 0xb11   : > { %6325 = vst.msk [vmem:[%s13669_s7 + $0x70] sm:$0xff] %vm6310_vm5, %v6292_v12 }
 0xb13   : > { %v6184_v48 = vpop.permute.xlu1 %6183 }
 0xb14   : > { %v6293_v41 = vld [vmem:[#allocation2 + $0x78] sm:$0xff]  ;;  %6263 = vst.msk [vmem:[#allocation2 + $0x88] sm:$0xff] %vm6245_vm4, %v6184_v48 }
 0xb15   : > { %6326 = vst.msk [vmem:[%s13669_s7 + $0x78] sm:$0xff] %vm6310_vm5, %v6293_v41 }
 0xb17   : > { %v6294_v35 = vld [vmem:[#allocation2 + $0x80] sm:$0xff]  ;;  %v6186_v61 = vpop.permute.xlu0 %6185 }
 0xb18   : > { %6327 = vst.msk [vmem:[%s13669_s7 + $0x80] sm:$0xff] %vm6310_vm5, %v6294_v35 }
 0xb19   : > { %6264 = vst.msk [vmem:[#allocation2 + $0x90] sm:$0xff] %vm6245_vm4, %v6186_v61 }
 0xb1b   : > { %v6295_v39 = vld [vmem:[#allocation2 + $0x88] sm:$0xff]  ;;  %v6188_v56 = vpop.permute.xlu1 %6187 }
 0xb1c   : > { %6328 = vst.msk [vmem:[%s13669_s7 + $0x88] sm:$0xff] %vm6310_vm5, %v6295_v39 }
 0xb1d   : > { %6265 = vst.msk [vmem:[#allocation2 + $0x98] sm:$0xff] %vm6245_vm4, %v6188_v56 }
 0xb1f   : > { %v6190_v5 = vpop.permute.xlu0 %6189 }
 0xb20   : > { %v6296_v45 = vld [vmem:[#allocation2 + $0x90] sm:$0xff]  ;;  %6266 = vst.msk [vmem:[#allocation2 + $0xa0] sm:$0xff] %vm6245_vm4, %v6190_v5 }
 0xb21   : > { %6329 = vst.msk [vmem:[%s13669_s7 + $0x90] sm:$0xff] %vm6310_vm5, %v6296_v45 }
 0xb23   : > { %v6192_v59 = vpop.permute.xlu1 %6191 }
 0xb24   : > { %v6297_v3 = vld [vmem:[#allocation2 + $0x98] sm:$0xff]  ;;  %6267 = vst.msk [vmem:[#allocation2 + $0xa8] sm:$0xff] %vm6245_vm4, %v6192_v59 }
 0xb25   : > { %6330 = vst.msk [vmem:[%s13669_s7 + $0x98] sm:$0xff] %vm6310_vm5, %v6297_v3 }
 0xb27   : > { %v6298_v62 = vld [vmem:[#allocation2 + $0xa0] sm:$0xff]  ;;  %v6194_v21 = vpop.permute.xlu0 %6193 }
 0xb28   : > { %6331 = vst.msk [vmem:[%s13669_s7 + $0xa0] sm:$0xff] %vm6310_vm5, %v6298_v62 }
 0xb29   : > { %6268 = vst.msk [vmem:[#allocation2 + $0xb0] sm:$0xff] %vm6245_vm4, %v6194_v21 }
 0xb2b   : > { %v6299_v44 = vld [vmem:[#allocation2 + $0xa8] sm:$0xff]  ;;  %v6196_v57 = vpop.permute.xlu1 %6195 }
 0xb2c   : > { %6332 = vst.msk [vmem:[%s13669_s7 + $0xa8] sm:$0xff] %vm6310_vm5, %v6299_v44 }
 0xb2d   : > { %6269 = vst.msk [vmem:[#allocation2 + $0xb8] sm:$0xff] %vm6245_vm4, %v6196_v57 }
 0xb2f   : > { %v6198_v31 = vpop.permute.xlu0 %6197 }
 0xb30   : > { %v6300_v18 = vld [vmem:[#allocation2 + $0xb0] sm:$0xff]  ;;  %6270 = vst.msk [vmem:[#allocation2 + $0xc0] sm:$0xff] %vm6245_vm4, %v6198_v31 }
 0xb31   : > { %6333 = vst.msk [vmem:[%s13669_s7 + $0xb0] sm:$0xff] %vm6310_vm5, %v6300_v18 }
 0xb33   : > { %v6200_v29 = vpop.permute.xlu1 %6199 }
 0xb34   : > { %v6301_v20 = vld [vmem:[#allocation2 + $0xb8] sm:$0xff]  ;;  %6271 = vst.msk [vmem:[#allocation2 + $0xc8] sm:$0xff] %vm6245_vm4, %v6200_v29 }
 0xb35   : > { %6334 = vst.msk [vmem:[%s13669_s7 + $0xb8] sm:$0xff] %vm6310_vm5, %v6301_v20 }
 0xb37   : > { %v6302_v40 = vld [vmem:[#allocation2 + $0xc0] sm:$0xff]  ;;  %v6202_v55 = vpop.permute.xlu0 %6201 }
 0xb38   : > { %6335 = vst.msk [vmem:[%s13669_s7 + $0xc0] sm:$0xff] %vm6310_vm5, %v6302_v40 }
 0xb39   : > { %6272 = vst.msk [vmem:[#allocation2 + $0xd0] sm:$0xff] %vm6245_vm4, %v6202_v55 }
 0xb3b   : > { %v6303_v32 = vld [vmem:[#allocation2 + $0xc8] sm:$0xff]  ;;  %v6204_v52 = vpop.permute.xlu1 %6203 }
 0xb3c   : > { %6336 = vst.msk [vmem:[%s13669_s7 + $0xc8] sm:$0xff] %vm6310_vm5, %v6303_v32 }
 0xb3d   : > { %6273 = vst.msk [vmem:[#allocation2 + $0xd8] sm:$0xff] %vm6245_vm4, %v6204_v52 }
 0xb3f   : > { %v6206_v36 = vpop.permute.xlu0 %6205 }
 0xb40   : > { %v6304_v6 = vld [vmem:[#allocation2 + $0xd0] sm:$0xff]  ;;  %6274 = vst.msk [vmem:[#allocation2 + $0xe0] sm:$0xff] %vm6245_vm4, %v6206_v36 }
 0xb41   : > { %6337 = vst.msk [vmem:[%s13669_s7 + $0xd0] sm:$0xff] %vm6310_vm5, %v6304_v6 }
 0xb43   : > { %v6208_v16 = vpop.permute.xlu1 %6207 }
 0xb44   : > { %v6305_v19 = vld [vmem:[#allocation2 + $0xd8] sm:$0xff]  ;;  %6275 = vst.msk [vmem:[#allocation2 + $0xe8] sm:$0xff] %vm6245_vm4, %v6208_v16 }
 0xb45   : > { %6338 = vst.msk [vmem:[%s13669_s7 + $0xd8] sm:$0xff] %vm6310_vm5, %v6305_v19 }
 0xb47   : > { %v6306_v60 = vld [vmem:[#allocation2 + $0xe0] sm:$0xff]  ;;  %v6210_v15 = vpop.permute.xlu0 %6209 }
 0xb48   : > { %6339 = vst.msk [vmem:[%s13669_s7 + $0xe0] sm:$0xff] %vm6310_vm5, %v6306_v60 }
 0xb49   : > { %6276 = vst.msk [vmem:[#allocation2 + $0xf0] sm:$0xff] %vm6245_vm4, %v6210_v15 }
 0xb4b   : > { %v6307_v51 = vld [vmem:[#allocation2 + $0xe8] sm:$0xff]  ;;  %v6212_v9 = vpop.permute.xlu1 %6211 }
 0xb4c   : > { %6340 = vst.msk [vmem:[%s13669_s7 + $0xe8] sm:$0xff] %vm6310_vm5, %v6307_v51 }
 0xb4d   : > { %6277 = vst.msk [vmem:[#allocation2 + $0xf8] sm:$0xff] %vm6245_vm4, %v6212_v9 }
 0xb50   : > { %v6308_v43 = vld [vmem:[#allocation2 + $0xf0] sm:$0xff] }
 0xb51   : > { %6341 = vst.msk [vmem:[%s13669_s7 + $0xf0] sm:$0xff] %vm6310_vm5, %v6308_v43 }
 0xb54   : > { %v6309_v23 = vld [vmem:[#allocation2 + $0xf8] sm:$0xff] }
 0xb55   : > { %6342 = vst.msk [vmem:[%s13669_s7 + $0xf8] sm:$0xff] %vm6310_vm5, %v6309_v23 }
 0xb56 PF: > { %s13_s14 = sadd.s32 1, %s8850_s14   ;;  %s15367_s12 = smov %s8846_s13 }
 0xb57   : > { %p10_p5 = scmp.ge.s32.totalorder %s13_s14, 4   ;;  %s15368_s13 = smov %s15370_s15 }
 0xb59   :  { %12 = sbr.rel (!%p10_p5) target bundleno = 2 (0x2), region = 68 }

</bundles_post_ra>
